<compile_context>
chip_gen: v5e
topology: v5e:2x2
jax: 0.10.0
libtpu: 0.0.40
codegen_flags: <defaults>
</compile_context>

<pallas_src>
import jax
import jax.numpy as jnp
from jax.experimental import pallas as pl
from jax.experimental.pallas import tpu as pltpu


# MXU operand dtype.  f32 by default (strict numeric check); set to jnp.bfloat16 on v6e/v7x:
# weights/embeddings are pre-cast once in the wrapper, only per-step activations get cast in
# the kernel, and all elementwise gate math + the h carry stay f32.
MATMUL_DTYPE = jnp.float32


def _round_up(x, m):
    return ((x + m - 1) // m) * m


def _dot(a, b):
    # b (weights) is pre-cast to MATMUL_DTYPE in the wrapper; only the activation is cast here.
    return jnp.dot(a.astype(MATMUL_DTYPE), b, preferred_element_type=jnp.float32)


# ---------------------------------------------------------------------------
# Pallas kernel: hoisted layer-1 projection + 2-layer GRU recurrence + fc_out.
# Gate order is PyTorch's [r | z | n]; each gate occupies its own Hp-lane block (G = 3*Hp).
# ---------------------------------------------------------------------------
def gru2_fc_kernel(emb_ref, wih1_ref, bih1_ref, wih2_ref, bih2_ref,
                   whh_bd_ref, bhh_ref, wfc_ref, bfc_ref,
                   pred_ref, gi1_ref):
    T, Bp, E = emb_ref.shape
    G = wih1_ref.shape[1]
    Hp = G // 3

    # ---- hoisted layer-1 input projection: one (T*Bp, E) x (E, G) matmul, done once ----
    emb_flat = emb_ref[...].reshape(T * Bp, E)
    gi1_all = _dot(emb_flat, wih1_ref[...]) + bih1_ref[...]          # bias b_ih1 folded in
    gi1_ref[...] = gi1_all.reshape(T, Bp, G)

    # ---- hoist weight loads / bias broadcasts out of the unrolled recurrence ----
    whh_bd = whh_bd_ref[...]                                         # (2Hp, 2G) block-diagonal
    wih2 = wih2_ref[...]                                             # (Hp, G)
    bhh = jnp.broadcast_to(bhh_ref[...], (Bp, 2 * G))                # [b_hh1 | b_hh2]
    bih2 = jnp.broadcast_to(bih2_ref[...], (Bp, G))

    def gates(gi, gh, h):
        # PyTorch GRU cell: r = sig(gi_r+gh_r), z = sig(gi_z+gh_z), n = tanh(gi_n + r*gh_n),
        # h' = (1-z)*n + z*h == n + z*(h-n).  All slices are vreg-aligned Hp-wide blocks.
        s = gi + gh                                                  # one full-vreg VPU add
        r = jax.nn.sigmoid(s[:, 0:Hp])
        z = jax.nn.sigmoid(s[:, Hp:2 * Hp])
        n = jnp.tanh(gi[:, 2 * Hp:3 * Hp] + r * gh[:, 2 * Hp:3 * Hp])
        return n + z * (h - n)

    def step(t, carry):
        h1, h2 = carry
        # Both recurrent projections depend only on the t-1 state -> one fused dot.
        h_cat = jnp.concatenate([h1, h2], axis=-1)                   # (Bp, 2Hp), lane-aligned
        gh_cat = _dot(h_cat, whh_bd) + bhh                           # (Bp, 2G) = [gh1 | gh2]
        gh1 = gh_cat[:, 0:G]
        gh2 = gh_cat[:, G:2 * G]

        gi1 = gi1_ref[t]                                             # precomputed (Bp, G)
        h1 = gates(gi1, gh1, h1)                                     # layer-0 update

        gi2 = _dot(h1, wih2) + bih2                                  # layer-1 input projection
        h2 = gates(gi2, gh2, h2)                                     # layer-1 update
        return (h1, h2)

    h0 = jnp.zeros((Bp, Hp), jnp.float32)                            # padded lanes stay 0
    unroll = True if T <= 16 else 4                                  # partial unroll for long T
    _, h2 = jax.lax.fori_loop(0, T, step, (h0, h0), unroll=unroll)

    # fc_out(outputs[-1]) -- executed exactly once, after the recurrence.
    pred_ref[...] = _dot(h2, wfc_ref[...]) + bfc_ref[...]


# ---------------------------------------------------------------------------
# Wrapper: embedding gather, gate/lane packing, block-diagonal W_hh, single pallas_call.
# ---------------------------------------------------------------------------
def _pack_gate_cols(w, H, Hp):
    """Pad each of the 3 gate blocks ([r|z|n] along the last axis) from H to Hp lanes."""
    lead = w.shape[:-1]
    w3 = w.reshape(lead + (3, H))
    w3 = jnp.pad(w3, [(0, 0)] * len(lead) + [(0, 0), (0, Hp - H)])
    return w3.reshape(lead + (3 * Hp,))


def rnn_gru_forward(tokens, params, *, lane=128, sublane=8):
    """Forward pass of RNN_GRU. tokens: (T, B) int32. Returns (B, 1) f32."""
    T, B = tokens.shape
    H = params["w_hh1"].shape[0]
    Hp = _round_up(H, lane)
    G = 3 * Hp
    Bp = _round_up(B, sublane)

    # Embedding gather stays in JAX glue; nn.Dropout(p=0.2) is eval-mode identity.
    # TODO(synk): training-mode dropout mask (pltpu.prng_random_bits) not wired in.
    emb = params["embedding"][tokens].astype(MATMUL_DTYPE)           # (T, B, E)
    if Bp != B:
        emb = jnp.pad(emb, ((0, 0), (0, Bp - B), (0, 0)))

    def row_pad(w):
        return jnp.pad(w, ((0, Hp - w.shape[0]), (0, 0)))

    # Gate-block lane padding + row padding to Hp + one-time MXU-operand cast.
    wih1 = _pack_gate_cols(params["w_ih1"], H, Hp).astype(MATMUL_DTYPE)            # (E, G)
    wih2 = row_pad(_pack_gate_cols(params["w_ih2"], H, Hp)).astype(MATMUL_DTYPE)   # (Hp, G)
    whh1 = row_pad(_pack_gate_cols(params["w_hh1"], H, Hp))                        # (Hp, G)
    whh2 = row_pad(_pack_gate_cols(params["w_hh2"], H, Hp))                        # (Hp, G)

    # Block-diagonal fused recurrent weight: one (Bp,2Hp)x(2Hp,2G) dot/step yields gh1|gh2.
    whh_bd = jnp.zeros((2 * Hp, 2 * G), jnp.float32)
    whh_bd = whh_bd.at[:Hp, :G].set(whh1).at[Hp:, G:].set(whh2).astype(MATMUL_DTYPE)

    bih1 = _pack_gate_cols(params["b_ih1"], H, Hp)[None, :]                        # (1, G)
    bih2 = _pack_gate_cols(params["b_ih2"], H, Hp)[None, :]                        # (1, G)
    bhh = jnp.concatenate([_pack_gate_cols(params["b_hh1"], H, Hp),
                           _pack_gate_cols(params["b_hh2"], H, Hp)])[None, :]      # (1, 2G)

    wfc = row_pad(params["w_fc"]).astype(MATMUL_DTYPE)                             # (Hp, 1)
    bfc = params["b_fc"].reshape(1, 1)

    args = (emb, wih1, bih1, wih2, bih2, whh_bd, bhh, wfc, bfc)

    pred = pl.pallas_call(
        gru2_fc_kernel,
        out_shape=jax.ShapeDtypeStruct((Bp, 1), jnp.float32),
        in_specs=[pl.BlockSpec(memory_space=pltpu.MemorySpace.VMEM)] * len(args),
        out_specs=pl.BlockSpec(memory_space=pltpu.MemorySpace.VMEM),
        scratch_shapes=[pltpu.VMEM((T, Bp, G), jnp.float32)],        # hoisted GI1
        # TODO(synk): at production sizes (T~512, H=512) add a T-chunked grid ("arbitrary")
        # with h1/h2 carried in VMEM scratch (pl.when init), a "parallel" batch axis for the
        # two v7x TensorCores, and pltpu.CompilerParams(vmem_limit_bytes=...) headroom
        # (v5e scoped default is only 16 MiB, v7x physical VMEM is 64 MiB).
    )(*args)
    return pred[:B]


# ---------------------------------------------------------------------------
# Deterministic parameter init, canonical (unpadded) layout:
#   per GRU layer l: w_ih_l (in, 3H), w_hh_l (H, 3H), b_ih_l (3H,), b_hh_l (3H,),
#   gate column order [r | z | n]; fc: w_fc (H, 1), b_fc (1,).
# ---------------------------------------------------------------------------
def init_params(key, vocab, embed_size, hidden_size):
    keys = iter(jax.random.split(key, 12))
    H = hidden_size
    s = 1.0 / float(H) ** 0.5

    def u(shape, scale):
        return jax.random.uniform(next(keys), shape, jnp.float32, -scale, scale)

    return {
        "embedding": u((vocab, embed_size), 0.5),
        # GRU layer 0 (input = embedding)
        "w_ih1": u((embed_size, 3 * H), s), "w_hh1": u((H, 3 * H), s),
        "b_ih1": u((3 * H,), s), "b_hh1": u((3 * H,), s),
        # GRU layer 1 (input = layer-0 output)
        "w_ih2": u((H, 3 * H), s), "w_hh2": u((H, 3 * H), s),
        "b_ih2": u((3 * H,), s), "b_hh2": u((3 * H,), s),
        # fc_out
        "w_fc": u((H, 1), 0.5), "b_fc": jnp.zeros((1,), jnp.float32),
    }


# ---------------------------------------------------------------------------
# Pure-JAX reference (lax.scan) on the canonical unpadded params, identical cell math.
# ---------------------------------------------------------------------------
def _gru_cell_ref(x, h, w_ih, w_hh, b_ih, b_hh, H):
    gi = _dot(x, w_ih) + b_ih
    gh = _dot(h, w_hh) + b_hh
    r = jax.nn.sigmoid(gi[:, 0:H] + gh[:, 0:H])
    z = jax.nn.sigmoid(gi[:, H:2 * H] + gh[:, H:2 * H])
    n = jnp.tanh(gi[:, 2 * H:3 * H] + r * gh[:, 2 * H:3 * H])
    return n + z * (h - n)


def reference_forward(tokens, params):
    emb = params["embedding"][tokens]                                # (T, B, E)
    B = tokens.shape[1]
    H = params["w_hh1"].shape[0]
    h0 = jnp.zeros((B, H), jnp.float32)

    def step(carry, x_t):
        h1, h2 = carry
        h1 = _gru_cell_ref(x_t, h1, params["w_ih1"], params["w_hh1"],
                           params["b_ih1"], params["b_hh1"], H)
        h2 = _gru_cell_ref(h1, h2, params["w_ih2"], params["w_hh2"],
                           params["b_ih2"], params["b_hh2"], H)
        return (h1, h2), None

    (_, h2), _ = jax.lax.scan(step, (h0, h0), emb)
    return _dot(h2, params["w_fc"]) + params["b_fc"]


if __name__ == "__main__":
    # Small shapes consistent with the module: vocab=50, embed=32, hidden=32, 2 GRU layers.
    T, B, VOCAB, E, H = 8, 4, 50, 32, 32

    key = jax.random.PRNGKey(0)
    k_tok, k_par = jax.random.split(key)
    tokens = jax.random.randint(k_tok, (T, B), 0, VOCAB, dtype=jnp.int32)
    params = init_params(k_par, VOCAB, E, H)

    pred = jax.block_until_ready(jax.jit(rnn_gru_forward)(tokens, params))
    ref = jax.block_until_ready(reference_forward(tokens, params))

    assert pred.shape == (B, 1), pred.shape
    assert jnp.allclose(pred, ref, atol=2e-5, rtol=2e-5), (pred, ref)
    print("KERNEL_OK")
</pallas_src>

<mosaic_0001>
module attributes {stable_mosaic.version = 11 : i64} {
  func.func @gru2_fc_kernel(%arg0: memref<8x8x32xf32, #tpu.memory_space<vmem>>, %arg1: memref<32x384xf32, #tpu.memory_space<vmem>>, %arg2: memref<1x384xf32, #tpu.memory_space<vmem>>, %arg3: memref<128x384xf32, #tpu.memory_space<vmem>>, %arg4: memref<1x384xf32, #tpu.memory_space<vmem>>, %arg5: memref<256x768xf32, #tpu.memory_space<vmem>>, %arg6: memref<1x768xf32, #tpu.memory_space<vmem>>, %arg7: memref<128x1xf32, #tpu.memory_space<vmem>>, %arg8: memref<1x1xf32, #tpu.memory_space<vmem>>, %arg9: memref<8x1xf32, #tpu.memory_space<vmem>>, %arg10: memref<8x8x384xf32, #tpu.memory_space<vmem>>) attributes {dimension_semantics = [], scalar_prefetch = 0 : i64, scratch_operands = 1 : i64, tpu.core_type = #tpu.core_type<tc>} {
    %c0 = arith.constant 0 : index
    %c0_0 = arith.constant 0 : index
    %c0_1 = arith.constant 0 : index
    %0 = vector.load %arg0[%c0, %c0_0, %c0_1] : memref<8x8x32xf32, #tpu.memory_space<vmem>>, vector<8x8x32xf32>
    %1 = vector.shape_cast %0 : vector<8x8x32xf32> to vector<64x32xf32>
    %c0_2 = arith.constant 0 : index
    %c0_3 = arith.constant 0 : index
    %2 = vector.load %arg1[%c0_2, %c0_3] : memref<32x384xf32, #tpu.memory_space<vmem>>, vector<32x384xf32>
    %cst = arith.constant dense<0.000000e+00> : vector<64x384xf32>
    %3 = tpu.matmul %1, %2, %cst {dimension_numbers = #tpu.dot_dimension_numbers<[1], [0], [0], [1], [0, 0, 1, 1], [], []>} : vector<64x32xf32>, vector<32x384xf32>, vector<64x384xf32> -> vector<64x384xf32>
    %c0_4 = arith.constant 0 : index
    %c0_5 = arith.constant 0 : index
    %4 = vector.load %arg2[%c0_4, %c0_5] : memref<1x384xf32, #tpu.memory_space<vmem>>, vector<1x384xf32>
    %5 = vector.broadcast %4 : vector<1x384xf32> to vector<64x384xf32>
    %6 = arith.addf %3, %5 : vector<64x384xf32>
    %7 = vector.shape_cast %6 : vector<64x384xf32> to vector<8x8x384xf32>
    %c0_6 = arith.constant 0 : index
    %c0_7 = arith.constant 0 : index
    %c0_8 = arith.constant 0 : index
    %8 = vector.load %arg10[%c0_6, %c0_7, %c0_8] : memref<8x8x384xf32, #tpu.memory_space<vmem>>, vector<8x8x384xf32>
    tpu.vector_store %arg10[%c0_6, %c0_7, %c0_8], %7 {strides = array<i32>} : memref<8x8x384xf32, #tpu.memory_space<vmem>>, vector<8x8x384xf32>,
    %c0_9 = arith.constant 0 : index
    %c0_10 = arith.constant 0 : index
    %9 = vector.load %arg5[%c0_9, %c0_10] : memref<256x768xf32, #tpu.memory_space<vmem>>, vector<256x768xf32>
    %c0_11 = arith.constant 0 : index
    %c0_12 = arith.constant 0 : index
    %10 = vector.load %arg3[%c0_11, %c0_12] : memref<128x384xf32, #tpu.memory_space<vmem>>, vector<128x384xf32>
    %c0_13 = arith.constant 0 : index
    %c0_14 = arith.constant 0 : index
    %11 = vector.load %arg6[%c0_13, %c0_14] : memref<1x768xf32, #tpu.memory_space<vmem>>, vector<1x768xf32>
    %12 = vector.shape_cast %11 : vector<1x768xf32> to vector<1x768xf32>
    %13 = vector.broadcast %12 : vector<1x768xf32> to vector<8x768xf32>
    %c0_15 = arith.constant 0 : index
    %c0_16 = arith.constant 0 : index
    %14 = vector.load %arg4[%c0_15, %c0_16] : memref<1x384xf32, #tpu.memory_space<vmem>>, vector<1x384xf32>
    %15 = vector.shape_cast %14 : vector<1x384xf32> to vector<1x384xf32>
    %16 = vector.broadcast %15 : vector<1x384xf32> to vector<8x384xf32>
    %cst_17 = arith.constant 0.000000e+00 : f32
    %17 = vector.broadcast %cst_17 : f32 to vector<8x128xf32>
    %c0_i32 = arith.constant 0 : i32
    %18 = tpu.concatenate %17, %17 in 1 : vector<8x128xf32>, vector<8x128xf32> -> vector<8x256xf32>
    %cst_18 = arith.constant dense<0.000000e+00> : vector<8x768xf32>
    %19 = tpu.matmul %18, %9, %cst_18 {dimension_numbers = #tpu.dot_dimension_numbers<[1], [0], [0], [1], [0, 0, 1, 1], [], []>} : vector<8x256xf32>, vector<256x768xf32>, vector<8x768xf32> -> vector<8x768xf32>
    %20 = arith.addf %19, %13 : vector<8x768xf32>
    %21 = vector.extract_strided_slice %20 {offsets = [0, 0], sizes = [8, 384], strides = [1, 1]} : vector<8x768xf32> to vector<8x384xf32>
    %22 = vector.extract_strided_slice %20 {offsets = [0, 384], sizes = [8, 384], strides = [1, 1]} : vector<8x768xf32> to vector<8x384xf32>
    %23 = arith.index_cast %c0_i32 : i32 to index
    %c0_19 = arith.constant 0 : index
    %c0_20 = arith.constant 0 : index
    %24 = vector.load %arg10[%23, %c0_19, %c0_20] : memref<8x8x384xf32, #tpu.memory_space<vmem>>, vector<1x8x384xf32>
    %25 = vector.shape_cast %24 : vector<1x8x384xf32> to vector<8x384xf32>
    %26 = arith.addf %25, %21 : vector<8x384xf32>
    %27 = vector.extract_strided_slice %26 {offsets = [0, 0], sizes = [8, 128], strides = [1, 1]} : vector<8x384xf32> to vector<8x128xf32>
    %28 = arith.negf %27 : vector<8x128xf32>
    %29 = math.exp %28 : vector<8x128xf32>
    %cst_21 = arith.constant 1.000000e+00 : f32
    %30 = vector.broadcast %cst_21 : f32 to vector<8x128xf32>
    %31 = arith.addf %30, %29 : vector<8x128xf32>
    %32 = arith.divf %30, %31 : vector<8x128xf32>
    %33 = vector.extract_strided_slice %26 {offsets = [0, 128], sizes = [8, 128], strides = [1, 1]} : vector<8x384xf32> to vector<8x128xf32>
    %34 = arith.negf %33 : vector<8x128xf32>
    %35 = math.exp %34 : vector<8x128xf32>
    %cst_22 = arith.constant 1.000000e+00 : f32
    %36 = vector.broadcast %cst_22 : f32 to vector<8x128xf32>
    %37 = arith.addf %36, %35 : vector<8x128xf32>
    %38 = arith.divf %36, %37 : vector<8x128xf32>
    %39 = vector.extract_strided_slice %25 {offsets = [0, 256], sizes = [8, 128], strides = [1, 1]} : vector<8x384xf32> to vector<8x128xf32>
    %40 = vector.extract_strided_slice %21 {offsets = [0, 256], sizes = [8, 128], strides = [1, 1]} : vector<8x384xf32> to vector<8x128xf32>
    %41 = arith.mulf %32, %40 : vector<8x128xf32>
    %42 = arith.addf %39, %41 : vector<8x128xf32>
    %43 = math.tanh %42 : vector<8x128xf32>
    %44 = arith.subf %17, %43 : vector<8x128xf32>
    %45 = arith.mulf %38, %44 : vector<8x128xf32>
    %46 = arith.addf %43, %45 : vector<8x128xf32>
    %cst_23 = arith.constant dense<0.000000e+00> : vector<8x384xf32>
    %47 = tpu.matmul %46, %10, %cst_23 {dimension_numbers = #tpu.dot_dimension_numbers<[1], [0], [0], [1], [0, 0, 1, 1], [], []>} : vector<8x128xf32>, vector<128x384xf32>, vector<8x384xf32> -> vector<8x384xf32>
    %48 = arith.addf %47, %16 : vector<8x384xf32>
    %49 = arith.addf %48, %22 : vector<8x384xf32>
    %50 = vector.extract_strided_slice %49 {offsets = [0, 0], sizes = [8, 128], strides = [1, 1]} : vector<8x384xf32> to vector<8x128xf32>
    %51 = arith.negf %50 : vector<8x128xf32>
    %52 = math.exp %51 : vector<8x128xf32>
    %cst_24 = arith.constant 1.000000e+00 : f32
    %53 = vector.broadcast %cst_24 : f32 to vector<8x128xf32>
    %54 = arith.addf %53, %52 : vector<8x128xf32>
    %55 = arith.divf %53, %54 : vector<8x128xf32>
    %56 = vector.extract_strided_slice %49 {offsets = [0, 128], sizes = [8, 128], strides = [1, 1]} : vector<8x384xf32> to vector<8x128xf32>
    %57 = arith.negf %56 : vector<8x128xf32>
    %58 = math.exp %57 : vector<8x128xf32>
    %cst_25 = arith.constant 1.000000e+00 : f32
    %59 = vector.broadcast %cst_25 : f32 to vector<8x128xf32>
    %60 = arith.addf %59, %58 : vector<8x128xf32>
    %61 = arith.divf %59, %60 : vector<8x128xf32>
    %62 = vector.extract_strided_slice %48 {offsets = [0, 256], sizes = [8, 128], strides = [1, 1]} : vector<8x384xf32> to vector<8x128xf32>
    %63 = vector.extract_strided_slice %22 {offsets = [0, 256], sizes = [8, 128], strides = [1, 1]} : vector<8x384xf32> to vector<8x128xf32>
    %64 = arith.mulf %55, %63 : vector<8x128xf32>
    %65 = arith.addf %62, %64 : vector<8x128xf32>
    %66 = math.tanh %65 : vector<8x128xf32>
    %67 = arith.subf %17, %66 : vector<8x128xf32>
    %68 = arith.mulf %61, %67 : vector<8x128xf32>
    %69 = arith.addf %66, %68 : vector<8x128xf32>
    %c1_i32 = arith.constant 1 : i32
    %70 = tpu.concatenate %46, %69 in 1 : vector<8x128xf32>, vector<8x128xf32> -> vector<8x256xf32>
    %cst_26 = arith.constant dense<0.000000e+00> : vector<8x768xf32>
    %71 = tpu.matmul %70, %9, %cst_26 {dimension_numbers = #tpu.dot_dimension_numbers<[1], [0], [0], [1], [0, 0, 1, 1], [], []>} : vector<8x256xf32>, vector<256x768xf32>, vector<8x768xf32> -> vector<8x768xf32>
    %72 = arith.addf %71, %13 : vector<8x768xf32>
    %73 = vector.extract_strided_slice %72 {offsets = [0, 0], sizes = [8, 384], strides = [1, 1]} : vector<8x768xf32> to vector<8x384xf32>
    %74 = vector.extract_strided_slice %72 {offsets = [0, 384], sizes = [8, 384], strides = [1, 1]} : vector<8x768xf32> to vector<8x384xf32>
    %75 = arith.index_cast %c1_i32 : i32 to index
    %c0_27 = arith.constant 0 : index
    %c0_28 = arith.constant 0 : index
    %76 = vector.load %arg10[%75, %c0_27, %c0_28] : memref<8x8x384xf32, #tpu.memory_space<vmem>>, vector<1x8x384xf32>
    %77 = vector.shape_cast %76 : vector<1x8x384xf32> to vector<8x384xf32>
    %78 = arith.addf %77, %73 : vector<8x384xf32>
    %79 = vector.extract_strided_slice %78 {offsets = [0, 0], sizes = [8, 128], strides = [1, 1]} : vector<8x384xf32> to vector<8x128xf32>
    %80 = arith.negf %79 : vector<8x128xf32>
    %81 = math.exp %80 : vector<8x128xf32>
    %cst_29 = arith.constant 1.000000e+00 : f32
    %82 = vector.broadcast %cst_29 : f32 to vector<8x128xf32>
    %83 = arith.addf %82, %81 : vector<8x128xf32>
    %84 = arith.divf %82, %83 : vector<8x128xf32>
    %85 = vector.extract_strided_slice %78 {offsets = [0, 128], sizes = [8, 128], strides = [1, 1]} : vector<8x384xf32> to vector<8x128xf32>
    %86 = arith.negf %85 : vector<8x128xf32>
    %87 = math.exp %86 : vector<8x128xf32>
    %cst_30 = arith.constant 1.000000e+00 : f32
    %88 = vector.broadcast %cst_30 : f32 to vector<8x128xf32>
    %89 = arith.addf %88, %87 : vector<8x128xf32>
    %90 = arith.divf %88, %89 : vector<8x128xf32>
    %91 = vector.extract_strided_slice %77 {offsets = [0, 256], sizes = [8, 128], strides = [1, 1]} : vector<8x384xf32> to vector<8x128xf32>
    %92 = vector.extract_strided_slice %73 {offsets = [0, 256], sizes = [8, 128], strides = [1, 1]} : vector<8x384xf32> to vector<8x128xf32>
    %93 = arith.mulf %84, %92 : vector<8x128xf32>
    %94 = arith.addf %91, %93 : vector<8x128xf32>
    %95 = math.tanh %94 : vector<8x128xf32>
    %96 = arith.subf %46, %95 : vector<8x128xf32>
    %97 = arith.mulf %90, %96 : vector<8x128xf32>
    %98 = arith.addf %95, %97 : vector<8x128xf32>
    %cst_31 = arith.constant dense<0.000000e+00> : vector<8x384xf32>
    %99 = tpu.matmul %98, %10, %cst_31 {dimension_numbers = #tpu.dot_dimension_numbers<[1], [0], [0], [1], [0, 0, 1, 1], [], []>} : vector<8x128xf32>, vector<128x384xf32>, vector<8x384xf32> -> vector<8x384xf32>
    %100 = arith.addf %99, %16 : vector<8x384xf32>
    %101 = arith.addf %100, %74 : vector<8x384xf32>
    %102 = vector.extract_strided_slice %101 {offsets = [0, 0], sizes = [8, 128], strides = [1, 1]} : vector<8x384xf32> to vector<8x128xf32>
    %103 = arith.negf %102 : vector<8x128xf32>
    %104 = math.exp %103 : vector<8x128xf32>
    %cst_32 = arith.constant 1.000000e+00 : f32
    %105 = vector.broadcast %cst_32 : f32 to vector<8x128xf32>
    %106 = arith.addf %105, %104 : vector<8x128xf32>
    %107 = arith.divf %105, %106 : vector<8x128xf32>
    %108 = vector.extract_strided_slice %101 {offsets = [0, 128], sizes = [8, 128], strides = [1, 1]} : vector<8x384xf32> to vector<8x128xf32>
    %109 = arith.negf %108 : vector<8x128xf32>
    %110 = math.exp %109 : vector<8x128xf32>
    %cst_33 = arith.constant 1.000000e+00 : f32
    %111 = vector.broadcast %cst_33 : f32 to vector<8x128xf32>
    %112 = arith.addf %111, %110 : vector<8x128xf32>
    %113 = arith.divf %111, %112 : vector<8x128xf32>
    %114 = vector.extract_strided_slice %100 {offsets = [0, 256], sizes = [8, 128], strides = [1, 1]} : vector<8x384xf32> to vector<8x128xf32>
    %115 = vector.extract_strided_slice %74 {offsets = [0, 256], sizes = [8, 128], strides = [1, 1]} : vector<8x384xf32> to vector<8x128xf32>
    %116 = arith.mulf %107, %115 : vector<8x128xf32>
    %117 = arith.addf %114, %116 : vector<8x128xf32>
    %118 = math.tanh %117 : vector<8x128xf32>
    %119 = arith.subf %69, %118 : vector<8x128xf32>
    %120 = arith.mulf %113, %119 : vector<8x128xf32>
    %121 = arith.addf %118, %120 : vector<8x128xf32>
    %c2_i32 = arith.constant 2 : i32
    %122 = tpu.concatenate %98, %121 in 1 : vector<8x128xf32>, vector<8x128xf32> -> vector<8x256xf32>
    %cst_34 = arith.constant dense<0.000000e+00> : vector<8x768xf32>
    %123 = tpu.matmul %122, %9, %cst_34 {dimension_numbers = #tpu.dot_dimension_numbers<[1], [0], [0], [1], [0, 0, 1, 1], [], []>} : vector<8x256xf32>, vector<256x768xf32>, vector<8x768xf32> -> vector<8x768xf32>
    %124 = arith.addf %123, %13 : vector<8x768xf32>
    %125 = vector.extract_strided_slice %124 {offsets = [0, 0], sizes = [8, 384], strides = [1, 1]} : vector<8x768xf32> to vector<8x384xf32>
    %126 = vector.extract_strided_slice %124 {offsets = [0, 384], sizes = [8, 384], strides = [1, 1]} : vector<8x768xf32> to vector<8x384xf32>
    %127 = arith.index_cast %c2_i32 : i32 to index
    %c0_35 = arith.constant 0 : index
    %c0_36 = arith.constant 0 : index
    %128 = vector.load %arg10[%127, %c0_35, %c0_36] : memref<8x8x384xf32, #tpu.memory_space<vmem>>, vector<1x8x384xf32>
    %129 = vector.shape_cast %128 : vector<1x8x384xf32> to vector<8x384xf32>
    %130 = arith.addf %129, %125 : vector<8x384xf32>
    %131 = vector.extract_strided_slice %130 {offsets = [0, 0], sizes = [8, 128], strides = [1, 1]} : vector<8x384xf32> to vector<8x128xf32>
    %132 = arith.negf %131 : vector<8x128xf32>
    %133 = math.exp %132 : vector<8x128xf32>
    %cst_37 = arith.constant 1.000000e+00 : f32
    %134 = vector.broadcast %cst_37 : f32 to vector<8x128xf32>
    %135 = arith.addf %134, %133 : vector<8x128xf32>
    %136 = arith.divf %134, %135 : vector<8x128xf32>
    %137 = vector.extract_strided_slice %130 {offsets = [0, 128], sizes = [8, 128], strides = [1, 1]} : vector<8x384xf32> to vector<8x128xf32>
    %138 = arith.negf %137 : vector<8x128xf32>
    %139 = math.exp %138 : vector<8x128xf32>
    %cst_38 = arith.constant 1.000000e+00 : f32
    %140 = vector.broadcast %cst_38 : f32 to vector<8x128xf32>
    %141 = arith.addf %140, %139 : vector<8x128xf32>
    %142 = arith.divf %140, %141 : vector<8x128xf32>
    %143 = vector.extract_strided_slice %129 {offsets = [0, 256], sizes = [8, 128], strides = [1, 1]} : vector<8x384xf32> to vector<8x128xf32>
    %144 = vector.extract_strided_slice %125 {offsets = [0, 256], sizes = [8, 128], strides = [1, 1]} : vector<8x384xf32> to vector<8x128xf32>
    %145 = arith.mulf %136, %144 : vector<8x128xf32>
    %146 = arith.addf %143, %145 : vector<8x128xf32>
    %147 = math.tanh %146 : vector<8x128xf32>
    %148 = arith.subf %98, %147 : vector<8x128xf32>
    %149 = arith.mulf %142, %148 : vector<8x128xf32>
    %150 = arith.addf %147, %149 : vector<8x128xf32>
    %cst_39 = arith.constant dense<0.000000e+00> : vector<8x384xf32>
    %151 = tpu.matmul %150, %10, %cst_39 {dimension_numbers = #tpu.dot_dimension_numbers<[1], [0], [0], [1], [0, 0, 1, 1], [], []>} : vector<8x128xf32>, vector<128x384xf32>, vector<8x384xf32> -> vector<8x384xf32>
    %152 = arith.addf %151, %16 : vector<8x384xf32>
    %153 = arith.addf %152, %126 : vector<8x384xf32>
    %154 = vector.extract_strided_slice %153 {offsets = [0, 0], sizes = [8, 128], strides = [1, 1]} : vector<8x384xf32> to vector<8x128xf32>
    %155 = arith.negf %154 : vector<8x128xf32>
    %156 = math.exp %155 : vector<8x128xf32>
    %cst_40 = arith.constant 1.000000e+00 : f32
    %157 = vector.broadcast %cst_40 : f32 to vector<8x128xf32>
    %158 = arith.addf %157, %156 : vector<8x128xf32>
    %159 = arith.divf %157, %158 : vector<8x128xf32>
    %160 = vector.extract_strided_slice %153 {offsets = [0, 128], sizes = [8, 128], strides = [1, 1]} : vector<8x384xf32> to vector<8x128xf32>
    %161 = arith.negf %160 : vector<8x128xf32>
    %162 = math.exp %161 : vector<8x128xf32>
    %cst_41 = arith.constant 1.000000e+00 : f32
    %163 = vector.broadcast %cst_41 : f32 to vector<8x128xf32>
    %164 = arith.addf %163, %162 : vector<8x128xf32>
    %165 = arith.divf %163, %164 : vector<8x128xf32>
    %166 = vector.extract_strided_slice %152 {offsets = [0, 256], sizes = [8, 128], strides = [1, 1]} : vector<8x384xf32> to vector<8x128xf32>
    %167 = vector.extract_strided_slice %126 {offsets = [0, 256], sizes = [8, 128], strides = [1, 1]} : vector<8x384xf32> to vector<8x128xf32>
    %168 = arith.mulf %159, %167 : vector<8x128xf32>
    %169 = arith.addf %166, %168 : vector<8x128xf32>
    %170 = math.tanh %169 : vector<8x128xf32>
    %171 = arith.subf %121, %170 : vector<8x128xf32>
    %172 = arith.mulf %165, %171 : vector<8x128xf32>
    %173 = arith.addf %170, %172 : vector<8x128xf32>
    %c3_i32 = arith.constant 3 : i32
    %174 = tpu.concatenate %150, %173 in 1 : vector<8x128xf32>, vector<8x128xf32> -> vector<8x256xf32>
    %cst_42 = arith.constant dense<0.000000e+00> : vector<8x768xf32>
    %175 = tpu.matmul %174, %9, %cst_42 {dimension_numbers = #tpu.dot_dimension_numbers<[1], [0], [0], [1], [0, 0, 1, 1], [], []>} : vector<8x256xf32>, vector<256x768xf32>, vector<8x768xf32> -> vector<8x768xf32>
    %176 = arith.addf %175, %13 : vector<8x768xf32>
    %177 = vector.extract_strided_slice %176 {offsets = [0, 0], sizes = [8, 384], strides = [1, 1]} : vector<8x768xf32> to vector<8x384xf32>
    %178 = vector.extract_strided_slice %176 {offsets = [0, 384], sizes = [8, 384], strides = [1, 1]} : vector<8x768xf32> to vector<8x384xf32>
    %179 = arith.index_cast %c3_i32 : i32 to index
    %c0_43 = arith.constant 0 : index
    %c0_44 = arith.constant 0 : index
    %180 = vector.load %arg10[%179, %c0_43, %c0_44] : memref<8x8x384xf32, #tpu.memory_space<vmem>>, vector<1x8x384xf32>
    %181 = vector.shape_cast %180 : vector<1x8x384xf32> to vector<8x384xf32>
    %182 = arith.addf %181, %177 : vector<8x384xf32>
    %183 = vector.extract_strided_slice %182 {offsets = [0, 0], sizes = [8, 128], strides = [1, 1]} : vector<8x384xf32> to vector<8x128xf32>
    %184 = arith.negf %183 : vector<8x128xf32>
    %185 = math.exp %184 : vector<8x128xf32>
    %cst_45 = arith.constant 1.000000e+00 : f32
    %186 = vector.broadcast %cst_45 : f32 to vector<8x128xf32>
    %187 = arith.addf %186, %185 : vector<8x128xf32>
    %188 = arith.divf %186, %187 : vector<8x128xf32>
    %189 = vector.extract_strided_slice %182 {offsets = [0, 128], sizes = [8, 128], strides = [1, 1]} : vector<8x384xf32> to vector<8x128xf32>
    %190 = arith.negf %189 : vector<8x128xf32>
    %191 = math.exp %190 : vector<8x128xf32>
    %cst_46 = arith.constant 1.000000e+00 : f32
    %192 = vector.broadcast %cst_46 : f32 to vector<8x128xf32>
    %193 = arith.addf %192, %191 : vector<8x128xf32>
    %194 = arith.divf %192, %193 : vector<8x128xf32>
    %195 = vector.extract_strided_slice %181 {offsets = [0, 256], sizes = [8, 128], strides = [1, 1]} : vector<8x384xf32> to vector<8x128xf32>
    %196 = vector.extract_strided_slice %177 {offsets = [0, 256], sizes = [8, 128], strides = [1, 1]} : vector<8x384xf32> to vector<8x128xf32>
    %197 = arith.mulf %188, %196 : vector<8x128xf32>
    %198 = arith.addf %195, %197 : vector<8x128xf32>
    %199 = math.tanh %198 : vector<8x128xf32>
    %200 = arith.subf %150, %199 : vector<8x128xf32>
    %201 = arith.mulf %194, %200 : vector<8x128xf32>
    %202 = arith.addf %199, %201 : vector<8x128xf32>
    %cst_47 = arith.constant dense<0.000000e+00> : vector<8x384xf32>
    %203 = tpu.matmul %202, %10, %cst_47 {dimension_numbers = #tpu.dot_dimension_numbers<[1], [0], [0], [1], [0, 0, 1, 1], [], []>} : vector<8x128xf32>, vector<128x384xf32>, vector<8x384xf32> -> vector<8x384xf32>
    %204 = arith.addf %203, %16 : vector<8x384xf32>
    %205 = arith.addf %204, %178 : vector<8x384xf32>
    %206 = vector.extract_strided_slice %205 {offsets = [0, 0], sizes = [8, 128], strides = [1, 1]} : vector<8x384xf32> to vector<8x128xf32>
    %207 = arith.negf %206 : vector<8x128xf32>
    %208 = math.exp %207 : vector<8x128xf32>
    %cst_48 = arith.constant 1.000000e+00 : f32
    %209 = vector.broadcast %cst_48 : f32 to vector<8x128xf32>
    %210 = arith.addf %209, %208 : vector<8x128xf32>
    %211 = arith.divf %209, %210 : vector<8x128xf32>
    %212 = vector.extract_strided_slice %205 {offsets = [0, 128], sizes = [8, 128], strides = [1, 1]} : vector<8x384xf32> to vector<8x128xf32>
    %213 = arith.negf %212 : vector<8x128xf32>
    %214 = math.exp %213 : vector<8x128xf32>
    %cst_49 = arith.constant 1.000000e+00 : f32
    %215 = vector.broadcast %cst_49 : f32 to vector<8x128xf32>
    %216 = arith.addf %215, %214 : vector<8x128xf32>
    %217 = arith.divf %215, %216 : vector<8x128xf32>
    %218 = vector.extract_strided_slice %204 {offsets = [0, 256], sizes = [8, 128], strides = [1, 1]} : vector<8x384xf32> to vector<8x128xf32>
    %219 = vector.extract_strided_slice %178 {offsets = [0, 256], sizes = [8, 128], strides = [1, 1]} : vector<8x384xf32> to vector<8x128xf32>
    %220 = arith.mulf %211, %219 : vector<8x128xf32>
    %221 = arith.addf %218, %220 : vector<8x128xf32>
    %222 = math.tanh %221 : vector<8x128xf32>
    %223 = arith.subf %173, %222 : vector<8x128xf32>
    %224 = arith.mulf %217, %223 : vector<8x128xf32>
    %225 = arith.addf %222, %224 : vector<8x128xf32>
    %c4_i32 = arith.constant 4 : i32
    %226 = tpu.concatenate %202, %225 in 1 : vector<8x128xf32>, vector<8x128xf32> -> vector<8x256xf32>
    %cst_50 = arith.constant dense<0.000000e+00> : vector<8x768xf32>
    %227 = tpu.matmul %226, %9, %cst_50 {dimension_numbers = #tpu.dot_dimension_numbers<[1], [0], [0], [1], [0, 0, 1, 1], [], []>} : vector<8x256xf32>, vector<256x768xf32>, vector<8x768xf32> -> vector<8x768xf32>
    %228 = arith.addf %227, %13 : vector<8x768xf32>
    %229 = vector.extract_strided_slice %228 {offsets = [0, 0], sizes = [8, 384], strides = [1, 1]} : vector<8x768xf32> to vector<8x384xf32>
    %230 = vector.extract_strided_slice %228 {offsets = [0, 384], sizes = [8, 384], strides = [1, 1]} : vector<8x768xf32> to vector<8x384xf32>
    %231 = arith.index_cast %c4_i32 : i32 to index
    %c0_51 = arith.constant 0 : index
    %c0_52 = arith.constant 0 : index
    %232 = vector.load %arg10[%231, %c0_51, %c0_52] : memref<8x8x384xf32, #tpu.memory_space<vmem>>, vector<1x8x384xf32>
    %233 = vector.shape_cast %232 : vector<1x8x384xf32> to vector<8x384xf32>
    %234 = arith.addf %233, %229 : vector<8x384xf32>
    %235 = vector.extract_strided_slice %234 {offsets = [0, 0], sizes = [8, 128], strides = [1, 1]} : vector<8x384xf32> to vector<8x128xf32>
    %236 = arith.negf %235 : vector<8x128xf32>
    %237 = math.exp %236 : vector<8x128xf32>
    %cst_53 = arith.constant 1.000000e+00 : f32
    %238 = vector.broadcast %cst_53 : f32 to vector<8x128xf32>
    %239 = arith.addf %238, %237 : vector<8x128xf32>
    %240 = arith.divf %238, %239 : vector<8x128xf32>
    %241 = vector.extract_strided_slice %234 {offsets = [0, 128], sizes = [8, 128], strides = [1, 1]} : vector<8x384xf32> to vector<8x128xf32>
    %242 = arith.negf %241 : vector<8x128xf32>
    %243 = math.exp %242 : vector<8x128xf32>
    %cst_54 = arith.constant 1.000000e+00 : f32
    %244 = vector.broadcast %cst_54 : f32 to vector<8x128xf32>
    %245 = arith.addf %244, %243 : vector<8x128xf32>
    %246 = arith.divf %244, %245 : vector<8x128xf32>
    %247 = vector.extract_strided_slice %233 {offsets = [0, 256], sizes = [8, 128], strides = [1, 1]} : vector<8x384xf32> to vector<8x128xf32>
    %248 = vector.extract_strided_slice %229 {offsets = [0, 256], sizes = [8, 128], strides = [1, 1]} : vector<8x384xf32> to vector<8x128xf32>
    %249 = arith.mulf %240, %248 : vector<8x128xf32>
    %250 = arith.addf %247, %249 : vector<8x128xf32>
    %251 = math.tanh %250 : vector<8x128xf32>
    %252 = arith.subf %202, %251 : vector<8x128xf32>
    %253 = arith.mulf %246, %252 : vector<8x128xf32>
    %254 = arith.addf %251, %253 : vector<8x128xf32>
    %cst_55 = arith.constant dense<0.000000e+00> : vector<8x384xf32>
    %255 = tpu.matmul %254, %10, %cst_55 {dimension_numbers = #tpu.dot_dimension_numbers<[1], [0], [0], [1], [0, 0, 1, 1], [], []>} : vector<8x128xf32>, vector<128x384xf32>, vector<8x384xf32> -> vector<8x384xf32>
    %256 = arith.addf %255, %16 : vector<8x384xf32>
    %257 = arith.addf %256, %230 : vector<8x384xf32>
    %258 = vector.extract_strided_slice %257 {offsets = [0, 0], sizes = [8, 128], strides = [1, 1]} : vector<8x384xf32> to vector<8x128xf32>
    %259 = arith.negf %258 : vector<8x128xf32>
    %260 = math.exp %259 : vector<8x128xf32>
    %cst_56 = arith.constant 1.000000e+00 : f32
    %261 = vector.broadcast %cst_56 : f32 to vector<8x128xf32>
    %262 = arith.addf %261, %260 : vector<8x128xf32>
    %263 = arith.divf %261, %262 : vector<8x128xf32>
    %264 = vector.extract_strided_slice %257 {offsets = [0, 128], sizes = [8, 128], strides = [1, 1]} : vector<8x384xf32> to vector<8x128xf32>
    %265 = arith.negf %264 : vector<8x128xf32>
    %266 = math.exp %265 : vector<8x128xf32>
    %cst_57 = arith.constant 1.000000e+00 : f32
    %267 = vector.broadcast %cst_57 : f32 to vector<8x128xf32>
    %268 = arith.addf %267, %266 : vector<8x128xf32>
    %269 = arith.divf %267, %268 : vector<8x128xf32>
    %270 = vector.extract_strided_slice %256 {offsets = [0, 256], sizes = [8, 128], strides = [1, 1]} : vector<8x384xf32> to vector<8x128xf32>
    %271 = vector.extract_strided_slice %230 {offsets = [0, 256], sizes = [8, 128], strides = [1, 1]} : vector<8x384xf32> to vector<8x128xf32>
    %272 = arith.mulf %263, %271 : vector<8x128xf32>
    %273 = arith.addf %270, %272 : vector<8x128xf32>
    %274 = math.tanh %273 : vector<8x128xf32>
    %275 = arith.subf %225, %274 : vector<8x128xf32>
    %276 = arith.mulf %269, %275 : vector<8x128xf32>
    %277 = arith.addf %274, %276 : vector<8x128xf32>
    %c5_i32 = arith.constant 5 : i32
    %278 = tpu.concatenate %254, %277 in 1 : vector<8x128xf32>, vector<8x128xf32> -> vector<8x256xf32>
    %cst_58 = arith.constant dense<0.000000e+00> : vector<8x768xf32>
    %279 = tpu.matmul %278, %9, %cst_58 {dimension_numbers = #tpu.dot_dimension_numbers<[1], [0], [0], [1], [0, 0, 1, 1], [], []>} : vector<8x256xf32>, vector<256x768xf32>, vector<8x768xf32> -> vector<8x768xf32>
    %280 = arith.addf %279, %13 : vector<8x768xf32>
    %281 = vector.extract_strided_slice %280 {offsets = [0, 0], sizes = [8, 384], strides = [1, 1]} : vector<8x768xf32> to vector<8x384xf32>
    %282 = vector.extract_strided_slice %280 {offsets = [0, 384], sizes = [8, 384], strides = [1, 1]} : vector<8x768xf32> to vector<8x384xf32>
    %283 = arith.index_cast %c5_i32 : i32 to index
    %c0_59 = arith.constant 0 : index
    %c0_60 = arith.constant 0 : index
    %284 = vector.load %arg10[%283, %c0_59, %c0_60] : memref<8x8x384xf32, #tpu.memory_space<vmem>>, vector<1x8x384xf32>
    %285 = vector.shape_cast %284 : vector<1x8x384xf32> to vector<8x384xf32>
    %286 = arith.addf %285, %281 : vector<8x384xf32>
    %287 = vector.extract_strided_slice %286 {offsets = [0, 0], sizes = [8, 128], strides = [1, 1]} : vector<8x384xf32> to vector<8x128xf32>
    %288 = arith.negf %287 : vector<8x128xf32>
    %289 = math.exp %288 : vector<8x128xf32>
    %cst_61 = arith.constant 1.000000e+00 : f32
    %290 = vector.broadcast %cst_61 : f32 to vector<8x128xf32>
    %291 = arith.addf %290, %289 : vector<8x128xf32>
    %292 = arith.divf %290, %291 : vector<8x128xf32>
    %293 = vector.extract_strided_slice %286 {offsets = [0, 128], sizes = [8, 128], strides = [1, 1]} : vector<8x384xf32> to vector<8x128xf32>
    %294 = arith.negf %293 : vector<8x128xf32>
    %295 = math.exp %294 : vector<8x128xf32>
    %cst_62 = arith.constant 1.000000e+00 : f32
    %296 = vector.broadcast %cst_62 : f32 to vector<8x128xf32>
    %297 = arith.addf %296, %295 : vector<8x128xf32>
    %298 = arith.divf %296, %297 : vector<8x128xf32>
    %299 = vector.extract_strided_slice %285 {offsets = [0, 256], sizes = [8, 128], strides = [1, 1]} : vector<8x384xf32> to vector<8x128xf32>
    %300 = vector.extract_strided_slice %281 {offsets = [0, 256], sizes = [8, 128], strides = [1, 1]} : vector<8x384xf32> to vector<8x128xf32>
    %301 = arith.mulf %292, %300 : vector<8x128xf32>
    %302 = arith.addf %299, %301 : vector<8x128xf32>
    %303 = math.tanh %302 : vector<8x128xf32>
    %304 = arith.subf %254, %303 : vector<8x128xf32>
    %305 = arith.mulf %298, %304 : vector<8x128xf32>
    %306 = arith.addf %303, %305 : vector<8x128xf32>
    %cst_63 = arith.constant dense<0.000000e+00> : vector<8x384xf32>
    %307 = tpu.matmul %306, %10, %cst_63 {dimension_numbers = #tpu.dot_dimension_numbers<[1], [0], [0], [1], [0, 0, 1, 1], [], []>} : vector<8x128xf32>, vector<128x384xf32>, vector<8x384xf32> -> vector<8x384xf32>
    %308 = arith.addf %307, %16 : vector<8x384xf32>
    %309 = arith.addf %308, %282 : vector<8x384xf32>
    %310 = vector.extract_strided_slice %309 {offsets = [0, 0], sizes = [8, 128], strides = [1, 1]} : vector<8x384xf32> to vector<8x128xf32>
    %311 = arith.negf %310 : vector<8x128xf32>
    %312 = math.exp %311 : vector<8x128xf32>
    %cst_64 = arith.constant 1.000000e+00 : f32
    %313 = vector.broadcast %cst_64 : f32 to vector<8x128xf32>
    %314 = arith.addf %313, %312 : vector<8x128xf32>
    %315 = arith.divf %313, %314 : vector<8x128xf32>
    %316 = vector.extract_strided_slice %309 {offsets = [0, 128], sizes = [8, 128], strides = [1, 1]} : vector<8x384xf32> to vector<8x128xf32>
    %317 = arith.negf %316 : vector<8x128xf32>
    %318 = math.exp %317 : vector<8x128xf32>
    %cst_65 = arith.constant 1.000000e+00 : f32
    %319 = vector.broadcast %cst_65 : f32 to vector<8x128xf32>
    %320 = arith.addf %319, %318 : vector<8x128xf32>
    %321 = arith.divf %319, %320 : vector<8x128xf32>
    %322 = vector.extract_strided_slice %308 {offsets = [0, 256], sizes = [8, 128], strides = [1, 1]} : vector<8x384xf32> to vector<8x128xf32>
    %323 = vector.extract_strided_slice %282 {offsets = [0, 256], sizes = [8, 128], strides = [1, 1]} : vector<8x384xf32> to vector<8x128xf32>
    %324 = arith.mulf %315, %323 : vector<8x128xf32>
    %325 = arith.addf %322, %324 : vector<8x128xf32>
    %326 = math.tanh %325 : vector<8x128xf32>
    %327 = arith.subf %277, %326 : vector<8x128xf32>
    %328 = arith.mulf %321, %327 : vector<8x128xf32>
    %329 = arith.addf %326, %328 : vector<8x128xf32>
    %c6_i32 = arith.constant 6 : i32
    %330 = tpu.concatenate %306, %329 in 1 : vector<8x128xf32>, vector<8x128xf32> -> vector<8x256xf32>
    %cst_66 = arith.constant dense<0.000000e+00> : vector<8x768xf32>
    %331 = tpu.matmul %330, %9, %cst_66 {dimension_numbers = #tpu.dot_dimension_numbers<[1], [0], [0], [1], [0, 0, 1, 1], [], []>} : vector<8x256xf32>, vector<256x768xf32>, vector<8x768xf32> -> vector<8x768xf32>
    %332 = arith.addf %331, %13 : vector<8x768xf32>
    %333 = vector.extract_strided_slice %332 {offsets = [0, 0], sizes = [8, 384], strides = [1, 1]} : vector<8x768xf32> to vector<8x384xf32>
    %334 = vector.extract_strided_slice %332 {offsets = [0, 384], sizes = [8, 384], strides = [1, 1]} : vector<8x768xf32> to vector<8x384xf32>
    %335 = arith.index_cast %c6_i32 : i32 to index
    %c0_67 = arith.constant 0 : index
    %c0_68 = arith.constant 0 : index
    %336 = vector.load %arg10[%335, %c0_67, %c0_68] : memref<8x8x384xf32, #tpu.memory_space<vmem>>, vector<1x8x384xf32>
    %337 = vector.shape_cast %336 : vector<1x8x384xf32> to vector<8x384xf32>
    %338 = arith.addf %337, %333 : vector<8x384xf32>
    %339 = vector.extract_strided_slice %338 {offsets = [0, 0], sizes = [8, 128], strides = [1, 1]} : vector<8x384xf32> to vector<8x128xf32>
    %340 = arith.negf %339 : vector<8x128xf32>
    %341 = math.exp %340 : vector<8x128xf32>
    %cst_69 = arith.constant 1.000000e+00 : f32
    %342 = vector.broadcast %cst_69 : f32 to vector<8x128xf32>
    %343 = arith.addf %342, %341 : vector<8x128xf32>
    %344 = arith.divf %342, %343 : vector<8x128xf32>
    %345 = vector.extract_strided_slice %338 {offsets = [0, 128], sizes = [8, 128], strides = [1, 1]} : vector<8x384xf32> to vector<8x128xf32>
    %346 = arith.negf %345 : vector<8x128xf32>
    %347 = math.exp %346 : vector<8x128xf32>
    %cst_70 = arith.constant 1.000000e+00 : f32
    %348 = vector.broadcast %cst_70 : f32 to vector<8x128xf32>
    %349 = arith.addf %348, %347 : vector<8x128xf32>
    %350 = arith.divf %348, %349 : vector<8x128xf32>
    %351 = vector.extract_strided_slice %337 {offsets = [0, 256], sizes = [8, 128], strides = [1, 1]} : vector<8x384xf32> to vector<8x128xf32>
    %352 = vector.extract_strided_slice %333 {offsets = [0, 256], sizes = [8, 128], strides = [1, 1]} : vector<8x384xf32> to vector<8x128xf32>
    %353 = arith.mulf %344, %352 : vector<8x128xf32>
    %354 = arith.addf %351, %353 : vector<8x128xf32>
    %355 = math.tanh %354 : vector<8x128xf32>
    %356 = arith.subf %306, %355 : vector<8x128xf32>
    %357 = arith.mulf %350, %356 : vector<8x128xf32>
    %358 = arith.addf %355, %357 : vector<8x128xf32>
    %cst_71 = arith.constant dense<0.000000e+00> : vector<8x384xf32>
    %359 = tpu.matmul %358, %10, %cst_71 {dimension_numbers = #tpu.dot_dimension_numbers<[1], [0], [0], [1], [0, 0, 1, 1], [], []>} : vector<8x128xf32>, vector<128x384xf32>, vector<8x384xf32> -> vector<8x384xf32>
    %360 = arith.addf %359, %16 : vector<8x384xf32>
    %361 = arith.addf %360, %334 : vector<8x384xf32>
    %362 = vector.extract_strided_slice %361 {offsets = [0, 0], sizes = [8, 128], strides = [1, 1]} : vector<8x384xf32> to vector<8x128xf32>
    %363 = arith.negf %362 : vector<8x128xf32>
    %364 = math.exp %363 : vector<8x128xf32>
    %cst_72 = arith.constant 1.000000e+00 : f32
    %365 = vector.broadcast %cst_72 : f32 to vector<8x128xf32>
    %366 = arith.addf %365, %364 : vector<8x128xf32>
    %367 = arith.divf %365, %366 : vector<8x128xf32>
    %368 = vector.extract_strided_slice %361 {offsets = [0, 128], sizes = [8, 128], strides = [1, 1]} : vector<8x384xf32> to vector<8x128xf32>
    %369 = arith.negf %368 : vector<8x128xf32>
    %370 = math.exp %369 : vector<8x128xf32>
    %cst_73 = arith.constant 1.000000e+00 : f32
    %371 = vector.broadcast %cst_73 : f32 to vector<8x128xf32>
    %372 = arith.addf %371, %370 : vector<8x128xf32>
    %373 = arith.divf %371, %372 : vector<8x128xf32>
    %374 = vector.extract_strided_slice %360 {offsets = [0, 256], sizes = [8, 128], strides = [1, 1]} : vector<8x384xf32> to vector<8x128xf32>
    %375 = vector.extract_strided_slice %334 {offsets = [0, 256], sizes = [8, 128], strides = [1, 1]} : vector<8x384xf32> to vector<8x128xf32>
    %376 = arith.mulf %367, %375 : vector<8x128xf32>
    %377 = arith.addf %374, %376 : vector<8x128xf32>
    %378 = math.tanh %377 : vector<8x128xf32>
    %379 = arith.subf %329, %378 : vector<8x128xf32>
    %380 = arith.mulf %373, %379 : vector<8x128xf32>
    %381 = arith.addf %378, %380 : vector<8x128xf32>
    %c7_i32 = arith.constant 7 : i32
    %382 = tpu.concatenate %358, %381 in 1 : vector<8x128xf32>, vector<8x128xf32> -> vector<8x256xf32>
    %cst_74 = arith.constant dense<0.000000e+00> : vector<8x768xf32>
    %383 = tpu.matmul %382, %9, %cst_74 {dimension_numbers = #tpu.dot_dimension_numbers<[1], [0], [0], [1], [0, 0, 1, 1], [], []>} : vector<8x256xf32>, vector<256x768xf32>, vector<8x768xf32> -> vector<8x768xf32>
    %384 = arith.addf %383, %13 : vector<8x768xf32>
    %385 = vector.extract_strided_slice %384 {offsets = [0, 0], sizes = [8, 384], strides = [1, 1]} : vector<8x768xf32> to vector<8x384xf32>
    %386 = vector.extract_strided_slice %384 {offsets = [0, 384], sizes = [8, 384], strides = [1, 1]} : vector<8x768xf32> to vector<8x384xf32>
    %387 = arith.index_cast %c7_i32 : i32 to index
    %c0_75 = arith.constant 0 : index
    %c0_76 = arith.constant 0 : index
    %388 = vector.load %arg10[%387, %c0_75, %c0_76] : memref<8x8x384xf32, #tpu.memory_space<vmem>>, vector<1x8x384xf32>
    %389 = vector.shape_cast %388 : vector<1x8x384xf32> to vector<8x384xf32>
    %390 = arith.addf %389, %385 : vector<8x384xf32>
    %391 = vector.extract_strided_slice %390 {offsets = [0, 0], sizes = [8, 128], strides = [1, 1]} : vector<8x384xf32> to vector<8x128xf32>
    %392 = arith.negf %391 : vector<8x128xf32>
    %393 = math.exp %392 : vector<8x128xf32>
    %cst_77 = arith.constant 1.000000e+00 : f32
    %394 = vector.broadcast %cst_77 : f32 to vector<8x128xf32>
    %395 = arith.addf %394, %393 : vector<8x128xf32>
    %396 = arith.divf %394, %395 : vector<8x128xf32>
    %397 = vector.extract_strided_slice %390 {offsets = [0, 128], sizes = [8, 128], strides = [1, 1]} : vector<8x384xf32> to vector<8x128xf32>
    %398 = arith.negf %397 : vector<8x128xf32>
    %399 = math.exp %398 : vector<8x128xf32>
    %cst_78 = arith.constant 1.000000e+00 : f32
    %400 = vector.broadcast %cst_78 : f32 to vector<8x128xf32>
    %401 = arith.addf %400, %399 : vector<8x128xf32>
    %402 = arith.divf %400, %401 : vector<8x128xf32>
    %403 = vector.extract_strided_slice %389 {offsets = [0, 256], sizes = [8, 128], strides = [1, 1]} : vector<8x384xf32> to vector<8x128xf32>
    %404 = vector.extract_strided_slice %385 {offsets = [0, 256], sizes = [8, 128], strides = [1, 1]} : vector<8x384xf32> to vector<8x128xf32>
    %405 = arith.mulf %396, %404 : vector<8x128xf32>
    %406 = arith.addf %403, %405 : vector<8x128xf32>
    %407 = math.tanh %406 : vector<8x128xf32>
    %408 = arith.subf %358, %407 : vector<8x128xf32>
    %409 = arith.mulf %402, %408 : vector<8x128xf32>
    %410 = arith.addf %407, %409 : vector<8x128xf32>
    %cst_79 = arith.constant dense<0.000000e+00> : vector<8x384xf32>
    %411 = tpu.matmul %410, %10, %cst_79 {dimension_numbers = #tpu.dot_dimension_numbers<[1], [0], [0], [1], [0, 0, 1, 1], [], []>} : vector<8x128xf32>, vector<128x384xf32>, vector<8x384xf32> -> vector<8x384xf32>
    %412 = arith.addf %411, %16 : vector<8x384xf32>
    %413 = arith.addf %412, %386 : vector<8x384xf32>
    %414 = vector.extract_strided_slice %413 {offsets = [0, 0], sizes = [8, 128], strides = [1, 1]} : vector<8x384xf32> to vector<8x128xf32>
    %415 = arith.negf %414 : vector<8x128xf32>
    %416 = math.exp %415 : vector<8x128xf32>
    %cst_80 = arith.constant 1.000000e+00 : f32
    %417 = vector.broadcast %cst_80 : f32 to vector<8x128xf32>
    %418 = arith.addf %417, %416 : vector<8x128xf32>
    %419 = arith.divf %417, %418 : vector<8x128xf32>
    %420 = vector.extract_strided_slice %413 {offsets = [0, 128], sizes = [8, 128], strides = [1, 1]} : vector<8x384xf32> to vector<8x128xf32>
    %421 = arith.negf %420 : vector<8x128xf32>
    %422 = math.exp %421 : vector<8x128xf32>
    %cst_81 = arith.constant 1.000000e+00 : f32
    %423 = vector.broadcast %cst_81 : f32 to vector<8x128xf32>
    %424 = arith.addf %423, %422 : vector<8x128xf32>
    %425 = arith.divf %423, %424 : vector<8x128xf32>
    %426 = vector.extract_strided_slice %412 {offsets = [0, 256], sizes = [8, 128], strides = [1, 1]} : vector<8x384xf32> to vector<8x128xf32>
    %427 = vector.extract_strided_slice %386 {offsets = [0, 256], sizes = [8, 128], strides = [1, 1]} : vector<8x384xf32> to vector<8x128xf32>
    %428 = arith.mulf %419, %427 : vector<8x128xf32>
    %429 = arith.addf %426, %428 : vector<8x128xf32>
    %430 = math.tanh %429 : vector<8x128xf32>
    %431 = arith.subf %381, %430 : vector<8x128xf32>
    %432 = arith.mulf %425, %431 : vector<8x128xf32>
    %433 = arith.addf %430, %432 : vector<8x128xf32>
    %c8_i32 = arith.constant 8 : i32
    %c0_82 = arith.constant 0 : index
    %c0_83 = arith.constant 0 : index
    %434 = vector.load %arg7[%c0_82, %c0_83] : memref<128x1xf32, #tpu.memory_space<vmem>>, vector<128x1xf32>
    %cst_84 = arith.constant dense<0.000000e+00> : vector<8x1xf32>
    %435 = tpu.matmul %433, %434, %cst_84 {dimension_numbers = #tpu.dot_dimension_numbers<[1], [0], [0], [1], [0, 0, 1, 1], [], []>} : vector<8x128xf32>, vector<128x1xf32>, vector<8x1xf32> -> vector<8x1xf32>
    %c0_85 = arith.constant 0 : index
    %c0_86 = arith.constant 0 : index
    %436 = vector.load %arg8[%c0_85, %c0_86] : memref<1x1xf32, #tpu.memory_space<vmem>>, vector<1x1xf32>
    %437 = vector.broadcast %436 : vector<1x1xf32> to vector<8x1xf32>
    %438 = arith.addf %435, %437 : vector<8x1xf32>
    %c0_87 = arith.constant 0 : index
    %c0_88 = arith.constant 0 : index
    %439 = vector.load %arg9[%c0_87, %c0_88] : memref<8x1xf32, #tpu.memory_space<vmem>>, vector<8x1xf32>
    tpu.vector_store %arg9[%c0_87, %c0_88], %438 {strides = array<i32>} : memref<8x1xf32, #tpu.memory_space<vmem>>, vector<8x1xf32>,
    return
  }
}

</mosaic_0001>

<bundles_post_ra>
// kernel: rnn_gru_forward.1
= control target key start
LH: loop header
LB: loop body
LE: loop exit
PB: predicated region body
PF: predicated region fallthrough
CT: control target
= control target key end

     0   :  { %vm62_vm0 = vcmask 261120   ;;  %s11950_s1 = inlined_call_operand.vmem [shape: f32[32,384], index: 1, kind: input, shape index: {}]   ;;  %s11951_s5 = inlined_call_operand.vmem [shape: f32[256,768], index: 5, kind: input, shape index: {}]   ;;  %s11952_s0 = inlined_call_operand.vmem [shape: f32[8,8,32], index: 0, kind: input, shape index: {}]   ;;  %s11953_s3 = inlined_call_operand.vmem [shape: f32[128,384], index: 3, kind: input, shape index: {}]   ;;  %s11954_s6 = inlined_call_operand.vmem [shape: f32[1,768], index: 6, kind: input, shape index: {}]   ;;  %s11955_s2 = inlined_call_operand.vmem [shape: f32[1,384], index: 2, kind: input, shape index: {}]   ;;  %s11956_s4 = inlined_call_operand.vmem [shape: f32[1,384], index: 4, kind: input, shape index: {}]   ;;  %s11957_s7 = inlined_call_operand.vmem [shape: f32[128,1], index: 7, kind: input, shape index: {}]   ;;  %s11958_s8 = inlined_call_operand.<no memory space> [shape: f32[1,1], index: 8, kind: input, shape index: {}]   ;;  %s11959_s9 = inlined_call_operand.vmem [shape: f32[8,1], index: 9, kind: output, shape index: {}]  }
   0x1   :  { %v51_v0 = vld [vmem:[%s11950_s1 + $0x48] sm:$0xff]  ;;  %v4810_v1 = vld [vmem:[%s11951_s5 + $0x2d0] sm:$0xff]  ;;  %v4822_v4 = vld [vmem:[%s11951_s5 + $0x2a0] sm:$0xff] }
   0x2   :  { %v48_v2 = vld [vmem:[%s11950_s1 + $0x30] sm:$0xff]  ;;  %99 = vmatpush.msra.mxu0 %v51_v0  ;;  %496 = vmatpush.msra.mxu3 %v4810_v1  ;;  %v45_v5 = vld [vmem:[%s11950_s1 + $0x18] sm:$0xff]  ;;  %v46_v8 = vld [vmem:[%s11950_s1 + $0x20] sm:$0xff] }
   0x3   :  { %v52_v3 = vld [vmem:[%s11950_s1 + $0x50] sm:$0xff]  ;;  %v49_v6 = vld [vmem:[%s11950_s1 + $0x38] sm:$0xff]  ;;  %v42_v9 = vld [vmem:[%s11950_s1] sm:$0xff] }
   0x4   :  { %140 = vmatpush.msra.mxu1 %v52_v3  ;;  %v4833_v7 = vld [vmem:[%s11951_s5 + $0x270] sm:$0xff]  ;;  %100 = vmatpush.msra.mxu0 %v48_v2  ;;  %v4845_v10 = vld [vmem:[%s11951_s5 + $0x240] sm:$0xff]  ;;  %v43_v12 = vld [vmem:[%s11950_s1 + $0x8] sm:$0xff] }
   0x5   :  { %497 = vmatpush.msra.mxu3 %v4822_v4  ;;  %v34_v11 = vld [vmem:[%s11952_s0] sm:$0xff]  ;;  %v4857_v13 = vld [vmem:[%s11951_s5 + $0x210] sm:$0xff]  ;;  %v4863_v14 = vld [vmem:[%s11951_s5 + $0x2d8] sm:$0xff] }
   0x6   :  { %141 = vmatpush.msra.mxu1 %v49_v6  ;;  %101 = vmatpush.msra.mxu0 %v45_v5  ;;  %v421_v15 = vld [vmem:[%s11951_s5 + $0x5d8] sm:$0xff]  ;;  %v4872_v16 = vld [vmem:[%s11951_s5 + $0x1e0] sm:$0xff]  ;;  %v4882_v18 = vld [vmem:[%s11951_s5 + $0x2a8] sm:$0xff] }
   0x7   :  { %498 = vmatpush.msra.mxu3 %v4833_v7  ;;  %v53_v17 = vld [vmem:[%s11950_s1 + $0x58] sm:$0xff]  ;;  %v415_v19 = vld [vmem:[%s11951_s5 + $0x5a8] sm:$0xff]  ;;  %v4890_v20 = vld [vmem:[%s11951_s5 + $0x1b0] sm:$0xff] }
   0x8   :  { %142 = vmatpush.msra.mxu1 %v46_v8  ;;  %102 = vmatpush.msra.mxu0 %v42_v9  ;;  %v50_v21 = vld [vmem:[%s11950_s1 + $0x40] sm:$0xff]  ;;  %v4900_v22 = vld [vmem:[%s11951_s5 + $0x278] sm:$0xff]  ;;  %v47_v25 = vld [vmem:[%s11950_s1 + $0x28] sm:$0xff]  ;;  %v11961_v8 = vmov 0.0  }
   0x9   :  { %499 = vmatpush.msra.mxu3 %v4845_v10  ;;  %3709 = vmatmul.msk.f32.vlgmr.msra.gmra.mxu0 %vm62_vm0, %v34_v11  ;;  %v409_v23 = vld [vmem:[%s11951_s5 + $0x578] sm:$0xff]  ;;  %v4908_v24 = vld [vmem:[%s11951_s5 + $0x180] sm:$0xff]  ;;  %v35_v26 = vld [vmem:[%s11952_s0 + $0x8] sm:$0xff] }
   0xa   :  { %143 = vmatpush.msra.mxu1 %v43_v12  ;;  %536 = vmatpush.msrb.mxu0 %v4863_v14  ;;  %v403_v27 = vld [vmem:[%s11951_s5 + $0x548] sm:$0xff]  ;;  %v4924_v28 = vld [vmem:[%s11951_s5 + $0x150] sm:$0xff]  ;;  %v4940_v31 = vld [vmem:[%s11951_s5 + $0x120] sm:$0xff] }
   0xb   :  { %500 = vmatpush.msra.mxu3 %v4857_v13  ;;  %3717 = vmatmul.msk.f32.vlgmr.msra.gmra.mxu1 %vm62_vm0, %v34_v11  ;;  %v44_v29 = vld [vmem:[%s11950_s1 + $0x10] sm:$0xff]  ;;  %v4934_v30 = vld [vmem:[%s11951_s5 + $0x248] sm:$0xff]  ;;  %v4947_v32 = vld [vmem:[%s11951_s5 + $0x2e0] sm:$0xff] }
   0xc   :  { %556 = vmatpush.msrb.mxu1 %v421_v15  ;;  %181 = vmatpush.msra.mxu2 %v53_v17  ;;  %v4952_v33 = vld [vmem:[%s11951_s5 + $0x218] sm:$0xff]  ;;  %v4957_v34 = vld [vmem:[%s11951_s5 + $0xf0] sm:$0xff]  ;;  %v4973_v37 = vld [vmem:[%s11951_s5 + $0x1e8] sm:$0xff] }
   0xd   :  { %501 = vmatpush.msra.mxu3 %v4872_v16  ;;  %537 = vmatpush.msrb.mxu0 %v4882_v18  ;;  %v397_v35 = vld [vmem:[%s11951_s5 + $0x518] sm:$0xff]  ;;  %v4968_v36 = vld [vmem:[%s11951_s5 + $0x2b0] sm:$0xff]  ;;  %v4978_v38 = vld [vmem:[%s11951_s5 + $0xc0] sm:$0xff] }
   0xe   :  { %557 = vmatpush.msrb.mxu1 %v415_v19  ;;  %182 = vmatpush.msra.mxu2 %v50_v21  ;;  %v391_v39 = vld [vmem:[%s11951_s5 + $0x4e8] sm:$0xff]  ;;  %v36_v40 = vld [vmem:[%s11952_s0 + $0x10] sm:$0xff]  ;;  %v4992_v41 = vld [vmem:[%s11951_s5 + $0x280] sm:$0xff] }
   0xf   :  { %502 = vmatpush.msra.mxu3 %v4890_v20  ;;  %538 = vmatpush.msrb.mxu0 %v4900_v22  ;;  %v4997_v42 = vld [vmem:[%s11951_s5 + $0x90] sm:$0xff]  ;;  %v5010_v44 = vld [vmem:[%s11951_s5 + $0x1b8] sm:$0xff]  ;;  %v5016_v45 = vld [vmem:[%s11951_s5 + $0x60] sm:$0xff] }
  0x10   :  { %558 = vmatpush.msrb.mxu1 %v409_v23  ;;  %183 = vmatpush.msra.mxu2 %v47_v25  ;;  %v5005_v43 = vld [vmem:[%s11951_s5 + $0x250] sm:$0xff]  ;;  %v385_v46 = vld [vmem:[%s11951_s5 + $0x4b8] sm:$0xff]  ;;  %v5027_v47 = vld [vmem:[%s11951_s5 + $0x220] sm:$0xff] }
  0x11   :  { %503 = vmatpush.msra.mxu3 %v4908_v24  ;;  %3710 = vmatmul.msk.f32.gmra.mxu0 %vm62_vm0, %v35_v26  ;;  %v5032_v48 = vld [vmem:[%s11951_s5 + $0x30] sm:$0xff]  ;;  %v5039_v49 = vld [vmem:[%s11951_s5 + $0x188] sm:$0xff]  ;;  %v5054_v52 = vld [vmem:[%s11951_s5] sm:$0xff] }
  0x12   :  { %559 = vmatpush.msrb.mxu1 %v403_v27  ;;  %184 = vmatpush.msra.mxu2 %v44_v29  ;;  %v379_v50 = vld [vmem:[%s11951_s5 + $0x488] sm:$0xff]  ;;  %v5049_v51 = vld [vmem:[%s11951_s5 + $0x1f0] sm:$0xff]  ;;  %v5060_v53 = vld [vmem:[%s11951_s5 + $0x158] sm:$0xff] }
  0x13   :  { %504 = vmatpush.msra.mxu3 %v4924_v28  ;;  %3718 = vmatmul.msk.f32.gmra.mxu1 %vm62_vm0, %v35_v26  ;;  %v37_v54 = vld [vmem:[%s11952_s0 + $0x18] sm:$0xff]  ;;  %v420_v55 = vld [vmem:[%s11951_s5 + $0x5d0] sm:$0xff]  ;;  %v5074_v56 = vld [vmem:[%s11951_s5 + $0x1c0] sm:$0xff] }
  0x14   :  { %539 = vmatpush.msrb.mxu0 %v4934_v30  ;;  %3725 = vmatmul.msk.f32.vlgmr.msra.gmra.mxu2 %vm62_vm0, %v34_v11  ;;  %v414_v57 = vld [vmem:[%s11951_s5 + $0x5a0] sm:$0xff]  ;;  %v373_v58 = vld [vmem:[%s11951_s5 + $0x458] sm:$0xff]  ;;  %v5088_v59 = vld [vmem:[%s11951_s5 + $0x128] sm:$0xff] }
  0x15   :  { %505 = vmatpush.msra.mxu3 %v4940_v31  ;;  %576 = vmatpush.msrb.mxu2 %v4947_v32  ;;  %v408_v60 = vld [vmem:[%s11951_s5 + $0x570] sm:$0xff]  ;;  %v367_v61 = vld [vmem:[%s11951_s5 + $0x428] sm:$0xff]  ;;  %v402_v63 = vld [vmem:[%s11951_s5 + $0x540] sm:$0xff] }
  0x16   :  { %540 = vmatpush.msrb.mxu0 %v4952_v33  ;;  %560 = vmatpush.msrb.mxu1 %v397_v35  ;;  %v5101_v62 = vld [vmem:[%s11951_s5 + $0x190] sm:$0xff]  ;;  %v5111_v0 = vld [vmem:[%s11951_s5 + $0xf8] sm:$0xff]  ;;  %v5119_v3 = vld [vmem:[%s11951_s5 + $0x160] sm:$0xff] }
  0x17   :  { %506 = vmatpush.msra.mxu3 %v4957_v34  ;;  %577 = vmatpush.msrb.mxu2 %v4968_v36  ;;  %v361_v2 = vld [vmem:[%s11951_s5 + $0x3f8] sm:$0xff]  ;;  %v38_v5 = vld [vmem:[%s11952_s0 + $0x20] sm:$0xff]  ;;  %v396_v6 = vld [vmem:[%s11951_s5 + $0x510] sm:$0xff] }
  0x18   :  { %541 = vmatpush.msrb.mxu0 %v4973_v37  ;;  %561 = vmatpush.msrb.mxu1 %v391_v39  ;;  %v5133_v9 = vld [vmem:[%s11951_s5 + $0xc8] sm:$0xff]  ;;  %v390_v11 = vld [vmem:[%s11951_s5 + $0x4e0] sm:$0xff]  ;;  %v5146_v15 = vld [vmem:[%s11951_s5 + $0x98] sm:$0xff] }
  0x19   :  { %507 = vmatpush.msra.mxu3 %v4978_v38  ;;  %3711 = vmatmul.msk.f32.gmra.mxu0 %vm62_vm0, %v36_v40  ;;  %v355_v12 = vld [vmem:[%s11951_s5 + $0x3c8] sm:$0xff]  ;;  %v384_v17 = vld [vmem:[%s11951_s5 + $0x4b0] sm:$0xff]  ;;  %v349_v23 = vld [vmem:[%s11951_s5 + $0x398] sm:$0xff] }
  0x1a   :  { %578 = vmatpush.msrb.mxu2 %v4992_v41  ;;  %542 = vmatpush.msrb.mxu0 %v5010_v44  ;;  %v5156_v19 = vld [vmem:[%s11951_s5 + $0x130] sm:$0xff]  ;;  %v5161_v21 = vld [vmem:[%s11951_s5 + $0x68] sm:$0xff]  ;;  %v378_v25 = vld [vmem:[%s11951_s5 + $0x480] sm:$0xff] }
  0x1b   :  { %508 = vmatpush.msra.mxu3 %v4997_v42  ;;  %3719 = vmatmul.msk.f32.gmra.mxu1 %vm62_vm0, %v36_v40  ;;  %v5180_v27 = vld [vmem:[%s11951_s5 + $0x38] sm:$0xff]  ;;  %v343_v29 = vld [vmem:[%s11951_s5 + $0x368] sm:$0xff]  ;;  %v372_v39 = vld [vmem:[%s11951_s5 + $0x450] sm:$0xff] }
  0x1c   :  { %579 = vmatpush.msrb.mxu2 %v5005_v43  ;;  %562 = vmatpush.msrb.mxu1 %v385_v46  ;;  %v39_v35 = vld [vmem:[%s11952_s0 + $0x28] sm:$0xff]  ;;  %v366_v46 = vld [vmem:[%s11951_s5 + $0x420] sm:$0xff] }
  0x1d   :  { %509 = vmatpush.msra.mxu3 %v5016_v45  ;;  %3726 = vmatmul.msk.f32.gmra.mxu2 %vm62_vm0, %v35_v26  ;;  %v5174_v26 = vld [vmem:[%s11951_s5 + $0x100] sm:$0xff] }
  0x1e   :  { %580 = vmatpush.msrb.mxu2 %v5027_v47  ;;  %543 = vmatpush.msrb.mxu0 %v5039_v49 }
  0x1f   :  { %510 = vmatpush.msra.mxu3 %v5032_v48  ;;  %563 = vmatpush.msrb.mxu1 %v379_v50  ;;  %v337_v50 = vld [vmem:[%s11951_s5 + $0x338] sm:$0xff] }
  0x20   :  { %581 = vmatpush.msrb.mxu2 %v5049_v51  ;;  %544 = vmatpush.msrb.mxu0 %v5060_v53 }
  0x21   :  { %511 = vmatpush.msra.mxu3 %v5054_v52  ;;  %3712 = vmatmul.msk.f32.gmra.mxu0 %vm62_vm0, %v37_v54 }
  0x22   :  { %582 = vmatpush.msrb.mxu2 %v5074_v56  ;;  %564 = vmatpush.msrb.mxu1 %v373_v58  ;;  %v354_v58 = vld [vmem:[%s11951_s5 + $0x3c0] sm:$0xff] }
  0x23   :  { %516 = vmatpush.msrb.mxu3 %v420_v55  ;;  %3720 = vmatmul.msk.f32.gmra.mxu1 %vm62_vm0, %v37_v54  ;;  %v5214_v55 = vld [vmem:[%s11951_s5 + $0xd0] sm:$0xff] }
  0x24   :  { %545 = vmatpush.msrb.mxu0 %v5088_v59  ;;  %565 = vmatpush.msrb.mxu1 %v367_v61  ;;  %v40_v61 = vld [vmem:[%s11952_s0 + $0x30] sm:$0xff] }
  0x25   :  { %517 = vmatpush.msrb.mxu3 %v414_v57  ;;  %3727 = vmatmul.msk.f32.gmra.mxu2 %vm62_vm0, %v36_v40  ;;  %v5196_v40 = vld [vmem:[%s11951_s5 + $0x8] sm:$0xff] }
  0x26   :  { %512 = vmatmul.f32.vlgmr.msra.gmra.mxu3 %v11961_v8  ;;  %583 = vmatpush.msrb.mxu2 %v5101_v62  ;;  %v331_v57 = vld [vmem:[%s11951_s5 + $0x308] sm:$0xff] }
  0x27   :  { %518 = vmatpush.msrb.mxu3 %v408_v60  ;;  %546 = vmatpush.msrb.mxu0 %v5111_v0  ;;  %v5226_v60 = vld [vmem:[%s11951_s5 + $0xa0] sm:$0xff] }
  0x28   :  { %566 = vmatpush.msrb.mxu1 %v361_v2  ;;  %584 = vmatpush.msrb.mxu2 %v5119_v3  ;;  %v5239_v2 = vld [vmem:[%s11951_s5 + $0x70] sm:$0xff] }
  0x29   :  { %519 = vmatpush.msrb.mxu3 %v402_v63  ;;  %3713 = vmatmul.msk.f32.gmra.mxu0 %vm62_vm0, %v38_v5  ;;  %v348_v63 = vld [vmem:[%s11951_s5 + $0x390] sm:$0xff] }
  0x2a   :  { %547 = vmatpush.msrb.mxu0 %v5133_v9  ;;  %567 = vmatpush.msrb.mxu1 %v355_v12  ;;  %v330_v12 = vld [vmem:[%s11951_s5 + $0x300] sm:$0xff] }
  0x2b   :  { %520 = vmatpush.msrb.mxu3 %v396_v6  ;;  %3721 = vmatmul.msk.f32.gmra.mxu1 %vm62_vm0, %v38_v5  ;;  %v336_v6 = vld [vmem:[%s11951_s5 + $0x330] sm:$0xff] }
  0x2c   :  { %548 = vmatpush.msrb.mxu0 %v5146_v15  ;;  %585 = vmatpush.msrb.mxu2 %v5156_v19 }
  0x2d   :  { %521 = vmatpush.msrb.mxu3 %v390_v11  ;;  %3728 = vmatmul.msk.f32.gmra.mxu2 %vm62_vm0, %v37_v54  ;;  %v360_v54 = vld [vmem:[%s11951_s5 + $0x3f0] sm:$0xff]  ;;  %v5253_v11 = vld [vmem:[%s11951_s5 + $0x40] sm:$0xff] }
  0x2e   :  { %549 = vmatpush.msrb.mxu0 %v5161_v21  ;;  %568 = vmatpush.msrb.mxu1 %v349_v23  ;;  %v422_v23 = vld [vmem:[%s11951_s5 + $0x5e0] sm:$0xff] }
  0x2f   :  { %522 = vmatpush.msrb.mxu3 %v384_v17  ;;  %586 = vmatpush.msrb.mxu2 %v5174_v26  ;;  %v5262_v17 = vld [vmem:[%s11951_s5 + $0x10] sm:$0xff] }
  0x30   :  { %550 = vmatpush.msrb.mxu0 %v5180_v27  ;;  %569 = vmatpush.msrb.mxu1 %v343_v29  ;;  %v416_v29 = vld [vmem:[%s11951_s5 + $0x5b0] sm:$0xff] }
  0x31   :  { %523 = vmatpush.msrb.mxu3 %v378_v25  ;;  %3714 = vmatmul.msk.f32.gmra.mxu0 %vm62_vm0, %v39_v35  ;;  %v41_v25 = vld [vmem:[%s11952_s0 + $0x38] sm:$0xff] }
  0x32   :  { %551 = vmatpush.msrb.mxu0 %v5196_v40  ;;  %570 = vmatpush.msrb.mxu1 %v337_v50  ;;  %v404_v50 = vld [vmem:[%s11951_s5 + $0x550] sm:$0xff] }
  0x33   :  { %524 = vmatpush.msrb.mxu3 %v372_v39  ;;  %3722 = vmatmul.msk.f32.gmra.mxu1 %vm62_vm0, %v39_v35  ;;  %v410_v39 = vld [vmem:[%s11951_s5 + $0x580] sm:$0xff] }
  0x34   :  { %587 = vmatpush.msrb.mxu2 %v5214_v55  ;;  %571 = vmatpush.msrb.mxu1 %v331_v57  ;;  %v398_v57 = vld [vmem:[%s11951_s5 + $0x520] sm:$0xff] }
  0x35   :  { %525 = vmatpush.msrb.mxu3 %v366_v46  ;;  %3729 = vmatmul.msk.f32.gmra.mxu2 %vm62_vm0, %v38_v5  ;;  %v342_v5 = vld [vmem:[%s11951_s5 + $0x360] sm:$0xff]  ;;  %v417_v46 = vld [vmem:[%s11951_s5 + $0x5b8] sm:$0xff] }
  0x36   :  { %588 = vmatpush.msrb.mxu2 %v5226_v60 }
  0x37   :  { %526 = vmatpush.msrb.mxu3 %v360_v54  ;;  %v411_v54 = vld [vmem:[%s11951_s5 + $0x588] sm:$0xff] }
  0x38   :  { %589 = vmatpush.msrb.mxu2 %v5239_v2 }
  0x39   :  { %527 = vmatpush.msrb.mxu3 %v354_v58  ;;  %3715 = vmatmul.msk.f32.gmra.mxu0 %vm62_vm0, %v40_v61  ;;  %v392_v58 = vld [vmem:[%s11951_s5 + $0x4f0] sm:$0xff] }
  0x3a   :  { %590 = vmatpush.msrb.mxu2 %v5253_v11 }
  0x3b   :  { %528 = vmatpush.msrb.mxu3 %v348_v63  ;;  %3723 = vmatmul.msk.f32.gmra.mxu1 %vm62_vm0, %v40_v61  ;;  %v386_v63 = vld [vmem:[%s11951_s5 + $0x4c0] sm:$0xff] }
  0x3c   :  { %591 = vmatpush.msrb.mxu2 %v5262_v17 }
  0x3d   :  { %529 = vmatpush.msrb.mxu3 %v342_v5  ;;  %3730 = vmatmul.msk.f32.gmra.mxu2 %vm62_vm0, %v39_v35  ;;  %v423_v35 = vld [vmem:[%s11951_s5 + $0x5e8] sm:$0xff] }
  0x3e   :  { %636 = vmatpush.msra.mxu1 %v423_v35  ;;  %v399_v5 = vld [vmem:[%s11951_s5 + $0x528] sm:$0xff]  ;;  %v356_v35 = vld [vmem:[%s11951_s5 + $0x3d0] sm:$0xff] }
  0x3f   :  { %530 = vmatpush.msrb.mxu3 %v336_v6  ;;  %v380_v6 = vld [vmem:[%s11951_s5 + $0x490] sm:$0xff] }
  0x40   :  { %637 = vmatpush.msra.mxu1 %v417_v46  ;;  %v344_v46 = vld [vmem:[%s11951_s5 + $0x370] sm:$0xff] }
  0x41   :  { %531 = vmatpush.msrb.mxu3 %v330_v12  ;;  %3716 = vmatmul.msk.f32.gmra.mxu0 %vm62_vm0, %v41_v25  ;;  %v393_v12 = vld [vmem:[%s11951_s5 + $0x4f8] sm:$0xff] }
  0x42   :  { %532 = vmatmul.f32.vlgmr.msrb.gmra.mxu3 %v11961_v8  ;;  %638 = vmatpush.msra.mxu1 %v411_v54  ;;  %v332_v54 = vld [vmem:[%s11951_s5 + $0x310] sm:$0xff] }
  0x43   :  { %596 = vmatpush.msra.mxu3 %v422_v23  ;;  %3724 = vmatmul.msk.f32.gmra.mxu1 %vm62_vm0, %v41_v25  ;;  %v374_v23 = vld [vmem:[%s11951_s5 + $0x460] sm:$0xff] }
  0x45   :  { %597 = vmatpush.msra.mxu3 %v416_v29  ;;  %3731 = vmatmul.msk.f32.gmra.mxu2 %vm62_vm0, %v40_v61  ;;  %v405_v61 = vld [vmem:[%s11951_s5 + $0x558] sm:$0xff]  ;;  %v368_v29 = vld [vmem:[%s11951_s5 + $0x430] sm:$0xff] }
  0x46   :  { %639 = vmatpush.msra.mxu1 %v405_v61  ;;  %v5358_v61 = vld [vmem:[%s11951_s5 + $0x468] sm:$0xff] }
  0x47   :  { %598 = vmatpush.msra.mxu3 %v410_v39  ;;  %v350_v39 = vld [vmem:[%s11951_s5 + $0x3a0] sm:$0xff]  ;;  %12577 = vst [vmem:[#allocation6_spill] sm:$0xff] %v5358_v61 }
  0x48   :  { %640 = vmatpush.msra.mxu1 %v399_v5  ;;  %v5371_v5 = vld [vmem:[%s11951_s5 + $0x408] sm:$0xff] }
  0x49   :  { %599 = vmatpush.msra.mxu3 %v404_v50  ;;  %552 = vmatmul.f32.vlgmr.msrb.gmra.mxu0 %v11961_v8  ;;  %v338_v50 = vld [vmem:[%s11951_s5 + $0x340] sm:$0xff]  ;;  %12579 = vst [vmem:[#allocation8_spill] sm:$0xff] %v5371_v5 }
  0x4a   :  { %641 = vmatpush.msra.mxu1 %v393_v12  ;;  %v351_v12 = vld [vmem:[%s11951_s5 + $0x3a8] sm:$0xff] }
  0x4b   :  { %600 = vmatpush.msra.mxu3 %v398_v57  ;;  %572 = vmatmul.f32.vlgmr.msrb.gmra.mxu1 %v11961_v8  ;;  %v5347_v57 = vld [vmem:[%s11951_s5 + $0x4c8] sm:$0xff] }
  0x4c   :  { %12575 = vst [vmem:[#allocation4_spill] sm:$0xff] %v5347_v57  ;;  %642 = vmatpush.msra.mxu1 %v5347_v57  ;;  %v5507_v57 = vld [vmem:[%s11951_s5 + $0x138] sm:$0xff] }
  0x4d   :  { %601 = vmatpush.msra.mxu3 %v392_v58  ;;  %3732 = vmatmul.msk.f32.gmra.mxu2 %vm62_vm0, %v41_v25  ;;  %v362_v25 = vld [vmem:[%s11951_s5 + $0x400] sm:$0xff]  ;;  %v5353_v58 = vld [vmem:[%s11951_s5 + $0x498] sm:$0xff]  ;;  %12586 = vst [vmem:[#allocation15_spill] sm:$0xff] %v5507_v57 }
  0x4e   :  { %12576 = vst [vmem:[#allocation5_spill] sm:$0xff] %v5353_v58  ;;  %643 = vmatpush.msra.mxu1 %v5353_v58  ;;  %v377_v58 = vld [vmem:[%s11951_s5 + $0x478] sm:$0xff] }
  0x4f   :  { %602 = vmatpush.msra.mxu3 %v386_v63  ;;  %v5364_v63 = vld [vmem:[%s11951_s5 + $0x438] sm:$0xff] }
  0x50   :  { %12578 = vst [vmem:[#allocation7_spill] sm:$0xff] %v5364_v63  ;;  %644 = vmatpush.msra.mxu1 %v5358_v61  ;;  %v5484_v61 = vld [vmem:[%s11951_s5 + $0x198] sm:$0xff] }
  0x51   :  { %603 = vmatpush.msra.mxu3 %v380_v6  ;;  %v5377_v6 = vld [vmem:[%s11951_s5 + $0x3d8] sm:$0xff]  ;;  %12584 = vst [vmem:[#allocation13_spill] sm:$0xff] %v5484_v61 }
  0x52   :  { %645 = vmatpush.msra.mxu1 %v5364_v63  ;;  %12580 = vst [vmem:[#allocation9_spill] sm:$0xff] %v5377_v6 }
  0x53   :  { %604 = vmatpush.msra.mxu3 %v374_v23  ;;  %v345_v23 = vld [vmem:[%s11951_s5 + $0x378] sm:$0xff] }
  0x54   :  { %646 = vmatpush.msra.mxu1 %v5371_v5  ;;  %v388_v5 = vld [vmem:[%s11951_s5 + $0x4d0] sm:$0xff] }
  0x55   :  { %605 = vmatpush.msra.mxu3 %v368_v29  ;;  %592 = vmatmul.f32.vlgmr.msrb.gmra.mxu2 %v11961_v8  ;;  %v339_v29 = vld [vmem:[%s11951_s5 + $0x348] sm:$0xff] }
  0x56   :  { %647 = vmatpush.msra.mxu1 %v5377_v6  ;;  %v407_v6 = vld [vmem:[%s11951_s5 + $0x568] sm:$0xff] }
  0x57   :  { %606 = vmatpush.msra.mxu3 %v362_v25  ;;  %v333_v25 = vld [vmem:[%s11951_s5 + $0x318] sm:$0xff] }
  0x58   :  { %648 = vmatpush.msra.mxu1 %v351_v12  ;;  %v419_v12 = vld [vmem:[%s11951_s5 + $0x5c8] sm:$0xff] }
  0x59   :  { %607 = vmatpush.msra.mxu3 %v356_v35  ;;  %v5395_v35 = vld [vmem:[%s11951_s5 + $0x2e8] sm:$0xff] }
  0x5a   :  { %649 = vmatpush.msra.mxu1 %v345_v23  ;;  %616 = vmatpush.msra.mxu0 %v5395_v35  ;;  %v5418_v23 = vld [vmem:[%s11951_s5 + $0x288] sm:$0xff] }
  0x5b   :  { %608 = vmatpush.msra.mxu3 %v350_v39  ;;  %v424_v39 = vld [vmem:[%s11951_s5 + $0x5f0] sm:$0xff] }
  0x5c   :  { %650 = vmatpush.msra.mxu1 %v339_v29  ;;  %v412_v29 = vld [vmem:[%s11951_s5 + $0x590] sm:$0xff] }
  0x5d   :  { %609 = vmatpush.msra.mxu3 %v344_v46  ;;  %v425_v46 = vld [vmem:[%s11951_s5 + $0x5f8] sm:$0xff] }
  0x5e   :  { %651 = vmatpush.msra.mxu1 %v333_v25  ;;  %v413_v25 = vld [vmem:[%s11951_s5 + $0x598] sm:$0xff] }
  0x5f   :  { %610 = vmatpush.msra.mxu3 %v338_v50  ;;  %v5407_v50 = vld [vmem:[%s11951_s5 + $0x2b8] sm:$0xff]  ;;  %652 = vmatmul.f32.vlgmr.msra.gmra.mxu1 %v11961_v8 }
  0x60   :  { %716 = vmatpush.msrb.mxu1 %v425_v46  ;;  %617 = vmatpush.msra.mxu0 %v5407_v50  ;;  %v406_v46 = vld [vmem:[%s11951_s5 + $0x560] sm:$0xff] }
  0x61   :  { %611 = vmatpush.msra.mxu3 %v332_v54  ;;  %v418_v54 = vld [vmem:[%s11951_s5 + $0x5c0] sm:$0xff] }
  0x62   :  { %612 = vmatmul.f32.vlgmr.msra.gmra.mxu3 %v11961_v8  ;;  %717 = vmatpush.msrb.mxu1 %v419_v12  ;;  %v400_v12 = vld [vmem:[%s11951_s5 + $0x530] sm:$0xff]  ;;  %v395_v8 = vld [vmem:[%s11951_s5 + $0x508] sm:$0xff] }
  0x63   :  { %676 = vmatpush.msrb.mxu3 %v424_v39  ;;  %618 = vmatpush.msra.mxu0 %v5418_v23  ;;  %v5432_v39 = vld [vmem:[%s11951_s5 + $0x258] sm:$0xff] }
  0x64   :  { %718 = vmatpush.msrb.mxu1 %v413_v25  ;;  %v5455_v25 = vld [vmem:[%s11951_s5 + $0x1f8] sm:$0xff] }
  0x65   :  { %677 = vmatpush.msrb.mxu3 %v418_v54  ;;  %619 = vmatpush.msra.mxu0 %v5432_v39  ;;  %v5444_v54 = vld [vmem:[%s11951_s5 + $0x228] sm:$0xff]  ;;  %12582 = vst [vmem:[#allocation11_spill] sm:$0xff] %v5455_v25 }
  0x66   :  { %12581 = vst [vmem:[#allocation10_spill] sm:$0xff] %v5444_v54  ;;  %719 = vmatpush.msrb.mxu1 %v407_v6  ;;  %v5467_v6 = vld [vmem:[%s11951_s5 + $0x1c8] sm:$0xff] }
  0x67   :  { %678 = vmatpush.msrb.mxu3 %v412_v29  ;;  %v401_v29 = vld [vmem:[%s11951_s5 + $0x538] sm:$0xff]  ;;  %620 = vmatpush.msra.mxu0 %v5444_v54  ;;  %12583 = vst [vmem:[#allocation12_spill] sm:$0xff] %v5467_v6  ;;  %v466_v54 = vld [vmem:[%s11953_s3 + $0x140] sm:$0xff] }
  0x68   :  { %720 = vmatpush.msrb.mxu1 %v401_v29 }
  0x69   :  { %679 = vmatpush.msrb.mxu3 %v406_v46  ;;  %v394_v46 = vld [vmem:[%s11951_s5 + $0x500] sm:$0xff]  ;;  %621 = vmatpush.msra.mxu0 %v5455_v25  ;;  %v5536_v25 = vld [vmem:[%s11951_s5 + $0xd8] sm:$0xff] }
  0x6a   :  { %721 = vmatpush.msrb.mxu1 %v395_v8  ;;  %v383_v8 = vld [vmem:[%s11951_s5 + $0x4a8] sm:$0xff]  ;;  %12590 = vst [vmem:[#allocation19_spill] sm:$0xff] %v5536_v25 }
  0x6b   :  { %680 = vmatpush.msrb.mxu3 %v400_v12  ;;  %v389_v12 = vld [vmem:[%s11951_s5 + $0x4d8] sm:$0xff]  ;;  %622 = vmatpush.msra.mxu0 %v5467_v6  ;;  %v364_v6 = vld [vmem:[%s11951_s5 + $0x410] sm:$0xff] }
  0x6c   :  { %722 = vmatpush.msrb.mxu1 %v389_v12  ;;  %v376_v12 = vld [vmem:[%s11951_s5 + $0x470] sm:$0xff] }
  0x6d   :  { %681 = vmatpush.msrb.mxu3 %v394_v46  ;;  %v382_v46 = vld [vmem:[%s11951_s5 + $0x4a0] sm:$0xff]  ;;  %623 = vmatpush.msra.mxu0 %v5484_v61  ;;  %v371_v61 = vld [vmem:[%s11951_s5 + $0x448] sm:$0xff] }
  0x6e   :  { %723 = vmatpush.msrb.mxu1 %v383_v8  ;;  %v5519_v8 = vld [vmem:[%s11951_s5 + $0x108] sm:$0xff] }
  0x6f   :  { %682 = vmatpush.msrb.mxu3 %v388_v5  ;;  %v5496_v5 = vld [vmem:[%s11951_s5 + $0x168] sm:$0xff]  ;;  %12587 = vst [vmem:[#allocation16_spill] sm:$0xff] %v5519_v8 }
  0x70   :  { %12585 = vst [vmem:[#allocation14_spill] sm:$0xff] %v5496_v5  ;;  %624 = vmatpush.msra.mxu0 %v5496_v5  ;;  %724 = vmatpush.msrb.mxu1 %v377_v58 }
  0x71   :  { %683 = vmatpush.msrb.mxu3 %v382_v46  ;;  %v370_v46 = vld [vmem:[%s11951_s5 + $0x440] sm:$0xff] }
  0x72   :  { %625 = vmatpush.msra.mxu0 %v5507_v57  ;;  %725 = vmatpush.msrb.mxu1 %v371_v61  ;;  %v359_v61 = vld [vmem:[%s11951_s5 + $0x3e8] sm:$0xff] }
  0x73   :  { %684 = vmatpush.msrb.mxu3 %v376_v12  ;;  %v365_v12 = vld [vmem:[%s11951_s5 + $0x418] sm:$0xff] }
  0x74   :  { %626 = vmatpush.msra.mxu0 %v5519_v8  ;;  %726 = vmatpush.msrb.mxu1 %v365_v12  ;;  %v352_v12 = vld [vmem:[%s11951_s5 + $0x3b0] sm:$0xff] }
  0x75   :  { %685 = vmatpush.msrb.mxu3 %v370_v46  ;;  %v358_v46 = vld [vmem:[%s11951_s5 + $0x3e0] sm:$0xff]  ;;  %v340_v8 = vld [vmem:[%s11951_s5 + $0x350] sm:$0xff] }
  0x76   :  { %627 = vmatpush.msra.mxu0 %v5536_v25  ;;  %727 = vmatpush.msrb.mxu1 %v359_v61  ;;  %v347_v25 = vld [vmem:[%s11951_s5 + $0x388] sm:$0xff] }
  0x77   :  { %686 = vmatpush.msrb.mxu3 %v364_v6  ;;  %v5548_v6 = vld [vmem:[%s11951_s5 + $0xa8] sm:$0xff] }
  0x78   :  { %12591 = vst [vmem:[#allocation20_spill] sm:$0xff] %v5548_v6  ;;  %628 = vmatpush.msra.mxu0 %v5548_v6  ;;  %v5571_v61 = vld [vmem:[%s11951_s5 + $0x48] sm:$0xff] }
  0x79   :  { %687 = vmatpush.msrb.mxu3 %v358_v46  ;;  %v346_v46 = vld [vmem:[%s11951_s5 + $0x380] sm:$0xff]  ;;  %12593 = vst [vmem:[#allocation22_spill] sm:$0xff] %v5571_v61 }
  0x7b   :  { %688 = vmatpush.msrb.mxu3 %v352_v12  ;;  %v341_v12 = vld [vmem:[%s11951_s5 + $0x358] sm:$0xff] }
  0x7d   :  { %689 = vmatpush.msrb.mxu3 %v346_v46  ;;  %v334_v46 = vld [vmem:[%s11951_s5 + $0x320] sm:$0xff] }
  0x7f   :  { %690 = vmatpush.msrb.mxu3 %v340_v8  ;;  %v5602_v8 = vld [vmem:[%s11951_s5 + $0x2f0] sm:$0xff] }
  0x80   :  { %656 = vmatpush.msra.mxu2 %v5602_v8 }
  0x81   :  { %691 = vmatpush.msrb.mxu3 %v334_v46  ;;  %v5616_v46 = vld [vmem:[%s11951_s5 + $0x2c0] sm:$0xff] }
  0x82   :  { %657 = vmatpush.msra.mxu2 %v5616_v46 }
  0x86   :  { %v5476_v63 = vpop.f32.mrf.mxu0 }
  0x88   :  { %v5479_v29 = vpop.f32.mrf.mxu1 }
  0x8e   :  { %v5528_v5 = vpop.f32.mrf.mxu0 }
  0x8f   :  { %12588 = vst [vmem:[#allocation17_spill] sm:$0xff] %v5528_v5  ;;  %v353_v5 = vld [vmem:[%s11951_s5 + $0x3b8] sm:$0xff] }
  0x90   :  { %v5531_v58 = vpop.f32.mrf.mxu1  ;;  %728 = vmatpush.msrb.mxu1 %v353_v5 }
  0x91   :  { %12589 = vst [vmem:[#allocation18_spill] sm:$0xff] %v5531_v58  ;;  %v5559_v58 = vld [vmem:[%s11951_s5 + $0x78] sm:$0xff] }
  0x92   :  { %12592 = vst [vmem:[#allocation21_spill] sm:$0xff] %v5559_v58  ;;  %629 = vmatpush.msra.mxu0 %v5559_v58  ;;  %729 = vmatpush.msrb.mxu1 %v347_v25  ;;  %v5590_v58 = vld [vmem:[%s11951_s5 + $0x18] sm:$0xff]  ;;  %v335_v25 = vld [vmem:[%s11951_s5 + $0x328] sm:$0xff] }
  0x93   :  { %12596 = vst [vmem:[#allocation25_spill] sm:$0xff] %v5590_v58 }
  0x94   :  { %630 = vmatpush.msra.mxu0 %v5571_v61  ;;  %730 = vmatpush.msrb.mxu1 %v341_v12  ;;  %v5607_v12 = vld [vmem:[%s11951_s5 + $0x2f8] sm:$0xff] }
  0x95   :  { %12597 = vst [vmem:[#allocation26_spill] sm:$0xff] %v5607_v12  ;;  %v5637_v61 = vld [vmem:[%s11951_s5 + $0x298] sm:$0xff] }
  0x96   :  { %v5580_v6 = vpop.f32.mrf.mxu0  ;;  %631 = vmatpush.msra.mxu0 %v5590_v58  ;;  %731 = vmatpush.msrb.mxu1 %v335_v25  ;;  %v469_v58 = vld [vmem:[%s11953_s3 + $0x158] sm:$0xff]  ;;  %v5630_v25 = vld [vmem:[%s11951_s5 + $0x290] sm:$0xff]  ;;  %12599 = vst [vmem:[#allocation28_spill] sm:$0xff] %v5637_v61 }
  0x97   :  { %12594 = vst [vmem:[#allocation23_spill] sm:$0xff] %v5580_v6  ;;  %v5585_v57 = vpop.f32.mrf.mxu2  ;;  %v5621_v6 = vld [vmem:[%s11951_s5 + $0x2c8] sm:$0xff]  ;;  %658 = vmatpush.msra.mxu2 %v5630_v25 }
  0x98   :  { %v5583_v5 = vpop.f32.mrf.mxu1  ;;  %12598 = vst [vmem:[#allocation27_spill] sm:$0xff] %v5621_v6  ;;  %696 = vmatpush.msrb.mxu0 %v5607_v12  ;;  %891 = vmatpush.msra.mxu1 %v4810_v1  ;;  %v5651_v1 = vld [vmem:[%s11951_s5 + $0x260] sm:$0xff]  ;;  %v5656_v12 = vld [vmem:[%s11951_s5 + $0x268] sm:$0xff] }
  0x99   :  { %12595 = vst [vmem:[#allocation24_spill] sm:$0xff] %v5583_v5  ;;  %v472_v5 = vld [vmem:[%s11953_s3 + $0x170] sm:$0xff]  ;;  %659 = vmatpush.msra.mxu2 %v5651_v1 }
  0x9a   :  { %805 = vmatpush.msra.mxu3 %v472_v5  ;;  %697 = vmatpush.msrb.mxu0 %v5621_v6  ;;  %12601 = vst [vmem:[#allocation30_spill] sm:$0xff] %v5656_v12  ;;  %v5919_v6 = vld [vmem:[%s11953_s3 + $0x148] sm:$0xff] }
  0x9b   :  { %892 = vmatpush.msra.mxu1 %v4822_v4  ;;  %v463_v4 = vld [vmem:[%s11953_s3 + $0x128] sm:$0xff]  ;;  %12632 = vst [vmem:[#allocation60_spill] sm:$0xff] %v5919_v6 }
  0x9c   :  { %806 = vmatpush.msra.mxu3 %v469_v58  ;;  %698 = vmatpush.msrb.mxu0 %v5637_v61  ;;  %v5676_v61 = vld [vmem:[%s11951_s5 + $0x238] sm:$0xff] }
  0x9d   :  { %893 = vmatpush.msra.mxu1 %v4833_v7  ;;  %12604 = vst [vmem:[#allocation33_spill] sm:$0xff] %v5676_v61  ;;  %v5686_v7 = vld [vmem:[%s11951_s5 + $0x200] sm:$0xff] }
  0x9e   :  { %v5645_v5 = vpop.f32.mrf.mxu0  ;;  %807 = vmatpush.msra.mxu3 %v466_v54  ;;  %699 = vmatpush.msrb.mxu0 %v5656_v12  ;;  %v5671_v54 = vld [vmem:[%s11951_s5 + $0x230] sm:$0xff]  ;;  %v5708_v12 = vld [vmem:[%s11951_s5 + $0x1d8] sm:$0xff] }
  0x9f   :  { %12600 = vst [vmem:[#allocation29_spill] sm:$0xff] %v5645_v5  ;;  %894 = vmatpush.msra.mxu1 %v4845_v10  ;;  %660 = vmatpush.msra.mxu2 %v5671_v54  ;;  %v5703_v10 = vld [vmem:[%s11951_s5 + $0x1d0] sm:$0xff] }
  0xa0   :  { %v5661_v58 = vpop.f32.mrf.mxu1  ;;  %v5663_v5 = vpop.f32.mrf.mxu2  ;;  %808 = vmatpush.msra.mxu3 %v463_v4  ;;  %v5691_v4 = vld [vmem:[%s11951_s5 + $0x208] sm:$0xff]  ;;  %700 = vmatpush.msrb.mxu0 %v5676_v61  ;;  %12606 = vst [vmem:[#allocation35_spill] sm:$0xff] %v5708_v12 }
  0xa1   :  { %12602 = vst [vmem:[#allocation31_spill] sm:$0xff] %v5661_v58  ;;  %v460_v58 = vld [vmem:[%s11953_s3 + $0x110] sm:$0xff]  ;;  %895 = vmatpush.msra.mxu1 %v4857_v13  ;;  %661 = vmatpush.msra.mxu2 %v5686_v7 }
  0xa2   :  { %12603 = vst [vmem:[#allocation32_spill] sm:$0xff] %v5663_v5  ;;  %v457_v5 = vld [vmem:[%s11953_s3 + $0xf8] sm:$0xff]  ;;  %809 = vmatpush.msra.mxu3 %v460_v58  ;;  %701 = vmatpush.msrb.mxu0 %v5691_v4  ;;  %v454_v58 = vld [vmem:[%s11953_s3 + $0xe0] sm:$0xff] }
  0xa3   :  { %12605 = vst [vmem:[#allocation34_spill] sm:$0xff] %v5691_v4  ;;  %896 = vmatpush.msra.mxu1 %v4872_v16  ;;  %662 = vmatpush.msra.mxu2 %v5703_v10  ;;  %v5726_v4 = vld [vmem:[%s11951_s5 + $0x1a8] sm:$0xff] }
  0xa4   :  { %810 = vmatpush.msra.mxu3 %v457_v5  ;;  %702 = vmatpush.msrb.mxu0 %v5708_v12  ;;  %v5721_v5 = vld [vmem:[%s11951_s5 + $0x1a0] sm:$0xff]  ;;  %12608 = vst [vmem:[#allocation37_spill] sm:$0xff] %v5726_v4  ;;  %v451_v16 = vld [vmem:[%s11953_s3 + $0xc8] sm:$0xff]  ;;  %v5746_v12 = vld [vmem:[%s11951_s5 + $0x178] sm:$0xff] }
  0xa5   :  { %897 = vmatpush.msra.mxu1 %v4890_v20  ;;  %663 = vmatpush.msra.mxu2 %v5721_v5  ;;  %12611 = vst [vmem:[#allocation40_spill] sm:$0xff] %v5746_v12  ;;  %v5757_v20 = vld [vmem:[%s11951_s5 + $0x140] sm:$0xff] }
  0xa6   :  { %v5715_v13 = vpop.f32.mrf.mxu0  ;;  %811 = vmatpush.msra.mxu3 %v454_v58  ;;  %703 = vmatpush.msrb.mxu0 %v5726_v4  ;;  %v5741_v58 = vld [vmem:[%s11951_s5 + $0x170] sm:$0xff] }
  0xa7   :  { %12607 = vst [vmem:[#allocation36_spill] sm:$0xff] %v5715_v13  ;;  %898 = vmatpush.msra.mxu1 %v4908_v24  ;;  %664 = vmatpush.msra.mxu2 %v5741_v58  ;;  %v5773_v24 = vld [vmem:[%s11951_s5 + $0x110] sm:$0xff] }
  0xa8   :  { %v5731_v61 = vpop.f32.mrf.mxu1  ;;  %v5733_v13 = vpop.f32.mrf.mxu2  ;;  %812 = vmatpush.msra.mxu3 %v451_v16  ;;  %704 = vmatpush.msrb.mxu0 %v5746_v12  ;;  %v5762_v16 = vld [vmem:[%s11951_s5 + $0x148] sm:$0xff]  ;;  %v442_v12 = vld [vmem:[%s11953_s3 + $0x80] sm:$0xff] }
  0xa9   :  { %12609 = vst [vmem:[#allocation38_spill] sm:$0xff] %v5731_v61  ;;  %v448_v61 = vld [vmem:[%s11953_s3 + $0xb0] sm:$0xff]  ;;  %899 = vmatpush.msra.mxu1 %v4924_v28  ;;  %665 = vmatpush.msra.mxu2 %v5757_v20 }
  0xaa   :  { %12610 = vst [vmem:[#allocation39_spill] sm:$0xff] %v5733_v13  ;;  %813 = vmatpush.msra.mxu3 %v448_v61  ;;  %v445_v13 = vld [vmem:[%s11953_s3 + $0x98] sm:$0xff]  ;;  %705 = vmatpush.msrb.mxu0 %v5762_v16 }
  0xab   :  { %12612 = vst [vmem:[#allocation41_spill] sm:$0xff] %v5762_v16  ;;  %v5778_v61 = vld [vmem:[%s11951_s5 + $0x118] sm:$0xff]  ;;  %900 = vmatpush.msra.mxu1 %v4940_v31  ;;  %666 = vmatpush.msra.mxu2 %v5773_v24  ;;  %v5796_v16 = vld [vmem:[%s11951_s5 + $0xe8] sm:$0xff] }
  0xac   :  { %814 = vmatpush.msra.mxu3 %v445_v13  ;;  %12613 = vst [vmem:[#allocation42_spill] sm:$0xff] %v5778_v61  ;;  %706 = vmatpush.msrb.mxu0 %v5778_v61  ;;  %v5791_v13 = vld [vmem:[%s11951_s5 + $0xe0] sm:$0xff]  ;;  %v439_v31 = vld [vmem:[%s11953_s3 + $0x68] sm:$0xff]  ;;  %v5816_v61 = vld [vmem:[%s11951_s5 + $0xb8] sm:$0xff] }
  0xad   :  { %12615 = vst [vmem:[#allocation44_spill] sm:$0xff] %v5796_v16  ;;  %901 = vmatpush.msra.mxu1 %v4957_v34  ;;  %667 = vmatpush.msra.mxu2 %v5791_v13  ;;  %v5827_v34 = vld [vmem:[%s11951_s5 + $0x80] sm:$0xff] }
  0xae   :  { %v5785_v28 = vpop.f32.mrf.mxu0  ;;  %815 = vmatpush.msra.mxu3 %v442_v12  ;;  %707 = vmatpush.msrb.mxu0 %v5796_v16  ;;  %v5811_v12 = vld [vmem:[%s11951_s5 + $0xb0] sm:$0xff]  ;;  %12618 = vst [vmem:[#allocation47_spill] sm:$0xff] %v5816_v61 }
  0xaf   :  { %12614 = vst [vmem:[#allocation43_spill] sm:$0xff] %v5785_v28  ;;  %902 = vmatpush.msra.mxu1 %v4978_v38  ;;  %668 = vmatpush.msra.mxu2 %v5811_v12  ;;  %v5843_v38 = vld [vmem:[%s11951_s5 + $0x50] sm:$0xff] }
  0xb0   :  { %v5801_v4 = vpop.f32.mrf.mxu1  ;;  %v5803_v28 = vpop.f32.mrf.mxu2  ;;  %816 = vmatpush.msra.mxu3 %v439_v31  ;;  %708 = vmatpush.msrb.mxu0 %v5816_v61  ;;  %v5832_v31 = vld [vmem:[%s11951_s5 + $0x88] sm:$0xff]  ;;  %v430_v61 = vld [vmem:[%s11953_s3 + $0x20] sm:$0xff] }
  0xb1   :  { %12616 = vst [vmem:[#allocation45_spill] sm:$0xff] %v5801_v4  ;;  %v436_v4 = vld [vmem:[%s11953_s3 + $0x50] sm:$0xff]  ;;  %903 = vmatpush.msra.mxu1 %v4997_v42  ;;  %669 = vmatpush.msra.mxu2 %v5827_v34 }
  0xb2   :  { %12617 = vst [vmem:[#allocation46_spill] sm:$0xff] %v5803_v28  ;;  %817 = vmatpush.msra.mxu3 %v436_v4  ;;  %v433_v28 = vld [vmem:[%s11953_s3 + $0x38] sm:$0xff]  ;;  %709 = vmatpush.msrb.mxu0 %v5832_v31 }
  0xb3   :  { %12619 = vst [vmem:[#allocation48_spill] sm:$0xff] %v5832_v31  ;;  %v5848_v4 = vld [vmem:[%s11951_s5 + $0x58] sm:$0xff]  ;;  %904 = vmatpush.msra.mxu1 %v5016_v45  ;;  %670 = vmatpush.msra.mxu2 %v5843_v38  ;;  %v5866_v31 = vld [vmem:[%s11951_s5 + $0x28] sm:$0xff] }
  0xb4   :  { %818 = vmatpush.msra.mxu3 %v433_v28  ;;  %12620 = vst [vmem:[#allocation49_spill] sm:$0xff] %v5848_v4  ;;  %710 = vmatpush.msrb.mxu0 %v5848_v4  ;;  %v5861_v28 = vld [vmem:[%s11951_s5 + $0x20] sm:$0xff]  ;;  %v427_v45 = vld [vmem:[%s11953_s3 + $0x8] sm:$0xff]  ;;  %v5886_v4 = vld [vmem:[%s11953_s3 + $0x178] sm:$0xff] }
  0xb5   :  { %12622 = vst [vmem:[#allocation51_spill] sm:$0xff] %v5861_v28  ;;  %905 = vmatpush.msra.mxu1 %v5032_v48  ;;  %671 = vmatpush.msra.mxu2 %v5861_v28  ;;  %v5895_v48 = vld [vmem:[%s11953_s3 + $0x150] sm:$0xff] }
  0xb6   :  { %v5855_v42 = vpop.f32.mrf.mxu0  ;;  %819 = vmatpush.msra.mxu3 %v430_v61  ;;  %12623 = vst [vmem:[#allocation52_spill] sm:$0xff] %v5866_v31  ;;  %711 = vmatpush.msrb.mxu0 %v5866_v31  ;;  %v5881_v61 = vld [vmem:[%s11953_s3 + $0x168] sm:$0xff]  ;;  %v5914_v31 = vld [vmem:[%s11953_s3 + $0x138] sm:$0xff] }
  0xb7   :  { %12621 = vst [vmem:[#allocation50_spill] sm:$0xff] %v5855_v42  ;;  %906 = vmatpush.msra.mxu1 %v5054_v52  ;;  %v5905_v52 = vld [vmem:[%s11954_s6] sm:$0x3f]  ;;  %785 = vmatpush.msrb.mxu2 %v5881_v61 }
  0xb8   :  { %v5871_v16 = vpop.f32.mrf.mxu1  ;;  %v5873_v42 = vpop.f32.mrf.mxu2  ;;  %820 = vmatpush.msra.mxu3 %v427_v45  ;;  %12626 = vst [vmem:[#allocation55_spill] sm:$0xff] %v5881_v61  ;;  %v5900_v45 = vld [vmem:[%s11953_s3 + $0x160] sm:$0xff] }
  0xb9   :  { %12624 = vst [vmem:[#allocation53_spill] sm:$0xff] %v5871_v16  ;;  %v513_v16 = vpop.f32.mrf.mxu3  ;;  %v5924_v61 = vld [vmem:[%s11955_s2] sm:$0x7]  ;;  %786 = vmatpush.msrb.mxu2 %v5895_v48 }
  0xba   :  { %12625 = vst [vmem:[#allocation54_spill] sm:$0xff] %v5873_v42  ;;  %v12628_v42 = vmov 0.0  }
  0xbb   :  { %12627 = vst [vmem:[#allocation56_spill] sm:$0xff] %v5886_v4  ;;  %632 = vmatmul.f32.vlgmr.msra.gmra.mxu0 %v12628_v42  ;;  %692 = vmatmul.f32.vlgmr.msrb.gmra.mxu3 %v12628_v42 }
  0xbc   :  { %732 = vmatmul.f32.vlgmr.msrb.gmra.mxu1 %v12628_v42  ;;  %12629 = vst [vmem:[#allocation57_spill] sm:$0xff] %v5895_v48  ;;  %825 = vmatpush.msra.mxu0 %v5886_v4  ;;  %v5938_v4 = vld [vmem:[%s11953_s3 + $0x120] sm:$0xff]  ;;  %v5943_v48 = vld [vmem:[%s11953_s3 + $0x130] sm:$0xff] }
  0xbd   :  { %12630 = vst [vmem:[#allocation58_spill] sm:$0xff] %v5900_v45  ;;  %931 = vmatpush.msrb.mxu3 %v4863_v14  ;;  %971 = vmatpush.msrb.mxu1 %v4947_v32  ;;  %v5929_v14 = vperm.slane %v5905_v52, 0 }
  0xbe   :  { %12631 = vst [vmem:[#allocation59_spill] sm:$0xff] %v5905_v52  ;;  %826 = vmatpush.msra.mxu0 %v5900_v45  ;;  %v5931_v32 = vpop.f32.mrf.mxu0  ;;  %787 = vmatpush.msrb.mxu2 %v5914_v31 }
  0xbf   :  { %12633 = vst [vmem:[#allocation61_spill] sm:$0xff] %v5929_v14  ;;  %932 = vmatpush.msrb.mxu3 %v4882_v18  ;;  %972 = vmatpush.msrb.mxu1 %v4968_v36  ;;  %v5952_v18 = vperm.slane %v5924_v61, 0  ;;  %v5959_v36 = vld [vmem:[%s11953_s3 + $0x108] sm:$0xff] }
  0xc0   :  { %12634 = vst [vmem:[#allocation62_spill] sm:$0xff] %v5931_v32  ;;  %v5945_v45 = vpop.f32.mrf.mxu1  ;;  %v5947_v28 = vpop.f32.mrf.mxu2  ;;  %827 = vmatpush.msra.mxu0 %v5919_v6  ;;  %788 = vmatpush.msrb.mxu2 %v5938_v4  ;;  %v514_v32 = vadd.f32 %v513_v16, %v5929_v14  ;;  %v5982_v6 = vperm.slane %v5905_v52, 1  ;;  %v5993_v16 = vld [vmem:[%s11953_s3 + $0xd8] sm:$0xff]  ;;  %v5998_v14 = vld [vmem:[%s11953_s3 + $0xe8] sm:$0xff] }
  0xc1   :  { %12635 = vst [vmem:[#allocation63_spill] sm:$0xff] %v5945_v45  ;;  %933 = vmatpush.msrb.mxu3 %v4900_v22  ;;  %973 = vmatpush.msrb.mxu1 %v4992_v41  ;;  %v5964_v45 = vld [vmem:[%s11953_s3 + $0x118] sm:$0xff]  ;;  %v5974_v22 = vld [vmem:[%s11953_s3 + $0xf0] sm:$0xff]  ;;  %v5979_v41 = vld [vmem:[%s11953_s3 + $0x100] sm:$0xff] }
  0xc2   :  { %12636 = vst [vmem:[#allocation64_spill] sm:$0xff] %v5947_v28  ;;  %828 = vmatpush.msra.mxu0 %v5943_v48  ;;  %789 = vmatpush.msrb.mxu2 %v5959_v36 }
  0xc3   :  { %12637 = vst [vmem:[#allocation65_spill] sm:$0xff] %v5952_v18  ;;  %934 = vmatpush.msrb.mxu3 %v4934_v30  ;;  %974 = vmatpush.msrb.mxu1 %v5005_v43  ;;  %v105_v30 = vadd.f32 %v5476_v63, %v5952_v18 }
  0xc4   :  { %12638 = vst [vmem:[#allocation66_spill] sm:$0xff] %v5964_v45  ;;  %829 = vmatpush.msra.mxu0 %v5964_v45  ;;  %v6001_v45 = vperm.slane %v5924_v61, 1  ;;  %790 = vmatpush.msrb.mxu2 %v5974_v22 }
  0xc5   :  { %v533_v28 = vpop.f32.mrf.mxu3  ;;  %12639 = vst [vmem:[#allocation67_spill] sm:$0xff] %v5982_v6  ;;  %935 = vmatpush.msrb.mxu3 %v4952_v33  ;;  %975 = vmatpush.msrb.mxu1 %v5027_v47  ;;  %v6010_v47 = vld [vmem:[%s11953_s3 + $0xc0] sm:$0xff] }
  0xc6   :  { %v534_v43 = vadd.f32 %v533_v28, %v514_v32  ;;  %12640 = vst [vmem:[#allocation68_spill] sm:$0xff] %v6001_v45  ;;  %830 = vmatpush.msra.mxu0 %v5979_v41  ;;  %v553_v63 = vpop.f32.mrf.mxu0  ;;  %v6015_v28 = vld [vmem:[%s11953_s3 + $0xd0] sm:$0xff]  ;;  %791 = vmatpush.msrb.mxu2 %v5993_v16 }
  0xc7   :  { %936 = vmatpush.msrb.mxu3 %v4973_v37  ;;  %976 = vmatpush.msrb.mxu1 %v5049_v51  ;;  %v554_v32 = vadd.f32 %v553_v63, %v5982_v6  ;;  %v6025_v51 = vld [vmem:[%s11953_s3 + $0xa8] sm:$0xff] }
  0xc8   :  { %v739_v33 = vadd.f32 %v534_v43, %v105_v30  ;;  %v573_v18 = vpop.f32.mrf.mxu1  ;;  %831 = vmatpush.msra.mxu0 %v5998_v14  ;;  %v6030_v30 = vld [vmem:[%s11953_s3 + $0xb8] sm:$0xff]  ;;  %v146_v43 = vadd.f32 %v5479_v29, %v6001_v45  ;;  %v6034_v6 = vpop.f32.mrf.mxu2  ;;  %792 = vmatpush.msrb.mxu2 %v6010_v47 }
  0xc9   :  { %937 = vmatpush.msrb.mxu3 %v5010_v44  ;;  %977 = vmatpush.msrb.mxu1 %v5074_v56  ;;  %v574_v63 = vadd.f32 %v573_v18, %v554_v32  ;;  %12641 = vst [vmem:[#allocation69_spill] sm:$0xff] %v6034_v6  ;;  %v6043_v44 = vld [vmem:[%s11953_s3 + $0x90] sm:$0xff]  ;;  %v6048_v56 = vld [vmem:[%s11953_s3 + $0xa0] sm:$0xff]  ;;  %v6094_v32 = vld [vmem:[%s11953_s3 + $0x58] sm:$0xff] }
  0xca   :  { %v3733_v37 = vmul.f32 -1.442695, %v739_v33  ;;  %832 = vmatpush.msra.mxu0 %v6015_v28  ;;  %793 = vmatpush.msrb.mxu2 %v6025_v51 }
  0xcb   :  { %938 = vmatpush.msrb.mxu3 %v5039_v49  ;;  %978 = vmatpush.msrb.mxu1 %v5101_v62  ;;  %v740_v29 = vadd.f32 %v574_v63, %v146_v43  ;;  %v6057_v49 = vld [vmem:[%s11953_s3 + $0x78] sm:$0xff]  ;;  %v6062_v62 = vld [vmem:[%s11953_s3 + $0x88] sm:$0xff] }
  0xcc   :  { %3767 = vpow2.f32 %v3733_v37  ;;  %833 = vmatpush.msra.mxu0 %v6030_v30  ;;  %794 = vmatpush.msrb.mxu2 %v6043_v44  ;;  %v6111_v37 = vld [vmem:[%s11953_s3 + $0x40] sm:$0xff] }
  0xcd   :  { %939 = vmatpush.msrb.mxu3 %v5060_v53  ;;  %979 = vmatpush.msrb.mxu1 %v5119_v3  ;;  %v3734_v18 = vmul.f32 -1.442695, %v740_v29  ;;  %v6071_v53 = vld [vmem:[%s11953_s3 + $0x60] sm:$0xff]  ;;  %v6076_v3 = vld [vmem:[%s11953_s3 + $0x70] sm:$0xff] }
  0xce   :  { %834 = vmatpush.msra.mxu0 %v6048_v56  ;;  %795 = vmatpush.msrb.mxu2 %v6057_v49 }
  0xcf   :  { %940 = vmatpush.msrb.mxu3 %v5088_v59  ;;  %980 = vmatpush.msrb.mxu1 %v5156_v19  ;;  %3769 = vpow2.f32 %v3734_v18  ;;  %v6089_v19 = vld [vmem:[%s11953_s3 + $0x48] sm:$0xff] }
  0xd0   :  { %835 = vmatpush.msra.mxu0 %v6062_v62  ;;  %796 = vmatpush.msrb.mxu2 %v6071_v53 }
  0xd1   :  { %941 = vmatpush.msrb.mxu3 %v5111_v0  ;;  %981 = vmatpush.msrb.mxu1 %v5174_v26  ;;  %v6099_v0 = vpop.f32.mrf.mxu2  ;;  %v6106_v26 = vld [vmem:[%s11953_s3 + $0x30] sm:$0xff] }
  0xd2   :  { %v3768_v33 = vpop.eup %3767  ;;  %836 = vmatpush.msra.mxu0 %v6076_v3  ;;  %12642 = vst [vmem:[#allocation70_spill] sm:$0xff] %v6099_v0  ;;  %672 = vmatmul.f32.vlgmr.msra.gmra.mxu2 %v12628_v42  ;;  %v6181_v0 = vld [vmem:[%s11951_s5 + $0x5a8] sm:$0xff] }
  0xd3   :  { %v6082_v59 = vadd.f32 1.0, %v3768_v33  ;;  %942 = vmatpush.msrb.mxu3 %v5133_v9  ;;  %982 = vmatpush.msrb.mxu1 %v5214_v55  ;;  %v6120_v55 = vld [vmem:[%s11953_s3 + $0x18] sm:$0xff]  ;;  %12647 = vst [vmem:[#allocation75_spill] sm:$0xff] %v6181_v0 }
  0xd4   :  { %712 = vmatmul.f32.vlgmr.msrb.gmra.mxu0 %v12628_v42  ;;  %797 = vmatpush.msrb.mxu2 %v6089_v19  ;;  %v6125_v42 = vld [vmem:[%s11953_s3 + $0x28] sm:$0xff] }
  0xd5   :  { %3771 = vrcp.f32 %v6082_v59  ;;  %837 = vmatpush.msra.mxu0 %v6094_v32  ;;  %v3770_v9 = vpop.eup %3769  ;;  %943 = vmatpush.msrb.mxu3 %v5146_v15  ;;  %12643 = vst [vmem:[#allocation71_spill] sm:$0xff] %v6125_v42  ;;  %v6136_v15 = vld [vmem:[%s11953_s3] sm:$0xff]  ;;  %vm750_vm2 = vweird.f32 %v6082_v59 }
  0xd6   :  { %983 = vmatpush.msrb.mxu1 %v5226_v60  ;;  %v6127_v43 = vadd.f32 1.0, %v3770_v9  ;;  %798 = vmatpush.msrb.mxu2 %v6106_v26  ;;  %v6141_v60 = vld [vmem:[%s11953_s3 + $0x10] sm:$0xff]  ;;  %v754_v9 = vand.u32 2147483647, %v6082_v59 }
  0xd7   :  { %838 = vmatpush.msra.mxu0 %v6111_v37  ;;  %944 = vmatpush.msrb.mxu3 %v5161_v21  ;;  %12644 = vst [vmem:[#allocation72_spill] sm:$0xff] %v6141_v60 }
  0xd8   :  { %984 = vmatpush.msrb.mxu1 %v5239_v2  ;;  %3773 = vrcp.f32 %v6127_v43  ;;  %799 = vmatpush.msrb.mxu2 %v6120_v55  ;;  %v6154_v2 = vperm.slane %v5905_v52, 2  ;;  %v6191_v52 = vld [vmem:[%s11951_s5 + $0x570] sm:$0xff]  ;;  %vm755_vm4 = vcmp.eq.f32.partialorder %v754_v9, 8.507059e+37  ;;  %vm769_vm6 = vweird.f32 %v6127_v43 }
  0xd9   :  { %839 = vmatpush.msra.mxu0 %v6125_v42  ;;  %945 = vmatpush.msrb.mxu3 %v5180_v27  ;;  %v6159_v27 = vld [vmem:[%s11951_s5 + $0x5d0] sm:$0xff] }
  0xda   :  { %985 = vmatpush.msrb.mxu1 %v5253_v11  ;;  %800 = vmatpush.msrb.mxu2 %v6136_v15  ;;  %12645 = vst [vmem:[#allocation73_spill] sm:$0xff] %v6154_v2  ;;  %v6165_v11 = vld [vmem:[%s11951_s5 + $0x5d8] sm:$0xff] }
  0xdb   :  { %v3772_v63 = vpop.eup %3771  ;;  %840 = vmatpush.msra.mxu0 %v6141_v60  ;;  %946 = vmatpush.msrb.mxu3 %v5196_v40  ;;  %12646 = vst [vmem:[#allocation74_spill] sm:$0xff] %v6165_v11  ;;  %v593_v40 = vpop.f32.mrf.mxu2 }
  0xdc   :  { %v746_v21 = vmul.f32 %v3772_v63, %v6082_v59  ;;  %986 = vmatpush.msrb.mxu1 %v5262_v17  ;;  %911 = vmatpush.msra.mxu2 %v6159_v27  ;;  %v756_v17 = vand.u32 2147483648, %v6082_v59  ;;  %vm751_vm1 = vweird.f32 %v3772_v63  ;;  %v594_v6 = vadd.f32 %v593_v40, %v6154_v2  ;;  %v6212_v2 = vld [vmem:[%s11951_s5 + $0x548] sm:$0xff] }
  0xdd   :  { %951 = vmatpush.msrb.mxu0 %v6165_v11  ;;  %v6197_v11 = vld [vmem:[%s11951_s5 + $0x578] sm:$0xff]  ;;  %vm752_vm3 = vmor %vm750_vm2, %vm751_vm1  ;;  %v6201_v40 = vperm.slane %v5924_v61, 2  ;;  %12650 = vst [vmem:[#allocation78_spill] sm:$0xff] %v6212_v2 }
  0xde   :  { %v747_v29 = vsub.f32 1.0, %v746_v21  ;;  %v6169_v18 = vpop.eup %3773  ;;  %v6175_v21 = vld [vmem:[%s11951_s5 + $0x5a0] sm:$0xff]  ;;  %12648 = vst [vmem:[#allocation76_spill] sm:$0xff] %v6197_v11 }
  0xdf   :  { %912 = vmatpush.msra.mxu2 %v6175_v21  ;;  %952 = vmatpush.msrb.mxu0 %v6181_v0  ;;  %v757_v0 = vor.u32 1.1754944e-38, %v756_v17  ;;  %12649 = vst [vmem:[#allocation77_spill] sm:$0xff] %v6201_v40  ;;  %v187_v9 = vadd.f32 %v5585_v57, %v6201_v40  ;;  %v6245_v57 = vld [vmem:[%s11951_s5 + $0x4b0] sm:$0xff]  ;;  %vm770_vm5 = vweird.f32 %v6169_v18  ;;  %v6278_v40 = vld [vmem:[%s11951_s5 + $0x458] sm:$0xff] }
  0xe0   :  { %v748_v33 = vmul.f32 %v3772_v63, %v747_v29  ;;  %v765_v29 = vmul.f32 %v6169_v18, %v6127_v43  ;;  %12655 = vst [vmem:[#allocation83_spill] sm:$0xff] %v6278_v40  ;;  %vm771_vm7 = vmor %vm769_vm6, %vm770_vm5 }
  0xe1   :  { %913 = vmatpush.msra.mxu2 %v6191_v52  ;;  %953 = vmatpush.msrb.mxu0 %v6197_v11 }
  0xe2   :  { %v749_v45 = vadd.f32 %v3772_v63, %v748_v33  ;;  %v6206_v33 = vld [vmem:[%s11951_s5 + $0x540] sm:$0xff]  ;;  %v766_v17 = vsub.f32 1.0, %v765_v29 }
  0xe3   :  { %914 = vmatpush.msra.mxu2 %v6206_v33  ;;  %954 = vmatpush.msrb.mxu0 %v6212_v2  ;;  %v6305_v2 = vld [vmem:[%s11951_s5 + $0x3f8] sm:$0xff] }
  0xe4   :  { %v753_v59 = vsel %vm752_vm3, %v3772_v63, %v749_v45  ;;  %v6218_v45 = vld [vmem:[%s11951_s5 + $0x510] sm:$0xff]  ;;  %v6224_v63 = vld [vmem:[%s11951_s5 + $0x518] sm:$0xff] }
  0xe5   :  { %v613_v11 = vpop.f32.mrf.mxu3  ;;  %v758_v61 = vsel %vm755_vm4, %v757_v0, %v753_v59  ;;  %915 = vmatpush.msra.mxu2 %v6218_v45  ;;  %12651 = vst [vmem:[#allocation79_spill] sm:$0xff] %v6224_v63  ;;  %955 = vmatpush.msrb.mxu0 %v6224_v63  ;;  %v6238_v0 = vld [vmem:[%s11951_s5 + $0x4e8] sm:$0xff] }
  0xe6   :  { %v614_v60 = vadd.f32 %v613_v11, %v594_v6  ;;  %v6232_v6 = vld [vmem:[%s11951_s5 + $0x4e0] sm:$0xff]  ;;  %12652 = vst [vmem:[#allocation80_spill] sm:$0xff] %v6238_v0  ;;  %v767_v11 = vmul.f32 %v6169_v18, %v766_v17 }
  0xe7   :  { %916 = vmatpush.msra.mxu2 %v6232_v6  ;;  %956 = vmatpush.msrb.mxu0 %v6238_v0  ;;  %v6257_v17 = vld [vmem:[%s11951_s5 + $0x480] sm:$0xff] }
  0xe8   :  { %v779_v29 = vmul.f32 %v758_v61, %v614_v60  ;;  %v6251_v60 = vld [vmem:[%s11951_s5 + $0x4b8] sm:$0xff]  ;;  %v6263_v61 = vld [vmem:[%s11951_s5 + $0x488] sm:$0xff] }
  0xe9   :  { %917 = vmatpush.msra.mxu2 %v6245_v57  ;;  %12653 = vst [vmem:[#allocation81_spill] sm:$0xff] %v6251_v60  ;;  %957 = vmatpush.msrb.mxu0 %v6251_v60  ;;  %v6292_v60 = vld [vmem:[%s11951_s5 + $0x428] sm:$0xff] }
  0xea   :  { %v780_v59 = vadd.f32 %v779_v29, %v187_v9  ;;  %12654 = vst [vmem:[#allocation82_spill] sm:$0xff] %v6263_v61  ;;  %v768_v9 = vadd.f32 %v6169_v18, %v767_v11  ;;  %v775_v29 = vand.u32 2147483648, %v6127_v43  ;;  %v773_v11 = vand.u32 2147483647, %v6127_v43  ;;  %v6299_v43 = vld [vmem:[%s11951_s5 + $0x3f0] sm:$0xff] }
  0xeb   :  { %918 = vmatpush.msra.mxu2 %v6257_v17  ;;  %958 = vmatpush.msrb.mxu0 %v6263_v61  ;;  %v6286_v61 = vld [vmem:[%s11951_s5 + $0x420] sm:$0xff]  ;;  %12656 = vst [vmem:[#allocation84_spill] sm:$0xff] %v6292_v60 }
  0xec   :  { %3775 = vtanh.f32 %v780_v59  ;;  %v6272_v59 = vld [vmem:[%s11951_s5 + $0x450] sm:$0xff]  ;;  %v776_v63 = vor.u32 1.1754944e-38, %v775_v29  ;;  %vm774_vm8 = vcmp.eq.f32.partialorder %v773_v11, 8.507059e+37 }
  0xed   :  { %919 = vmatpush.msra.mxu2 %v6272_v59  ;;  %959 = vmatpush.msrb.mxu0 %v6278_v40  ;;  %v772_v40 = vsel %vm771_vm7, %v6169_v18, %v768_v9  ;;  %v6311_v18 = vld [vmem:[%s11951_s5 + $0x3c0] sm:$0xff]  ;;  %v6317_v9 = vld [vmem:[%s11951_s5 + $0x3c8] sm:$0xff]  ;;  %v6323_v11 = vld [vmem:[%s11951_s5 + $0x390] sm:$0xff] }
  0xee   :  { %v777_v42 = vsel %vm774_vm8, %v776_v63, %v772_v40  ;;  %v6329_v40 = vld [vmem:[%s11951_s5 + $0x398] sm:$0xff] }
  0xef   :  { %920 = vmatpush.msra.mxu2 %v6286_v61  ;;  %960 = vmatpush.msrb.mxu0 %v6292_v60 }
  0xf1   :  { %921 = vmatpush.msra.mxu2 %v6299_v43  ;;  %961 = vmatpush.msrb.mxu0 %v6305_v2 }
  0xf2   :  { %v3776_v0 = vpop.eup %3775 }
  0xf3   :  { %v782_v60 = vsub.f32 0.0, %v3776_v0  ;;  %922 = vmatpush.msra.mxu2 %v6311_v18  ;;  %962 = vmatpush.msrb.mxu0 %v6317_v9 }
  0xf5   :  { %v783_v29 = vmul.f32 %v782_v60, %v777_v42  ;;  %923 = vmatpush.msra.mxu2 %v6323_v11  ;;  %963 = vmatpush.msrb.mxu0 %v6329_v40  ;;  %v6337_v42 = vld [vmem:[%s11951_s5 + $0x360] sm:$0xff]  ;;  %v6343_v60 = vld [vmem:[%s11951_s5 + $0x368] sm:$0xff] }
  0xf7   :  { %v6332_v63 = vadd.f32 %v3776_v0, %v783_v29  ;;  %924 = vmatpush.msra.mxu2 %v6337_v42  ;;  %964 = vmatpush.msrb.mxu0 %v6343_v60  ;;  %v6355_v0 = vld [vmem:[%s11951_s5 + $0x330] sm:$0xff]  ;;  %v6361_v29 = vld [vmem:[%s11951_s5 + $0x338] sm:$0xff] }
  0xf9   :  { %801 = vmatmul.f32.vlgmr.msrb.gmra.mxu2 %v6332_v63  ;;  %821 = vmatmul.f32.vlgmr.msra.gmra.mxu3 %v6332_v63 }
  0xfa   :  { %841 = vmatmul.f32.vlgmr.msra.gmra.mxu0 %v6332_v63  ;;  %907 = vmatmul.f32.vlgmr.msra.gmra.mxu1 %v6332_v63 }
  0xfb   :  { %1011 = vmatpush.msra.mxu3 %v5395_v35  ;;  %1051 = vmatpush.msra.mxu1 %v5602_v8  ;;  %v6369_v35 = vld [vmem:[%s11951_s5 + $0x300] sm:$0xff]  ;;  %v6375_v8 = vld [vmem:[%s11951_s5 + $0x308] sm:$0xff] }
  0xfc   :  { %925 = vmatpush.msra.mxu2 %v6355_v0  ;;  %965 = vmatpush.msrb.mxu0 %v6361_v29 }
  0xfd   :  { %1012 = vmatpush.msra.mxu3 %v5407_v50  ;;  %1052 = vmatpush.msra.mxu1 %v5616_v46  ;;  %v6383_v50 = vld [vmem:[%s11951_s5 + $0x5e0] sm:$0xff]  ;;  %v6389_v46 = vld [vmem:[%s11951_s5 + $0x5e8] sm:$0xff] }
  0xfe   :  { %926 = vmatpush.msra.mxu2 %v6369_v35  ;;  %966 = vmatpush.msrb.mxu0 %v6375_v8 }
  0xff   :  { %1013 = vmatpush.msra.mxu3 %v5418_v23  ;;  %1053 = vmatpush.msra.mxu1 %v5630_v25  ;;  %v12657_v23 = vld [vmem:[#allocation10_spill] sm:$0xff] }
 0x100   :  { %991 = vmatpush.msrb.mxu2 %v6383_v50  ;;  %1031 = vmatpush.msra.mxu0 %v6389_v46  ;;  %v6401_v25 = vld [vmem:[%s11951_s5 + $0x5b0] sm:$0xff] }
 0x101   :  { %1014 = vmatpush.msra.mxu3 %v5432_v39  ;;  %1054 = vmatpush.msra.mxu1 %v5651_v1  ;;  %12658 = vst [vmem:[#allocation10_spill] sm:$0xff] %v6401_v25  ;;  %v6407_v39 = vld [vmem:[%s11951_s5 + $0x5b8] sm:$0xff] }
 0x102   :  { %947 = vmatmul.f32.vlgmr.msrb.gmra.mxu3 %v6332_v63  ;;  %987 = vmatmul.f32.vlgmr.msrb.gmra.mxu1 %v6332_v63  ;;  %v12659_v1 = vld [vmem:[#allocation11_spill] sm:$0xff] }
 0x103   :  { %1015 = vmatpush.msra.mxu3 %v12657_v23  ;;  %1055 = vmatpush.msra.mxu1 %v5671_v54  ;;  %v6415_v54 = vld [vmem:[%s11951_s5 + $0x580] sm:$0xff]  ;;  %v6421_v23 = vld [vmem:[%s11951_s5 + $0x588] sm:$0xff] }
 0x104   :  { %992 = vmatpush.msrb.mxu2 %v6401_v25  ;;  %1032 = vmatpush.msra.mxu0 %v6407_v39  ;;  %12660 = vst [vmem:[#allocation11_spill] sm:$0xff] %v6415_v54  ;;  %v12661_v25 = vld [vmem:[#allocation12_spill] sm:$0xff] }
 0x105   :  { %1016 = vmatpush.msra.mxu3 %v12659_v1  ;;  %1056 = vmatpush.msra.mxu1 %v5686_v7  ;;  %v6429_v7 = vld [vmem:[%s11951_s5 + $0x550] sm:$0xff]  ;;  %v6435_v1 = vld [vmem:[%s11951_s5 + $0x558] sm:$0xff] }
 0x106   :  { %993 = vmatpush.msrb.mxu2 %v6415_v54  ;;  %1033 = vmatpush.msra.mxu0 %v6421_v23  ;;  %12662 = vst [vmem:[#allocation12_spill] sm:$0xff] %v6429_v7  ;;  %v12663_v54 = vld [vmem:[#allocation13_spill] sm:$0xff] }
 0x107   :  { %1017 = vmatpush.msra.mxu3 %v12661_v25  ;;  %1057 = vmatpush.msra.mxu1 %v5703_v10  ;;  %v6443_v10 = vld [vmem:[%s11951_s5 + $0x520] sm:$0xff]  ;;  %v6449_v25 = vld [vmem:[%s11951_s5 + $0x528] sm:$0xff] }
 0x108   :  { %994 = vmatpush.msrb.mxu2 %v6429_v7  ;;  %1034 = vmatpush.msra.mxu0 %v6435_v1  ;;  %12664 = vst [vmem:[#allocation13_spill] sm:$0xff] %v6443_v10  ;;  %v12665_v7 = vld [vmem:[#allocation14_spill] sm:$0xff] }
 0x109   :  { %1018 = vmatpush.msra.mxu3 %v12663_v54  ;;  %1058 = vmatpush.msra.mxu1 %v5721_v5  ;;  %v6457_v5 = vld [vmem:[%s11951_s5 + $0x4f0] sm:$0xff]  ;;  %v6463_v54 = vld [vmem:[%s11951_s5 + $0x4f8] sm:$0xff] }
 0x10a   :  { %995 = vmatpush.msrb.mxu2 %v6443_v10  ;;  %1035 = vmatpush.msra.mxu0 %v6449_v25  ;;  %12666 = vst [vmem:[#allocation14_spill] sm:$0xff] %v6457_v5  ;;  %v12668_v10 = vld [vmem:[#allocation15_spill] sm:$0xff] }
 0x10b   :  { %1019 = vmatpush.msra.mxu3 %v12665_v7  ;;  %1059 = vmatpush.msra.mxu1 %v5741_v58  ;;  %12667 = vst [vmem:[#allocation85_spill] sm:$0xff] %v6463_v54  ;;  %v6471_v58 = vld [vmem:[%s11951_s5 + $0x4c0] sm:$0xff] }
 0x10c   :  { %996 = vmatpush.msrb.mxu2 %v6457_v5  ;;  %1036 = vmatpush.msra.mxu0 %v6463_v54  ;;  %v12669_v7 = vld [vmem:[#allocation4_spill] sm:$0xff]  ;;  %v6480_v54 = vld [vmem:[%s11951_s5 + $0x490] sm:$0xff] }
 0x10d   :  { %1020 = vmatpush.msra.mxu3 %v12668_v10  ;;  %1060 = vmatpush.msra.mxu1 %v5757_v20  ;;  %v12670_v5 = vld [vmem:[#allocation16_spill] sm:$0xff]  ;;  %v12671_v20 = vld [vmem:[#allocation5_spill] sm:$0xff]  ;;  %v12672_v10 = vld [vmem:[#allocation19_spill] sm:$0xff] }
 0x10e   :  { %997 = vmatpush.msrb.mxu2 %v6471_v58  ;;  %1037 = vmatpush.msra.mxu0 %v12669_v7  ;;  %v6489_v7 = vld [vmem:[%s11951_s5 + $0x460] sm:$0xff] }
 0x10f   :  { %1021 = vmatpush.msra.mxu3 %v12670_v5  ;;  %1061 = vmatpush.msra.mxu1 %v5773_v24  ;;  %v12673_v24 = vld [vmem:[#allocation6_spill] sm:$0xff]  ;;  %v12674_v5 = vld [vmem:[#allocation20_spill] sm:$0xff] }
 0x110   :  { %998 = vmatpush.msrb.mxu2 %v6480_v54  ;;  %1038 = vmatpush.msra.mxu0 %v12671_v20  ;;  %v6498_v20 = vld [vmem:[%s11951_s5 + $0x430] sm:$0xff] }
 0x111   :  { %1022 = vmatpush.msra.mxu3 %v12672_v10  ;;  %1062 = vmatpush.msra.mxu1 %v5791_v13  ;;  %12675 = vst [vmem:[#allocation15_spill] sm:$0xff] %v6498_v20  ;;  %v12676_v13 = vld [vmem:[#allocation7_spill] sm:$0xff]  ;;  %v12677_v10 = vld [vmem:[#allocation21_spill] sm:$0xff] }
 0x112   :  { %999 = vmatpush.msrb.mxu2 %v6489_v7  ;;  %1039 = vmatpush.msra.mxu0 %v12673_v24  ;;  %v6507_v24 = vld [vmem:[%s11951_s5 + $0x400] sm:$0xff] }
 0x113   :  { %1023 = vmatpush.msra.mxu3 %v12674_v5  ;;  %1063 = vmatpush.msra.mxu1 %v5811_v12  ;;  %v12678_v12 = vld [vmem:[#allocation8_spill] sm:$0xff]  ;;  %v12679_v5 = vld [vmem:[#allocation22_spill] sm:$0xff] }
 0x114   :  { %1000 = vmatpush.msrb.mxu2 %v6498_v20  ;;  %1040 = vmatpush.msra.mxu0 %v12676_v13  ;;  %v6516_v13 = vld [vmem:[%s11951_s5 + $0x3d0] sm:$0xff]  ;;  %v12682_v20 = vld [vmem:[#allocation51_spill] sm:$0xff] }
 0x115   :  { %1024 = vmatpush.msra.mxu3 %v12677_v10  ;;  %1064 = vmatpush.msra.mxu1 %v5827_v34  ;;  %v12680_v34 = vld [vmem:[#allocation9_spill] sm:$0xff] }
 0x116   :  { %1001 = vmatpush.msrb.mxu2 %v6507_v24  ;;  %1041 = vmatpush.msra.mxu0 %v12678_v12  ;;  %v12681_v10 = vld [vmem:[#allocation25_spill] sm:$0xff]  ;;  %v12683_v12 = vld [vmem:[#allocation26_spill] sm:$0xff] }
 0x117   :  { %1025 = vmatpush.msra.mxu3 %v12679_v5  ;;  %1065 = vmatpush.msra.mxu1 %v5843_v38  ;;  %v6528_v38 = vld [vmem:[%s11951_s5 + $0x3a0] sm:$0xff]  ;;  %v6534_v5 = vld [vmem:[%s11951_s5 + $0x3a8] sm:$0xff] }
 0x118   :  { %1002 = vmatpush.msrb.mxu2 %v6516_v13  ;;  %1042 = vmatpush.msra.mxu0 %v12680_v34  ;;  %12684 = vst [vmem:[#allocation4_spill] sm:$0xff] %v6528_v38  ;;  %v12687_v34 = vld [vmem:[#allocation27_spill] sm:$0xff] }
 0x119   :  { %1026 = vmatpush.msra.mxu3 %v12681_v10  ;;  %1066 = vmatpush.msra.mxu1 %v12682_v20  ;;  %12685 = vst [vmem:[#allocation16_spill] sm:$0xff] %v6534_v5  ;;  %v12686_v20 = vld [vmem:[#allocation55_spill] sm:$0xff]  ;;  %v6542_v10 = vld [vmem:[%s11951_s5 + $0x370] sm:$0xff] }
 0x11a   :  { %1027 = vmatmul.f32.vlgmr.msra.gmra.mxu3 %v6332_v63  ;;  %1067 = vmatmul.f32.vlgmr.msra.gmra.mxu1 %v6332_v63 }
 0x11b   :  { %1091 = vmatpush.msrb.mxu3 %v12683_v12  ;;  %1003 = vmatpush.msrb.mxu2 %v6528_v38  ;;  %v6548_v12 = vld [vmem:[%s11951_s5 + $0x378] sm:$0xff]  ;;  %v12689_v38 = vld [vmem:[#allocation57_spill] sm:$0xff] }
 0x11c   :  { %1043 = vmatpush.msra.mxu0 %v6534_v5  ;;  %1181 = vmatpush.msrb.mxu1 %v12686_v20  ;;  %12688 = vst [vmem:[#allocation5_spill] sm:$0xff] %v6548_v12  ;;  %v12690_v5 = vld [vmem:[#allocation28_spill] sm:$0xff] }
 0x11d   :  { %1092 = vmatpush.msrb.mxu3 %v12687_v34  ;;  %1004 = vmatpush.msrb.mxu2 %v6542_v10  ;;  %v6556_v20 = vld [vmem:[%s11951_s5 + $0x340] sm:$0xff]  ;;  %v6562_v34 = vld [vmem:[%s11951_s5 + $0x348] sm:$0xff] }
 0x11e   :  { %1044 = vmatpush.msra.mxu0 %v6548_v12  ;;  %1182 = vmatpush.msrb.mxu1 %v12689_v38  ;;  %12691 = vst [vmem:[#allocation19_spill] sm:$0xff] %v6556_v20  ;;  %v12693_v12 = vld [vmem:[#allocation30_spill] sm:$0xff] }
 0x11f   :  { %1093 = vmatpush.msrb.mxu3 %v12690_v5  ;;  %1005 = vmatpush.msrb.mxu2 %v6556_v20  ;;  %12692 = vst [vmem:[#allocation6_spill] sm:$0xff] %v6562_v34  ;;  %v6570_v38 = vld [vmem:[%s11951_s5 + $0x310] sm:$0xff]  ;;  %v6576_v5 = vld [vmem:[%s11951_s5 + $0x318] sm:$0xff]  ;;  %v12699_v20 = vld [vmem:[#allocation40_spill] sm:$0xff] }
 0x120   :  { %1045 = vmatpush.msra.mxu0 %v6562_v34  ;;  %1183 = vmatpush.msrb.mxu1 %v5914_v31  ;;  %12694 = vst [vmem:[#allocation20_spill] sm:$0xff] %v6570_v38  ;;  %v12695_v34 = vld [vmem:[#allocation33_spill] sm:$0xff]  ;;  %v12696_v31 = vld [vmem:[#allocation34_spill] sm:$0xff] }
 0x121   :  { %1094 = vmatpush.msrb.mxu3 %v12693_v12  ;;  %1006 = vmatpush.msrb.mxu2 %v6570_v38  ;;  %v12697_v12 = vld [vmem:[#allocation35_spill] sm:$0xff]  ;;  %v12698_v38 = vld [vmem:[#allocation37_spill] sm:$0xff] }
 0x122   :  { %1046 = vmatpush.msra.mxu0 %v6576_v5  ;;  %1184 = vmatpush.msrb.mxu1 %v5938_v4  ;;  %v12700_v4 = vld [vmem:[#allocation41_spill] sm:$0xff] }
 0x123   :  { %1095 = vmatpush.msrb.mxu3 %v12695_v34 }
 0x124   :  { %1185 = vmatpush.msrb.mxu1 %v5959_v36  ;;  %v12701_v36 = vld [vmem:[#allocation42_spill] sm:$0xff] }
 0x125   :  { %1096 = vmatpush.msrb.mxu3 %v12696_v31 }
 0x126   :  { %1186 = vmatpush.msrb.mxu1 %v5974_v22  ;;  %v12702_v22 = vld [vmem:[#allocation44_spill] sm:$0xff] }
 0x127   :  { %1097 = vmatpush.msrb.mxu3 %v12697_v12 }
 0x128   :  { %1187 = vmatpush.msrb.mxu1 %v5993_v16  ;;  %v12703_v16 = vld [vmem:[#allocation47_spill] sm:$0xff] }
 0x129   :  { %1098 = vmatpush.msrb.mxu3 %v12698_v38 }
 0x12a   :  { %1188 = vmatpush.msrb.mxu1 %v6010_v47  ;;  %v12704_v47 = vld [vmem:[#allocation48_spill] sm:$0xff] }
 0x12b   :  { %1099 = vmatpush.msrb.mxu3 %v12699_v20 }
 0x12c   :  { %1189 = vmatpush.msrb.mxu1 %v6025_v51  ;;  %v12705_v51 = vld [vmem:[#allocation49_spill] sm:$0xff] }
 0x12d   :  { %1100 = vmatpush.msrb.mxu3 %v12700_v4 }
 0x12e   :  { %1190 = vmatpush.msrb.mxu1 %v6043_v44  ;;  %v12706_v44 = vld [vmem:[#allocation52_spill] sm:$0xff] }
 0x12f   :  { %1101 = vmatpush.msrb.mxu3 %v12701_v36 }
 0x130   :  { %1191 = vmatpush.msrb.mxu1 %v6057_v49  ;;  %v12707_v49 = vld [vmem:[#allocation56_spill] sm:$0xff] }
 0x131   :  { %1102 = vmatpush.msrb.mxu3 %v12702_v22 }
 0x132   :  { %1192 = vmatpush.msrb.mxu1 %v6071_v53  ;;  %v12708_v53 = vld [vmem:[#allocation58_spill] sm:$0xff] }
 0x133   :  { %1103 = vmatpush.msrb.mxu3 %v12703_v16 }
 0x134   :  { %1193 = vmatpush.msrb.mxu1 %v6089_v19  ;;  %v12709_v19 = vld [vmem:[#allocation60_spill] sm:$0xff] }
 0x135   :  { %1104 = vmatpush.msrb.mxu3 %v12704_v47 }
 0x136   :  { %1194 = vmatpush.msrb.mxu1 %v6106_v26  ;;  %v12710_v26 = vld [vmem:[#allocation66_spill] sm:$0xff] }
 0x137   :  { %1105 = vmatpush.msrb.mxu3 %v12705_v51 }
 0x138   :  { %1195 = vmatpush.msrb.mxu1 %v6120_v55  ;;  %v12722_v55 = vld [vmem:[#allocation84_spill] sm:$0xff] }
 0x139   :  { %1106 = vmatpush.msrb.mxu3 %v12706_v44 }
 0x13a   :  { %1107 = vmatmul.f32.vlgmr.msrb.gmra.mxu3 %v6332_v63  ;;  %1196 = vmatpush.msrb.mxu1 %v6136_v15 }
 0x13b   :  { %1221 = vmatpush.msra.mxu3 %v12707_v49 }
 0x13c   :  { %1307 = vmatpush.msra.mxu1 %v6159_v27 }
 0x13d   :  { %1222 = vmatpush.msra.mxu3 %v12708_v53 }
 0x13e   :  { %1308 = vmatpush.msra.mxu1 %v6175_v21  ;;  %v693_v27 = vpop.f32.mrf.mxu3  ;;  %v12723_v21 = vld [vmem:[#allocation59_spill] sm:$0xff] }
 0x13f   :  { %1223 = vmatpush.msra.mxu3 %v12709_v19  ;;  %v6671_v22 = vperm.slane %v12723_v21, 5 }
 0x140   :  { %1309 = vmatpush.msra.mxu1 %v6191_v52  ;;  %v12712_v52 = vld [vmem:[#allocation72_spill] sm:$0xff] }
 0x141   :  { %1224 = vmatpush.msra.mxu3 %v5943_v48  ;;  %v12711_v48 = vld [vmem:[#allocation71_spill] sm:$0xff]  ;;  %12728 = vst [vmem:[#allocation9_spill] sm:$0xff] %v6671_v22 }
 0x142   :  { %1310 = vmatpush.msra.mxu1 %v6206_v33  ;;  %v6651_v33 = vperm.slane %v12723_v21, 3 }
 0x143   :  { %1225 = vmatpush.msra.mxu3 %v12710_v26 }
 0x144   :  { %1311 = vmatpush.msra.mxu1 %v6218_v45  ;;  %12724 = vst [vmem:[#allocation7_spill] sm:$0xff] %v6651_v33  ;;  %v6655_v45 = vperm.slane %v12723_v21, 4 }
 0x145   :  { %1226 = vmatpush.msra.mxu3 %v5979_v41  ;;  %v12714_v41 = vld [vmem:[#allocation75_spill] sm:$0xff] }
 0x146   :  { %1312 = vmatpush.msra.mxu1 %v6232_v6  ;;  %12725 = vst [vmem:[#allocation21_spill] sm:$0xff] %v6655_v45  ;;  %v633_v6 = vpop.f32.mrf.mxu0 }
 0x147   :  { %1227 = vmatpush.msra.mxu3 %v5998_v14  ;;  %v12713_v14 = vld [vmem:[#allocation74_spill] sm:$0xff] }
 0x148   :  { %1313 = vmatpush.msra.mxu1 %v6245_v57  ;;  %v634_v57 = vadd.f32 %v633_v6, %v6651_v33 }
 0x149   :  { %1228 = vmatpush.msra.mxu3 %v6015_v28  ;;  %v12715_v28 = vld [vmem:[#allocation76_spill] sm:$0xff] }
 0x14a   :  { %1314 = vmatpush.msra.mxu1 %v6257_v17 }
 0x14b   :  { %1229 = vmatpush.msra.mxu3 %v6030_v30  ;;  %v12716_v30 = vld [vmem:[#allocation78_spill] sm:$0xff] }
 0x14c   :  { %1315 = vmatpush.msra.mxu1 %v6272_v59 }
 0x14d   :  { %1230 = vmatpush.msra.mxu3 %v6048_v56  ;;  %v12717_v56 = vld [vmem:[#allocation79_spill] sm:$0xff] }
 0x14e   :  { %1316 = vmatpush.msra.mxu1 %v6286_v61 }
 0x14f   :  { %1231 = vmatpush.msra.mxu3 %v6062_v62  ;;  %v12718_v62 = vld [vmem:[#allocation80_spill] sm:$0xff] }
 0x150   :  { %1317 = vmatpush.msra.mxu1 %v6299_v43  ;;  %v653_v43 = vpop.f32.mrf.mxu1 }
 0x151   :  { %1232 = vmatpush.msra.mxu3 %v6076_v3  ;;  %v12719_v3 = vld [vmem:[#allocation81_spill] sm:$0xff]  ;;  %v713_v12 = vpop.f32.mrf.mxu0 }
 0x152   :  { %1318 = vmatpush.msra.mxu1 %v6311_v18  ;;  %v654_v18 = vadd.f32 %v653_v43, %v634_v57  ;;  %v714_v49 = vadd.f32 %v713_v12, %v6671_v22  ;;  %v6758_v12 = vld [vmem:[%s11951_s5 + $0x4d0] sm:$0xff] }
 0x153   :  { %1233 = vmatpush.msra.mxu3 %v6094_v32  ;;  %v12720_v32 = vld [vmem:[#allocation82_spill] sm:$0xff] }
 0x154   :  { %1319 = vmatpush.msra.mxu1 %v6323_v11 }
 0x155   :  { %1234 = vmatpush.msra.mxu3 %v6111_v37  ;;  %v12721_v37 = vld [vmem:[#allocation83_spill] sm:$0xff]  ;;  %v673_v15 = vpop.f32.mrf.mxu2 }
 0x156   :  { %1320 = vmatpush.msra.mxu1 %v6337_v42  ;;  %v674_v17 = vadd.f32 %v673_v15, %v6655_v45 }
 0x157   :  { %1235 = vmatpush.msra.mxu3 %v12711_v48 }
 0x158   :  { %1321 = vmatpush.msra.mxu1 %v6355_v0 }
 0x159   :  { %1236 = vmatpush.msra.mxu3 %v12712_v52  ;;  %v733_v52 = vpop.f32.mrf.mxu1 }
 0x15a   :  { %1322 = vmatpush.msra.mxu1 %v6369_v35 }
 0x15b   :  { %1347 = vmatpush.msrb.mxu3 %v12713_v14 }
 0x15d   :  { %1348 = vmatpush.msrb.mxu3 %v12714_v41 }
 0x15f   :  { %1349 = vmatpush.msrb.mxu3 %v12715_v28 }
 0x161   :  { %1350 = vmatpush.msrb.mxu3 %v12716_v30  ;;  %v734_v30 = vadd.f32 %v733_v52, %v714_v49  ;;  %v6800_v49 = vld [vmem:[%s11951_s5 + $0x448] sm:$0xff] }
 0x162   :  { %12731 = vst [vmem:[#allocation26_spill] sm:$0xff] %v6800_v49  ;;  %v6824_v52 = vld [vmem:[%s11951_s5 + $0x3e8] sm:$0xff] }
 0x163   :  { %1351 = vmatpush.msrb.mxu3 %v12717_v56  ;;  %12735 = vst [vmem:[#allocation28_spill] sm:$0xff] %v6824_v52 }
 0x165   :  { %1352 = vmatpush.msrb.mxu3 %v12718_v62 }
 0x167   :  { %1353 = vmatpush.msrb.mxu3 %v12719_v3 }
 0x169   :  { %1354 = vmatpush.msrb.mxu3 %v12720_v32 }
 0x16b   :  { %1355 = vmatpush.msrb.mxu3 %v12721_v37 }
 0x16d   :  { %1356 = vmatpush.msrb.mxu3 %v12722_v55 }
 0x16f   :  { %1357 = vmatpush.msrb.mxu3 %v6305_v2  ;;  %v488_v2 = vld [vmem:[%s11956_s4] sm:$0x7] }
 0x170   :  { %v6664_v61 = vperm.slane %v488_v2, 0  ;;  %v6666_v59 = vperm.slane %v488_v2, 1  ;;  %v6674_v26 = vperm.slane %v488_v2, 2 }
 0x171   :  { %1358 = vmatpush.msrb.mxu3 %v6317_v9 }
 0x172   :  { %12726 = vst [vmem:[#allocation8_spill] sm:$0xff] %v6664_v61 }
 0x173   :  { %1359 = vmatpush.msrb.mxu3 %v6329_v40  ;;  %12727 = vst [vmem:[#allocation22_spill] sm:$0xff] %v6666_v59  ;;  %v694_v40 = vadd.f32 %v693_v27, %v674_v17 }
 0x175   :  { %1360 = vmatpush.msrb.mxu3 %v6343_v60 }
 0x177   :  { %1361 = vmatpush.msrb.mxu3 %v6361_v29  ;;  %v842_v14 = vpop.f32.mrf.mxu0 }
 0x178   :  { %v843_v3 = vadd.f32 %v842_v14, %v6674_v26  ;;  %v6830_v14 = vld [vmem:[%s11951_s5 + $0x3b0] sm:$0xff] }
 0x179   :  { %1362 = vmatpush.msrb.mxu3 %v6375_v8  ;;  %12736 = vst [vmem:[#allocation30_spill] sm:$0xff] %v6830_v14 }
 0x17c   :  { %v802_v9 = vpop.f32.mrf.mxu2  ;;  %v822_v11 = vpop.f32.mrf.mxu3 }
 0x17d   :  { %v803_v42 = vadd.f32 %v802_v9, %v6664_v61  ;;  %v823_v60 = vadd.f32 %v822_v11, %v6666_v59  ;;  %v6684_v11 = vld [vmem:[%s11951_s5 + $0x5f0] sm:$0xff] }
 0x17f   :  { %v845_v0 = vadd.f32 %v803_v42, %v654_v18  ;;  %v846_v29 = vadd.f32 %v823_v60, %v694_v40  ;;  %v6690_v40 = vld [vmem:[%s11951_s5 + $0x5f8] sm:$0xff]  ;;  %v6696_v42 = vld [vmem:[%s11951_s5 + $0x5c0] sm:$0xff]  ;;  %v6702_v60 = vld [vmem:[%s11951_s5 + $0x5c8] sm:$0xff] }
 0x181   :  { %v3735_v35 = vmul.f32 -1.442695, %v845_v0  ;;  %v3736_v20 = vmul.f32 -1.442695, %v846_v29  ;;  %v6708_v0 = vld [vmem:[%s11951_s5 + $0x590] sm:$0xff]  ;;  %v6714_v29 = vld [vmem:[%s11951_s5 + $0x598] sm:$0xff] }
 0x183   :  { %3777 = vpow2.f32 %v3735_v35  ;;  %v6720_v35 = vld [vmem:[%s11951_s5 + $0x560] sm:$0xff] }
 0x184   :  { %3779 = vpow2.f32 %v3736_v20  ;;  %v6726_v20 = vld [vmem:[%s11951_s5 + $0x568] sm:$0xff] }
 0x189   :  { %v3778_v8 = vpop.eup %3777 }
 0x18a   :  { %v3780_v34 = vpop.eup %3779  ;;  %v850_v38 = vadd.f32 1.0, %v3778_v8  ;;  %v6734_v8 = vld [vmem:[%s11951_s5 + $0x530] sm:$0xff] }
 0x18b   :  { %v869_v31 = vadd.f32 1.0, %v3780_v34  ;;  %v6740_v34 = vld [vmem:[%s11951_s5 + $0x538] sm:$0xff] }
 0x18c   :  { %3781 = vrcp.f32 %v850_v38  ;;  %v862_v51 = vand.u32 2147483648, %v850_v38  ;;  %v860_v19 = vand.u32 2147483647, %v850_v38  ;;  %vm856_vm10 = vweird.f32 %v850_v38 }
 0x18d   :  { %3783 = vrcp.f32 %v869_v31  ;;  %v881_v27 = vand.u32 2147483648, %v869_v31  ;;  %vm875_vm14 = vweird.f32 %v869_v31  ;;  %v879_v21 = vand.u32 2147483647, %v869_v31 }
 0x18e   :  { %v863_v41 = vor.u32 1.1754944e-38, %v862_v51  ;;  %vm861_vm12 = vcmp.eq.f32.partialorder %v860_v19, 8.507059e+37  ;;  %v6788_v51 = vld [vmem:[%s11951_s5 + $0x478] sm:$0xff] }
 0x18f   :  { %v882_v2 = vor.u32 1.1754944e-38, %v881_v27  ;;  %vm880_vm0 = vcmp.eq.f32.partialorder %v879_v21, 8.507059e+37  ;;  %12729 = vst [vmem:[#allocation25_spill] sm:$0xff] %v6788_v51  ;;  %v6812_v19 = vld [vmem:[%s11951_s5 + $0x418] sm:$0xff]  ;;  %v6898_v27 = vld [vmem:[%s11951_s5 + $0x2a0] sm:$0xff] }
 0x190   :  { %12733 = vst [vmem:[#allocation27_spill] sm:$0xff] %v6812_v19  ;;  %v6904_v21 = vld [vmem:[%s11953_s3 + $0x140] sm:$0xff] }
 0x191   :  { %12747 = vst [vmem:[#allocation49_spill] sm:$0xff] %v6898_v27 }
 0x192   :  { %v3782_v4 = vpop.eup %3781  ;;  %12748 = vst [vmem:[#allocation52_spill] sm:$0xff] %v6904_v21 }
 0x193   :  { %v3784_v36 = vpop.eup %3783  ;;  %v852_v16 = vmul.f32 %v3782_v4, %v850_v38  ;;  %vm857_vm9 = vweird.f32 %v3782_v4  ;;  %v6746_v38 = vld [vmem:[%s11951_s5 + $0x500] sm:$0xff] }
 0x194   :  { %v871_v44 = vmul.f32 %v3784_v36, %v869_v31  ;;  %vm858_vm11 = vmor %vm856_vm10, %vm857_vm9  ;;  %vm876_vm13 = vweird.f32 %v3784_v36  ;;  %v6752_v31 = vld [vmem:[%s11951_s5 + $0x508] sm:$0xff] }
 0x195   :  { %v853_v47 = vsub.f32 1.0, %v852_v16  ;;  %vm877_vm15 = vmor %vm875_vm14, %vm876_vm13  ;;  %v6776_v16 = vld [vmem:[%s11951_s5 + $0x4a8] sm:$0xff] }
 0x196   :  { %v872_v28 = vsub.f32 1.0, %v871_v44  ;;  %v6794_v44 = vld [vmem:[%s11951_s5 + $0x440] sm:$0xff] }
 0x197   :  { %v854_v53 = vmul.f32 %v3782_v4, %v853_v47  ;;  %v6782_v47 = vld [vmem:[%s11951_s5 + $0x470] sm:$0xff]  ;;  %12730 = vst [vmem:[#allocation51_spill] sm:$0xff] %v6794_v44 }
 0x198   :  { %v873_v37 = vmul.f32 %v3784_v36, %v872_v28  ;;  %v6842_v28 = vld [vmem:[%s11951_s5 + $0x380] sm:$0xff] }
 0x199   :  { %v855_v48 = vadd.f32 %v3782_v4, %v854_v53  ;;  %v6806_v53 = vld [vmem:[%s11951_s5 + $0x410] sm:$0xff]  ;;  %12738 = vst [vmem:[#allocation34_spill] sm:$0xff] %v6842_v28 }
 0x19a   :  { %v874_v15 = vadd.f32 %v3784_v36, %v873_v37  ;;  %12732 = vst [vmem:[#allocation55_spill] sm:$0xff] %v6806_v53  ;;  %v6880_v37 = vld [vmem:[%s11953_s3 + $0x170] sm:$0xff] }
 0x19b   :  { %v859_v56 = vsel %vm858_vm11, %v3782_v4, %v855_v48  ;;  %v6764_v4 = vld [vmem:[%s11951_s5 + $0x4d8] sm:$0xff]  ;;  %v6818_v48 = vld [vmem:[%s11951_s5 + $0x3e0] sm:$0xff]  ;;  %12744 = vst [vmem:[#allocation44_spill] sm:$0xff] %v6880_v37 }
 0x19c   :  { %v864_v62 = vsel %vm861_vm12, %v863_v41, %v859_v56  ;;  %v878_v6 = vsel %vm877_vm15, %v3784_v36, %v874_v15  ;;  %v6770_v36 = vld [vmem:[%s11951_s5 + $0x4a0] sm:$0xff]  ;;  %12734 = vst [vmem:[#allocation57_spill] sm:$0xff] %v6818_v48  ;;  %v6836_v41 = vld [vmem:[%s11951_s5 + $0x3b8] sm:$0xff]  ;;  %v6854_v56 = vld [vmem:[%s11951_s5 + $0x350] sm:$0xff] }
 0x19d   :  { %v885_v32 = vmul.f32 %v864_v62, %v734_v30  ;;  %v883_v43 = vsel %vm880_vm0, %v882_v2, %v878_v6  ;;  %12737 = vst [vmem:[#allocation33_spill] sm:$0xff] %v6836_v41  ;;  %v6848_v30 = vld [vmem:[%s11951_s5 + $0x388] sm:$0xff]  ;;  %v6860_v62 = vld [vmem:[%s11951_s5 + $0x358] sm:$0xff]  ;;  %v6910_v6 = vld [vmem:[%s11951_s5 + $0x270] sm:$0xff] }
 0x19e   :  { %12739 = vst [vmem:[#allocation35_spill] sm:$0xff] %v6848_v30  ;;  %v6892_v15 = vld [vmem:[%s11953_s3 + $0x158] sm:$0xff]  ;;  %v6922_v2 = vld [vmem:[%s11951_s5 + $0x240] sm:$0xff] }
 0x19f   :  { %v886_v55 = vadd.f32 %v885_v32, %v843_v3  ;;  %12740 = vst [vmem:[#allocation37_spill] sm:$0xff] %v6854_v56  ;;  %v6866_v3 = vld [vmem:[%s11951_s5 + $0x320] sm:$0xff]  ;;  %v6872_v32 = vld [vmem:[%s11951_s5 + $0x328] sm:$0xff] }
 0x1a0   :  { %12741 = vst [vmem:[#allocation40_spill] sm:$0xff] %v6860_v62 }
 0x1a1   :  { %3785 = vtanh.f32 %v886_v55  ;;  %12742 = vst [vmem:[#allocation41_spill] sm:$0xff] %v6866_v3  ;;  %v6886_v55 = vld [vmem:[%s11951_s5 + $0x2d0] sm:$0xff] }
 0x1a2   :  { %12743 = vst [vmem:[#allocation42_spill] sm:$0xff] %v6872_v32 }
 0x1a3   :  { %12745 = vst [vmem:[#allocation47_spill] sm:$0xff] %v6886_v55 }
 0x1a4   :  { %12746 = vst [vmem:[#allocation48_spill] sm:$0xff] %v6892_v15 }
 0x1a5   :  { %12749 = vst [vmem:[#allocation56_spill] sm:$0xff] %v6910_v6 }
 0x1a6   :  { %12751 = vst [vmem:[#allocation60_spill] sm:$0xff] %v6922_v2 }
 0x1a7   :  { %v3786_v57 = vpop.eup %3785 }
 0x1a8   :  { %v888_v17 = vsub.f32 0.0, %v3786_v57 }
 0x1aa   :  { %v889_v18 = vmul.f32 %v888_v17, %v883_v43  ;;  %v6928_v17 = vld [vmem:[%s11953_s3 + $0x110] sm:$0xff] }
 0x1ab   :  { %12752 = vst [vmem:[#allocation66_spill] sm:$0xff] %v6928_v17  ;;  %v6934_v43 = vld [vmem:[%s11951_s5 + $0x210] sm:$0xff] }
 0x1ac   :  { %v6677_v9 = vadd.f32 %v3786_v57, %v889_v18  ;;  %v6916_v57 = vld [vmem:[%s11953_s3 + $0x128] sm:$0xff]  ;;  %12753 = vst [vmem:[#allocation71_spill] sm:$0xff] %v6934_v43  ;;  %v6940_v18 = vld [vmem:[%s11953_s3 + $0xf8] sm:$0xff] }
 0x1ad   :  { %12750 = vst [vmem:[#allocation58_spill] sm:$0xff] %v6916_v57 }
 0x1ae   :  { %927 = vmatmul.f32.vlgmr.msra.gmra.mxu2 %v6677_v9  ;;  %967 = vmatmul.f32.vlgmr.msrb.gmra.mxu0 %v6677_v9  ;;  %12754 = vst [vmem:[#allocation72_spill] sm:$0xff] %v6940_v18 }
 0x1af   :  { %1071 = vmatpush.msra.mxu2 %v6684_v11  ;;  %1111 = vmatpush.msrb.mxu0 %v6690_v40 }
 0x1b1   :  { %1072 = vmatpush.msra.mxu2 %v6696_v42  ;;  %1112 = vmatpush.msrb.mxu0 %v6702_v60 }
 0x1b3   :  { %1073 = vmatpush.msra.mxu2 %v6708_v0  ;;  %1113 = vmatpush.msrb.mxu0 %v6714_v29 }
 0x1b5   :  { %1074 = vmatpush.msra.mxu2 %v6720_v35  ;;  %1114 = vmatpush.msrb.mxu0 %v6726_v20 }
 0x1b6   :  { %1007 = vmatmul.f32.vlgmr.msrb.gmra.mxu2 %v6677_v9  ;;  %1047 = vmatmul.f32.vlgmr.msra.gmra.mxu0 %v6677_v9 }
 0x1b7   :  { %1075 = vmatpush.msra.mxu2 %v6734_v8  ;;  %1115 = vmatpush.msrb.mxu0 %v6740_v34 }
 0x1b9   :  { %1076 = vmatpush.msra.mxu2 %v6746_v38  ;;  %1116 = vmatpush.msrb.mxu0 %v6752_v31 }
 0x1bb   :  { %1077 = vmatpush.msra.mxu2 %v6758_v12  ;;  %1117 = vmatpush.msrb.mxu0 %v6764_v4 }
 0x1bd   :  { %1078 = vmatpush.msra.mxu2 %v6770_v36  ;;  %1118 = vmatpush.msrb.mxu0 %v6776_v16 }
 0x1bf   :  { %1079 = vmatpush.msra.mxu2 %v6782_v47  ;;  %1119 = vmatpush.msrb.mxu0 %v6788_v51 }
 0x1c1   :  { %1080 = vmatpush.msra.mxu2 %v6794_v44  ;;  %1120 = vmatpush.msrb.mxu0 %v6800_v49 }
 0x1c3   :  { %1081 = vmatpush.msra.mxu2 %v6806_v53  ;;  %1121 = vmatpush.msrb.mxu0 %v6812_v19 }
 0x1c5   :  { %1082 = vmatpush.msra.mxu2 %v6818_v48  ;;  %1122 = vmatpush.msrb.mxu0 %v6824_v52 }
 0x1c7   :  { %1083 = vmatpush.msra.mxu2 %v6830_v14  ;;  %1123 = vmatpush.msrb.mxu0 %v6836_v41 }
 0x1c9   :  { %1084 = vmatpush.msra.mxu2 %v6842_v28  ;;  %1124 = vmatpush.msrb.mxu0 %v6848_v30  ;;  %v12812_v30 = vld [vmem:[#allocation65_spill] sm:$0xff] }
 0x1ca   :  { %v12813_v28 = vld [vmem:[#allocation17_spill] sm:$0xff] }
 0x1cb   :  { %1085 = vmatpush.msra.mxu2 %v6854_v56  ;;  %1125 = vmatpush.msrb.mxu0 %v6860_v62  ;;  %v108_v41 = vadd.f32 %v12813_v28, %v12812_v30  ;;  %v12815_v30 = vld [vmem:[#allocation77_spill] sm:$0xff] }
 0x1cd   :  { %1086 = vmatpush.msra.mxu2 %v6866_v3  ;;  %1126 = vmatpush.msrb.mxu0 %v6872_v32  ;;  %v12811_v3 = vld [vmem:[#allocation61_spill] sm:$0xff] }
 0x1ce   :  { %1087 = vmatmul.f32.vlgmr.msra.gmra.mxu2 %v6677_v9  ;;  %1127 = vmatmul.f32.vlgmr.msrb.gmra.mxu0 %v6677_v9 }
 0x1cf   :  { %1201 = vmatpush.msrb.mxu2 %v6880_v37  ;;  %1287 = vmatpush.msra.mxu0 %v6886_v55  ;;  %v908_v37 = vpop.f32.mrf.mxu1 }
 0x1d0   :  { %v909_v62 = vadd.f32 %v908_v37, %v12811_v3 }
 0x1d1   :  { %1202 = vmatpush.msrb.mxu2 %v6892_v15  ;;  %1288 = vmatpush.msra.mxu0 %v6898_v27  ;;  %v12809_v27 = vld [vmem:[#allocation68_spill] sm:$0xff] }
 0x1d3   :  { %1203 = vmatpush.msrb.mxu2 %v6904_v21  ;;  %1289 = vmatpush.msra.mxu0 %v6910_v6 }
 0x1d5   :  { %1204 = vmatpush.msrb.mxu2 %v6916_v57  ;;  %1290 = vmatpush.msra.mxu0 %v6922_v2  ;;  %v6946_v2 = vld [vmem:[%s11951_s5 + $0x1e0] sm:$0xff] }
 0x1d6   :  { %12755 = vst [vmem:[#allocation74_spill] sm:$0xff] %v6946_v2  ;;  %v12808_v57 = vld [vmem:[#allocation67_spill] sm:$0xff] }
 0x1d7   :  { %1205 = vmatpush.msrb.mxu2 %v6928_v17  ;;  %1291 = vmatpush.msra.mxu0 %v6934_v43  ;;  %v6952_v17 = vld [vmem:[%s11953_s3 + $0xe0] sm:$0xff]  ;;  %v6958_v43 = vld [vmem:[%s11951_s5 + $0x1b0] sm:$0xff] }
 0x1d8   :  { %12756 = vst [vmem:[#allocation75_spill] sm:$0xff] %v6952_v17 }
 0x1d9   :  { %1206 = vmatpush.msrb.mxu2 %v6940_v18  ;;  %1292 = vmatpush.msra.mxu0 %v6946_v2  ;;  %12757 = vst [vmem:[#allocation76_spill] sm:$0xff] %v6958_v43  ;;  %v6964_v18 = vld [vmem:[%s11953_s3 + $0xc8] sm:$0xff]  ;;  %v6970_v2 = vld [vmem:[%s11951_s5 + $0x180] sm:$0xff] }
 0x1da   :  { %12758 = vst [vmem:[#allocation78_spill] sm:$0xff] %v6964_v18 }
 0x1db   :  { %1207 = vmatpush.msrb.mxu2 %v6952_v17  ;;  %1293 = vmatpush.msra.mxu0 %v6958_v43  ;;  %12759 = vst [vmem:[#allocation79_spill] sm:$0xff] %v6970_v2  ;;  %v6976_v17 = vld [vmem:[%s11953_s3 + $0xb0] sm:$0xff] }
 0x1dc   :  { %12760 = vst [vmem:[#allocation80_spill] sm:$0xff] %v6976_v17  ;;  %v6982_v43 = vld [vmem:[%s11951_s5 + $0x150] sm:$0xff] }
 0x1dd   :  { %1208 = vmatpush.msrb.mxu2 %v6964_v18  ;;  %1294 = vmatpush.msra.mxu0 %v6970_v2  ;;  %12761 = vst [vmem:[#allocation81_spill] sm:$0xff] %v6982_v43  ;;  %v6988_v18 = vld [vmem:[%s11953_s3 + $0x98] sm:$0xff]  ;;  %v6994_v2 = vld [vmem:[%s11951_s5 + $0x120] sm:$0xff] }
 0x1de   :  { %12762 = vst [vmem:[#allocation82_spill] sm:$0xff] %v6988_v18 }
 0x1df   :  { %1209 = vmatpush.msrb.mxu2 %v6976_v17  ;;  %1295 = vmatpush.msra.mxu0 %v6982_v43  ;;  %12763 = vst [vmem:[#allocation83_spill] sm:$0xff] %v6994_v2  ;;  %v7000_v17 = vld [vmem:[%s11953_s3 + $0x80] sm:$0xff]  ;;  %v7006_v43 = vld [vmem:[%s11951_s5 + $0xf0] sm:$0xff] }
 0x1e0   :  { %12764 = vst [vmem:[#allocation84_spill] sm:$0xff] %v7000_v17 }
 0x1e1   :  { %1210 = vmatpush.msrb.mxu2 %v6988_v18  ;;  %1296 = vmatpush.msra.mxu0 %v6994_v2  ;;  %12765 = vst [vmem:[#allocation59_spill] sm:$0xff] %v7006_v43  ;;  %v7012_v18 = vld [vmem:[%s11953_s3 + $0x68] sm:$0xff]  ;;  %v7018_v2 = vld [vmem:[%s11951_s5 + $0xc0] sm:$0xff] }
 0x1e2   :  { %12766 = vst [vmem:[#allocation86_spill] sm:$0xff] %v7012_v18 }
 0x1e3   :  { %1211 = vmatpush.msrb.mxu2 %v7000_v17  ;;  %1297 = vmatpush.msra.mxu0 %v7006_v43  ;;  %12767 = vst [vmem:[#allocation87_spill] sm:$0xff] %v7018_v2  ;;  %v7024_v17 = vld [vmem:[%s11953_s3 + $0x50] sm:$0xff] }
 0x1e4   :  { %12768 = vst [vmem:[#allocation88_spill] sm:$0xff] %v7024_v17  ;;  %v7030_v43 = vld [vmem:[%s11951_s5 + $0x90] sm:$0xff] }
 0x1e5   :  { %1212 = vmatpush.msrb.mxu2 %v7012_v18  ;;  %1298 = vmatpush.msra.mxu0 %v7018_v2  ;;  %12769 = vst [vmem:[#allocation89_spill] sm:$0xff] %v7030_v43  ;;  %v7036_v18 = vld [vmem:[%s11953_s3 + $0x38] sm:$0xff]  ;;  %v7042_v2 = vld [vmem:[%s11951_s5 + $0x60] sm:$0xff] }
 0x1e6   :  { %12770 = vst [vmem:[#allocation90_spill] sm:$0xff] %v7036_v18 }
 0x1e7   :  { %1213 = vmatpush.msrb.mxu2 %v7024_v17  ;;  %1299 = vmatpush.msra.mxu0 %v7030_v43  ;;  %12771 = vst [vmem:[#allocation91_spill] sm:$0xff] %v7042_v2  ;;  %v7048_v17 = vld [vmem:[%s11953_s3 + $0x20] sm:$0xff]  ;;  %v7054_v43 = vld [vmem:[%s11951_s5 + $0x30] sm:$0xff] }
 0x1e8   :  { %12772 = vst [vmem:[#allocation92_spill] sm:$0xff] %v7048_v17 }
 0x1e9   :  { %1214 = vmatpush.msrb.mxu2 %v7036_v18  ;;  %1300 = vmatpush.msra.mxu0 %v7042_v2  ;;  %12773 = vst [vmem:[#allocation93_spill] sm:$0xff] %v7054_v43  ;;  %v7060_v18 = vld [vmem:[%s11953_s3 + $0x8] sm:$0xff]  ;;  %v7066_v2 = vld [vmem:[%s11951_s5] sm:$0xff] }
 0x1ea   :  { %12774 = vst [vmem:[#allocation94_spill] sm:$0xff] %v7060_v18 }
 0x1eb   :  { %1215 = vmatpush.msrb.mxu2 %v7048_v17  ;;  %1301 = vmatpush.msra.mxu0 %v7054_v43  ;;  %12775 = vst [vmem:[#allocation95_spill] sm:$0xff] %v7066_v2  ;;  %v7072_v17 = vld [vmem:[%s11951_s5 + $0x2d8] sm:$0xff]  ;;  %v7078_v43 = vld [vmem:[%s11951_s5 + $0x2e0] sm:$0xff] }
 0x1ec   :  { %12776 = vst [vmem:[#allocation96_spill] sm:$0xff] %v7072_v17 }
 0x1ed   :  { %1216 = vmatpush.msrb.mxu2 %v7060_v18  ;;  %1302 = vmatpush.msra.mxu0 %v7066_v2  ;;  %12777 = vst [vmem:[#allocation97_spill] sm:$0xff] %v7078_v43  ;;  %v7084_v18 = vld [vmem:[%s11951_s5 + $0x2a8] sm:$0xff]  ;;  %v7090_v2 = vld [vmem:[%s11951_s5 + $0x2b0] sm:$0xff] }
 0x1ee   :  { %12778 = vst [vmem:[#allocation98_spill] sm:$0xff] %v7084_v18 }
 0x1ef   :  { %1327 = vmatpush.msra.mxu2 %v7072_v17  ;;  %1367 = vmatpush.msrb.mxu0 %v7078_v43  ;;  %12779 = vst [vmem:[#allocation99_spill] sm:$0xff] %v7090_v2  ;;  %v7096_v17 = vld [vmem:[%s11951_s5 + $0x278] sm:$0xff]  ;;  %v7102_v43 = vld [vmem:[%s11951_s5 + $0x280] sm:$0xff] }
 0x1f0   :  { %12780 = vst [vmem:[#allocation100_spill] sm:$0xff] %v7096_v17 }
 0x1f1   :  { %1328 = vmatpush.msra.mxu2 %v7084_v18  ;;  %1368 = vmatpush.msrb.mxu0 %v7090_v2  ;;  %12781 = vst [vmem:[#allocation101_spill] sm:$0xff] %v7102_v43  ;;  %v7108_v18 = vld [vmem:[%s11951_s5 + $0x248] sm:$0xff]  ;;  %v7114_v2 = vld [vmem:[%s11951_s5 + $0x250] sm:$0xff] }
 0x1f2   :  { %12782 = vst [vmem:[#allocation102_spill] sm:$0xff] %v7108_v18 }
 0x1f3   :  { %1329 = vmatpush.msra.mxu2 %v7096_v17  ;;  %1369 = vmatpush.msrb.mxu0 %v7102_v43  ;;  %12783 = vst [vmem:[#allocation103_spill] sm:$0xff] %v7114_v2  ;;  %v7120_v17 = vld [vmem:[%s11951_s5 + $0x218] sm:$0xff]  ;;  %v7126_v43 = vld [vmem:[%s11951_s5 + $0x220] sm:$0xff] }
 0x1f4   :  { %12784 = vst [vmem:[#allocation104_spill] sm:$0xff] %v7120_v17 }
 0x1f5   :  { %1330 = vmatpush.msra.mxu2 %v7108_v18  ;;  %1370 = vmatpush.msrb.mxu0 %v7114_v2  ;;  %12785 = vst [vmem:[#allocation105_spill] sm:$0xff] %v7126_v43  ;;  %v7132_v18 = vld [vmem:[%s11951_s5 + $0x1e8] sm:$0xff]  ;;  %v7138_v2 = vld [vmem:[%s11951_s5 + $0x1f0] sm:$0xff] }
 0x1f6   :  { %12786 = vst [vmem:[#allocation106_spill] sm:$0xff] %v7132_v18 }
 0x1f7   :  { %1331 = vmatpush.msra.mxu2 %v7120_v17  ;;  %1371 = vmatpush.msrb.mxu0 %v7126_v43  ;;  %12787 = vst [vmem:[#allocation107_spill] sm:$0xff] %v7138_v2  ;;  %v7144_v17 = vld [vmem:[%s11951_s5 + $0x1b8] sm:$0xff]  ;;  %v7150_v43 = vld [vmem:[%s11951_s5 + $0x1c0] sm:$0xff] }
 0x1f8   :  { %12788 = vst [vmem:[#allocation108_spill] sm:$0xff] %v7144_v17 }
 0x1f9   :  { %1332 = vmatpush.msra.mxu2 %v7132_v18  ;;  %1372 = vmatpush.msrb.mxu0 %v7138_v2  ;;  %12789 = vst [vmem:[#allocation109_spill] sm:$0xff] %v7150_v43  ;;  %v7156_v18 = vld [vmem:[%s11951_s5 + $0x188] sm:$0xff]  ;;  %v7162_v2 = vld [vmem:[%s11951_s5 + $0x190] sm:$0xff] }
 0x1fa   :  { %12790 = vst [vmem:[#allocation110_spill] sm:$0xff] %v7156_v18 }
 0x1fb   :  { %1333 = vmatpush.msra.mxu2 %v7144_v17  ;;  %1373 = vmatpush.msrb.mxu0 %v7150_v43  ;;  %12791 = vst [vmem:[#allocation111_spill] sm:$0xff] %v7162_v2  ;;  %v7168_v17 = vld [vmem:[%s11951_s5 + $0x158] sm:$0xff]  ;;  %v7174_v43 = vld [vmem:[%s11951_s5 + $0x160] sm:$0xff] }
 0x1fc   :  { %12792 = vst [vmem:[#allocation112_spill] sm:$0xff] %v7168_v17 }
 0x1fd   :  { %1334 = vmatpush.msra.mxu2 %v7156_v18  ;;  %1374 = vmatpush.msrb.mxu0 %v7162_v2  ;;  %12793 = vst [vmem:[#allocation113_spill] sm:$0xff] %v7174_v43  ;;  %v7180_v18 = vld [vmem:[%s11951_s5 + $0x128] sm:$0xff]  ;;  %v7186_v2 = vld [vmem:[%s11951_s5 + $0x130] sm:$0xff] }
 0x1fe   :  { %12794 = vst [vmem:[#allocation114_spill] sm:$0xff] %v7180_v18 }
 0x1ff   :  { %1335 = vmatpush.msra.mxu2 %v7168_v17  ;;  %1375 = vmatpush.msrb.mxu0 %v7174_v43  ;;  %12795 = vst [vmem:[#allocation115_spill] sm:$0xff] %v7186_v2  ;;  %v7192_v17 = vld [vmem:[%s11951_s5 + $0xf8] sm:$0xff]  ;;  %v7198_v43 = vld [vmem:[%s11951_s5 + $0x100] sm:$0xff] }
 0x200   :  { %12796 = vst [vmem:[#allocation116_spill] sm:$0xff] %v7192_v17 }
 0x201   :  { %1336 = vmatpush.msra.mxu2 %v7180_v18  ;;  %1376 = vmatpush.msrb.mxu0 %v7186_v2  ;;  %12797 = vst [vmem:[#allocation117_spill] sm:$0xff] %v7198_v43  ;;  %v7204_v18 = vld [vmem:[%s11951_s5 + $0xc8] sm:$0xff]  ;;  %v7210_v2 = vld [vmem:[%s11951_s5 + $0xd0] sm:$0xff] }
 0x202   :  { %12798 = vst [vmem:[#allocation118_spill] sm:$0xff] %v7204_v18 }
 0x203   :  { %1337 = vmatpush.msra.mxu2 %v7192_v17  ;;  %1377 = vmatpush.msrb.mxu0 %v7198_v43  ;;  %12799 = vst [vmem:[#allocation119_spill] sm:$0xff] %v7210_v2  ;;  %v7216_v17 = vld [vmem:[%s11951_s5 + $0x98] sm:$0xff]  ;;  %v7222_v43 = vld [vmem:[%s11951_s5 + $0xa0] sm:$0xff] }
 0x204   :  { %12800 = vst [vmem:[#allocation120_spill] sm:$0xff] %v7216_v17 }
 0x205   :  { %1338 = vmatpush.msra.mxu2 %v7204_v18  ;;  %1378 = vmatpush.msrb.mxu0 %v7210_v2  ;;  %12801 = vst [vmem:[#allocation121_spill] sm:$0xff] %v7222_v43  ;;  %v7228_v18 = vld [vmem:[%s11951_s5 + $0x68] sm:$0xff]  ;;  %v7234_v2 = vld [vmem:[%s11951_s5 + $0x70] sm:$0xff] }
 0x206   :  { %12802 = vst [vmem:[#allocation122_spill] sm:$0xff] %v7228_v18 }
 0x207   :  { %1339 = vmatpush.msra.mxu2 %v7216_v17  ;;  %1379 = vmatpush.msrb.mxu0 %v7222_v43  ;;  %12803 = vst [vmem:[#allocation123_spill] sm:$0xff] %v7234_v2  ;;  %v7240_v17 = vld [vmem:[%s11951_s5 + $0x38] sm:$0xff]  ;;  %v7246_v43 = vld [vmem:[%s11951_s5 + $0x40] sm:$0xff] }
 0x208   :  { %12804 = vst [vmem:[#allocation124_spill] sm:$0xff] %v7240_v17 }
 0x209   :  { %1340 = vmatpush.msra.mxu2 %v7228_v18  ;;  %1380 = vmatpush.msrb.mxu0 %v7234_v2  ;;  %12805 = vst [vmem:[#allocation125_spill] sm:$0xff] %v7246_v43  ;;  %v7252_v18 = vld [vmem:[%s11951_s5 + $0x8] sm:$0xff]  ;;  %v7258_v2 = vld [vmem:[%s11951_s5 + $0x10] sm:$0xff] }
 0x20a   :  { %12806 = vst [vmem:[#allocation126_spill] sm:$0xff] %v7252_v18 }
 0x20b   :  { %1341 = vmatpush.msra.mxu2 %v7240_v17  ;;  %1381 = vmatpush.msrb.mxu0 %v7246_v43  ;;  %12807 = vst [vmem:[#allocation127_spill] sm:$0xff] %v7258_v2  ;;  %v948_v17 = vpop.f32.mrf.mxu3  ;;  %v12810_v43 = vld [vmem:[#allocation18_spill] sm:$0xff] }
 0x20c   :  { %v949_v6 = vadd.f32 %v948_v17, %v12808_v57  ;;  %v149_v15 = vadd.f32 %v12810_v43, %v12809_v27 }
 0x20d   :  { %1342 = vmatpush.msra.mxu2 %v7252_v18  ;;  %1382 = vmatpush.msrb.mxu0 %v7258_v2 }
 0x22b   :  { %v968_v21 = vpop.f32.mrf.mxu0 }
 0x22c   :  { %v969_v55 = vadd.f32 %v968_v21, %v949_v6 }
 0x22e   :  { %v1136_v32 = vadd.f32 %v969_v55, %v149_v15 }
 0x230   :  { %v3738_v18 = vmul.f32 -1.442695, %v1136_v32  ;;  %v988_v32 = vpop.f32.mrf.mxu1 }
 0x231   :  { %v928_v56 = vpop.f32.mrf.mxu2 }
 0x232   :  { %v929_v14 = vadd.f32 %v928_v56, %v909_v62  ;;  %3787 = vpow2.f32 %v3738_v18 }
 0x234   :  { %v1135_v52 = vadd.f32 %v929_v14, %v108_v41  ;;  %v12814_v41 = vld [vmem:[#allocation73_spill] sm:$0xff] }
 0x236   :  { %v3737_v2 = vmul.f32 -1.442695, %v1135_v52  ;;  %v989_v52 = vadd.f32 %v988_v32, %v12814_v41 }
 0x238   :  { %3789 = vpow2.f32 %v3737_v2  ;;  %v3788_v17 = vpop.eup %3787 }
 0x239   :  { %v1159_v48 = vadd.f32 1.0, %v3788_v17  ;;  %v1008_v14 = vpop.f32.mrf.mxu2 }
 0x23a   :  { %v1009_v2 = vadd.f32 %v1008_v14, %v989_v52  ;;  %v12819_v52 = vld [vmem:[#allocation12_spill] sm:$0xff] }
 0x23b   :  { %v1171_v51 = vand.u32 2147483648, %v1159_v48  ;;  %vm1165_vm6 = vweird.f32 %v1159_v48 }
 0x23e   :  { %v3790_v57 = vpop.eup %3789 }
 0x23f   :  { %v1140_v19 = vadd.f32 1.0, %v3790_v57 }
 0x241   :  { %3791 = vrcp.f32 %v1140_v19  ;;  %v1152_v43 = vand.u32 2147483648, %v1140_v19  ;;  %v1150_v28 = vand.u32 2147483647, %v1140_v19  ;;  %vm1146_vm2 = vweird.f32 %v1140_v19 }
 0x242   :  { %3793 = vrcp.f32 %v1159_v48 }
 0x243   :  { %v1153_v57 = vor.u32 1.1754944e-38, %v1152_v43  ;;  %vm1151_vm4 = vcmp.eq.f32.partialorder %v1150_v28, 8.507059e+37 }
 0x247   :  { %v3792_v21 = vpop.eup %3791 }
 0x248   :  { %v3794_v55 = vpop.eup %3793  ;;  %v1142_v15 = vmul.f32 %v3792_v21, %v1140_v19  ;;  %vm1147_vm1 = vweird.f32 %v3792_v21 }
 0x249   :  { %v1161_v6 = vmul.f32 %v3794_v55, %v1159_v48  ;;  %vm1148_vm3 = vmor %vm1146_vm2, %vm1147_vm1  ;;  %vm1166_vm5 = vweird.f32 %v3794_v55 }
 0x24a   :  { %v1143_v37 = vsub.f32 1.0, %v1142_v15  ;;  %v12816_v15 = vld [vmem:[#allocation32_spill] sm:$0xff]  ;;  %vm1167_vm7 = vmor %vm1165_vm6, %vm1166_vm5 }
 0x24b   :  { %v1162_v62 = vsub.f32 1.0, %v1161_v6  ;;  %v190_v3 = vadd.f32 %v12816_v15, %v12815_v30  ;;  %v1172_v6 = vor.u32 1.1754944e-38, %v1171_v51  ;;  %v7294_v51 = vld [vmem:[%s11951_s5 + $0x2b8] sm:$0xff]  ;;  %v7384_v15 = vld [vmem:[%s11951_s5 + $0x1a0] sm:$0xff] }
 0x24c   :  { %v1144_v27 = vmul.f32 %v3792_v21, %v1143_v37 }
 0x24d   :  { %v1163_v49 = vmul.f32 %v3794_v55, %v1162_v62  ;;  %v7356_v62 = vld [vmem:[%s11951_s5 + $0x200] sm:$0xff] }
 0x24e   :  { %v1145_v56 = vadd.f32 %v3792_v21, %v1144_v27  ;;  %v1169_v27 = vand.u32 2147483647, %v1159_v48  ;;  %v12818_v48 = vld [vmem:[#allocation11_spill] sm:$0xff] }
 0x24f   :  { %v1164_v44 = vadd.f32 %v3794_v55, %v1163_v49  ;;  %v7300_v49 = vld [vmem:[%s11951_s5 + $0x2c0] sm:$0xff] }
 0x250   :  { %v1149_v18 = vsel %vm1148_vm3, %v3792_v21, %v1145_v56  ;;  %vm1170_vm8 = vcmp.eq.f32.partialorder %v1169_v27, 8.507059e+37  ;;  %v7350_v56 = vld [vmem:[%s11951_s5 + $0x1f8] sm:$0xff]  ;;  %v7397_v27 = vld [vmem:[%s11951_s5 + $0x168] sm:$0xff] }
 0x251   :  { %v1154_v17 = vsel %vm1151_vm4, %v1153_v57, %v1149_v18  ;;  %v1168_v19 = vsel %vm1167_vm7, %v3794_v55, %v1164_v44  ;;  %v7280_v44 = vld [vmem:[%s11951_s5 + $0x2e8] sm:$0xff]  ;;  %v7342_v55 = vld [vmem:[%s11951_s5 + $0x230] sm:$0xff] }
 0x252   :  { %v1175_v53 = vmul.f32 %v1154_v17, %v1009_v2  ;;  %v1173_v43 = vsel %vm1170_vm8, %v1172_v6, %v1168_v19  ;;  %v12820_v57 = vld [vmem:[#allocation13_spill] sm:$0xff]  ;;  %v12821_v18 = vld [vmem:[#allocation14_spill] sm:$0xff]  ;;  %v7422_v6 = vld [vmem:[%s11951_s5 + $0x140] sm:$0xff] }
 0x253   :  { %v7370_v2 = vld [vmem:[%s11951_s5 + $0x1d0] sm:$0xff]  ;;  %12826 = vst [vmem:[#allocation77_spill] sm:$0xff] %v7422_v6 }
 0x254   :  { %v1176_v37 = vadd.f32 %v1175_v53, %v190_v3  ;;  %v12817_v53 = vld [vmem:[#allocation10_spill] sm:$0xff]  ;;  %v7328_v3 = vld [vmem:[%s11951_s5 + $0x260] sm:$0xff]  ;;  %v12822_v17 = vld [vmem:[#allocation85_spill] sm:$0xff] }
 0x255   :  { %v7403_v19 = vld [vmem:[%s11951_s5 + $0x170] sm:$0xff] }
 0x256   :  { %3795 = vtanh.f32 %v1176_v37  ;;  %v7391_v37 = vld [vmem:[%s11951_s5 + $0x4c8] sm:$0xff]  ;;  %12823 = vst [vmem:[#allocation18_spill] sm:$0xff] %v7403_v19 }
 0x25c   :  { %v3796_v32 = vpop.eup %3795 }
 0x25d   :  { %v1178_v21 = vsub.f32 %v6332_v63, %v3796_v32  ;;  %v7286_v63 = vld [vmem:[%s11951_s5 + $0x2f0] sm:$0xff] }
 0x25f   :  { %v1179_v28 = vmul.f32 %v1178_v21, %v1173_v43  ;;  %v7435_v21 = vld [vmem:[%s11951_s5 + $0x108] sm:$0xff]  ;;  %v7441_v43 = vld [vmem:[%s11951_s5 + $0x110] sm:$0xff] }
 0x260   :  { %12828 = vst [vmem:[#allocation10_spill] sm:$0xff] %v7435_v21 }
 0x261   :  { %v7271_v14 = vadd.f32 %v3796_v32, %v1179_v28  ;;  %v7416_v32 = vld [vmem:[%s11951_s5 + $0x138] sm:$0xff]  ;;  %12829 = vst [vmem:[#allocation11_spill] sm:$0xff] %v7441_v43 }
 0x262   :  { %12825 = vst [vmem:[#allocation73_spill] sm:$0xff] %v7416_v32  ;;  %v7448_v28 = vld [vmem:[%s11951_s5 + $0x438] sm:$0xff] }
 0x263   :  { %1197 = vmatmul.f32.vlgmr.msrb.gmra.mxu1 %v7271_v14  ;;  %1217 = vmatmul.f32.vlgmr.msrb.gmra.mxu2 %v7271_v14  ;;  %12831 = vst [vmem:[#allocation12_spill] sm:$0xff] %v7448_v28 }
 0x264   :  { %1237 = vmatmul.f32.vlgmr.msra.gmra.mxu3 %v7271_v14  ;;  %1303 = vmatmul.f32.vlgmr.msra.gmra.mxu0 %v7271_v14 }
 0x265   :  { %1407 = vmatpush.msrb.mxu2 %v7280_v44  ;;  %1447 = vmatpush.msra.mxu0 %v7286_v63 }
 0x266   :  { %1387 = vmatpush.msrb.mxu1 %v6383_v50  ;;  %1427 = vmatpush.msra.mxu3 %v6389_v46  ;;  %v7308_v50 = vld [vmem:[%s11951_s5 + $0x288] sm:$0xff]  ;;  %v7314_v46 = vld [vmem:[%s11951_s5 + $0x290] sm:$0xff] }
 0x267   :  { %1408 = vmatpush.msrb.mxu2 %v7294_v51  ;;  %1448 = vmatpush.msra.mxu0 %v7300_v49 }
 0x268   :  { %1388 = vmatpush.msrb.mxu1 %v12817_v53  ;;  %1428 = vmatpush.msra.mxu3 %v6407_v39  ;;  %v7322_v39 = vld [vmem:[%s11951_s5 + $0x258] sm:$0xff] }
 0x269   :  { %1409 = vmatpush.msrb.mxu2 %v7308_v50  ;;  %1449 = vmatpush.msra.mxu0 %v7314_v46  ;;  %v7454_v53 = vld [vmem:[%s11951_s5 + $0xd8] sm:$0xff] }
 0x26a   :  { %1389 = vmatpush.msrb.mxu1 %v12818_v48  ;;  %1429 = vmatpush.msra.mxu3 %v6421_v23  ;;  %v7336_v23 = vld [vmem:[%s11951_s5 + $0x228] sm:$0xff]  ;;  %12832 = vst [vmem:[#allocation13_spill] sm:$0xff] %v7454_v53  ;;  %v7460_v48 = vld [vmem:[%s11951_s5 + $0xe0] sm:$0xff] }
 0x26b   :  { %1410 = vmatpush.msrb.mxu2 %v7322_v39  ;;  %1450 = vmatpush.msra.mxu0 %v7328_v3  ;;  %12833 = vst [vmem:[#allocation14_spill] sm:$0xff] %v7460_v48 }
 0x26c   :  { %1343 = vmatmul.f32.vlgmr.msra.gmra.mxu2 %v7271_v14  ;;  %1383 = vmatmul.f32.vlgmr.msrb.gmra.mxu0 %v7271_v14 }
 0x26d   :  { %1411 = vmatpush.msrb.mxu2 %v7336_v23  ;;  %1451 = vmatpush.msra.mxu0 %v7342_v55 }
 0x26e   :  { %1390 = vmatpush.msrb.mxu1 %v12819_v52  ;;  %1430 = vmatpush.msra.mxu3 %v6435_v1  ;;  %v7364_v1 = vld [vmem:[%s11951_s5 + $0x1c8] sm:$0xff] }
 0x26f   :  { %1412 = vmatpush.msrb.mxu2 %v7350_v56  ;;  %1452 = vmatpush.msra.mxu0 %v7356_v62  ;;  %v7467_v52 = vld [vmem:[%s11951_s5 + $0x408] sm:$0xff] }
 0x270   :  { %1391 = vmatpush.msrb.mxu1 %v12820_v57  ;;  %1431 = vmatpush.msra.mxu3 %v6449_v25  ;;  %v7378_v25 = vld [vmem:[%s11951_s5 + $0x198] sm:$0xff]  ;;  %12834 = vst [vmem:[#allocation85_spill] sm:$0xff] %v7467_v52  ;;  %v7473_v57 = vld [vmem:[%s11951_s5 + $0xa8] sm:$0xff] }
 0x271   :  { %1413 = vmatpush.msrb.mxu2 %v7364_v1  ;;  %1453 = vmatpush.msra.mxu0 %v7370_v2 }
 0x272   :  { %1392 = vmatpush.msrb.mxu1 %v12821_v18  ;;  %1432 = vmatpush.msra.mxu3 %v12822_v17  ;;  %v7479_v18 = vld [vmem:[%s11951_s5 + $0xb0] sm:$0xff]  ;;  %v7492_v17 = vld [vmem:[%s11951_s5 + $0x78] sm:$0xff] }
 0x273   :  { %1414 = vmatpush.msrb.mxu2 %v7378_v25  ;;  %1454 = vmatpush.msra.mxu0 %v7384_v15  ;;  %12836 = vst [vmem:[#allocation128_spill] sm:$0xff] %v7479_v18 }
 0x274   :  { %1393 = vmatpush.msrb.mxu1 %v6471_v58  ;;  %1433 = vmatpush.msra.mxu3 %v7391_v37  ;;  %v7410_v58 = vld [vmem:[%s11951_s5 + $0x498] sm:$0xff]  ;;  %12838 = vst [vmem:[#allocation130_spill] sm:$0xff] %v7492_v17 }
 0x275   :  { %1415 = vmatpush.msrb.mxu2 %v7397_v27  ;;  %1455 = vmatpush.msra.mxu0 %v7403_v19  ;;  %12824 = vst [vmem:[#allocation17_spill] sm:$0xff] %v7410_v58 }
 0x276   :  { %1394 = vmatpush.msrb.mxu1 %v6480_v54  ;;  %1434 = vmatpush.msra.mxu3 %v7410_v58  ;;  %v7429_v54 = vld [vmem:[%s11951_s5 + $0x468] sm:$0xff] }
 0x277   :  { %1416 = vmatpush.msrb.mxu2 %v7416_v32  ;;  %1456 = vmatpush.msra.mxu0 %v7422_v6  ;;  %12827 = vst [vmem:[#allocation32_spill] sm:$0xff] %v7429_v54 }
 0x278   :  { %1395 = vmatpush.msrb.mxu1 %v6489_v7  ;;  %1435 = vmatpush.msra.mxu3 %v7429_v54  ;;  %v12830_v7 = vld [vmem:[#allocation15_spill] sm:$0xff] }
 0x279   :  { %1417 = vmatpush.msrb.mxu2 %v7435_v21  ;;  %1457 = vmatpush.msra.mxu0 %v7441_v43  ;;  %12835 = vst [vmem:[#allocation15_spill] sm:$0xff] %v7473_v57 }
 0x27a   :  { %1396 = vmatpush.msrb.mxu1 %v12830_v7  ;;  %1436 = vmatpush.msra.mxu3 %v7448_v28  ;;  %v7498_v7 = vld [vmem:[%s11951_s5 + $0x80] sm:$0xff] }
 0x27b   :  { %1418 = vmatpush.msrb.mxu2 %v7454_v53  ;;  %1458 = vmatpush.msra.mxu0 %v7460_v48  ;;  %12839 = vst [vmem:[#allocation131_spill] sm:$0xff] %v7498_v7  ;;  %v8015_v53 = vld [vmem:[%s11951_s5 + $0x308] sm:$0xff] }
 0x27c   :  { %1397 = vmatpush.msrb.mxu1 %v6507_v24  ;;  %1437 = vmatpush.msra.mxu3 %v7467_v52  ;;  %v7486_v24 = vld [vmem:[%s11951_s5 + $0x3d8] sm:$0xff]  ;;  %12929 = vst [vmem:[#allocation209_spill] sm:$0xff] %v8015_v53 }
 0x27d   :  { %1419 = vmatpush.msrb.mxu2 %v7473_v57  ;;  %1459 = vmatpush.msra.mxu0 %v7479_v18  ;;  %12837 = vst [vmem:[#allocation129_spill] sm:$0xff] %v7486_v24  ;;  %v12841_v18 = vld [vmem:[#allocation16_spill] sm:$0xff]  ;;  %v8008_v52 = vld [vmem:[%s11951_s5 + $0x338] sm:$0xff] }
 0x27e   :  { %1398 = vmatpush.msrb.mxu1 %v6516_v13  ;;  %1438 = vmatpush.msra.mxu3 %v7486_v24  ;;  %v12840_v13 = vld [vmem:[#allocation4_spill] sm:$0xff]  ;;  %12928 = vst [vmem:[#allocation208_spill] sm:$0xff] %v8008_v52 }
 0x27f   :  { %1420 = vmatpush.msrb.mxu2 %v7492_v17  ;;  %1460 = vmatpush.msra.mxu0 %v7498_v7  ;;  %v7506_v24 = vld [vmem:[%s11951_s5 + $0x48] sm:$0xff]  ;;  %v7512_v17 = vld [vmem:[%s11951_s5 + $0x50] sm:$0xff] }
 0x280   :  { %1399 = vmatpush.msrb.mxu1 %v12840_v13  ;;  %1439 = vmatpush.msra.mxu3 %v12841_v18  ;;  %12842 = vst [vmem:[#allocation4_spill] sm:$0xff] %v7506_v24  ;;  %v12844_v7 = vld [vmem:[#allocation5_spill] sm:$0xff]  ;;  %v7520_v18 = vld [vmem:[%s11951_s5 + $0x18] sm:$0xff]  ;;  %v7526_v13 = vld [vmem:[%s11951_s5 + $0x20] sm:$0xff] }
 0x281   :  { %1421 = vmatpush.msrb.mxu2 %v7506_v24  ;;  %12843 = vst [vmem:[#allocation16_spill] sm:$0xff] %v7512_v17  ;;  %1461 = vmatpush.msra.mxu0 %v7512_v17  ;;  %v7542_v17 = vld [vmem:[%s11953_s3 + $0x168] sm:$0xff] }
 0x282   :  { %1400 = vmatpush.msrb.mxu1 %v6542_v10  ;;  %1440 = vmatpush.msra.mxu3 %v12844_v7  ;;  %12845 = vst [vmem:[#allocation5_spill] sm:$0xff] %v7520_v18  ;;  %v7534_v10 = vld [vmem:[%s11951_s5 + $0x2f8] sm:$0xff]  ;;  %v12852_v24 = vld [vmem:[#allocation20_spill] sm:$0xff] }
 0x283   :  { %1422 = vmatpush.msrb.mxu2 %v7520_v18  ;;  %12846 = vst [vmem:[#allocation132_spill] sm:$0xff] %v7526_v13  ;;  %1462 = vmatpush.msra.mxu0 %v7526_v13  ;;  %v12848_v7 = vld [vmem:[#allocation19_spill] sm:$0xff]  ;;  %v12849_v18 = vld [vmem:[#allocation6_spill] sm:$0xff]  ;;  %v7548_v13 = vld [vmem:[%s11951_s5 + $0x2c8] sm:$0xff] }
 0x284   :  { %1423 = vmatmul.f32.vlgmr.msrb.gmra.mxu2 %v7271_v14  ;;  %1463 = vmatmul.f32.vlgmr.msra.gmra.mxu0 %v7271_v14  ;;  %12847 = vst [vmem:[#allocation133_spill] sm:$0xff] %v7534_v10 }
 0x285   :  { %1487 = vmatpush.msra.mxu2 %v7534_v10  ;;  %1401 = vmatpush.msrb.mxu1 %v12848_v7  ;;  %12850 = vst [vmem:[#allocation19_spill] sm:$0xff] %v7542_v17  ;;  %v7562_v7 = vld [vmem:[%s11951_s5 + $0x298] sm:$0xff]  ;;  %v1088_v10 = vpop.f32.mrf.mxu2 }
 0x286   :  { %1441 = vmatpush.msra.mxu3 %v12849_v18  ;;  %1577 = vmatpush.msrb.mxu0 %v7542_v17  ;;  %12851 = vst [vmem:[#allocation6_spill] sm:$0xff] %v7548_v13  ;;  %v7556_v18 = vld [vmem:[%s11953_s3 + $0x150] sm:$0xff]  ;;  %v1048_v17 = vpop.f32.mrf.mxu0 }
 0x287   :  { %1488 = vmatpush.msra.mxu2 %v7548_v13  ;;  %1402 = vmatpush.msrb.mxu1 %v12852_v24  ;;  %12853 = vst [vmem:[#allocation20_spill] sm:$0xff] %v7556_v18  ;;  %v7568_v24 = vld [vmem:[%s11953_s3 + $0x138] sm:$0xff] }
 0x288   :  { %1442 = vmatpush.msra.mxu3 %v6576_v5  ;;  %1578 = vmatpush.msrb.mxu0 %v7556_v18  ;;  %12854 = vst [vmem:[#allocation134_spill] sm:$0xff] %v7562_v7  ;;  %v7574_v5 = vld [vmem:[%s11951_s5 + $0x268] sm:$0xff]  ;;  %v7580_v18 = vld [vmem:[%s11953_s3 + $0x120] sm:$0xff]  ;;  %v7983_v13 = vld [vmem:[%s11951_s5 + $0x3f8] sm:$0xff] }
 0x289   :  { %1489 = vmatpush.msra.mxu2 %v7562_v7  ;;  %12855 = vst [vmem:[#allocation135_spill] sm:$0xff] %v7568_v24  ;;  %v7586_v7 = vld [vmem:[%s11951_s5 + $0x238] sm:$0xff] }
 0x28a   :  { %1579 = vmatpush.msrb.mxu0 %v7568_v24  ;;  %12856 = vst [vmem:[#allocation136_spill] sm:$0xff] %v7574_v5  ;;  %v7592_v24 = vld [vmem:[%s11953_s3 + $0x108] sm:$0xff] }
 0x28b   :  { %1490 = vmatpush.msra.mxu2 %v7574_v5  ;;  %12857 = vst [vmem:[#allocation137_spill] sm:$0xff] %v7580_v18  ;;  %v7598_v5 = vld [vmem:[%s11951_s5 + $0x208] sm:$0xff] }
 0x28c   :  { %1580 = vmatpush.msrb.mxu0 %v7580_v18  ;;  %12858 = vst [vmem:[#allocation138_spill] sm:$0xff] %v7586_v7  ;;  %v7604_v18 = vld [vmem:[%s11953_s3 + $0xf0] sm:$0xff] }
 0x28d   :  { %1491 = vmatpush.msra.mxu2 %v7586_v7  ;;  %12859 = vst [vmem:[#allocation139_spill] sm:$0xff] %v7592_v24  ;;  %v7610_v7 = vld [vmem:[%s11951_s5 + $0x1d8] sm:$0xff] }
 0x28e   :  { %1581 = vmatpush.msrb.mxu0 %v7592_v24  ;;  %12860 = vst [vmem:[#allocation140_spill] sm:$0xff] %v7598_v5  ;;  %v7616_v24 = vld [vmem:[%s11953_s3 + $0xd8] sm:$0xff] }
 0x28f   :  { %1492 = vmatpush.msra.mxu2 %v7598_v5  ;;  %12861 = vst [vmem:[#allocation141_spill] sm:$0xff] %v7604_v18  ;;  %v7622_v5 = vld [vmem:[%s11951_s5 + $0x1a8] sm:$0xff] }
 0x290   :  { %1582 = vmatpush.msrb.mxu0 %v7604_v18  ;;  %12862 = vst [vmem:[#allocation142_spill] sm:$0xff] %v7610_v7  ;;  %v7628_v18 = vld [vmem:[%s11953_s3 + $0xc0] sm:$0xff] }
 0x291   :  { %1493 = vmatpush.msra.mxu2 %v7610_v7  ;;  %12863 = vst [vmem:[#allocation143_spill] sm:$0xff] %v7616_v24  ;;  %v7634_v7 = vld [vmem:[%s11951_s5 + $0x178] sm:$0xff] }
 0x292   :  { %1583 = vmatpush.msrb.mxu0 %v7616_v24  ;;  %12864 = vst [vmem:[#allocation144_spill] sm:$0xff] %v7622_v5  ;;  %v7640_v24 = vld [vmem:[%s11953_s3 + $0xa8] sm:$0xff] }
 0x293   :  { %1494 = vmatpush.msra.mxu2 %v7622_v5  ;;  %12865 = vst [vmem:[#allocation145_spill] sm:$0xff] %v7628_v18  ;;  %v7646_v5 = vld [vmem:[%s11951_s5 + $0x148] sm:$0xff] }
 0x294   :  { %1584 = vmatpush.msrb.mxu0 %v7628_v18  ;;  %12866 = vst [vmem:[#allocation146_spill] sm:$0xff] %v7634_v7  ;;  %v7652_v18 = vld [vmem:[%s11953_s3 + $0x90] sm:$0xff] }
 0x295   :  { %1495 = vmatpush.msra.mxu2 %v7634_v7  ;;  %12867 = vst [vmem:[#allocation147_spill] sm:$0xff] %v7640_v24  ;;  %v7658_v7 = vld [vmem:[%s11951_s5 + $0x118] sm:$0xff] }
 0x296   :  { %1585 = vmatpush.msrb.mxu0 %v7640_v24  ;;  %12868 = vst [vmem:[#allocation148_spill] sm:$0xff] %v7646_v5  ;;  %v7664_v24 = vld [vmem:[%s11953_s3 + $0x78] sm:$0xff] }
 0x297   :  { %1496 = vmatpush.msra.mxu2 %v7646_v5  ;;  %12869 = vst [vmem:[#allocation149_spill] sm:$0xff] %v7652_v18  ;;  %v7670_v5 = vld [vmem:[%s11951_s5 + $0xe8] sm:$0xff] }
 0x298   :  { %1586 = vmatpush.msrb.mxu0 %v7652_v18  ;;  %12870 = vst [vmem:[#allocation150_spill] sm:$0xff] %v7658_v7  ;;  %v7676_v18 = vld [vmem:[%s11953_s3 + $0x60] sm:$0xff] }
 0x299   :  { %1497 = vmatpush.msra.mxu2 %v7658_v7  ;;  %12871 = vst [vmem:[#allocation151_spill] sm:$0xff] %v7664_v24  ;;  %v7682_v7 = vld [vmem:[%s11951_s5 + $0xb8] sm:$0xff] }
 0x29a   :  { %1587 = vmatpush.msrb.mxu0 %v7664_v24  ;;  %12872 = vst [vmem:[#allocation152_spill] sm:$0xff] %v7670_v5  ;;  %v7688_v24 = vld [vmem:[%s11953_s3 + $0x48] sm:$0xff] }
 0x29b   :  { %1498 = vmatpush.msra.mxu2 %v7670_v5  ;;  %12873 = vst [vmem:[#allocation153_spill] sm:$0xff] %v7676_v18  ;;  %v7694_v5 = vld [vmem:[%s11951_s5 + $0x88] sm:$0xff] }
 0x29c   :  { %1588 = vmatpush.msrb.mxu0 %v7676_v18  ;;  %12874 = vst [vmem:[#allocation154_spill] sm:$0xff] %v7682_v7  ;;  %v7700_v18 = vld [vmem:[%s11953_s3 + $0x30] sm:$0xff] }
 0x29d   :  { %1499 = vmatpush.msra.mxu2 %v7682_v7  ;;  %12875 = vst [vmem:[#allocation155_spill] sm:$0xff] %v7688_v24  ;;  %v7706_v7 = vld [vmem:[%s11951_s5 + $0x58] sm:$0xff] }
 0x29e   :  { %1589 = vmatpush.msrb.mxu0 %v7688_v24  ;;  %12876 = vst [vmem:[#allocation156_spill] sm:$0xff] %v7694_v5  ;;  %v7712_v24 = vld [vmem:[%s11953_s3 + $0x18] sm:$0xff] }
 0x29f   :  { %1500 = vmatpush.msra.mxu2 %v7694_v5  ;;  %12877 = vst [vmem:[#allocation157_spill] sm:$0xff] %v7700_v18  ;;  %v7718_v5 = vld [vmem:[%s11951_s5 + $0x28] sm:$0xff] }
 0x2a0   :  { %1590 = vmatpush.msrb.mxu0 %v7700_v18  ;;  %12878 = vst [vmem:[#allocation158_spill] sm:$0xff] %v7706_v7  ;;  %v7743_v18 = vld [vmem:[%s11953_s3 + $0x160] sm:$0xff] }
 0x2a1   :  { %1501 = vmatpush.msra.mxu2 %v7706_v7  ;;  %12879 = vst [vmem:[#allocation159_spill] sm:$0xff] %v7712_v24  ;;  %v7725_v7 = vld [vmem:[%s11953_s3] sm:$0xff] }
 0x2a2   :  { %1591 = vmatpush.msrb.mxu0 %v7712_v24  ;;  %12880 = vst [vmem:[#allocation160_spill] sm:$0xff] %v7718_v5  ;;  %v7731_v24 = vld [vmem:[%s11953_s3 + $0x178] sm:$0xff] }
 0x2a3   :  { %1502 = vmatpush.msra.mxu2 %v7718_v5  ;;  %12881 = vst [vmem:[#allocation161_spill] sm:$0xff] %v7725_v7  ;;  %v7737_v5 = vld [vmem:[%s11951_s5 + $0x5d0] sm:$0xff] }
 0x2a4   :  { %1503 = vmatmul.f32.vlgmr.msra.gmra.mxu2 %v7271_v14  ;;  %1592 = vmatpush.msrb.mxu0 %v7725_v7  ;;  %12882 = vst [vmem:[#allocation162_spill] sm:$0xff] %v7731_v24  ;;  %v7749_v7 = vld [vmem:[%s11951_s5 + $0x5a0] sm:$0xff] }
 0x2a5   :  { %1617 = vmatpush.msrb.mxu2 %v7731_v24  ;;  %12883 = vst [vmem:[#allocation163_spill] sm:$0xff] %v7737_v5  ;;  %v7755_v24 = vld [vmem:[%s11953_s3 + $0x148] sm:$0xff] }
 0x2a6   :  { %1703 = vmatpush.msra.mxu0 %v7737_v5  ;;  %12884 = vst [vmem:[#allocation164_spill] sm:$0xff] %v7743_v18  ;;  %v7761_v5 = vld [vmem:[%s11951_s5 + $0x570] sm:$0xff] }
 0x2a7   :  { %1618 = vmatpush.msrb.mxu2 %v7743_v18  ;;  %12885 = vst [vmem:[#allocation165_spill] sm:$0xff] %v7749_v7  ;;  %v7767_v18 = vld [vmem:[%s11953_s3 + $0x130] sm:$0xff] }
 0x2a8   :  { %1704 = vmatpush.msra.mxu0 %v7749_v7  ;;  %12886 = vst [vmem:[#allocation166_spill] sm:$0xff] %v7755_v24  ;;  %v7773_v7 = vld [vmem:[%s11951_s5 + $0x540] sm:$0xff] }
 0x2a9   :  { %1619 = vmatpush.msrb.mxu2 %v7755_v24  ;;  %12887 = vst [vmem:[#allocation167_spill] sm:$0xff] %v7761_v5  ;;  %v7779_v24 = vld [vmem:[%s11953_s3 + $0x118] sm:$0xff] }
 0x2aa   :  { %1705 = vmatpush.msra.mxu0 %v7761_v5  ;;  %12888 = vst [vmem:[#allocation168_spill] sm:$0xff] %v7767_v18  ;;  %v7785_v5 = vld [vmem:[%s11951_s5 + $0x510] sm:$0xff] }
 0x2ab   :  { %1620 = vmatpush.msrb.mxu2 %v7767_v18  ;;  %12889 = vst [vmem:[#allocation169_spill] sm:$0xff] %v7773_v7  ;;  %v7791_v18 = vld [vmem:[%s11953_s3 + $0x100] sm:$0xff] }
 0x2ac   :  { %1706 = vmatpush.msra.mxu0 %v7773_v7  ;;  %12890 = vst [vmem:[#allocation170_spill] sm:$0xff] %v7779_v24  ;;  %v7797_v7 = vld [vmem:[%s11951_s5 + $0x4e0] sm:$0xff] }
 0x2ad   :  { %1621 = vmatpush.msrb.mxu2 %v7779_v24  ;;  %12891 = vst [vmem:[#allocation171_spill] sm:$0xff] %v7785_v5  ;;  %v7803_v24 = vld [vmem:[%s11953_s3 + $0xe8] sm:$0xff] }
 0x2ae   :  { %1707 = vmatpush.msra.mxu0 %v7785_v5  ;;  %12892 = vst [vmem:[#allocation172_spill] sm:$0xff] %v7791_v18  ;;  %v7809_v5 = vld [vmem:[%s11951_s5 + $0x4b0] sm:$0xff] }
 0x2af   :  { %1622 = vmatpush.msrb.mxu2 %v7791_v18  ;;  %12893 = vst [vmem:[#allocation173_spill] sm:$0xff] %v7797_v7  ;;  %v7815_v18 = vld [vmem:[%s11953_s3 + $0xd0] sm:$0xff] }
 0x2b0   :  { %1708 = vmatpush.msra.mxu0 %v7797_v7  ;;  %12894 = vst [vmem:[#allocation174_spill] sm:$0xff] %v7803_v24  ;;  %v7821_v7 = vld [vmem:[%s11951_s5 + $0x480] sm:$0xff] }
 0x2b1   :  { %1623 = vmatpush.msrb.mxu2 %v7803_v24  ;;  %12895 = vst [vmem:[#allocation175_spill] sm:$0xff] %v7809_v5  ;;  %v7827_v24 = vld [vmem:[%s11953_s3 + $0xb8] sm:$0xff] }
 0x2b2   :  { %1709 = vmatpush.msra.mxu0 %v7809_v5  ;;  %12896 = vst [vmem:[#allocation176_spill] sm:$0xff] %v7815_v18  ;;  %v7833_v5 = vld [vmem:[%s11951_s5 + $0x450] sm:$0xff] }
 0x2b3   :  { %1624 = vmatpush.msrb.mxu2 %v7815_v18  ;;  %12897 = vst [vmem:[#allocation177_spill] sm:$0xff] %v7821_v7  ;;  %v7839_v18 = vld [vmem:[%s11953_s3 + $0xa0] sm:$0xff] }
 0x2b4   :  { %1710 = vmatpush.msra.mxu0 %v7821_v7  ;;  %12898 = vst [vmem:[#allocation178_spill] sm:$0xff] %v7827_v24  ;;  %v7845_v7 = vld [vmem:[%s11951_s5 + $0x420] sm:$0xff] }
 0x2b5   :  { %1625 = vmatpush.msrb.mxu2 %v7827_v24  ;;  %12899 = vst [vmem:[#allocation179_spill] sm:$0xff] %v7833_v5  ;;  %v7851_v24 = vld [vmem:[%s11953_s3 + $0x88] sm:$0xff] }
 0x2b6   :  { %1711 = vmatpush.msra.mxu0 %v7833_v5  ;;  %12900 = vst [vmem:[#allocation180_spill] sm:$0xff] %v7839_v18  ;;  %v7857_v5 = vld [vmem:[%s11951_s5 + $0x3f0] sm:$0xff] }
 0x2b7   :  { %1626 = vmatpush.msrb.mxu2 %v7839_v18  ;;  %12901 = vst [vmem:[#allocation181_spill] sm:$0xff] %v7845_v7  ;;  %v7863_v18 = vld [vmem:[%s11953_s3 + $0x70] sm:$0xff] }
 0x2b8   :  { %1712 = vmatpush.msra.mxu0 %v7845_v7  ;;  %12902 = vst [vmem:[#allocation182_spill] sm:$0xff] %v7851_v24  ;;  %v7869_v7 = vld [vmem:[%s11951_s5 + $0x3c0] sm:$0xff] }
 0x2b9   :  { %1627 = vmatpush.msrb.mxu2 %v7851_v24  ;;  %12903 = vst [vmem:[#allocation183_spill] sm:$0xff] %v7857_v5  ;;  %v7875_v24 = vld [vmem:[%s11953_s3 + $0x58] sm:$0xff] }
 0x2ba   :  { %1713 = vmatpush.msra.mxu0 %v7857_v5  ;;  %12904 = vst [vmem:[#allocation184_spill] sm:$0xff] %v7863_v18  ;;  %v7881_v5 = vld [vmem:[%s11951_s5 + $0x390] sm:$0xff] }
 0x2bb   :  { %1628 = vmatpush.msrb.mxu2 %v7863_v18  ;;  %12905 = vst [vmem:[#allocation185_spill] sm:$0xff] %v7869_v7  ;;  %v7887_v18 = vld [vmem:[%s11953_s3 + $0x40] sm:$0xff] }
 0x2bc   :  { %1714 = vmatpush.msra.mxu0 %v7869_v7  ;;  %12906 = vst [vmem:[#allocation186_spill] sm:$0xff] %v7875_v24  ;;  %v7893_v7 = vld [vmem:[%s11951_s5 + $0x360] sm:$0xff] }
 0x2bd   :  { %1629 = vmatpush.msrb.mxu2 %v7875_v24  ;;  %12907 = vst [vmem:[#allocation187_spill] sm:$0xff] %v7881_v5  ;;  %v7899_v24 = vld [vmem:[%s11953_s3 + $0x28] sm:$0xff] }
 0x2be   :  { %1715 = vmatpush.msra.mxu0 %v7881_v5  ;;  %12908 = vst [vmem:[#allocation188_spill] sm:$0xff] %v7887_v18  ;;  %v7905_v5 = vld [vmem:[%s11951_s5 + $0x330] sm:$0xff] }
 0x2bf   :  { %1630 = vmatpush.msrb.mxu2 %v7887_v18  ;;  %12909 = vst [vmem:[#allocation189_spill] sm:$0xff] %v7893_v7  ;;  %v7911_v18 = vld [vmem:[%s11953_s3 + $0x10] sm:$0xff] }
 0x2c0   :  { %1716 = vmatpush.msra.mxu0 %v7893_v7  ;;  %12910 = vst [vmem:[#allocation190_spill] sm:$0xff] %v7899_v24  ;;  %v7917_v7 = vld [vmem:[%s11951_s5 + $0x300] sm:$0xff] }
 0x2c1   :  { %1631 = vmatpush.msrb.mxu2 %v7899_v24  ;;  %12911 = vst [vmem:[#allocation191_spill] sm:$0xff] %v7905_v5  ;;  %v7923_v24 = vld [vmem:[%s11951_s5 + $0x5d8] sm:$0xff] }
 0x2c2   :  { %1717 = vmatpush.msra.mxu0 %v7905_v5  ;;  %12912 = vst [vmem:[#allocation192_spill] sm:$0xff] %v7911_v18  ;;  %v7929_v5 = vld [vmem:[%s11951_s5 + $0x5a8] sm:$0xff] }
 0x2c3   :  { %1632 = vmatpush.msrb.mxu2 %v7911_v18  ;;  %12913 = vst [vmem:[#allocation193_spill] sm:$0xff] %v7917_v7  ;;  %v7935_v18 = vld [vmem:[%s11951_s5 + $0x578] sm:$0xff] }
 0x2c4   :  { %1718 = vmatpush.msra.mxu0 %v7917_v7  ;;  %12914 = vst [vmem:[#allocation194_spill] sm:$0xff] %v7923_v24  ;;  %v7941_v7 = vld [vmem:[%s11951_s5 + $0x548] sm:$0xff] }
 0x2c5   :  { %1743 = vmatpush.msra.mxu2 %v7923_v24  ;;  %12915 = vst [vmem:[#allocation195_spill] sm:$0xff] %v7929_v5  ;;  %v7947_v24 = vld [vmem:[%s11951_s5 + $0x518] sm:$0xff] }
 0x2c6   :  { %12916 = vst [vmem:[#allocation196_spill] sm:$0xff] %v7935_v18 }
 0x2c7   :  { %1744 = vmatpush.msra.mxu2 %v7929_v5  ;;  %12917 = vst [vmem:[#allocation197_spill] sm:$0xff] %v7941_v7  ;;  %v7953_v5 = vld [vmem:[%s11951_s5 + $0x4e8] sm:$0xff] }
 0x2c8   :  { %12918 = vst [vmem:[#allocation198_spill] sm:$0xff] %v7947_v24 }
 0x2c9   :  { %1745 = vmatpush.msra.mxu2 %v7935_v18  ;;  %12919 = vst [vmem:[#allocation199_spill] sm:$0xff] %v7953_v5  ;;  %v7959_v18 = vld [vmem:[%s11951_s5 + $0x4b8] sm:$0xff] }
 0x2ca   :  { %12920 = vst [vmem:[#allocation200_spill] sm:$0xff] %v7959_v18 }
 0x2cb   :  { %1746 = vmatpush.msra.mxu2 %v7941_v7  ;;  %v7965_v7 = vld [vmem:[%s11951_s5 + $0x488] sm:$0xff]  ;;  %12924 = vst [vmem:[#allocation204_spill] sm:$0xff] %v7983_v13 }
 0x2cc   :  { %12921 = vst [vmem:[#allocation201_spill] sm:$0xff] %v7965_v7 }
 0x2cd   :  { %1747 = vmatpush.msra.mxu2 %v7947_v24  ;;  %v7971_v24 = vld [vmem:[%s11951_s5 + $0x458] sm:$0xff] }
 0x2ce   :  { %12922 = vst [vmem:[#allocation202_spill] sm:$0xff] %v7971_v24 }
 0x2cf   :  { %1748 = vmatpush.msra.mxu2 %v7953_v5  ;;  %v7977_v5 = vld [vmem:[%s11951_s5 + $0x428] sm:$0xff] }
 0x2d0   :  { %12923 = vst [vmem:[#allocation203_spill] sm:$0xff] %v7977_v5 }
 0x2d1   :  { %1749 = vmatpush.msra.mxu2 %v7959_v18  ;;  %v1068_v18 = vpop.f32.mrf.mxu1 }
 0x2d3   :  { %1750 = vmatpush.msra.mxu2 %v7965_v7  ;;  %v7989_v7 = vld [vmem:[%s11951_s5 + $0x3c8] sm:$0xff] }
 0x2d4   :  { %12925 = vst [vmem:[#allocation205_spill] sm:$0xff] %v7989_v7 }
 0x2d5   :  { %1751 = vmatpush.msra.mxu2 %v7971_v24  ;;  %v1028_v24 = vpop.f32.mrf.mxu3 }
 0x2d6   :  { %v1029_v57 = vadd.f32 %v1028_v24, %v6651_v33  ;;  %v1069_v24 = vadd.f32 %v1068_v18, %v6655_v45 }
 0x2d7   :  { %1752 = vmatpush.msra.mxu2 %v7977_v5  ;;  %v7995_v5 = vld [vmem:[%s11951_s5 + $0x398] sm:$0xff] }
 0x2d8   :  { %12926 = vst [vmem:[#allocation206_spill] sm:$0xff] %v7995_v5  ;;  %v1089_v43 = vadd.f32 %v1088_v10, %v1069_v24  ;;  %v1128_v24 = vpop.f32.mrf.mxu0 }
 0x2d9   :  { %1753 = vmatpush.msra.mxu2 %v7983_v13  ;;  %v8001_v13 = vld [vmem:[%s11951_s5 + $0x368] sm:$0xff] }
 0x2da   :  { %12927 = vst [vmem:[#allocation207_spill] sm:$0xff] %v8001_v13 }
 0x2db   :  { %1754 = vmatpush.msra.mxu2 %v7989_v7 }
 0x2dd   :  { %1755 = vmatpush.msra.mxu2 %v7995_v5  ;;  %v1049_v5 = vadd.f32 %v1048_v17, %v1029_v57  ;;  %v1108_v32 = vpop.f32.mrf.mxu3 }
 0x2df   :  { %1756 = vmatpush.msra.mxu2 %v8001_v13 }
 0x2e0   :  { %v1198_v7 = vpop.f32.mrf.mxu1 }
 0x2e1   :  { %1757 = vmatpush.msra.mxu2 %v8008_v52  ;;  %v1199_v48 = vadd.f32 %v1198_v7, %v6664_v61 }
 0x2e3   :  { %1758 = vmatpush.msra.mxu2 %v8015_v53  ;;  %v1241_v13 = vadd.f32 %v1199_v48, %v1049_v5 }
 0x2e5   :  { %v3739_v33 = vmul.f32 -1.442695, %v1241_v13 }
 0x2e6   :  { %v1218_v28 = vpop.f32.mrf.mxu2 }
 0x2e7   :  { %3797 = vpow2.f32 %v3739_v33  ;;  %v1219_v21 = vadd.f32 %v1218_v28, %v6666_v59 }
 0x2e9   :  { %v1242_v52 = vadd.f32 %v1219_v21, %v1089_v43  ;;  %v1109_v21 = vadd.f32 %v1108_v32, %v6671_v22 }
 0x2eb   :  { %v3740_v57 = vmul.f32 -1.442695, %v1242_v52  ;;  %v1238_v52 = vpop.f32.mrf.mxu3 }
 0x2ed   :  { %v3798_v17 = vpop.eup %3797  ;;  %3799 = vpow2.f32 %v3740_v57 }
 0x2ee   :  { %v1246_v7 = vadd.f32 1.0, %v3798_v17 }
 0x2f0   :  { %3801 = vrcp.f32 %v1246_v7  ;;  %v1258_v18 = vand.u32 2147483648, %v1246_v7  ;;  %v1256_v10 = vand.u32 2147483647, %v1246_v7  ;;  %vm1252_vm10 = vweird.f32 %v1246_v7 }
 0x2f2   :  { %v1259_v57 = vor.u32 1.1754944e-38, %v1258_v18  ;;  %vm1257_vm12 = vcmp.eq.f32.partialorder %v1256_v10, 8.507059e+37 }
 0x2f3   :  { %v3800_v61 = vpop.eup %3799 }
 0x2f4   :  { %v1265_v54 = vadd.f32 1.0, %v3800_v61  ;;  %v1129_v61 = vadd.f32 %v1128_v24, %v1109_v21  ;;  %v12955_v21 = vld [vmem:[#allocation72_spill] sm:$0xff] }
 0x2f6   :  { %v3802_v6 = vpop.eup %3801  ;;  %3803 = vrcp.f32 %v1265_v54  ;;  %v1277_v32 = vand.u32 2147483648, %v1265_v54  ;;  %vm1271_vm14 = vweird.f32 %v1265_v54 }
 0x2f7   :  { %v1248_v48 = vmul.f32 %v3802_v6, %v1246_v7  ;;  %vm1253_vm9 = vweird.f32 %v3802_v6 }
 0x2f8   :  { %vm1254_vm11 = vmor %vm1252_vm10, %vm1253_vm9  ;;  %v1278_v18 = vor.u32 1.1754944e-38, %v1277_v32  ;;  %v12964_v32 = vld [vmem:[#allocation83_spill] sm:$0xff] }
 0x2f9   :  { %v1249_v5 = vsub.f32 1.0, %v1248_v48  ;;  %v1239_v48 = vadd.f32 %v1238_v52, %v6674_v26  ;;  %v12958_v52 = vld [vmem:[#allocation76_spill] sm:$0xff] }
 0x2fb   :  { %v1250_v13 = vmul.f32 %v3802_v6, %v1249_v5 }
 0x2fc   :  { %v3804_v33 = vpop.eup %3803 }
 0x2fd   :  { %v1267_v43 = vmul.f32 %v3804_v33, %v1265_v54  ;;  %v1251_v28 = vadd.f32 %v3802_v6, %v1250_v13  ;;  %vm1272_vm13 = vweird.f32 %v3804_v33  ;;  %v1275_v13 = vand.u32 2147483647, %v1265_v54  ;;  %v12953_v54 = vld [vmem:[#allocation66_spill] sm:$0xff] }
 0x2fe   :  { %vm1273_vm15 = vmor %vm1271_vm14, %vm1272_vm13 }
 0x2ff   :  { %v1268_v17 = vsub.f32 1.0, %v1267_v43  ;;  %v1255_v53 = vsel %vm1254_vm11, %v3802_v6, %v1251_v28  ;;  %vm1276_vm0 = vcmp.eq.f32.partialorder %v1275_v13, 8.507059e+37  ;;  %v12956_v43 = vld [vmem:[#allocation74_spill] sm:$0xff]  ;;  %v12957_v28 = vld [vmem:[#allocation75_spill] sm:$0xff]  ;;  %v12965_v13 = vld [vmem:[#allocation84_spill] sm:$0xff] }
 0x300   :  { %v1260_v59 = vsel %vm1257_vm12, %v1259_v57, %v1255_v53  ;;  %v12959_v57 = vld [vmem:[#allocation78_spill] sm:$0xff] }
 0x301   :  { %v1281_v5 = vmul.f32 %v1260_v59, %v1129_v61  ;;  %v1269_v45 = vmul.f32 %v3804_v33, %v1268_v17  ;;  %v12931_v59 = vld [vmem:[#allocation51_spill] sm:$0xff]  ;;  %v12961_v17 = vld [vmem:[#allocation80_spill] sm:$0xff] }
 0x302   :  { %v12960_v61 = vld [vmem:[#allocation79_spill] sm:$0xff] }
 0x303   :  { %v1282_v58 = vadd.f32 %v1281_v5, %v1239_v48  ;;  %v1270_v19 = vadd.f32 %v3804_v33, %v1269_v45  ;;  %v12930_v45 = vld [vmem:[#allocation25_spill] sm:$0xff]  ;;  %v12963_v5 = vld [vmem:[#allocation82_spill] sm:$0xff] }
 0x304   :  { %v12962_v48 = vld [vmem:[#allocation81_spill] sm:$0xff] }
 0x305   :  { %3805 = vtanh.f32 %v1282_v58  ;;  %v1274_v7 = vsel %vm1273_vm15, %v3804_v33, %v1270_v19  ;;  %v12951_v19 = vld [vmem:[#allocation58_spill] sm:$0xff]  ;;  %v12952_v58 = vld [vmem:[#allocation60_spill] sm:$0xff]  ;;  %v12954_v33 = vld [vmem:[#allocation71_spill] sm:$0xff] }
 0x306   :  { %v1279_v10 = vsel %vm1276_vm0, %v1278_v18, %v1274_v7  ;;  %v12966_v7 = vld [vmem:[#allocation59_spill] sm:$0xff]  ;;  %v12967_v18 = vld [vmem:[#allocation86_spill] sm:$0xff] }
 0x30b   :  { %v3806_v22 = vpop.eup %3805 }
 0x30c   :  { %v1284_v6 = vsub.f32 %v6677_v9, %v3806_v22  ;;  %v12933_v9 = vld [vmem:[#allocation55_spill] sm:$0xff] }
 0x30e   :  { %v1285_v53 = vmul.f32 %v1284_v6, %v1279_v10  ;;  %v12968_v6 = vld [vmem:[#allocation87_spill] sm:$0xff]  ;;  %v12969_v10 = vld [vmem:[#allocation88_spill] sm:$0xff] }
 0x310   :  { %v8023_v24 = vadd.f32 %v3806_v22, %v1285_v53  ;;  %v12932_v22 = vld [vmem:[#allocation26_spill] sm:$0xff]  ;;  %v12970_v53 = vld [vmem:[#allocation89_spill] sm:$0xff] }
 0x312   :  { %1323 = vmatmul.f32.vlgmr.msra.gmra.mxu1 %v8023_v24  ;;  %1363 = vmatmul.f32.vlgmr.msrb.gmra.mxu3 %v8023_v24 }
 0x313   :  { %1467 = vmatpush.msra.mxu1 %v6684_v11  ;;  %1507 = vmatpush.msrb.mxu3 %v6690_v40  ;;  %v12934_v11 = vld [vmem:[#allocation27_spill] sm:$0xff]  ;;  %v12935_v40 = vld [vmem:[#allocation57_spill] sm:$0xff] }
 0x315   :  { %1468 = vmatpush.msra.mxu1 %v6696_v42  ;;  %1508 = vmatpush.msrb.mxu3 %v6702_v60  ;;  %v12936_v42 = vld [vmem:[#allocation28_spill] sm:$0xff]  ;;  %v12937_v60 = vld [vmem:[#allocation30_spill] sm:$0xff] }
 0x317   :  { %1469 = vmatpush.msra.mxu1 %v6708_v0  ;;  %1509 = vmatpush.msrb.mxu3 %v6714_v29  ;;  %v12938_v0 = vld [vmem:[#allocation33_spill] sm:$0xff]  ;;  %v12939_v29 = vld [vmem:[#allocation34_spill] sm:$0xff] }
 0x319   :  { %1470 = vmatpush.msra.mxu1 %v6720_v35  ;;  %1510 = vmatpush.msrb.mxu3 %v6726_v20  ;;  %v12940_v35 = vld [vmem:[#allocation35_spill] sm:$0xff]  ;;  %v12941_v20 = vld [vmem:[#allocation37_spill] sm:$0xff] }
 0x31a   :  { %1403 = vmatmul.f32.vlgmr.msrb.gmra.mxu1 %v8023_v24  ;;  %1443 = vmatmul.f32.vlgmr.msra.gmra.mxu3 %v8023_v24 }
 0x31b   :  { %1471 = vmatpush.msra.mxu1 %v6734_v8  ;;  %1511 = vmatpush.msrb.mxu3 %v6740_v34  ;;  %v12942_v8 = vld [vmem:[#allocation40_spill] sm:$0xff]  ;;  %v12943_v34 = vld [vmem:[#allocation41_spill] sm:$0xff] }
 0x31d   :  { %1472 = vmatpush.msra.mxu1 %v6746_v38  ;;  %1512 = vmatpush.msrb.mxu3 %v6752_v31  ;;  %v12944_v38 = vld [vmem:[#allocation42_spill] sm:$0xff]  ;;  %v12945_v31 = vld [vmem:[#allocation44_spill] sm:$0xff] }
 0x31f   :  { %1473 = vmatpush.msra.mxu1 %v6758_v12  ;;  %1513 = vmatpush.msrb.mxu3 %v6764_v4  ;;  %v12946_v12 = vld [vmem:[#allocation47_spill] sm:$0xff]  ;;  %v12947_v4 = vld [vmem:[#allocation48_spill] sm:$0xff] }
 0x321   :  { %1474 = vmatpush.msra.mxu1 %v6770_v36  ;;  %1514 = vmatpush.msrb.mxu3 %v6776_v16  ;;  %v12948_v36 = vld [vmem:[#allocation49_spill] sm:$0xff]  ;;  %v12949_v16 = vld [vmem:[#allocation52_spill] sm:$0xff] }
 0x323   :  { %1475 = vmatpush.msra.mxu1 %v6782_v47  ;;  %1515 = vmatpush.msrb.mxu3 %v12930_v45  ;;  %v12950_v47 = vld [vmem:[#allocation56_spill] sm:$0xff]  ;;  %v12971_v45 = vld [vmem:[#allocation90_spill] sm:$0xff] }
 0x325   :  { %1476 = vmatpush.msra.mxu1 %v12931_v59  ;;  %1516 = vmatpush.msrb.mxu3 %v12932_v22  ;;  %v12972_v59 = vld [vmem:[#allocation91_spill] sm:$0xff]  ;;  %v12973_v22 = vld [vmem:[#allocation92_spill] sm:$0xff] }
 0x327   :  { %1477 = vmatpush.msra.mxu1 %v12933_v9  ;;  %1517 = vmatpush.msrb.mxu3 %v12934_v11  ;;  %v12974_v9 = vld [vmem:[#allocation93_spill] sm:$0xff]  ;;  %v12975_v11 = vld [vmem:[#allocation94_spill] sm:$0xff] }
 0x329   :  { %1478 = vmatpush.msra.mxu1 %v12935_v40  ;;  %1518 = vmatpush.msrb.mxu3 %v12936_v42  ;;  %v12976_v40 = vld [vmem:[#allocation95_spill] sm:$0xff]  ;;  %v12977_v42 = vld [vmem:[#allocation96_spill] sm:$0xff] }
 0x32b   :  { %1479 = vmatpush.msra.mxu1 %v12937_v60  ;;  %1519 = vmatpush.msrb.mxu3 %v12938_v0  ;;  %v12978_v60 = vld [vmem:[#allocation97_spill] sm:$0xff]  ;;  %v12979_v0 = vld [vmem:[#allocation98_spill] sm:$0xff] }
 0x32d   :  { %1480 = vmatpush.msra.mxu1 %v12939_v29  ;;  %1520 = vmatpush.msrb.mxu3 %v12940_v35  ;;  %v12980_v29 = vld [vmem:[#allocation99_spill] sm:$0xff]  ;;  %v12981_v35 = vld [vmem:[#allocation100_spill] sm:$0xff] }
 0x32f   :  { %1481 = vmatpush.msra.mxu1 %v12941_v20  ;;  %1521 = vmatpush.msrb.mxu3 %v12942_v8  ;;  %v12982_v20 = vld [vmem:[#allocation101_spill] sm:$0xff]  ;;  %v12983_v8 = vld [vmem:[#allocation102_spill] sm:$0xff] }
 0x331   :  { %1482 = vmatpush.msra.mxu1 %v12943_v34  ;;  %1522 = vmatpush.msrb.mxu3 %v12944_v38  ;;  %v12984_v34 = vld [vmem:[#allocation103_spill] sm:$0xff]  ;;  %v12985_v38 = vld [vmem:[#allocation104_spill] sm:$0xff] }
 0x332   :  { %1483 = vmatmul.f32.vlgmr.msra.gmra.mxu1 %v8023_v24  ;;  %1523 = vmatmul.f32.vlgmr.msrb.gmra.mxu3 %v8023_v24 }
 0x333   :  { %1597 = vmatpush.msrb.mxu1 %v12945_v31  ;;  %1683 = vmatpush.msra.mxu3 %v12946_v12  ;;  %v12986_v31 = vld [vmem:[#allocation105_spill] sm:$0xff]  ;;  %v12987_v12 = vld [vmem:[#allocation106_spill] sm:$0xff] }
 0x335   :  { %1598 = vmatpush.msrb.mxu1 %v12947_v4  ;;  %1684 = vmatpush.msra.mxu3 %v12948_v36  ;;  %v12988_v4 = vld [vmem:[#allocation107_spill] sm:$0xff]  ;;  %v12989_v36 = vld [vmem:[#allocation108_spill] sm:$0xff] }
 0x337   :  { %1599 = vmatpush.msrb.mxu1 %v12949_v16  ;;  %1685 = vmatpush.msra.mxu3 %v12950_v47  ;;  %v12990_v16 = vld [vmem:[#allocation109_spill] sm:$0xff]  ;;  %v12991_v47 = vld [vmem:[#allocation110_spill] sm:$0xff] }
 0x339   :  { %1600 = vmatpush.msrb.mxu1 %v12951_v19  ;;  %1686 = vmatpush.msra.mxu3 %v12952_v58  ;;  %v12992_v19 = vld [vmem:[#allocation111_spill] sm:$0xff]  ;;  %v12993_v58 = vld [vmem:[#allocation112_spill] sm:$0xff] }
 0x33b   :  { %1601 = vmatpush.msrb.mxu1 %v12953_v54  ;;  %1687 = vmatpush.msra.mxu3 %v12954_v33  ;;  %v12994_v54 = vld [vmem:[#allocation113_spill] sm:$0xff]  ;;  %v12995_v33 = vld [vmem:[#allocation114_spill] sm:$0xff] }
 0x33d   :  { %1602 = vmatpush.msrb.mxu1 %v12955_v21  ;;  %1688 = vmatpush.msra.mxu3 %v12956_v43  ;;  %v12996_v21 = vld [vmem:[#allocation115_spill] sm:$0xff]  ;;  %v12997_v43 = vld [vmem:[#allocation116_spill] sm:$0xff] }
 0x33f   :  { %1603 = vmatpush.msrb.mxu1 %v12957_v28  ;;  %1689 = vmatpush.msra.mxu3 %v12958_v52  ;;  %v12998_v28 = vld [vmem:[#allocation117_spill] sm:$0xff]  ;;  %v12999_v52 = vld [vmem:[#allocation118_spill] sm:$0xff] }
 0x341   :  { %1604 = vmatpush.msrb.mxu1 %v12959_v57  ;;  %1690 = vmatpush.msra.mxu3 %v12960_v61  ;;  %v13000_v57 = vld [vmem:[#allocation119_spill] sm:$0xff]  ;;  %v13001_v61 = vld [vmem:[#allocation120_spill] sm:$0xff] }
 0x343   :  { %1605 = vmatpush.msrb.mxu1 %v12961_v17  ;;  %1691 = vmatpush.msra.mxu3 %v12962_v48  ;;  %v13002_v17 = vld [vmem:[#allocation121_spill] sm:$0xff]  ;;  %v13003_v48 = vld [vmem:[#allocation122_spill] sm:$0xff] }
 0x345   :  { %1606 = vmatpush.msrb.mxu1 %v12963_v5  ;;  %1692 = vmatpush.msra.mxu3 %v12964_v32  ;;  %v13004_v5 = vld [vmem:[#allocation123_spill] sm:$0xff]  ;;  %v13005_v32 = vld [vmem:[#allocation124_spill] sm:$0xff] }
 0x347   :  { %1607 = vmatpush.msrb.mxu1 %v12965_v13  ;;  %1693 = vmatpush.msra.mxu3 %v12966_v7  ;;  %v13006_v13 = vld [vmem:[#allocation125_spill] sm:$0xff]  ;;  %v13007_v7 = vld [vmem:[#allocation126_spill] sm:$0xff] }
 0x349   :  { %1608 = vmatpush.msrb.mxu1 %v12967_v18  ;;  %1694 = vmatpush.msra.mxu3 %v12968_v6  ;;  %v13008_v18 = vld [vmem:[#allocation127_spill] sm:$0xff]  ;;  %v1304_v6 = vpop.f32.mrf.mxu0 }
 0x34b   :  { %1609 = vmatpush.msrb.mxu1 %v12969_v10  ;;  %1695 = vmatpush.msra.mxu3 %v12970_v53  ;;  %v13009_v10 = vld [vmem:[#allocation61_spill] sm:$0xff] }
 0x34c   :  { %v1305_v53 = vadd.f32 %v1304_v6, %v13009_v10  ;;  %v13015_v6 = vld [vmem:[#allocation39_spill] sm:$0xff] }
 0x34d   :  { %1610 = vmatpush.msrb.mxu1 %v12971_v45  ;;  %1696 = vmatpush.msra.mxu3 %v12972_v59  ;;  %v13010_v59 = vld [vmem:[#allocation65_spill] sm:$0xff] }
 0x34f   :  { %1611 = vmatpush.msrb.mxu1 %v12973_v22  ;;  %1697 = vmatpush.msra.mxu3 %v12974_v9  ;;  %v13011_v22 = vld [vmem:[#allocation23_spill] sm:$0xff] }
 0x350   :  { %v111_v9 = vadd.f32 %v13011_v22, %v13010_v59 }
 0x351   :  { %1612 = vmatpush.msrb.mxu1 %v12975_v11  ;;  %1698 = vmatpush.msra.mxu3 %v12976_v40  ;;  %v1344_v40 = vpop.f32.mrf.mxu2 }
 0x353   :  { %1723 = vmatpush.msra.mxu1 %v12977_v42  ;;  %1763 = vmatpush.msrb.mxu3 %v12978_v60  ;;  %v13012_v60 = vld [vmem:[#allocation67_spill] sm:$0xff] }
 0x355   :  { %1724 = vmatpush.msra.mxu1 %v12979_v0  ;;  %1764 = vmatpush.msrb.mxu3 %v12980_v29  ;;  %v1345_v0 = vadd.f32 %v1344_v40, %v13012_v60 }
 0x357   :  { %1725 = vmatpush.msra.mxu1 %v12981_v35  ;;  %1765 = vmatpush.msrb.mxu3 %v12982_v20  ;;  %v13013_v20 = vld [vmem:[#allocation68_spill] sm:$0xff] }
 0x359   :  { %1726 = vmatpush.msra.mxu1 %v12983_v8  ;;  %1766 = vmatpush.msrb.mxu3 %v12984_v34  ;;  %v13014_v8 = vld [vmem:[#allocation24_spill] sm:$0xff] }
 0x35a   :  { %v152_v34 = vadd.f32 %v13014_v8, %v13013_v20 }
 0x35b   :  { %1727 = vmatpush.msra.mxu1 %v12985_v38  ;;  %1767 = vmatpush.msrb.mxu3 %v12986_v31 }
 0x35d   :  { %1728 = vmatpush.msra.mxu1 %v12987_v12  ;;  %1768 = vmatpush.msrb.mxu3 %v12988_v4 }
 0x35f   :  { %1729 = vmatpush.msra.mxu1 %v12989_v36  ;;  %1769 = vmatpush.msrb.mxu3 %v12990_v16 }
 0x361   :  { %1730 = vmatpush.msra.mxu1 %v12991_v47  ;;  %1770 = vmatpush.msrb.mxu3 %v12992_v19 }
 0x363   :  { %1731 = vmatpush.msra.mxu1 %v12993_v58  ;;  %1771 = vmatpush.msrb.mxu3 %v12994_v54 }
 0x365   :  { %1732 = vmatpush.msra.mxu1 %v12995_v33  ;;  %1772 = vmatpush.msrb.mxu3 %v12996_v21  ;;  %v1384_v33 = vpop.f32.mrf.mxu0 }
 0x367   :  { %1733 = vmatpush.msra.mxu1 %v12997_v43  ;;  %1773 = vmatpush.msrb.mxu3 %v12998_v28 }
 0x369   :  { %1734 = vmatpush.msra.mxu1 %v12999_v52  ;;  %1774 = vmatpush.msrb.mxu3 %v13000_v57 }
 0x36b   :  { %1735 = vmatpush.msra.mxu1 %v13001_v61  ;;  %1775 = vmatpush.msrb.mxu3 %v13002_v17  ;;  %v1385_v61 = vadd.f32 %v1384_v33, %v12814_v41  ;;  %v13026_v33 = vld [vmem:[#allocation85_spill] sm:$0xff] }
 0x36d   :  { %1736 = vmatpush.msra.mxu1 %v13003_v48  ;;  %1776 = vmatpush.msrb.mxu3 %v13004_v5 }
 0x36f   :  { %1737 = vmatpush.msra.mxu1 %v13005_v32  ;;  %1777 = vmatpush.msrb.mxu3 %v13006_v13 }
 0x371   :  { %1738 = vmatpush.msra.mxu1 %v13007_v7  ;;  %1778 = vmatpush.msrb.mxu3 %v13008_v18 }
 0x38f   :  { %v1324_v45 = vpop.f32.mrf.mxu1 }
 0x390   :  { %v1325_v11 = vadd.f32 %v1324_v45, %v1305_v53  ;;  %v193_v53 = vadd.f32 %v13015_v6, %v12815_v30  ;;  %v13035_v6 = vld [vmem:[#allocation132_spill] sm:$0xff] }
 0x392   :  { %v1531_v42 = vadd.f32 %v1325_v11, %v111_v9 }
 0x394   :  { %v3741_v29 = vmul.f32 -1.442695, %v1531_v42 }
 0x395   :  { %v1364_v35 = vpop.f32.mrf.mxu3 }
 0x396   :  { %3807 = vpow2.f32 %v3741_v29  ;;  %v1365_v38 = vadd.f32 %v1364_v35, %v1345_v0 }
 0x397   :  { %v1404_v57 = vpop.f32.mrf.mxu1 }
 0x398   :  { %v1532_v31 = vadd.f32 %v1365_v38, %v152_v34  ;;  %v1405_v13 = vadd.f32 %v1404_v57, %v1385_v61  ;;  %v13030_v57 = vld [vmem:[#allocation130_spill] sm:$0xff]  ;;  %v13031_v61 = vld [vmem:[#allocation131_spill] sm:$0xff] }
 0x39a   :  { %v3742_v12 = vmul.f32 -1.442695, %v1532_v31 }
 0x39c   :  { %v3808_v4 = vpop.eup %3807  ;;  %3809 = vpow2.f32 %v3742_v12  ;;  %v8154_v12 = vld [vmem:[%s11951_s5 + $0x5e8] sm:$0xff] }
 0x39d   :  { %v1536_v36 = vadd.f32 1.0, %v3808_v4  ;;  %v13021_v4 = vld [vmem:[#allocation10_spill] sm:$0xff] }
 0x39f   :  { %3811 = vrcp.f32 %v1536_v36  ;;  %v1548_v21 = vand.u32 2147483648, %v1536_v36  ;;  %v1546_v28 = vand.u32 2147483647, %v1536_v36  ;;  %vm1542_vm2 = vweird.f32 %v1536_v36 }
 0x3a1   :  { %v1549_v5 = vor.u32 1.1754944e-38, %v1548_v21  ;;  %vm1547_vm4 = vcmp.eq.f32.partialorder %v1546_v28, 8.507059e+37  ;;  %v13027_v21 = vld [vmem:[#allocation15_spill] sm:$0xff]  ;;  %v8281_v28 = vld [vmem:[%s11951_s5 + $0x3d0] sm:$0xff] }
 0x3a2   :  { %v3810_v16 = vpop.eup %3809 }
 0x3a3   :  { %v1555_v47 = vadd.f32 1.0, %v3810_v16  ;;  %v8263_v16 = vld [vmem:[%s11951_s5 + $0x430] sm:$0xff] }
 0x3a5   :  { %v3812_v19 = vpop.eup %3811  ;;  %3813 = vrcp.f32 %v1555_v47  ;;  %v1567_v40 = vand.u32 2147483648, %v1555_v47  ;;  %vm1561_vm6 = vweird.f32 %v1555_v47  ;;  %v1565_v42 = vand.u32 2147483647, %v1555_v47 }
 0x3a6   :  { %v1538_v58 = vmul.f32 %v3812_v19, %v1536_v36  ;;  %vm1543_vm1 = vweird.f32 %v3812_v19  ;;  %v13022_v36 = vld [vmem:[#allocation11_spill] sm:$0xff] }
 0x3a7   :  { %vm1544_vm3 = vmor %vm1542_vm2, %vm1543_vm1  ;;  %v1568_v35 = vor.u32 1.1754944e-38, %v1567_v40  ;;  %vm1566_vm8 = vcmp.eq.f32.partialorder %v1565_v42, 8.507059e+37  ;;  %v8335_v40 = vld [vmem:[%s11951_s5 + $0x310] sm:$0xff]  ;;  %v8341_v42 = vld [vmem:[%s11951_s5 + $0x318] sm:$0xff] }
 0x3a8   :  { %v1539_v54 = vsub.f32 1.0, %v1538_v58  ;;  %v13025_v58 = vld [vmem:[#allocation14_spill] sm:$0xff] }
 0x3aa   :  { %v1540_v43 = vmul.f32 %v3812_v19, %v1539_v54  ;;  %v8272_v54 = vld [vmem:[%s11951_s5 + $0x400] sm:$0xff] }
 0x3ab   :  { %v3814_v52 = vpop.eup %3813 }
 0x3ac   :  { %v1557_v17 = vmul.f32 %v3814_v52, %v1555_v47  ;;  %v1541_v48 = vadd.f32 %v3812_v19, %v1540_v43  ;;  %vm1562_vm5 = vweird.f32 %v3814_v52  ;;  %v13023_v47 = vld [vmem:[#allocation12_spill] sm:$0xff] }
 0x3ad   :  { %vm1563_vm7 = vmor %vm1561_vm6, %vm1562_vm5  ;;  %v13028_v43 = vld [vmem:[#allocation128_spill] sm:$0xff] }
 0x3ae   :  { %v1558_v32 = vsub.f32 1.0, %v1557_v17  ;;  %v1545_v7 = vsel %vm1544_vm3, %v3812_v19, %v1541_v48  ;;  %v13024_v19 = vld [vmem:[#allocation13_spill] sm:$0xff]  ;;  %v8290_v17 = vld [vmem:[%s11951_s5 + $0x3a0] sm:$0xff] }
 0x3af   :  { %v1550_v18 = vsel %vm1547_vm4, %v1549_v5, %v1545_v7  ;;  %v8296_v48 = vld [vmem:[%s11951_s5 + $0x3a8] sm:$0xff]  ;;  %v8310_v7 = vld [vmem:[%s11951_s5 + $0x378] sm:$0xff] }
 0x3b0   :  { %v1571_v45 = vmul.f32 %v1550_v18, %v1405_v13  ;;  %v1559_v22 = vmul.f32 %v3814_v52, %v1558_v32  ;;  %v13032_v5 = vld [vmem:[#allocation4_spill] sm:$0xff]  ;;  %v8304_v13 = vld [vmem:[%s11951_s5 + $0x370] sm:$0xff] }
 0x3b1   :  { %v13033_v32 = vld [vmem:[#allocation16_spill] sm:$0xff]  ;;  %v13034_v18 = vld [vmem:[#allocation5_spill] sm:$0xff] }
 0x3b2   :  { %v1572_v9 = vadd.f32 %v1571_v45, %v193_v53  ;;  %v1560_v11 = vadd.f32 %v3814_v52, %v1559_v22  ;;  %v13036_v53 = vld [vmem:[#allocation133_spill] sm:$0xff]  ;;  %v8321_v45 = vld [vmem:[%s11951_s5 + $0x340] sm:$0xff] }
 0x3b3   :  { %v8327_v22 = vld [vmem:[%s11951_s5 + $0x348] sm:$0xff] }
 0x3b4   :  { %3815 = vtanh.f32 %v1572_v9  ;;  %v1564_v0 = vsel %vm1563_vm7, %v3814_v52, %v1560_v11  ;;  %v13029_v52 = vld [vmem:[#allocation129_spill] sm:$0xff]  ;;  %v13037_v9 = vld [vmem:[#allocation19_spill] sm:$0xff]  ;;  %v13038_v11 = vld [vmem:[#allocation6_spill] sm:$0xff] }
 0x3b5   :  { %v1569_v34 = vsel %vm1566_vm8, %v1568_v35, %v1564_v0  ;;  %v13039_v0 = vld [vmem:[#allocation20_spill] sm:$0xff]  ;;  %v13041_v35 = vld [vmem:[#allocation135_spill] sm:$0xff] }
 0x3ba   :  { %v3816_v29 = vpop.eup %3815 }
 0x3bb   :  { %v1574_v8 = vsub.f32 %v7271_v14, %v3816_v29  ;;  %v8148_v14 = vld [vmem:[%s11951_s5 + $0x5e0] sm:$0xff] }
 0x3bd   :  { %v1575_v38 = vmul.f32 %v1574_v8, %v1569_v34  ;;  %v13042_v8 = vld [vmem:[#allocation136_spill] sm:$0xff]  ;;  %v13043_v34 = vld [vmem:[#allocation137_spill] sm:$0xff] }
 0x3bf   :  { %v8137_v31 = vadd.f32 %v3816_v29, %v1575_v38  ;;  %v13040_v29 = vld [vmem:[#allocation134_spill] sm:$0xff] }
 0x3c0   :  { %v13044_v38 = vld [vmem:[#allocation138_spill] sm:$0xff] }
 0x3c1   :  { %1593 = vmatmul.f32.vlgmr.msrb.gmra.mxu0 %v8137_v31  ;;  %1613 = vmatmul.f32.vlgmr.msrb.gmra.mxu1 %v8137_v31 }
 0x3c2   :  { %1633 = vmatmul.f32.vlgmr.msrb.gmra.mxu2 %v8137_v31  ;;  %1699 = vmatmul.f32.vlgmr.msra.gmra.mxu3 %v8137_v31 }
 0x3c3   :  { %1803 = vmatpush.msrb.mxu1 %v7280_v44  ;;  %1843 = vmatpush.msra.mxu3 %v7286_v63  ;;  %v8162_v44 = vld [vmem:[%s11951_s5 + $0x5b0] sm:$0xff]  ;;  %v8168_v63 = vld [vmem:[%s11951_s5 + $0x5b8] sm:$0xff] }
 0x3c4   :  { %1783 = vmatpush.msrb.mxu0 %v8148_v14  ;;  %1823 = vmatpush.msrb.mxu2 %v8154_v12 }
 0x3c5   :  { %1804 = vmatpush.msrb.mxu1 %v7294_v51  ;;  %1844 = vmatpush.msra.mxu3 %v7300_v49  ;;  %v8176_v51 = vld [vmem:[%s11951_s5 + $0x580] sm:$0xff]  ;;  %v8182_v49 = vld [vmem:[%s11951_s5 + $0x588] sm:$0xff] }
 0x3c6   :  { %1784 = vmatpush.msrb.mxu0 %v8162_v44  ;;  %1824 = vmatpush.msrb.mxu2 %v8168_v63 }
 0x3c7   :  { %1805 = vmatpush.msrb.mxu1 %v7308_v50  ;;  %1845 = vmatpush.msra.mxu3 %v7314_v46  ;;  %v8194_v50 = vld [vmem:[%s11951_s5 + $0x550] sm:$0xff]  ;;  %v8200_v46 = vld [vmem:[%s11951_s5 + $0x558] sm:$0xff] }
 0x3c8   :  { %1785 = vmatpush.msrb.mxu0 %v8176_v51  ;;  %1825 = vmatpush.msrb.mxu2 %v8182_v49 }
 0x3c9   :  { %1806 = vmatpush.msrb.mxu1 %v7322_v39  ;;  %1846 = vmatpush.msra.mxu3 %v7328_v3  ;;  %v8208_v39 = vld [vmem:[%s11951_s5 + $0x520] sm:$0xff]  ;;  %v8214_v3 = vld [vmem:[%s11951_s5 + $0x528] sm:$0xff] }
 0x3ca   :  { %1739 = vmatmul.f32.vlgmr.msra.gmra.mxu1 %v8137_v31  ;;  %1779 = vmatmul.f32.vlgmr.msrb.gmra.mxu3 %v8137_v31 }
 0x3cb   :  { %1807 = vmatpush.msrb.mxu1 %v7336_v23  ;;  %1847 = vmatpush.msra.mxu3 %v7342_v55  ;;  %v8222_v23 = vld [vmem:[%s11951_s5 + $0x4f0] sm:$0xff]  ;;  %v8228_v55 = vld [vmem:[%s11951_s5 + $0x4f8] sm:$0xff] }
 0x3cc   :  { %1786 = vmatpush.msrb.mxu0 %v8194_v50  ;;  %1826 = vmatpush.msrb.mxu2 %v8200_v46 }
 0x3cd   :  { %1808 = vmatpush.msrb.mxu1 %v7350_v56  ;;  %1848 = vmatpush.msra.mxu3 %v7356_v62  ;;  %v8236_v56 = vld [vmem:[%s11951_s5 + $0x4c0] sm:$0xff]  ;;  %v13016_v62 = vld [vmem:[#allocation18_spill] sm:$0xff] }
 0x3ce   :  { %1787 = vmatpush.msrb.mxu0 %v8208_v39  ;;  %1827 = vmatpush.msrb.mxu2 %v8214_v3 }
 0x3cf   :  { %1809 = vmatpush.msrb.mxu1 %v7364_v1  ;;  %1849 = vmatpush.msra.mxu3 %v7370_v2  ;;  %v8245_v1 = vld [vmem:[%s11951_s5 + $0x490] sm:$0xff] }
 0x3d0   :  { %1788 = vmatpush.msrb.mxu0 %v8222_v23  ;;  %1828 = vmatpush.msrb.mxu2 %v8228_v55  ;;  %v13017_v2 = vld [vmem:[#allocation17_spill] sm:$0xff] }
 0x3d1   :  { %1810 = vmatpush.msrb.mxu1 %v7378_v25  ;;  %1850 = vmatpush.msra.mxu3 %v7384_v15  ;;  %v13018_v25 = vld [vmem:[#allocation73_spill] sm:$0xff] }
 0x3d2   :  { %1789 = vmatpush.msrb.mxu0 %v8236_v56  ;;  %1829 = vmatpush.msrb.mxu2 %v7391_v37  ;;  %v13019_v15 = vld [vmem:[#allocation77_spill] sm:$0xff]  ;;  %v8254_v37 = vld [vmem:[%s11951_s5 + $0x460] sm:$0xff] }
 0x3d3   :  { %1811 = vmatpush.msrb.mxu1 %v7397_v27  ;;  %1851 = vmatpush.msra.mxu3 %v13016_v62  ;;  %v13020_v27 = vld [vmem:[#allocation32_spill] sm:$0xff]  ;;  %v13045_v62 = vld [vmem:[#allocation139_spill] sm:$0xff] }
 0x3d4   :  { %1790 = vmatpush.msrb.mxu0 %v8245_v1  ;;  %1830 = vmatpush.msrb.mxu2 %v13017_v2  ;;  %v13046_v2 = vld [vmem:[#allocation140_spill] sm:$0xff] }
 0x3d5   :  { %1812 = vmatpush.msrb.mxu1 %v13018_v25  ;;  %1852 = vmatpush.msra.mxu3 %v13019_v15  ;;  %v13047_v25 = vld [vmem:[#allocation141_spill] sm:$0xff]  ;;  %v13048_v15 = vld [vmem:[#allocation142_spill] sm:$0xff] }
 0x3d6   :  { %1791 = vmatpush.msrb.mxu0 %v8254_v37  ;;  %1831 = vmatpush.msrb.mxu2 %v13020_v27  ;;  %v13049_v27 = vld [vmem:[#allocation143_spill] sm:$0xff] }
 0x3d7   :  { %1813 = vmatpush.msrb.mxu1 %v13021_v4  ;;  %1853 = vmatpush.msra.mxu3 %v13022_v36  ;;  %v13050_v4 = vld [vmem:[#allocation144_spill] sm:$0xff]  ;;  %v13051_v36 = vld [vmem:[#allocation145_spill] sm:$0xff] }
 0x3d8   :  { %1792 = vmatpush.msrb.mxu0 %v8263_v16  ;;  %1832 = vmatpush.msrb.mxu2 %v13023_v47  ;;  %v13052_v47 = vld [vmem:[#allocation146_spill] sm:$0xff] }
 0x3d9   :  { %1814 = vmatpush.msrb.mxu1 %v13024_v19  ;;  %1854 = vmatpush.msra.mxu3 %v13025_v58  ;;  %v13053_v19 = vld [vmem:[#allocation147_spill] sm:$0xff]  ;;  %v13054_v58 = vld [vmem:[#allocation148_spill] sm:$0xff] }
 0x3da   :  { %1793 = vmatpush.msrb.mxu0 %v8272_v54  ;;  %1833 = vmatpush.msrb.mxu2 %v13026_v33  ;;  %v13055_v33 = vld [vmem:[#allocation149_spill] sm:$0xff] }
 0x3db   :  { %1815 = vmatpush.msrb.mxu1 %v13027_v21  ;;  %1855 = vmatpush.msra.mxu3 %v13028_v43  ;;  %v13056_v21 = vld [vmem:[#allocation150_spill] sm:$0xff]  ;;  %v13057_v43 = vld [vmem:[#allocation151_spill] sm:$0xff] }
 0x3dc   :  { %1794 = vmatpush.msrb.mxu0 %v8281_v28  ;;  %1834 = vmatpush.msrb.mxu2 %v13029_v52  ;;  %v13058_v52 = vld [vmem:[#allocation152_spill] sm:$0xff] }
 0x3dd   :  { %1816 = vmatpush.msrb.mxu1 %v13030_v57  ;;  %1856 = vmatpush.msra.mxu3 %v13031_v61  ;;  %v13059_v57 = vld [vmem:[#allocation153_spill] sm:$0xff]  ;;  %v13060_v61 = vld [vmem:[#allocation154_spill] sm:$0xff] }
 0x3de   :  { %1795 = vmatpush.msrb.mxu0 %v8290_v17  ;;  %1835 = vmatpush.msrb.mxu2 %v8296_v48 }
 0x3df   :  { %1817 = vmatpush.msrb.mxu1 %v13032_v5  ;;  %1857 = vmatpush.msra.mxu3 %v13033_v32  ;;  %v13061_v5 = vld [vmem:[#allocation155_spill] sm:$0xff]  ;;  %v13062_v32 = vld [vmem:[#allocation156_spill] sm:$0xff] }
 0x3e0   :  { %1796 = vmatpush.msrb.mxu0 %v8304_v13  ;;  %1836 = vmatpush.msrb.mxu2 %v8310_v7 }
 0x3e1   :  { %1818 = vmatpush.msrb.mxu1 %v13034_v18  ;;  %1858 = vmatpush.msra.mxu3 %v13035_v6  ;;  %v13063_v18 = vld [vmem:[#allocation157_spill] sm:$0xff]  ;;  %v13064_v6 = vld [vmem:[#allocation158_spill] sm:$0xff] }
 0x3e2   :  { %1819 = vmatmul.f32.vlgmr.msrb.gmra.mxu1 %v8137_v31  ;;  %1859 = vmatmul.f32.vlgmr.msra.gmra.mxu3 %v8137_v31 }
 0x3e3   :  { %1883 = vmatpush.msra.mxu1 %v13036_v53  ;;  %1797 = vmatpush.msrb.mxu0 %v8321_v45  ;;  %v13065_v53 = vld [vmem:[#allocation159_spill] sm:$0xff] }
 0x3e4   :  { %1837 = vmatpush.msrb.mxu2 %v8327_v22  ;;  %1973 = vmatpush.msrb.mxu3 %v13037_v9  ;;  %v13066_v9 = vld [vmem:[#allocation160_spill] sm:$0xff] }
 0x3e5   :  { %1884 = vmatpush.msra.mxu1 %v13038_v11  ;;  %1798 = vmatpush.msrb.mxu0 %v8335_v40  ;;  %v13067_v11 = vld [vmem:[#allocation161_spill] sm:$0xff] }
 0x3e6   :  { %1838 = vmatpush.msrb.mxu2 %v8341_v42  ;;  %1974 = vmatpush.msrb.mxu3 %v13039_v0  ;;  %v13068_v0 = vld [vmem:[#allocation162_spill] sm:$0xff] }
 0x3e7   :  { %1885 = vmatpush.msra.mxu1 %v13040_v29  ;;  %v13069_v29 = vld [vmem:[#allocation163_spill] sm:$0xff] }
 0x3e8   :  { %1975 = vmatpush.msrb.mxu3 %v13041_v35  ;;  %v13070_v35 = vld [vmem:[#allocation164_spill] sm:$0xff] }
 0x3e9   :  { %1886 = vmatpush.msra.mxu1 %v13042_v8  ;;  %v13071_v8 = vld [vmem:[#allocation165_spill] sm:$0xff] }
 0x3ea   :  { %1976 = vmatpush.msrb.mxu3 %v13043_v34  ;;  %v13072_v34 = vld [vmem:[#allocation166_spill] sm:$0xff] }
 0x3eb   :  { %1887 = vmatpush.msra.mxu1 %v13044_v38  ;;  %v13073_v38 = vld [vmem:[#allocation167_spill] sm:$0xff] }
 0x3ec   :  { %1977 = vmatpush.msrb.mxu3 %v13045_v62  ;;  %v13074_v62 = vld [vmem:[#allocation168_spill] sm:$0xff] }
 0x3ed   :  { %1888 = vmatpush.msra.mxu1 %v13046_v2  ;;  %v13075_v2 = vld [vmem:[#allocation169_spill] sm:$0xff] }
 0x3ee   :  { %1978 = vmatpush.msrb.mxu3 %v13047_v25  ;;  %v13076_v25 = vld [vmem:[#allocation170_spill] sm:$0xff] }
 0x3ef   :  { %1889 = vmatpush.msra.mxu1 %v13048_v15  ;;  %v13077_v15 = vld [vmem:[#allocation171_spill] sm:$0xff] }
 0x3f0   :  { %1979 = vmatpush.msrb.mxu3 %v13049_v27  ;;  %v13078_v27 = vld [vmem:[#allocation172_spill] sm:$0xff] }
 0x3f1   :  { %1890 = vmatpush.msra.mxu1 %v13050_v4  ;;  %v13079_v4 = vld [vmem:[#allocation173_spill] sm:$0xff] }
 0x3f2   :  { %1980 = vmatpush.msrb.mxu3 %v13051_v36  ;;  %v13080_v36 = vld [vmem:[#allocation174_spill] sm:$0xff] }
 0x3f3   :  { %1891 = vmatpush.msra.mxu1 %v13052_v47  ;;  %v13081_v47 = vld [vmem:[#allocation175_spill] sm:$0xff] }
 0x3f4   :  { %1981 = vmatpush.msrb.mxu3 %v13053_v19  ;;  %v13082_v19 = vld [vmem:[#allocation176_spill] sm:$0xff] }
 0x3f5   :  { %1892 = vmatpush.msra.mxu1 %v13054_v58  ;;  %v13083_v58 = vld [vmem:[#allocation177_spill] sm:$0xff] }
 0x3f6   :  { %1982 = vmatpush.msrb.mxu3 %v13055_v33  ;;  %v13084_v33 = vld [vmem:[#allocation178_spill] sm:$0xff] }
 0x3f7   :  { %1893 = vmatpush.msra.mxu1 %v13056_v21  ;;  %v13085_v21 = vld [vmem:[#allocation179_spill] sm:$0xff] }
 0x3f8   :  { %1983 = vmatpush.msrb.mxu3 %v13057_v43  ;;  %v13086_v43 = vld [vmem:[#allocation180_spill] sm:$0xff] }
 0x3f9   :  { %1894 = vmatpush.msra.mxu1 %v13058_v52  ;;  %v13087_v52 = vld [vmem:[#allocation181_spill] sm:$0xff] }
 0x3fa   :  { %1984 = vmatpush.msrb.mxu3 %v13059_v57  ;;  %v13088_v57 = vld [vmem:[#allocation182_spill] sm:$0xff] }
 0x3fb   :  { %1895 = vmatpush.msra.mxu1 %v13060_v61  ;;  %v13089_v61 = vld [vmem:[#allocation183_spill] sm:$0xff] }
 0x3fc   :  { %1985 = vmatpush.msrb.mxu3 %v13061_v5  ;;  %v13090_v5 = vld [vmem:[#allocation184_spill] sm:$0xff] }
 0x3fd   :  { %1896 = vmatpush.msra.mxu1 %v13062_v32  ;;  %v13091_v32 = vld [vmem:[#allocation185_spill] sm:$0xff] }
 0x3fe   :  { %1986 = vmatpush.msrb.mxu3 %v13063_v18  ;;  %v13092_v18 = vld [vmem:[#allocation186_spill] sm:$0xff] }
 0x3ff   :  { %1897 = vmatpush.msra.mxu1 %v13064_v6  ;;  %v13093_v6 = vld [vmem:[#allocation187_spill] sm:$0xff] }
 0x400   :  { %1987 = vmatpush.msrb.mxu3 %v13065_v53  ;;  %v13094_v53 = vld [vmem:[#allocation188_spill] sm:$0xff] }
 0x401   :  { %1898 = vmatpush.msra.mxu1 %v13066_v9  ;;  %v13095_v9 = vld [vmem:[#allocation189_spill] sm:$0xff] }
 0x402   :  { %1899 = vmatmul.f32.vlgmr.msra.gmra.mxu1 %v8137_v31  ;;  %1988 = vmatpush.msrb.mxu3 %v13067_v11  ;;  %v13096_v11 = vld [vmem:[#allocation190_spill] sm:$0xff] }
 0x403   :  { %2013 = vmatpush.msrb.mxu1 %v13068_v0  ;;  %v13097_v0 = vld [vmem:[#allocation191_spill] sm:$0xff] }
 0x404   :  { %2099 = vmatpush.msra.mxu3 %v13069_v29  ;;  %v13098_v29 = vld [vmem:[#allocation192_spill] sm:$0xff] }
 0x405   :  { %2014 = vmatpush.msrb.mxu1 %v13070_v35  ;;  %v13099_v35 = vld [vmem:[#allocation193_spill] sm:$0xff] }
 0x406   :  { %2100 = vmatpush.msra.mxu3 %v13071_v8  ;;  %v13100_v8 = vld [vmem:[#allocation194_spill] sm:$0xff] }
 0x407   :  { %2015 = vmatpush.msrb.mxu1 %v13072_v34  ;;  %v13101_v34 = vld [vmem:[#allocation195_spill] sm:$0xff] }
 0x408   :  { %2101 = vmatpush.msra.mxu3 %v13073_v38  ;;  %v13102_v38 = vld [vmem:[#allocation196_spill] sm:$0xff] }
 0x409   :  { %2016 = vmatpush.msrb.mxu1 %v13074_v62  ;;  %v13103_v62 = vld [vmem:[#allocation197_spill] sm:$0xff] }
 0x40a   :  { %2102 = vmatpush.msra.mxu3 %v13075_v2  ;;  %v13104_v2 = vld [vmem:[#allocation198_spill] sm:$0xff] }
 0x40b   :  { %2017 = vmatpush.msrb.mxu1 %v13076_v25  ;;  %v13105_v25 = vld [vmem:[#allocation199_spill] sm:$0xff] }
 0x40c   :  { %2103 = vmatpush.msra.mxu3 %v13077_v15  ;;  %v13106_v15 = vld [vmem:[#allocation200_spill] sm:$0xff] }
 0x40d   :  { %2018 = vmatpush.msrb.mxu1 %v13078_v27  ;;  %v13107_v27 = vld [vmem:[#allocation201_spill] sm:$0xff] }
 0x40e   :  { %2104 = vmatpush.msra.mxu3 %v13079_v4  ;;  %v13108_v4 = vld [vmem:[#allocation202_spill] sm:$0xff] }
 0x40f   :  { %2019 = vmatpush.msrb.mxu1 %v13080_v36  ;;  %v13109_v36 = vld [vmem:[#allocation203_spill] sm:$0xff] }
 0x410   :  { %2105 = vmatpush.msra.mxu3 %v13081_v47  ;;  %v1464_v47 = vpop.f32.mrf.mxu0 }
 0x411   :  { %2020 = vmatpush.msrb.mxu1 %v13082_v19  ;;  %v1484_v19 = vpop.f32.mrf.mxu1 }
 0x412   :  { %2106 = vmatpush.msra.mxu3 %v13083_v58  ;;  %v13110_v58 = vld [vmem:[#allocation204_spill] sm:$0xff] }
 0x413   :  { %2021 = vmatpush.msrb.mxu1 %v13084_v33  ;;  %v13111_v33 = vld [vmem:[#allocation205_spill] sm:$0xff] }
 0x414   :  { %2107 = vmatpush.msra.mxu3 %v13085_v21  ;;  %v1424_v21 = vpop.f32.mrf.mxu2 }
 0x415   :  { %2022 = vmatpush.msrb.mxu1 %v13086_v43  ;;  %v13112_v43 = vld [vmem:[#allocation206_spill] sm:$0xff] }
 0x416   :  { %2108 = vmatpush.msra.mxu3 %v13087_v52  ;;  %v1444_v52 = vpop.f32.mrf.mxu3 }
 0x417   :  { %2023 = vmatpush.msrb.mxu1 %v13088_v57  ;;  %v13113_v57 = vld [vmem:[#allocation207_spill] sm:$0xff] }
 0x418   :  { %2109 = vmatpush.msra.mxu3 %v13089_v61  ;;  %v13114_v61 = vld [vmem:[#allocation21_spill] sm:$0xff] }
 0x419   :  { %2024 = vmatpush.msrb.mxu1 %v13090_v5  ;;  %v1465_v5 = vadd.f32 %v1464_v47, %v13114_v61 }
 0x41a   :  { %2110 = vmatpush.msra.mxu3 %v13091_v32  ;;  %v13115_v32 = vld [vmem:[#allocation7_spill] sm:$0xff] }
 0x41b   :  { %2025 = vmatpush.msrb.mxu1 %v13092_v18  ;;  %v1425_v18 = vadd.f32 %v1424_v21, %v13115_v32 }
 0x41c   :  { %2111 = vmatpush.msra.mxu3 %v13093_v6 }
 0x41d   :  { %2026 = vmatpush.msrb.mxu1 %v13094_v53 }
 0x41e   :  { %2112 = vmatpush.msra.mxu3 %v13095_v9  ;;  %v13116_v9 = vld [vmem:[#allocation208_spill] sm:$0xff] }
 0x41f   :  { %2027 = vmatpush.msrb.mxu1 %v13096_v11  ;;  %v1445_v11 = vadd.f32 %v1444_v52, %v1425_v18 }
 0x420   :  { %2113 = vmatpush.msra.mxu3 %v13097_v0  ;;  %v1485_v0 = vadd.f32 %v1484_v19, %v1465_v5  ;;  %v1504_v19 = vpop.f32.mrf.mxu2 }
 0x421   :  { %2028 = vmatpush.msrb.mxu1 %v13098_v29  ;;  %v13117_v29 = vld [vmem:[#allocation8_spill] sm:$0xff] }
 0x422   :  { %2114 = vmatpush.msra.mxu3 %v13099_v35 }
 0x423   :  { %2139 = vmatpush.msra.mxu1 %v13100_v8  ;;  %v13118_v8 = vld [vmem:[#allocation22_spill] sm:$0xff] }
 0x425   :  { %2140 = vmatpush.msra.mxu1 %v13101_v34 }
 0x427   :  { %2141 = vmatpush.msra.mxu1 %v13102_v38  ;;  %v13119_v38 = vld [vmem:[#allocation209_spill] sm:$0xff] }
 0x429   :  { %2142 = vmatpush.msra.mxu1 %v13103_v62 }
 0x42b   :  { %2143 = vmatpush.msra.mxu1 %v13104_v2 }
 0x42d   :  { %2144 = vmatpush.msra.mxu1 %v13105_v25 }
 0x42f   :  { %2145 = vmatpush.msra.mxu1 %v13106_v15 }
 0x431   :  { %2146 = vmatpush.msra.mxu1 %v13107_v27 }
 0x433   :  { %2147 = vmatpush.msra.mxu1 %v13108_v4 }
 0x435   :  { %2148 = vmatpush.msra.mxu1 %v13109_v36 }
 0x437   :  { %2149 = vmatpush.msra.mxu1 %v13110_v58 }
 0x439   :  { %2150 = vmatpush.msra.mxu1 %v13111_v33 }
 0x43b   :  { %2151 = vmatpush.msra.mxu1 %v13112_v43 }
 0x43d   :  { %2152 = vmatpush.msra.mxu1 %v13113_v57 }
 0x43e   :  { %v1594_v6 = vpop.f32.mrf.mxu0  ;;  %v1614_v53 = vpop.f32.mrf.mxu1 }
 0x43f   :  { %2153 = vmatpush.msra.mxu1 %v13116_v9  ;;  %v1595_v35 = vadd.f32 %v1594_v6, %v13117_v29  ;;  %v1615_v34 = vadd.f32 %v1614_v53, %v13118_v8  ;;  %v1524_v6 = vpop.f32.mrf.mxu3  ;;  %v13120_v53 = vld [vmem:[#allocation9_spill] sm:$0xff] }
 0x440   :  { %v1505_v9 = vadd.f32 %v1504_v19, %v13120_v53 }
 0x441   :  { %2154 = vmatpush.msra.mxu1 %v13119_v38  ;;  %v1637_v62 = vadd.f32 %v1595_v35, %v1445_v11  ;;  %v1638_v2 = vadd.f32 %v1615_v34, %v1485_v0 }
 0x442   :  { %v1525_v38 = vadd.f32 %v1524_v6, %v1505_v9  ;;  %v8436_v9 = vld [vmem:[%s11951_s5 + $0x5f0] sm:$0xff] }
 0x443   :  { %v3743_v25 = vmul.f32 -1.442695, %v1637_v62  ;;  %v3744_v15 = vmul.f32 -1.442695, %v1638_v2 }
 0x445   :  { %3817 = vpow2.f32 %v3743_v25  ;;  %v1634_v35 = vpop.f32.mrf.mxu2 }
 0x446   :  { %3819 = vpow2.f32 %v3744_v15  ;;  %v1635_v25 = vadd.f32 %v1634_v35, %v6674_v26  ;;  %v8472_v35 = vld [vmem:[%s11951_s5 + $0x560] sm:$0xff] }
 0x447   :  { %13122 = vst [vmem:[#allocation51_spill] sm:$0xff] %v8472_v35 }
 0x44b   :  { %v3818_v27 = vpop.eup %3817 }
 0x44c   :  { %v3820_v4 = vpop.eup %3819  ;;  %v1642_v36 = vadd.f32 1.0, %v3818_v27 }
 0x44d   :  { %v1661_v47 = vadd.f32 1.0, %v3820_v4 }
 0x44e   :  { %3821 = vrcp.f32 %v1642_v36  ;;  %v1654_v57 = vand.u32 2147483648, %v1642_v36  ;;  %v1652_v18 = vand.u32 2147483647, %v1642_v36  ;;  %vm1648_vm10 = vweird.f32 %v1642_v36 }
 0x44f   :  { %3823 = vrcp.f32 %v1661_v47  ;;  %vm1667_vm14 = vweird.f32 %v1661_v47  ;;  %v1671_v19 = vand.u32 2147483647, %v1661_v47 }
 0x450   :  { %v1655_v34 = vor.u32 1.1754944e-38, %v1654_v57  ;;  %vm1653_vm12 = vcmp.eq.f32.partialorder %v1652_v18, 8.507059e+37 }
 0x451   :  { %vm1672_vm0 = vcmp.eq.f32.partialorder %v1671_v19, 8.507059e+37  ;;  %v8540_v19 = vld [vmem:[%s11951_s5 + $0x478] sm:$0xff] }
 0x452   :  { %13133 = vst [vmem:[#allocation40_spill] sm:$0xff] %v8540_v19 }
 0x454   :  { %v3822_v58 = vpop.eup %3821 }
 0x455   :  { %v3824_v33 = vpop.eup %3823  ;;  %v1644_v21 = vmul.f32 %v3822_v58, %v1642_v36  ;;  %vm1649_vm9 = vweird.f32 %v3822_v58 }
 0x456   :  { %v1663_v52 = vmul.f32 %v3824_v33, %v1661_v47  ;;  %vm1650_vm11 = vmor %vm1648_vm10, %vm1649_vm9  ;;  %vm1668_vm13 = vweird.f32 %v3824_v33 }
 0x457   :  { %v1645_v43 = vsub.f32 1.0, %v1644_v21  ;;  %vm1669_vm15 = vmor %vm1667_vm14, %vm1668_vm13 }
 0x458   :  { %v1664_v0 = vsub.f32 1.0, %v1663_v52 }
 0x459   :  { %v1646_v5 = vmul.f32 %v3822_v58, %v1645_v43  ;;  %v1673_v43 = vand.u32 2147483648, %v1661_v47  ;;  %v8442_v47 = vld [vmem:[%s11951_s5 + $0x5f8] sm:$0xff] }
 0x45a   :  { %v1665_v27 = vmul.f32 %v3824_v33, %v1664_v0  ;;  %v8466_v0 = vld [vmem:[%s11951_s5 + $0x598] sm:$0xff] }
 0x45b   :  { %v1647_v11 = vadd.f32 %v3822_v58, %v1646_v5  ;;  %v1674_v5 = vor.u32 1.1754944e-38, %v1673_v43  ;;  %13121 = vst [vmem:[#allocation25_spill] sm:$0xff] %v8466_v0  ;;  %v8534_v43 = vld [vmem:[%s11951_s5 + $0x470] sm:$0xff] }
 0x45c   :  { %v1666_v21 = vadd.f32 %v3824_v33, %v1665_v27  ;;  %v8516_v27 = vld [vmem:[%s11951_s5 + $0x4d8] sm:$0xff]  ;;  %13132 = vst [vmem:[#allocation37_spill] sm:$0xff] %v8534_v43 }
 0x45d   :  { %v1651_v62 = vsel %vm1650_vm11, %v3822_v58, %v1647_v11  ;;  %v8460_v11 = vld [vmem:[%s11951_s5 + $0x590] sm:$0xff]  ;;  %13129 = vst [vmem:[#allocation33_spill] sm:$0xff] %v8516_v27 }
 0x45e   :  { %v1656_v2 = vsel %vm1653_vm12, %v1655_v34, %v1651_v62  ;;  %v1670_v36 = vsel %vm1669_vm15, %v3824_v33, %v1666_v21  ;;  %v8454_v33 = vld [vmem:[%s11951_s5 + $0x5c8] sm:$0xff]  ;;  %v8492_v62 = vld [vmem:[%s11951_s5 + $0x538] sm:$0xff] }
 0x45f   :  { %v1677_v15 = vmul.f32 %v1656_v2, %v1525_v38  ;;  %v1675_v57 = vsel %vm1672_vm0, %v1674_v5, %v1670_v36  ;;  %v8478_v34 = vld [vmem:[%s11951_s5 + $0x568] sm:$0xff]  ;;  %v8486_v38 = vld [vmem:[%s11951_s5 + $0x530] sm:$0xff]  ;;  %13125 = vst [vmem:[#allocation27_spill] sm:$0xff] %v8492_v62  ;;  %v8498_v2 = vld [vmem:[%s11951_s5 + $0x500] sm:$0xff] }
 0x460   :  { %13123 = vst [vmem:[#allocation26_spill] sm:$0xff] %v8478_v34  ;;  %v8528_v21 = vld [vmem:[%s11951_s5 + $0x4a8] sm:$0xff]  ;;  %v8546_v36 = vld [vmem:[%s11951_s5 + $0x440] sm:$0xff]  ;;  %v8558_v5 = vld [vmem:[%s11951_s5 + $0x410] sm:$0xff] }
 0x461   :  { %v1678_v4 = vadd.f32 %v1677_v15, %v1635_v25  ;;  %13124 = vst [vmem:[#allocation55_spill] sm:$0xff] %v8486_v38  ;;  %v8504_v25 = vld [vmem:[%s11951_s5 + $0x508] sm:$0xff]  ;;  %v8510_v15 = vld [vmem:[%s11951_s5 + $0x4d0] sm:$0xff] }
 0x462   :  { %13126 = vst [vmem:[#allocation57_spill] sm:$0xff] %v8498_v2 }
 0x463   :  { %3825 = vtanh.f32 %v1678_v4  ;;  %13127 = vst [vmem:[#allocation28_spill] sm:$0xff] %v8504_v25  ;;  %v8522_v4 = vld [vmem:[%s11951_s5 + $0x4a0] sm:$0xff] }
 0x464   :  { %13128 = vst [vmem:[#allocation30_spill] sm:$0xff] %v8510_v15 }
 0x465   :  { %13130 = vst [vmem:[#allocation34_spill] sm:$0xff] %v8522_v4 }
 0x466   :  { %13131 = vst [vmem:[#allocation35_spill] sm:$0xff] %v8528_v21 }
 0x467   :  { %13134 = vst [vmem:[#allocation41_spill] sm:$0xff] %v8546_v36 }
 0x468   :  { %13136 = vst [vmem:[#allocation44_spill] sm:$0xff] %v8558_v5 }
 0x469   :  { %v3826_v52 = vpop.eup %3825 }
 0x46a   :  { %v1680_v58 = vsub.f32 %v8023_v24, %v3826_v52  ;;  %v8448_v24 = vld [vmem:[%s11951_s5 + $0x5c0] sm:$0xff] }
 0x46c   :  { %v1681_v18 = vmul.f32 %v1680_v58, %v1675_v57  ;;  %v8564_v58 = vld [vmem:[%s11951_s5 + $0x418] sm:$0xff]  ;;  %v8570_v57 = vld [vmem:[%s11951_s5 + $0x3e0] sm:$0xff] }
 0x46d   :  { %13137 = vst [vmem:[#allocation47_spill] sm:$0xff] %v8564_v58 }
 0x46e   :  { %v8429_v6 = vadd.f32 %v3826_v52, %v1681_v18  ;;  %v8552_v52 = vld [vmem:[%s11951_s5 + $0x448] sm:$0xff]  ;;  %13138 = vst [vmem:[#allocation48_spill] sm:$0xff] %v8570_v57 }
 0x46f   :  { %13135 = vst [vmem:[#allocation42_spill] sm:$0xff] %v8552_v52  ;;  %v8576_v18 = vld [vmem:[%s11951_s5 + $0x3e8] sm:$0xff] }
 0x470   :  { %1719 = vmatmul.f32.vlgmr.msra.gmra.mxu0 %v8429_v6  ;;  %1759 = vmatmul.f32.vlgmr.msra.gmra.mxu2 %v8429_v6  ;;  %13139 = vst [vmem:[#allocation49_spill] sm:$0xff] %v8576_v18 }
 0x471   :  { %1863 = vmatpush.msra.mxu0 %v8436_v9  ;;  %1903 = vmatpush.msra.mxu2 %v8442_v47 }
 0x473   :  { %1864 = vmatpush.msra.mxu0 %v8448_v24  ;;  %1904 = vmatpush.msra.mxu2 %v8454_v33 }
 0x475   :  { %1865 = vmatpush.msra.mxu0 %v8460_v11  ;;  %1905 = vmatpush.msra.mxu2 %v8466_v0 }
 0x477   :  { %1866 = vmatpush.msra.mxu0 %v8472_v35  ;;  %1906 = vmatpush.msra.mxu2 %v8478_v34 }
 0x478   :  { %1799 = vmatmul.f32.vlgmr.msrb.gmra.mxu0 %v8429_v6  ;;  %1839 = vmatmul.f32.vlgmr.msrb.gmra.mxu2 %v8429_v6 }
 0x479   :  { %1867 = vmatpush.msra.mxu0 %v8486_v38  ;;  %1907 = vmatpush.msra.mxu2 %v8492_v62 }
 0x47b   :  { %1868 = vmatpush.msra.mxu0 %v8498_v2  ;;  %1908 = vmatpush.msra.mxu2 %v8504_v25  ;;  %v13213_v25 = vld [vmem:[#allocation31_spill] sm:$0xff] }
 0x47c   :  { %v155_v2 = vadd.f32 %v13213_v25, %v13013_v20 }
 0x47d   :  { %1869 = vmatpush.msra.mxu0 %v8510_v15  ;;  %1909 = vmatpush.msra.mxu2 %v8516_v27 }
 0x47f   :  { %1870 = vmatpush.msra.mxu0 %v8522_v4  ;;  %1910 = vmatpush.msra.mxu2 %v8528_v21  ;;  %v1740_v21 = vpop.f32.mrf.mxu1 }
 0x480   :  { %v1741_v27 = vadd.f32 %v1740_v21, %v13012_v60 }
 0x481   :  { %1871 = vmatpush.msra.mxu0 %v8534_v43  ;;  %1911 = vmatpush.msra.mxu2 %v8540_v19 }
 0x483   :  { %1872 = vmatpush.msra.mxu0 %v8546_v36  ;;  %1912 = vmatpush.msra.mxu2 %v8552_v52 }
 0x485   :  { %1873 = vmatpush.msra.mxu0 %v8558_v5  ;;  %1913 = vmatpush.msra.mxu2 %v8564_v58  ;;  %v8582_v5 = vld [vmem:[%s11951_s5 + $0x3b0] sm:$0xff]  ;;  %v8588_v58 = vld [vmem:[%s11951_s5 + $0x3b8] sm:$0xff] }
 0x486   :  { %13140 = vst [vmem:[#allocation52_spill] sm:$0xff] %v8582_v5 }
 0x487   :  { %1874 = vmatpush.msra.mxu0 %v8570_v57  ;;  %1914 = vmatpush.msra.mxu2 %v8576_v18  ;;  %13141 = vst [vmem:[#allocation56_spill] sm:$0xff] %v8588_v58  ;;  %v8594_v57 = vld [vmem:[%s11951_s5 + $0x380] sm:$0xff]  ;;  %v8600_v18 = vld [vmem:[%s11951_s5 + $0x388] sm:$0xff] }
 0x488   :  { %13142 = vst [vmem:[#allocation58_spill] sm:$0xff] %v8594_v57 }
 0x489   :  { %1875 = vmatpush.msra.mxu0 %v8582_v5  ;;  %1915 = vmatpush.msra.mxu2 %v8588_v58  ;;  %13143 = vst [vmem:[#allocation60_spill] sm:$0xff] %v8600_v18  ;;  %v8606_v5 = vld [vmem:[%s11951_s5 + $0x350] sm:$0xff]  ;;  %v8612_v58 = vld [vmem:[%s11951_s5 + $0x358] sm:$0xff] }
 0x48a   :  { %13144 = vst [vmem:[#allocation66_spill] sm:$0xff] %v8606_v5 }
 0x48b   :  { %1876 = vmatpush.msra.mxu0 %v8594_v57  ;;  %1916 = vmatpush.msra.mxu2 %v8600_v18  ;;  %13145 = vst [vmem:[#allocation71_spill] sm:$0xff] %v8612_v58  ;;  %v8618_v57 = vld [vmem:[%s11951_s5 + $0x320] sm:$0xff]  ;;  %v8624_v18 = vld [vmem:[%s11951_s5 + $0x328] sm:$0xff] }
 0x48c   :  { %13146 = vst [vmem:[#allocation72_spill] sm:$0xff] %v8618_v57 }
 0x48d   :  { %1877 = vmatpush.msra.mxu0 %v8606_v5  ;;  %1917 = vmatpush.msra.mxu2 %v8612_v58  ;;  %13147 = vst [vmem:[#allocation74_spill] sm:$0xff] %v8624_v18  ;;  %v8632_v58 = vld [vmem:[%s11953_s3 + $0x170] sm:$0xff]  ;;  %v8650_v5 = vld [vmem:[%s11951_s5 + $0x2a0] sm:$0xff] }
 0x48e   :  { %13148 = vst [vmem:[#allocation75_spill] sm:$0xff] %v8632_v58 }
 0x48f   :  { %1878 = vmatpush.msra.mxu0 %v8618_v57  ;;  %1918 = vmatpush.msra.mxu2 %v8624_v18  ;;  %v8638_v57 = vld [vmem:[%s11951_s5 + $0x2d0] sm:$0xff]  ;;  %v8644_v18 = vld [vmem:[%s11953_s3 + $0x158] sm:$0xff]  ;;  %13151 = vst [vmem:[#allocation79_spill] sm:$0xff] %v8650_v5 }
 0x490   :  { %1879 = vmatmul.f32.vlgmr.msra.gmra.mxu0 %v8429_v6  ;;  %1919 = vmatmul.f32.vlgmr.msra.gmra.mxu2 %v8429_v6  ;;  %13149 = vst [vmem:[#allocation76_spill] sm:$0xff] %v8638_v57 }
 0x491   :  { %1993 = vmatpush.msrb.mxu0 %v8632_v58  ;;  %2079 = vmatpush.msrb.mxu2 %v8638_v57  ;;  %13150 = vst [vmem:[#allocation78_spill] sm:$0xff] %v8644_v18  ;;  %v8656_v58 = vld [vmem:[%s11953_s3 + $0x140] sm:$0xff]  ;;  %v8662_v57 = vld [vmem:[%s11951_s5 + $0x270] sm:$0xff] }
 0x492   :  { %13152 = vst [vmem:[#allocation80_spill] sm:$0xff] %v8656_v58 }
 0x493   :  { %1994 = vmatpush.msrb.mxu0 %v8644_v18  ;;  %2080 = vmatpush.msrb.mxu2 %v8650_v5  ;;  %13153 = vst [vmem:[#allocation81_spill] sm:$0xff] %v8662_v57  ;;  %v8668_v18 = vld [vmem:[%s11953_s3 + $0x128] sm:$0xff]  ;;  %v8674_v5 = vld [vmem:[%s11951_s5 + $0x240] sm:$0xff] }
 0x494   :  { %13154 = vst [vmem:[#allocation82_spill] sm:$0xff] %v8668_v18 }
 0x495   :  { %1995 = vmatpush.msrb.mxu0 %v8656_v58  ;;  %2081 = vmatpush.msrb.mxu2 %v8662_v57  ;;  %13155 = vst [vmem:[#allocation83_spill] sm:$0xff] %v8674_v5  ;;  %v8680_v58 = vld [vmem:[%s11953_s3 + $0x110] sm:$0xff] }
 0x496   :  { %13156 = vst [vmem:[#allocation84_spill] sm:$0xff] %v8680_v58  ;;  %v8686_v57 = vld [vmem:[%s11951_s5 + $0x210] sm:$0xff] }
 0x497   :  { %1996 = vmatpush.msrb.mxu0 %v8668_v18  ;;  %2082 = vmatpush.msrb.mxu2 %v8674_v5  ;;  %13157 = vst [vmem:[#allocation59_spill] sm:$0xff] %v8686_v57  ;;  %v8692_v18 = vld [vmem:[%s11953_s3 + $0xf8] sm:$0xff]  ;;  %v8698_v5 = vld [vmem:[%s11951_s5 + $0x1e0] sm:$0xff] }
 0x498   :  { %13158 = vst [vmem:[#allocation86_spill] sm:$0xff] %v8692_v18 }
 0x499   :  { %1997 = vmatpush.msrb.mxu0 %v8680_v58  ;;  %2083 = vmatpush.msrb.mxu2 %v8686_v57  ;;  %13159 = vst [vmem:[#allocation87_spill] sm:$0xff] %v8698_v5  ;;  %v8704_v58 = vld [vmem:[%s11953_s3 + $0xe0] sm:$0xff]  ;;  %v8710_v57 = vld [vmem:[%s11951_s5 + $0x1b0] sm:$0xff] }
 0x49a   :  { %13160 = vst [vmem:[#allocation88_spill] sm:$0xff] %v8704_v58 }
 0x49b   :  { %1998 = vmatpush.msrb.mxu0 %v8692_v18  ;;  %2084 = vmatpush.msrb.mxu2 %v8698_v5  ;;  %13161 = vst [vmem:[#allocation89_spill] sm:$0xff] %v8710_v57  ;;  %v8716_v18 = vld [vmem:[%s11953_s3 + $0xc8] sm:$0xff]  ;;  %v8722_v5 = vld [vmem:[%s11951_s5 + $0x180] sm:$0xff] }
 0x49c   :  { %13162 = vst [vmem:[#allocation90_spill] sm:$0xff] %v8716_v18 }
 0x49d   :  { %1999 = vmatpush.msrb.mxu0 %v8704_v58  ;;  %2085 = vmatpush.msrb.mxu2 %v8710_v57  ;;  %13163 = vst [vmem:[#allocation91_spill] sm:$0xff] %v8722_v5  ;;  %v8728_v58 = vld [vmem:[%s11953_s3 + $0xb0] sm:$0xff] }
 0x49e   :  { %13164 = vst [vmem:[#allocation92_spill] sm:$0xff] %v8728_v58  ;;  %v8734_v57 = vld [vmem:[%s11951_s5 + $0x150] sm:$0xff] }
 0x49f   :  { %2000 = vmatpush.msrb.mxu0 %v8716_v18  ;;  %2086 = vmatpush.msrb.mxu2 %v8722_v5  ;;  %13165 = vst [vmem:[#allocation93_spill] sm:$0xff] %v8734_v57  ;;  %v8740_v18 = vld [vmem:[%s11953_s3 + $0x98] sm:$0xff]  ;;  %v8746_v5 = vld [vmem:[%s11951_s5 + $0x120] sm:$0xff] }
 0x4a0   :  { %13166 = vst [vmem:[#allocation94_spill] sm:$0xff] %v8740_v18 }
 0x4a1   :  { %2001 = vmatpush.msrb.mxu0 %v8728_v58  ;;  %2087 = vmatpush.msrb.mxu2 %v8734_v57  ;;  %13167 = vst [vmem:[#allocation95_spill] sm:$0xff] %v8746_v5  ;;  %v8752_v58 = vld [vmem:[%s11953_s3 + $0x80] sm:$0xff]  ;;  %v8758_v57 = vld [vmem:[%s11951_s5 + $0xf0] sm:$0xff] }
 0x4a2   :  { %13168 = vst [vmem:[#allocation96_spill] sm:$0xff] %v8752_v58 }
 0x4a3   :  { %2002 = vmatpush.msrb.mxu0 %v8740_v18  ;;  %2088 = vmatpush.msrb.mxu2 %v8746_v5  ;;  %13169 = vst [vmem:[#allocation97_spill] sm:$0xff] %v8758_v57  ;;  %v8764_v18 = vld [vmem:[%s11953_s3 + $0x68] sm:$0xff]  ;;  %v8770_v5 = vld [vmem:[%s11951_s5 + $0xc0] sm:$0xff] }
 0x4a4   :  { %13170 = vst [vmem:[#allocation98_spill] sm:$0xff] %v8764_v18 }
 0x4a5   :  { %2003 = vmatpush.msrb.mxu0 %v8752_v58  ;;  %2089 = vmatpush.msrb.mxu2 %v8758_v57  ;;  %13171 = vst [vmem:[#allocation99_spill] sm:$0xff] %v8770_v5  ;;  %v8776_v58 = vld [vmem:[%s11953_s3 + $0x50] sm:$0xff] }
 0x4a6   :  { %13172 = vst [vmem:[#allocation100_spill] sm:$0xff] %v8776_v58  ;;  %v8782_v57 = vld [vmem:[%s11951_s5 + $0x90] sm:$0xff] }
 0x4a7   :  { %2004 = vmatpush.msrb.mxu0 %v8764_v18  ;;  %2090 = vmatpush.msrb.mxu2 %v8770_v5  ;;  %13173 = vst [vmem:[#allocation101_spill] sm:$0xff] %v8782_v57  ;;  %v8788_v18 = vld [vmem:[%s11953_s3 + $0x38] sm:$0xff]  ;;  %v8794_v5 = vld [vmem:[%s11951_s5 + $0x60] sm:$0xff] }
 0x4a8   :  { %13174 = vst [vmem:[#allocation102_spill] sm:$0xff] %v8788_v18 }
 0x4a9   :  { %2005 = vmatpush.msrb.mxu0 %v8776_v58  ;;  %2091 = vmatpush.msrb.mxu2 %v8782_v57  ;;  %13175 = vst [vmem:[#allocation103_spill] sm:$0xff] %v8794_v5  ;;  %v8800_v58 = vld [vmem:[%s11953_s3 + $0x20] sm:$0xff]  ;;  %v8806_v57 = vld [vmem:[%s11951_s5 + $0x30] sm:$0xff] }
 0x4aa   :  { %13176 = vst [vmem:[#allocation104_spill] sm:$0xff] %v8800_v58 }
 0x4ab   :  { %2006 = vmatpush.msrb.mxu0 %v8788_v18  ;;  %2092 = vmatpush.msrb.mxu2 %v8794_v5  ;;  %13177 = vst [vmem:[#allocation105_spill] sm:$0xff] %v8806_v57  ;;  %v8812_v18 = vld [vmem:[%s11953_s3 + $0x8] sm:$0xff]  ;;  %v8818_v5 = vld [vmem:[%s11951_s5] sm:$0xff] }
 0x4ac   :  { %13178 = vst [vmem:[#allocation106_spill] sm:$0xff] %v8812_v18 }
 0x4ad   :  { %2007 = vmatpush.msrb.mxu0 %v8800_v58  ;;  %2093 = vmatpush.msrb.mxu2 %v8806_v57  ;;  %13179 = vst [vmem:[#allocation107_spill] sm:$0xff] %v8818_v5  ;;  %v8824_v58 = vld [vmem:[%s11951_s5 + $0x2d8] sm:$0xff]  ;;  %v8830_v57 = vld [vmem:[%s11951_s5 + $0x2e0] sm:$0xff] }
 0x4ae   :  { %13180 = vst [vmem:[#allocation108_spill] sm:$0xff] %v8824_v58 }
 0x4af   :  { %2008 = vmatpush.msrb.mxu0 %v8812_v18  ;;  %2094 = vmatpush.msrb.mxu2 %v8818_v5  ;;  %13181 = vst [vmem:[#allocation109_spill] sm:$0xff] %v8830_v57  ;;  %v8836_v18 = vld [vmem:[%s11951_s5 + $0x2a8] sm:$0xff]  ;;  %v8842_v5 = vld [vmem:[%s11951_s5 + $0x2b0] sm:$0xff] }
 0x4b0   :  { %13182 = vst [vmem:[#allocation110_spill] sm:$0xff] %v8836_v18 }
 0x4b1   :  { %2119 = vmatpush.msra.mxu0 %v8824_v58  ;;  %2159 = vmatpush.msra.mxu2 %v8830_v57  ;;  %13183 = vst [vmem:[#allocation111_spill] sm:$0xff] %v8842_v5  ;;  %v8848_v58 = vld [vmem:[%s11951_s5 + $0x278] sm:$0xff]  ;;  %v8854_v57 = vld [vmem:[%s11951_s5 + $0x280] sm:$0xff] }
 0x4b2   :  { %13184 = vst [vmem:[#allocation112_spill] sm:$0xff] %v8848_v58 }
 0x4b3   :  { %2120 = vmatpush.msra.mxu0 %v8836_v18  ;;  %2160 = vmatpush.msra.mxu2 %v8842_v5  ;;  %13185 = vst [vmem:[#allocation113_spill] sm:$0xff] %v8854_v57  ;;  %v8860_v18 = vld [vmem:[%s11951_s5 + $0x248] sm:$0xff]  ;;  %v8866_v5 = vld [vmem:[%s11951_s5 + $0x250] sm:$0xff] }
 0x4b4   :  { %13186 = vst [vmem:[#allocation114_spill] sm:$0xff] %v8860_v18 }
 0x4b5   :  { %2121 = vmatpush.msra.mxu0 %v8848_v58  ;;  %2161 = vmatpush.msra.mxu2 %v8854_v57  ;;  %13187 = vst [vmem:[#allocation115_spill] sm:$0xff] %v8866_v5  ;;  %v8872_v58 = vld [vmem:[%s11951_s5 + $0x218] sm:$0xff]  ;;  %v8878_v57 = vld [vmem:[%s11951_s5 + $0x220] sm:$0xff] }
 0x4b6   :  { %13188 = vst [vmem:[#allocation116_spill] sm:$0xff] %v8872_v58 }
 0x4b7   :  { %2122 = vmatpush.msra.mxu0 %v8860_v18  ;;  %2162 = vmatpush.msra.mxu2 %v8866_v5  ;;  %13189 = vst [vmem:[#allocation117_spill] sm:$0xff] %v8878_v57  ;;  %v8884_v18 = vld [vmem:[%s11951_s5 + $0x1e8] sm:$0xff]  ;;  %v8890_v5 = vld [vmem:[%s11951_s5 + $0x1f0] sm:$0xff] }
 0x4b8   :  { %13190 = vst [vmem:[#allocation118_spill] sm:$0xff] %v8884_v18 }
 0x4b9   :  { %2123 = vmatpush.msra.mxu0 %v8872_v58  ;;  %2163 = vmatpush.msra.mxu2 %v8878_v57  ;;  %13191 = vst [vmem:[#allocation119_spill] sm:$0xff] %v8890_v5  ;;  %v8896_v58 = vld [vmem:[%s11951_s5 + $0x1b8] sm:$0xff]  ;;  %v8902_v57 = vld [vmem:[%s11951_s5 + $0x1c0] sm:$0xff] }
 0x4ba   :  { %13192 = vst [vmem:[#allocation120_spill] sm:$0xff] %v8896_v58 }
 0x4bb   :  { %2124 = vmatpush.msra.mxu0 %v8884_v18  ;;  %2164 = vmatpush.msra.mxu2 %v8890_v5  ;;  %13193 = vst [vmem:[#allocation121_spill] sm:$0xff] %v8902_v57  ;;  %v8908_v18 = vld [vmem:[%s11951_s5 + $0x188] sm:$0xff]  ;;  %v8914_v5 = vld [vmem:[%s11951_s5 + $0x190] sm:$0xff] }
 0x4bc   :  { %13194 = vst [vmem:[#allocation122_spill] sm:$0xff] %v8908_v18 }
 0x4bd   :  { %2125 = vmatpush.msra.mxu0 %v8896_v58  ;;  %2165 = vmatpush.msra.mxu2 %v8902_v57  ;;  %13195 = vst [vmem:[#allocation123_spill] sm:$0xff] %v8914_v5  ;;  %v8920_v58 = vld [vmem:[%s11951_s5 + $0x158] sm:$0xff]  ;;  %v8926_v57 = vld [vmem:[%s11951_s5 + $0x160] sm:$0xff] }
 0x4be   :  { %13196 = vst [vmem:[#allocation124_spill] sm:$0xff] %v8920_v58 }
 0x4bf   :  { %2126 = vmatpush.msra.mxu0 %v8908_v18  ;;  %2166 = vmatpush.msra.mxu2 %v8914_v5  ;;  %13197 = vst [vmem:[#allocation125_spill] sm:$0xff] %v8926_v57  ;;  %v8932_v18 = vld [vmem:[%s11951_s5 + $0x128] sm:$0xff]  ;;  %v8938_v5 = vld [vmem:[%s11951_s5 + $0x130] sm:$0xff] }
 0x4c0   :  { %13198 = vst [vmem:[#allocation126_spill] sm:$0xff] %v8932_v18 }
 0x4c1   :  { %2127 = vmatpush.msra.mxu0 %v8920_v58  ;;  %2167 = vmatpush.msra.mxu2 %v8926_v57  ;;  %13199 = vst [vmem:[#allocation127_spill] sm:$0xff] %v8938_v5  ;;  %v8944_v58 = vld [vmem:[%s11951_s5 + $0xf8] sm:$0xff]  ;;  %v8950_v57 = vld [vmem:[%s11951_s5 + $0x100] sm:$0xff] }
 0x4c2   :  { %13200 = vst [vmem:[#allocation23_spill] sm:$0xff] %v8944_v58 }
 0x4c3   :  { %2128 = vmatpush.msra.mxu0 %v8932_v18  ;;  %2168 = vmatpush.msra.mxu2 %v8938_v5  ;;  %13201 = vst [vmem:[#allocation24_spill] sm:$0xff] %v8950_v57  ;;  %v8956_v18 = vld [vmem:[%s11951_s5 + $0xc8] sm:$0xff]  ;;  %v8962_v5 = vld [vmem:[%s11951_s5 + $0xd0] sm:$0xff] }
 0x4c4   :  { %13202 = vst [vmem:[#allocation39_spill] sm:$0xff] %v8956_v18 }
 0x4c5   :  { %2129 = vmatpush.msra.mxu0 %v8944_v58  ;;  %2169 = vmatpush.msra.mxu2 %v8950_v57  ;;  %13203 = vst [vmem:[#allocation18_spill] sm:$0xff] %v8962_v5  ;;  %v8968_v58 = vld [vmem:[%s11951_s5 + $0x98] sm:$0xff]  ;;  %v8974_v57 = vld [vmem:[%s11951_s5 + $0xa0] sm:$0xff] }
 0x4c6   :  { %13204 = vst [vmem:[#allocation17_spill] sm:$0xff] %v8968_v58 }
 0x4c7   :  { %2130 = vmatpush.msra.mxu0 %v8956_v18  ;;  %2170 = vmatpush.msra.mxu2 %v8962_v5  ;;  %13205 = vst [vmem:[#allocation73_spill] sm:$0xff] %v8974_v57  ;;  %v8980_v18 = vld [vmem:[%s11951_s5 + $0x68] sm:$0xff]  ;;  %v8986_v5 = vld [vmem:[%s11951_s5 + $0x70] sm:$0xff] }
 0x4c8   :  { %13206 = vst [vmem:[#allocation77_spill] sm:$0xff] %v8980_v18 }
 0x4c9   :  { %2131 = vmatpush.msra.mxu0 %v8968_v58  ;;  %2171 = vmatpush.msra.mxu2 %v8974_v57  ;;  %13207 = vst [vmem:[#allocation32_spill] sm:$0xff] %v8986_v5  ;;  %v8992_v58 = vld [vmem:[%s11951_s5 + $0x38] sm:$0xff]  ;;  %v8998_v57 = vld [vmem:[%s11951_s5 + $0x40] sm:$0xff] }
 0x4ca   :  { %13208 = vst [vmem:[#allocation10_spill] sm:$0xff] %v8992_v58 }
 0x4cb   :  { %2132 = vmatpush.msra.mxu0 %v8980_v18  ;;  %2172 = vmatpush.msra.mxu2 %v8986_v5  ;;  %13209 = vst [vmem:[#allocation11_spill] sm:$0xff] %v8998_v57  ;;  %v9004_v18 = vld [vmem:[%s11951_s5 + $0x8] sm:$0xff]  ;;  %v9010_v5 = vld [vmem:[%s11951_s5 + $0x10] sm:$0xff] }
 0x4cc   :  { %13210 = vst [vmem:[#allocation12_spill] sm:$0xff] %v9004_v18 }
 0x4cd   :  { %2133 = vmatpush.msra.mxu0 %v8992_v58  ;;  %2173 = vmatpush.msra.mxu2 %v8998_v57  ;;  %13211 = vst [vmem:[#allocation13_spill] sm:$0xff] %v9010_v5  ;;  %v1700_v58 = vpop.f32.mrf.mxu3  ;;  %v13212_v57 = vld [vmem:[#allocation29_spill] sm:$0xff] }
 0x4ce   :  { %v1701_v52 = vadd.f32 %v1700_v58, %v13009_v10  ;;  %v114_v19 = vadd.f32 %v13212_v57, %v13010_v59 }
 0x4cf   :  { %2134 = vmatpush.msra.mxu0 %v9004_v18  ;;  %2174 = vmatpush.msra.mxu2 %v9010_v5 }
 0x4d5   :  { %v1780_v21 = vpop.f32.mrf.mxu3 }
 0x4ed   :  { %v1720_v36 = vpop.f32.mrf.mxu0 }
 0x4ee   :  { %v1721_v43 = vadd.f32 %v1720_v36, %v1701_v52 }
 0x4f0   :  { %v1927_v4 = vadd.f32 %v1721_v43, %v114_v19 }
 0x4f2   :  { %v3745_v18 = vmul.f32 -1.442695, %v1927_v4 }
 0x4f3   :  { %v1760_v15 = vpop.f32.mrf.mxu2 }
 0x4f4   :  { %3827 = vpow2.f32 %v3745_v18  ;;  %v1761_v62 = vadd.f32 %v1760_v15, %v1741_v27 }
 0x4f5   :  { %v1800_v18 = vpop.f32.mrf.mxu0 }
 0x4f6   :  { %v1928_v5 = vadd.f32 %v1761_v62, %v155_v2  ;;  %v1781_v62 = vadd.f32 %v1780_v21, %v12814_v41 }
 0x4f8   :  { %v3746_v38 = vmul.f32 -1.442695, %v1928_v5 }
 0x4fa   :  { %v3828_v34 = vpop.eup %3827  ;;  %3829 = vpow2.f32 %v3746_v38 }
 0x4fb   :  { %v1932_v58 = vadd.f32 1.0, %v3828_v34 }
 0x4fd   :  { %3831 = vrcp.f32 %v1932_v58  ;;  %v1944_v4 = vand.u32 2147483648, %v1932_v58  ;;  %v1942_v59 = vand.u32 2147483647, %v1932_v58  ;;  %vm1938_vm2 = vweird.f32 %v1932_v58 }
 0x4ff   :  { %v1945_v34 = vor.u32 1.1754944e-38, %v1944_v4  ;;  %vm1943_vm4 = vcmp.eq.f32.partialorder %v1942_v59, 8.507059e+37 }
 0x500   :  { %v3830_v10 = vpop.eup %3829 }
 0x501   :  { %v1951_v57 = vadd.f32 1.0, %v3830_v10  ;;  %v1801_v10 = vadd.f32 %v1800_v18, %v1781_v62 }
 0x503   :  { %v3832_v36 = vpop.eup %3831  ;;  %3833 = vrcp.f32 %v1951_v57  ;;  %v1963_v21 = vand.u32 2147483648, %v1951_v57  ;;  %vm1957_vm6 = vweird.f32 %v1951_v57 }
 0x504   :  { %v1934_v43 = vmul.f32 %v3832_v36, %v1932_v58  ;;  %vm1939_vm1 = vweird.f32 %v3832_v36 }
 0x505   :  { %vm1940_vm3 = vmor %vm1938_vm2, %vm1939_vm1 }
 0x506   :  { %v1935_v19 = vsub.f32 1.0, %v1934_v43  ;;  %v13214_v43 = vld [vmem:[#allocation46_spill] sm:$0xff] }
 0x507   :  { %v196_v20 = vadd.f32 %v13214_v43, %v12815_v30  ;;  %v9225_v43 = vld [vmem:[%s11951_s5 + $0xa8] sm:$0xff] }
 0x508   :  { %v1936_v52 = vmul.f32 %v3832_v36, %v1935_v19  ;;  %13215 = vst [vmem:[#allocation14_spill] sm:$0xff] %v9225_v43 }
 0x509   :  { %v3834_v25 = vpop.eup %3833 }
 0x50a   :  { %v1953_v2 = vmul.f32 %v3834_v25, %v1951_v57  ;;  %v1937_v15 = vadd.f32 %v3832_v36, %v1936_v52  ;;  %vm1958_vm5 = vweird.f32 %v3834_v25  ;;  %v1961_v52 = vand.u32 2147483647, %v1951_v57  ;;  %v9108_v57 = vld [vmem:[%s11951_s5 + $0x200] sm:$0xff] }
 0x50b   :  { %vm1959_vm7 = vmor %vm1957_vm6, %vm1958_vm5 }
 0x50c   :  { %v1954_v38 = vsub.f32 1.0, %v1953_v2  ;;  %v1941_v27 = vsel %vm1940_vm3, %v3832_v36, %v1937_v15  ;;  %v1964_v2 = vor.u32 1.1754944e-38, %v1963_v21  ;;  %vm1962_vm8 = vcmp.eq.f32.partialorder %v1961_v52, 8.507059e+37  ;;  %v9168_v15 = vld [vmem:[%s11951_s5 + $0x138] sm:$0xff]  ;;  %v9250_v52 = vld [vmem:[%s11951_s5 + $0x80] sm:$0xff] }
 0x50d   :  { %v1946_v5 = vsel %vm1943_vm4, %v1945_v34, %v1941_v27  ;;  %v9174_v34 = vld [vmem:[%s11951_s5 + $0x140] sm:$0xff]  ;;  %v9206_v27 = vld [vmem:[%s11951_s5 + $0xd8] sm:$0xff]  ;;  %13219 = vst [vmem:[#allocation129_spill] sm:$0xff] %v9250_v52 }
 0x50e   :  { %v1967_v19 = vmul.f32 %v1946_v5, %v1801_v10  ;;  %v1955_v60 = vmul.f32 %v3834_v25, %v1954_v38  ;;  %v9187_v38 = vld [vmem:[%s11951_s5 + $0x108] sm:$0xff]  ;;  %v9193_v10 = vld [vmem:[%s11951_s5 + $0x110] sm:$0xff]  ;;  %v9212_v5 = vld [vmem:[%s11951_s5 + $0xe0] sm:$0xff] }
 0x50f   :  { %v9244_v21 = vld [vmem:[%s11951_s5 + $0x78] sm:$0xff] }
 0x510   :  { %v1968_v35 = vadd.f32 %v1967_v19, %v196_v20  ;;  %v1956_v0 = vadd.f32 %v3834_v25, %v1955_v60  ;;  %v9032_v60 = vld [vmem:[%s11951_s5 + $0x2e8] sm:$0xff]  ;;  %v9038_v20 = vld [vmem:[%s11951_s5 + $0x2f0] sm:$0xff]  ;;  %13218 = vst [vmem:[#allocation128_spill] sm:$0xff] %v9244_v21 }
 0x511   :  { %v9231_v19 = vld [vmem:[%s11951_s5 + $0xb0] sm:$0xff] }
 0x512   :  { %3835 = vtanh.f32 %v1968_v35  ;;  %v1960_v58 = vsel %vm1959_vm7, %v3834_v25, %v1956_v0  ;;  %v9052_v0 = vld [vmem:[%s11951_s5 + $0x2c0] sm:$0xff]  ;;  %v9102_v35 = vld [vmem:[%s11951_s5 + $0x1f8] sm:$0xff]  ;;  %v9155_v25 = vld [vmem:[%s11951_s5 + $0x170] sm:$0xff]  ;;  %13216 = vst [vmem:[#allocation85_spill] sm:$0xff] %v9231_v19 }
 0x513   :  { %v1965_v36 = vsel %vm1962_vm8, %v1964_v2, %v1960_v58  ;;  %v9264_v58 = vld [vmem:[%s11951_s5 + $0x50] sm:$0xff]  ;;  %v9332_v2 = vld [vmem:[%s11953_s3 + $0x120] sm:$0xff] }
 0x514   :  { %13221 = vst [vmem:[#allocation131_spill] sm:$0xff] %v9264_v58 }
 0x515   :  { %13231 = vst [vmem:[#allocation135_spill] sm:$0xff] %v9332_v2 }
 0x518   :  { %v3836_v4 = vpop.eup %3835 }
 0x519   :  { %v1970_v59 = vsub.f32 %v8137_v31, %v3836_v4  ;;  %v9046_v31 = vld [vmem:[%s11951_s5 + $0x2b8] sm:$0xff] }
 0x51b   :  { %v1971_v18 = vmul.f32 %v1970_v59, %v1965_v36  ;;  %v9338_v59 = vld [vmem:[%s11951_s5 + $0x238] sm:$0xff]  ;;  %v9344_v36 = vld [vmem:[%s11953_s3 + $0x108] sm:$0xff] }
 0x51c   :  { %13232 = vst [vmem:[#allocation136_spill] sm:$0xff] %v9338_v59 }
 0x51d   :  { %v9023_v62 = vadd.f32 %v3836_v4, %v1971_v18  ;;  %v9300_v4 = vld [vmem:[%s11951_s5 + $0x2c8] sm:$0xff]  ;;  %13233 = vst [vmem:[#allocation137_spill] sm:$0xff] %v9344_v36 }
 0x51e   :  { %13226 = vst [vmem:[#allocation133_spill] sm:$0xff] %v9300_v4  ;;  %v9350_v18 = vld [vmem:[%s11951_s5 + $0x208] sm:$0xff] }
 0x51f   :  { %1989 = vmatmul.f32.vlgmr.msrb.gmra.mxu3 %v9023_v62  ;;  %2009 = vmatmul.f32.vlgmr.msrb.gmra.mxu0 %v9023_v62  ;;  %13234 = vst [vmem:[#allocation138_spill] sm:$0xff] %v9350_v18 }
 0x520   :  { %2029 = vmatmul.f32.vlgmr.msrb.gmra.mxu1 %v9023_v62  ;;  %2095 = vmatmul.f32.vlgmr.msrb.gmra.mxu2 %v9023_v62 }
 0x521   :  { %2199 = vmatpush.msrb.mxu0 %v9032_v60  ;;  %2239 = vmatpush.msrb.mxu2 %v9038_v20 }
 0x522   :  { %2179 = vmatpush.msrb.mxu3 %v8148_v14  ;;  %2219 = vmatpush.msrb.mxu1 %v8154_v12  ;;  %v9060_v14 = vld [vmem:[%s11951_s5 + $0x288] sm:$0xff]  ;;  %v9066_v12 = vld [vmem:[%s11951_s5 + $0x290] sm:$0xff] }
 0x523   :  { %2200 = vmatpush.msrb.mxu0 %v9046_v31  ;;  %2240 = vmatpush.msrb.mxu2 %v9052_v0 }
 0x524   :  { %2180 = vmatpush.msrb.mxu3 %v8162_v44  ;;  %2220 = vmatpush.msrb.mxu1 %v8168_v63  ;;  %v9074_v44 = vld [vmem:[%s11951_s5 + $0x258] sm:$0xff]  ;;  %v9080_v63 = vld [vmem:[%s11951_s5 + $0x260] sm:$0xff] }
 0x525   :  { %2201 = vmatpush.msrb.mxu0 %v9060_v14  ;;  %2241 = vmatpush.msrb.mxu2 %v9066_v12 }
 0x526   :  { %2181 = vmatpush.msrb.mxu3 %v8176_v51  ;;  %2221 = vmatpush.msrb.mxu1 %v8182_v49  ;;  %v9088_v51 = vld [vmem:[%s11951_s5 + $0x228] sm:$0xff]  ;;  %v9094_v49 = vld [vmem:[%s11951_s5 + $0x230] sm:$0xff] }
 0x527   :  { %2202 = vmatpush.msrb.mxu0 %v9074_v44  ;;  %2242 = vmatpush.msrb.mxu2 %v9080_v63 }
 0x528   :  { %2135 = vmatmul.f32.vlgmr.msra.gmra.mxu0 %v9023_v62  ;;  %2175 = vmatmul.f32.vlgmr.msra.gmra.mxu2 %v9023_v62 }
 0x529   :  { %2203 = vmatpush.msrb.mxu0 %v9088_v51  ;;  %2243 = vmatpush.msrb.mxu2 %v9094_v49 }
 0x52a   :  { %2182 = vmatpush.msrb.mxu3 %v8194_v50  ;;  %2222 = vmatpush.msrb.mxu1 %v8200_v46  ;;  %v9116_v50 = vld [vmem:[%s11951_s5 + $0x1c8] sm:$0xff]  ;;  %v9122_v46 = vld [vmem:[%s11951_s5 + $0x1d0] sm:$0xff] }
 0x52b   :  { %2204 = vmatpush.msrb.mxu0 %v9102_v35  ;;  %2244 = vmatpush.msrb.mxu2 %v9108_v57 }
 0x52c   :  { %2183 = vmatpush.msrb.mxu3 %v8208_v39  ;;  %2223 = vmatpush.msrb.mxu1 %v8214_v3  ;;  %v9130_v39 = vld [vmem:[%s11951_s5 + $0x198] sm:$0xff]  ;;  %v9136_v3 = vld [vmem:[%s11951_s5 + $0x1a0] sm:$0xff] }
 0x52d   :  { %2205 = vmatpush.msrb.mxu0 %v9116_v50  ;;  %2245 = vmatpush.msrb.mxu2 %v9122_v46 }
 0x52e   :  { %2184 = vmatpush.msrb.mxu3 %v8222_v23  ;;  %2224 = vmatpush.msrb.mxu1 %v8228_v55  ;;  %v9143_v23 = vld [vmem:[%s11951_s5 + $0x4c8] sm:$0xff] }
 0x52f   :  { %2206 = vmatpush.msrb.mxu0 %v9130_v39  ;;  %2246 = vmatpush.msrb.mxu2 %v9136_v3  ;;  %v9149_v55 = vld [vmem:[%s11951_s5 + $0x168] sm:$0xff] }
 0x530   :  { %2185 = vmatpush.msrb.mxu3 %v8236_v56  ;;  %2225 = vmatpush.msrb.mxu1 %v9143_v23  ;;  %v9162_v56 = vld [vmem:[%s11951_s5 + $0x498] sm:$0xff] }
 0x531   :  { %2207 = vmatpush.msrb.mxu0 %v9149_v55  ;;  %2247 = vmatpush.msrb.mxu2 %v9155_v25 }
 0x532   :  { %2186 = vmatpush.msrb.mxu3 %v8245_v1  ;;  %2226 = vmatpush.msrb.mxu1 %v9162_v56  ;;  %v9181_v1 = vld [vmem:[%s11951_s5 + $0x468] sm:$0xff] }
 0x533   :  { %2208 = vmatpush.msrb.mxu0 %v9168_v15  ;;  %2248 = vmatpush.msrb.mxu2 %v9174_v34 }
 0x534   :  { %2187 = vmatpush.msrb.mxu3 %v8254_v37  ;;  %2227 = vmatpush.msrb.mxu1 %v9181_v1  ;;  %v9200_v37 = vld [vmem:[%s11951_s5 + $0x438] sm:$0xff] }
 0x535   :  { %2209 = vmatpush.msrb.mxu0 %v9187_v38  ;;  %2249 = vmatpush.msrb.mxu2 %v9193_v10 }
 0x536   :  { %2188 = vmatpush.msrb.mxu3 %v8263_v16  ;;  %2228 = vmatpush.msrb.mxu1 %v9200_v37  ;;  %v9219_v16 = vld [vmem:[%s11951_s5 + $0x408] sm:$0xff] }
 0x537   :  { %2210 = vmatpush.msrb.mxu0 %v9206_v27  ;;  %2250 = vmatpush.msrb.mxu2 %v9212_v5 }
 0x538   :  { %2189 = vmatpush.msrb.mxu3 %v8272_v54  ;;  %2229 = vmatpush.msrb.mxu1 %v9219_v16  ;;  %v9238_v54 = vld [vmem:[%s11951_s5 + $0x3d8] sm:$0xff] }
 0x539   :  { %2211 = vmatpush.msrb.mxu0 %v9225_v43  ;;  %2251 = vmatpush.msrb.mxu2 %v9231_v19  ;;  %13217 = vst [vmem:[#allocation15_spill] sm:$0xff] %v9238_v54 }
 0x53a   :  { %2190 = vmatpush.msrb.mxu3 %v8281_v28  ;;  %2230 = vmatpush.msrb.mxu1 %v9238_v54  ;;  %v9258_v28 = vld [vmem:[%s11951_s5 + $0x48] sm:$0xff] }
 0x53b   :  { %2212 = vmatpush.msrb.mxu0 %v9244_v21  ;;  %2252 = vmatpush.msrb.mxu2 %v9250_v52  ;;  %13220 = vst [vmem:[#allocation130_spill] sm:$0xff] %v9258_v28 }
 0x53c   :  { %2191 = vmatpush.msrb.mxu3 %v8290_v17  ;;  %2231 = vmatpush.msrb.mxu1 %v8296_v48  ;;  %v9272_v17 = vld [vmem:[%s11951_s5 + $0x18] sm:$0xff]  ;;  %v9278_v48 = vld [vmem:[%s11951_s5 + $0x20] sm:$0xff] }
 0x53d   :  { %2213 = vmatpush.msrb.mxu0 %v9258_v28  ;;  %2253 = vmatpush.msrb.mxu2 %v9264_v58  ;;  %13222 = vst [vmem:[#allocation4_spill] sm:$0xff] %v9272_v17 }
 0x53e   :  { %2192 = vmatpush.msrb.mxu3 %v8304_v13  ;;  %2232 = vmatpush.msrb.mxu1 %v8310_v7  ;;  %13223 = vst [vmem:[#allocation16_spill] sm:$0xff] %v9278_v48  ;;  %v9286_v13 = vld [vmem:[%s11951_s5 + $0x2f8] sm:$0xff]  ;;  %v9294_v7 = vld [vmem:[%s11953_s3 + $0x168] sm:$0xff] }
 0x53f   :  { %2214 = vmatpush.msrb.mxu0 %v9272_v17  ;;  %2254 = vmatpush.msrb.mxu2 %v9278_v48  ;;  %13224 = vst [vmem:[#allocation5_spill] sm:$0xff] %v9286_v13 }
 0x540   :  { %2215 = vmatmul.f32.vlgmr.msrb.gmra.mxu0 %v9023_v62  ;;  %2255 = vmatmul.f32.vlgmr.msrb.gmra.mxu2 %v9023_v62  ;;  %13225 = vst [vmem:[#allocation132_spill] sm:$0xff] %v9294_v7 }
 0x541   :  { %2279 = vmatpush.msra.mxu0 %v9286_v13  ;;  %2193 = vmatpush.msrb.mxu3 %v8321_v45  ;;  %v9308_v45 = vld [vmem:[%s11953_s3 + $0x150] sm:$0xff] }
 0x542   :  { %2233 = vmatpush.msrb.mxu1 %v8327_v22  ;;  %2369 = vmatpush.msra.mxu2 %v9294_v7  ;;  %13227 = vst [vmem:[#allocation19_spill] sm:$0xff] %v9308_v45  ;;  %v9314_v22 = vld [vmem:[%s11951_s5 + $0x298] sm:$0xff]  ;;  %v9767_v7 = vld [vmem:[%s11951_s5 + $0x308] sm:$0xff] }
 0x543   :  { %2280 = vmatpush.msra.mxu0 %v9300_v4  ;;  %2194 = vmatpush.msrb.mxu3 %v8335_v40  ;;  %13228 = vst [vmem:[#allocation6_spill] sm:$0xff] %v9314_v22  ;;  %v9320_v40 = vld [vmem:[%s11953_s3 + $0x138] sm:$0xff]  ;;  %v1820_v4 = vpop.f32.mrf.mxu1 }
 0x544   :  { %2234 = vmatpush.msrb.mxu1 %v8341_v42  ;;  %2370 = vmatpush.msra.mxu2 %v9308_v45  ;;  %13229 = vst [vmem:[#allocation20_spill] sm:$0xff] %v9320_v40  ;;  %v9326_v42 = vld [vmem:[%s11951_s5 + $0x268] sm:$0xff] }
 0x545   :  { %2281 = vmatpush.msra.mxu0 %v9314_v22  ;;  %13230 = vst [vmem:[#allocation134_spill] sm:$0xff] %v9326_v42 }
 0x546   :  { %2371 = vmatpush.msra.mxu2 %v9320_v40  ;;  %v9753_v40 = vld [vmem:[%s11951_s5 + $0x368] sm:$0xff]  ;;  %13303 = vst [vmem:[#allocation207_spill] sm:$0xff] %v9767_v7 }
 0x547   :  { %2282 = vmatpush.msra.mxu0 %v9326_v42  ;;  %v9735_v42 = vld [vmem:[%s11951_s5 + $0x3f8] sm:$0xff]  ;;  %13301 = vst [vmem:[#allocation205_spill] sm:$0xff] %v9753_v40 }
 0x548   :  { %2372 = vmatpush.msra.mxu2 %v9332_v2  ;;  %v9356_v2 = vld [vmem:[%s11953_s3 + $0xf0] sm:$0xff]  ;;  %13298 = vst [vmem:[#allocation202_spill] sm:$0xff] %v9735_v42 }
 0x549   :  { %2283 = vmatpush.msra.mxu0 %v9338_v59  ;;  %13235 = vst [vmem:[#allocation139_spill] sm:$0xff] %v9356_v2  ;;  %v9362_v59 = vld [vmem:[%s11951_s5 + $0x1d8] sm:$0xff] }
 0x54a   :  { %2373 = vmatpush.msra.mxu2 %v9344_v36  ;;  %13236 = vst [vmem:[#allocation140_spill] sm:$0xff] %v9362_v59  ;;  %v9368_v36 = vld [vmem:[%s11953_s3 + $0xd8] sm:$0xff] }
 0x54b   :  { %2284 = vmatpush.msra.mxu0 %v9350_v18  ;;  %13237 = vst [vmem:[#allocation141_spill] sm:$0xff] %v9368_v36  ;;  %v9374_v18 = vld [vmem:[%s11951_s5 + $0x1a8] sm:$0xff] }
 0x54c   :  { %2374 = vmatpush.msra.mxu2 %v9356_v2  ;;  %13238 = vst [vmem:[#allocation142_spill] sm:$0xff] %v9374_v18  ;;  %v9380_v2 = vld [vmem:[%s11953_s3 + $0xc0] sm:$0xff] }
 0x54d   :  { %2285 = vmatpush.msra.mxu0 %v9362_v59  ;;  %13239 = vst [vmem:[#allocation143_spill] sm:$0xff] %v9380_v2  ;;  %v9386_v59 = vld [vmem:[%s11951_s5 + $0x178] sm:$0xff] }
 0x54e   :  { %2375 = vmatpush.msra.mxu2 %v9368_v36  ;;  %13240 = vst [vmem:[#allocation144_spill] sm:$0xff] %v9386_v59  ;;  %v9392_v36 = vld [vmem:[%s11953_s3 + $0xa8] sm:$0xff] }
 0x54f   :  { %2286 = vmatpush.msra.mxu0 %v9374_v18  ;;  %13241 = vst [vmem:[#allocation145_spill] sm:$0xff] %v9392_v36  ;;  %v9398_v18 = vld [vmem:[%s11951_s5 + $0x148] sm:$0xff] }
 0x550   :  { %2376 = vmatpush.msra.mxu2 %v9380_v2  ;;  %13242 = vst [vmem:[#allocation146_spill] sm:$0xff] %v9398_v18  ;;  %v9404_v2 = vld [vmem:[%s11953_s3 + $0x90] sm:$0xff] }
 0x551   :  { %2287 = vmatpush.msra.mxu0 %v9386_v59  ;;  %13243 = vst [vmem:[#allocation147_spill] sm:$0xff] %v9404_v2  ;;  %v9410_v59 = vld [vmem:[%s11951_s5 + $0x118] sm:$0xff] }
 0x552   :  { %2377 = vmatpush.msra.mxu2 %v9392_v36  ;;  %13244 = vst [vmem:[#allocation148_spill] sm:$0xff] %v9410_v59  ;;  %v9416_v36 = vld [vmem:[%s11953_s3 + $0x78] sm:$0xff] }
 0x553   :  { %2288 = vmatpush.msra.mxu0 %v9398_v18  ;;  %13245 = vst [vmem:[#allocation149_spill] sm:$0xff] %v9416_v36  ;;  %v9422_v18 = vld [vmem:[%s11951_s5 + $0xe8] sm:$0xff] }
 0x554   :  { %2378 = vmatpush.msra.mxu2 %v9404_v2  ;;  %13246 = vst [vmem:[#allocation150_spill] sm:$0xff] %v9422_v18  ;;  %v9428_v2 = vld [vmem:[%s11953_s3 + $0x60] sm:$0xff] }
 0x555   :  { %2289 = vmatpush.msra.mxu0 %v9410_v59  ;;  %13247 = vst [vmem:[#allocation151_spill] sm:$0xff] %v9428_v2  ;;  %v9434_v59 = vld [vmem:[%s11951_s5 + $0xb8] sm:$0xff] }
 0x556   :  { %2379 = vmatpush.msra.mxu2 %v9416_v36  ;;  %13248 = vst [vmem:[#allocation152_spill] sm:$0xff] %v9434_v59  ;;  %v9440_v36 = vld [vmem:[%s11953_s3 + $0x48] sm:$0xff] }
 0x557   :  { %2290 = vmatpush.msra.mxu0 %v9422_v18  ;;  %13249 = vst [vmem:[#allocation153_spill] sm:$0xff] %v9440_v36  ;;  %v9446_v18 = vld [vmem:[%s11951_s5 + $0x88] sm:$0xff] }
 0x558   :  { %2380 = vmatpush.msra.mxu2 %v9428_v2  ;;  %13250 = vst [vmem:[#allocation154_spill] sm:$0xff] %v9446_v18  ;;  %v9452_v2 = vld [vmem:[%s11953_s3 + $0x30] sm:$0xff] }
 0x559   :  { %2291 = vmatpush.msra.mxu0 %v9434_v59  ;;  %13251 = vst [vmem:[#allocation155_spill] sm:$0xff] %v9452_v2  ;;  %v9458_v59 = vld [vmem:[%s11951_s5 + $0x58] sm:$0xff] }
 0x55a   :  { %2381 = vmatpush.msra.mxu2 %v9440_v36  ;;  %13252 = vst [vmem:[#allocation156_spill] sm:$0xff] %v9458_v59  ;;  %v9464_v36 = vld [vmem:[%s11953_s3 + $0x18] sm:$0xff] }
 0x55b   :  { %2292 = vmatpush.msra.mxu0 %v9446_v18  ;;  %13253 = vst [vmem:[#allocation157_spill] sm:$0xff] %v9464_v36  ;;  %v9470_v18 = vld [vmem:[%s11951_s5 + $0x28] sm:$0xff] }
 0x55c   :  { %2382 = vmatpush.msra.mxu2 %v9452_v2  ;;  %13254 = vst [vmem:[#allocation158_spill] sm:$0xff] %v9470_v18  ;;  %v9495_v2 = vld [vmem:[%s11953_s3 + $0x160] sm:$0xff] }
 0x55d   :  { %2293 = vmatpush.msra.mxu0 %v9458_v59  ;;  %v9477_v59 = vld [vmem:[%s11953_s3] sm:$0xff]  ;;  %13258 = vst [vmem:[#allocation162_spill] sm:$0xff] %v9495_v2 }
 0x55e   :  { %2383 = vmatpush.msra.mxu2 %v9464_v36  ;;  %13255 = vst [vmem:[#allocation159_spill] sm:$0xff] %v9477_v59  ;;  %v9483_v36 = vld [vmem:[%s11953_s3 + $0x178] sm:$0xff] }
 0x55f   :  { %2294 = vmatpush.msra.mxu0 %v9470_v18  ;;  %13256 = vst [vmem:[#allocation160_spill] sm:$0xff] %v9483_v36  ;;  %v9489_v18 = vld [vmem:[%s11951_s5 + $0x5d0] sm:$0xff] }
 0x560   :  { %2295 = vmatmul.f32.vlgmr.msra.gmra.mxu0 %v9023_v62  ;;  %2384 = vmatpush.msra.mxu2 %v9477_v59  ;;  %13257 = vst [vmem:[#allocation161_spill] sm:$0xff] %v9489_v18  ;;  %v9501_v59 = vld [vmem:[%s11951_s5 + $0x5a0] sm:$0xff] }
 0x561   :  { %2409 = vmatpush.msrb.mxu0 %v9483_v36  ;;  %13259 = vst [vmem:[#allocation163_spill] sm:$0xff] %v9501_v59  ;;  %v9507_v36 = vld [vmem:[%s11953_s3 + $0x148] sm:$0xff] }
 0x562   :  { %2495 = vmatpush.msrb.mxu2 %v9489_v18  ;;  %13260 = vst [vmem:[#allocation164_spill] sm:$0xff] %v9507_v36  ;;  %v9513_v18 = vld [vmem:[%s11951_s5 + $0x570] sm:$0xff] }
 0x563   :  { %2410 = vmatpush.msrb.mxu0 %v9495_v2  ;;  %13261 = vst [vmem:[#allocation165_spill] sm:$0xff] %v9513_v18  ;;  %v9519_v2 = vld [vmem:[%s11953_s3 + $0x130] sm:$0xff] }
 0x564   :  { %2496 = vmatpush.msrb.mxu2 %v9501_v59  ;;  %13262 = vst [vmem:[#allocation166_spill] sm:$0xff] %v9519_v2  ;;  %v9525_v59 = vld [vmem:[%s11951_s5 + $0x540] sm:$0xff] }
 0x565   :  { %2411 = vmatpush.msrb.mxu0 %v9507_v36  ;;  %13263 = vst [vmem:[#allocation167_spill] sm:$0xff] %v9525_v59  ;;  %v9531_v36 = vld [vmem:[%s11953_s3 + $0x118] sm:$0xff] }
 0x566   :  { %2497 = vmatpush.msrb.mxu2 %v9513_v18  ;;  %13264 = vst [vmem:[#allocation168_spill] sm:$0xff] %v9531_v36  ;;  %v9537_v18 = vld [vmem:[%s11951_s5 + $0x510] sm:$0xff] }
 0x567   :  { %2412 = vmatpush.msrb.mxu0 %v9519_v2  ;;  %13265 = vst [vmem:[#allocation169_spill] sm:$0xff] %v9537_v18  ;;  %v9543_v2 = vld [vmem:[%s11953_s3 + $0x100] sm:$0xff] }
 0x568   :  { %2498 = vmatpush.msrb.mxu2 %v9525_v59  ;;  %13266 = vst [vmem:[#allocation170_spill] sm:$0xff] %v9543_v2  ;;  %v9549_v59 = vld [vmem:[%s11951_s5 + $0x4e0] sm:$0xff] }
 0x569   :  { %2413 = vmatpush.msrb.mxu0 %v9531_v36  ;;  %13267 = vst [vmem:[#allocation171_spill] sm:$0xff] %v9549_v59  ;;  %v9555_v36 = vld [vmem:[%s11953_s3 + $0xe8] sm:$0xff] }
 0x56a   :  { %2499 = vmatpush.msrb.mxu2 %v9537_v18  ;;  %13268 = vst [vmem:[#allocation172_spill] sm:$0xff] %v9555_v36  ;;  %v9561_v18 = vld [vmem:[%s11951_s5 + $0x4b0] sm:$0xff] }
 0x56b   :  { %2414 = vmatpush.msrb.mxu0 %v9543_v2  ;;  %13269 = vst [vmem:[#allocation173_spill] sm:$0xff] %v9561_v18  ;;  %v9567_v2 = vld [vmem:[%s11953_s3 + $0xd0] sm:$0xff] }
 0x56c   :  { %2500 = vmatpush.msrb.mxu2 %v9549_v59  ;;  %13270 = vst [vmem:[#allocation174_spill] sm:$0xff] %v9567_v2  ;;  %v9573_v59 = vld [vmem:[%s11951_s5 + $0x480] sm:$0xff] }
 0x56d   :  { %2415 = vmatpush.msrb.mxu0 %v9555_v36  ;;  %13271 = vst [vmem:[#allocation175_spill] sm:$0xff] %v9573_v59  ;;  %v9579_v36 = vld [vmem:[%s11953_s3 + $0xb8] sm:$0xff] }
 0x56e   :  { %2501 = vmatpush.msrb.mxu2 %v9561_v18  ;;  %13272 = vst [vmem:[#allocation176_spill] sm:$0xff] %v9579_v36  ;;  %v9585_v18 = vld [vmem:[%s11951_s5 + $0x450] sm:$0xff] }
 0x56f   :  { %2416 = vmatpush.msrb.mxu0 %v9567_v2  ;;  %13273 = vst [vmem:[#allocation177_spill] sm:$0xff] %v9585_v18  ;;  %v9591_v2 = vld [vmem:[%s11953_s3 + $0xa0] sm:$0xff] }
 0x570   :  { %2502 = vmatpush.msrb.mxu2 %v9573_v59  ;;  %13274 = vst [vmem:[#allocation178_spill] sm:$0xff] %v9591_v2  ;;  %v9597_v59 = vld [vmem:[%s11951_s5 + $0x420] sm:$0xff] }
 0x571   :  { %2417 = vmatpush.msrb.mxu0 %v9579_v36  ;;  %13275 = vst [vmem:[#allocation179_spill] sm:$0xff] %v9597_v59  ;;  %v9603_v36 = vld [vmem:[%s11953_s3 + $0x88] sm:$0xff] }
 0x572   :  { %2503 = vmatpush.msrb.mxu2 %v9585_v18  ;;  %13276 = vst [vmem:[#allocation180_spill] sm:$0xff] %v9603_v36  ;;  %v9609_v18 = vld [vmem:[%s11951_s5 + $0x3f0] sm:$0xff] }
 0x573   :  { %2418 = vmatpush.msrb.mxu0 %v9591_v2  ;;  %13277 = vst [vmem:[#allocation181_spill] sm:$0xff] %v9609_v18  ;;  %v9615_v2 = vld [vmem:[%s11953_s3 + $0x70] sm:$0xff] }
 0x574   :  { %2504 = vmatpush.msrb.mxu2 %v9597_v59  ;;  %13278 = vst [vmem:[#allocation182_spill] sm:$0xff] %v9615_v2  ;;  %v9621_v59 = vld [vmem:[%s11951_s5 + $0x3c0] sm:$0xff] }
 0x575   :  { %2419 = vmatpush.msrb.mxu0 %v9603_v36  ;;  %13279 = vst [vmem:[#allocation183_spill] sm:$0xff] %v9621_v59  ;;  %v9627_v36 = vld [vmem:[%s11953_s3 + $0x58] sm:$0xff] }
 0x576   :  { %2505 = vmatpush.msrb.mxu2 %v9609_v18  ;;  %13280 = vst [vmem:[#allocation184_spill] sm:$0xff] %v9627_v36  ;;  %v9633_v18 = vld [vmem:[%s11951_s5 + $0x390] sm:$0xff] }
 0x577   :  { %2420 = vmatpush.msrb.mxu0 %v9615_v2  ;;  %13281 = vst [vmem:[#allocation185_spill] sm:$0xff] %v9633_v18  ;;  %v9639_v2 = vld [vmem:[%s11953_s3 + $0x40] sm:$0xff] }
 0x578   :  { %2506 = vmatpush.msrb.mxu2 %v9621_v59  ;;  %13282 = vst [vmem:[#allocation186_spill] sm:$0xff] %v9639_v2  ;;  %v9645_v59 = vld [vmem:[%s11951_s5 + $0x360] sm:$0xff] }
 0x579   :  { %2421 = vmatpush.msrb.mxu0 %v9627_v36  ;;  %13283 = vst [vmem:[#allocation187_spill] sm:$0xff] %v9645_v59  ;;  %v9651_v36 = vld [vmem:[%s11953_s3 + $0x28] sm:$0xff] }
 0x57a   :  { %2507 = vmatpush.msrb.mxu2 %v9633_v18  ;;  %13284 = vst [vmem:[#allocation188_spill] sm:$0xff] %v9651_v36  ;;  %v9657_v18 = vld [vmem:[%s11951_s5 + $0x330] sm:$0xff] }
 0x57b   :  { %2422 = vmatpush.msrb.mxu0 %v9639_v2  ;;  %13285 = vst [vmem:[#allocation189_spill] sm:$0xff] %v9657_v18  ;;  %v9663_v2 = vld [vmem:[%s11953_s3 + $0x10] sm:$0xff] }
 0x57c   :  { %2508 = vmatpush.msrb.mxu2 %v9645_v59  ;;  %13286 = vst [vmem:[#allocation190_spill] sm:$0xff] %v9663_v2  ;;  %v9669_v59 = vld [vmem:[%s11951_s5 + $0x300] sm:$0xff] }
 0x57d   :  { %2423 = vmatpush.msrb.mxu0 %v9651_v36  ;;  %13287 = vst [vmem:[#allocation191_spill] sm:$0xff] %v9669_v59  ;;  %v9675_v36 = vld [vmem:[%s11951_s5 + $0x5d8] sm:$0xff] }
 0x57e   :  { %2509 = vmatpush.msrb.mxu2 %v9657_v18  ;;  %13288 = vst [vmem:[#allocation192_spill] sm:$0xff] %v9675_v36  ;;  %v9681_v18 = vld [vmem:[%s11951_s5 + $0x5a8] sm:$0xff] }
 0x57f   :  { %2424 = vmatpush.msrb.mxu0 %v9663_v2  ;;  %13289 = vst [vmem:[#allocation193_spill] sm:$0xff] %v9681_v18  ;;  %v9687_v2 = vld [vmem:[%s11951_s5 + $0x578] sm:$0xff] }
 0x580   :  { %2510 = vmatpush.msrb.mxu2 %v9669_v59  ;;  %13290 = vst [vmem:[#allocation194_spill] sm:$0xff] %v9687_v2  ;;  %v9693_v59 = vld [vmem:[%s11951_s5 + $0x548] sm:$0xff] }
 0x581   :  { %2535 = vmatpush.msra.mxu0 %v9675_v36  ;;  %13291 = vst [vmem:[#allocation195_spill] sm:$0xff] %v9693_v59  ;;  %v9699_v36 = vld [vmem:[%s11951_s5 + $0x518] sm:$0xff] }
 0x582   :  { %13292 = vst [vmem:[#allocation196_spill] sm:$0xff] %v9699_v36 }
 0x583   :  { %2536 = vmatpush.msra.mxu0 %v9681_v18  ;;  %v9705_v18 = vld [vmem:[%s11951_s5 + $0x4e8] sm:$0xff] }
 0x584   :  { %13293 = vst [vmem:[#allocation197_spill] sm:$0xff] %v9705_v18 }
 0x585   :  { %2537 = vmatpush.msra.mxu0 %v9687_v2  ;;  %v9711_v2 = vld [vmem:[%s11951_s5 + $0x4b8] sm:$0xff] }
 0x586   :  { %13294 = vst [vmem:[#allocation198_spill] sm:$0xff] %v9711_v2 }
 0x587   :  { %2538 = vmatpush.msra.mxu0 %v9693_v59  ;;  %v9717_v59 = vld [vmem:[%s11951_s5 + $0x488] sm:$0xff] }
 0x588   :  { %13295 = vst [vmem:[#allocation199_spill] sm:$0xff] %v9717_v59 }
 0x589   :  { %2539 = vmatpush.msra.mxu0 %v9699_v36  ;;  %v9723_v36 = vld [vmem:[%s11951_s5 + $0x458] sm:$0xff] }
 0x58a   :  { %13296 = vst [vmem:[#allocation200_spill] sm:$0xff] %v9723_v36 }
 0x58b   :  { %2540 = vmatpush.msra.mxu0 %v9705_v18  ;;  %v9729_v18 = vld [vmem:[%s11951_s5 + $0x428] sm:$0xff] }
 0x58c   :  { %13297 = vst [vmem:[#allocation201_spill] sm:$0xff] %v9729_v18 }
 0x58d   :  { %2541 = vmatpush.msra.mxu0 %v9711_v2  ;;  %v1880_v2 = vpop.f32.mrf.mxu0 }
 0x58f   :  { %2542 = vmatpush.msra.mxu0 %v9717_v59  ;;  %v9741_v59 = vld [vmem:[%s11951_s5 + $0x3c8] sm:$0xff] }
 0x590   :  { %13299 = vst [vmem:[#allocation203_spill] sm:$0xff] %v9741_v59 }
 0x591   :  { %2543 = vmatpush.msra.mxu0 %v9723_v36  ;;  %v1860_v36 = vpop.f32.mrf.mxu3 }
 0x593   :  { %2544 = vmatpush.msra.mxu0 %v9729_v18  ;;  %v9747_v18 = vld [vmem:[%s11951_s5 + $0x398] sm:$0xff] }
 0x594   :  { %13300 = vst [vmem:[#allocation204_spill] sm:$0xff] %v9747_v18 }
 0x595   :  { %2545 = vmatpush.msra.mxu0 %v9735_v42  ;;  %v1861_v42 = vadd.f32 %v1860_v36, %v13114_v61  ;;  %v1840_v61 = vpop.f32.mrf.mxu2 }
 0x597   :  { %2546 = vmatpush.msra.mxu0 %v9741_v59  ;;  %v9760_v59 = vld [vmem:[%s11951_s5 + $0x338] sm:$0xff]  ;;  %v1881_v45 = vadd.f32 %v1880_v2, %v1861_v42 }
 0x598   :  { %13302 = vst [vmem:[#allocation206_spill] sm:$0xff] %v9760_v59 }
 0x599   :  { %2547 = vmatpush.msra.mxu0 %v9747_v18 }
 0x59b   :  { %2548 = vmatpush.msra.mxu0 %v9753_v40  ;;  %v1821_v40 = vadd.f32 %v1820_v4, %v13115_v32 }
 0x59c   :  { %v2010_v22 = vpop.f32.mrf.mxu0 }
 0x59d   :  { %2549 = vmatpush.msra.mxu0 %v9760_v59  ;;  %v2011_v18 = vadd.f32 %v2010_v22, %v13118_v8  ;;  %v1841_v17 = vadd.f32 %v1840_v61, %v1821_v40 }
 0x59f   :  { %2550 = vmatpush.msra.mxu0 %v9767_v7  ;;  %v2034_v36 = vadd.f32 %v2011_v18, %v1881_v45  ;;  %v1900_v45 = vpop.f32.mrf.mxu1 }
 0x5a1   :  { %v3748_v13 = vmul.f32 -1.442695, %v2034_v36 }
 0x5a2   :  { %v1990_v48 = vpop.f32.mrf.mxu3 }
 0x5a3   :  { %v1991_v59 = vadd.f32 %v1990_v48, %v13117_v29  ;;  %3837 = vpow2.f32 %v3748_v13  ;;  %v1901_v13 = vadd.f32 %v1900_v45, %v13120_v53 }
 0x5a5   :  { %v2033_v42 = vadd.f32 %v1991_v59, %v1841_v17  ;;  %v1920_v17 = vpop.f32.mrf.mxu2 }
 0x5a7   :  { %v3747_v22 = vmul.f32 -1.442695, %v2033_v42  ;;  %v2030_v42 = vpop.f32.mrf.mxu1 }
 0x5a9   :  { %3839 = vpow2.f32 %v3747_v22  ;;  %v3838_v2 = vpop.eup %3837  ;;  %v1921_v22 = vadd.f32 %v1920_v17, %v1901_v13  ;;  %v13317_v13 = vld [vmem:[#allocation41_spill] sm:$0xff] }
 0x5aa   :  { %v2057_v58 = vadd.f32 1.0, %v3838_v2 }
 0x5ac   :  { %v2069_v43 = vand.u32 2147483648, %v2057_v58  ;;  %vm2063_vm14 = vweird.f32 %v2057_v58  ;;  %v2067_v45 = vand.u32 2147483647, %v2057_v58 }
 0x5ae   :  { %vm2068_vm0 = vcmp.eq.f32.partialorder %v2067_v45, 8.507059e+37  ;;  %v13326_v45 = vld [vmem:[#allocation60_spill] sm:$0xff] }
 0x5af   :  { %v3840_v8 = vpop.eup %3839 }
 0x5b0   :  { %v2038_v28 = vadd.f32 1.0, %v3840_v8 }
 0x5b2   :  { %3841 = vrcp.f32 %v2038_v28  ;;  %v2050_v32 = vand.u32 2147483648, %v2038_v28  ;;  %v2048_v48 = vand.u32 2147483647, %v2038_v28  ;;  %vm2044_vm10 = vweird.f32 %v2038_v28 }
 0x5b3   :  { %3843 = vrcp.f32 %v2057_v58 }
 0x5b4   :  { %v2051_v8 = vor.u32 1.1754944e-38, %v2050_v32  ;;  %vm2049_vm12 = vcmp.eq.f32.partialorder %v2048_v48, 8.507059e+37 }
 0x5b8   :  { %v3842_v7 = vpop.eup %3841 }
 0x5b9   :  { %v3844_v18 = vpop.eup %3843  ;;  %v2040_v52 = vmul.f32 %v3842_v7, %v2038_v28  ;;  %vm2045_vm9 = vweird.f32 %v3842_v7 }
 0x5ba   :  { %v2059_v36 = vmul.f32 %v3844_v18, %v2057_v58  ;;  %vm2046_vm11 = vmor %vm2044_vm10, %vm2045_vm9  ;;  %vm2064_vm13 = vweird.f32 %v3844_v18  ;;  %v13315_v58 = vld [vmem:[#allocation37_spill] sm:$0xff] }
 0x5bb   :  { %v2041_v4 = vsub.f32 1.0, %v2040_v52  ;;  %v2031_v52 = vadd.f32 %v2030_v42, %v6674_v26  ;;  %vm2065_vm15 = vmor %vm2063_vm14, %vm2064_vm13  ;;  %v13320_v42 = vld [vmem:[#allocation47_spill] sm:$0xff] }
 0x5bc   :  { %v2060_v59 = vsub.f32 1.0, %v2059_v36 }
 0x5bd   :  { %v2042_v61 = vmul.f32 %v3842_v7, %v2041_v4 }
 0x5be   :  { %v2061_v54 = vmul.f32 %v3844_v18, %v2060_v59  ;;  %v13319_v59 = vld [vmem:[#allocation44_spill] sm:$0xff] }
 0x5bf   :  { %v2043_v40 = vadd.f32 %v3842_v7, %v2042_v61  ;;  %v2070_v61 = vor.u32 1.1754944e-38, %v2069_v43  ;;  %v13306_v43 = vld [vmem:[#allocation26_spill] sm:$0xff] }
 0x5c0   :  { %v2062_v19 = vadd.f32 %v3844_v18, %v2061_v54  ;;  %v13313_v54 = vld [vmem:[#allocation34_spill] sm:$0xff] }
 0x5c1   :  { %v2047_v2 = vsel %vm2046_vm11, %v3842_v7, %v2043_v40  ;;  %v13318_v40 = vld [vmem:[#allocation42_spill] sm:$0xff] }
 0x5c2   :  { %v2052_v29 = vsel %vm2049_vm12, %v2051_v8, %v2047_v2  ;;  %v2066_v28 = vsel %vm2065_vm15, %v3844_v18, %v2062_v19  ;;  %v13307_v19 = vld [vmem:[#allocation55_spill] sm:$0xff]  ;;  %v13316_v18 = vld [vmem:[#allocation40_spill] sm:$0xff] }
 0x5c3   :  { %v2073_v21 = vmul.f32 %v2052_v29, %v1921_v22  ;;  %v2071_v7 = vsel %vm2068_vm0, %v2070_v61, %v2066_v28  ;;  %v13304_v29 = vld [vmem:[#allocation25_spill] sm:$0xff]  ;;  %v13321_v8 = vld [vmem:[#allocation48_spill] sm:$0xff]  ;;  %v13327_v28 = vld [vmem:[#allocation66_spill] sm:$0xff] }
 0x5c4   :  { %v13322_v22 = vld [vmem:[#allocation49_spill] sm:$0xff]  ;;  %v13323_v2 = vld [vmem:[#allocation52_spill] sm:$0xff] }
 0x5c5   :  { %v2074_v4 = vadd.f32 %v2073_v21, %v2031_v52  ;;  %v13314_v21 = vld [vmem:[#allocation35_spill] sm:$0xff]  ;;  %v13324_v52 = vld [vmem:[#allocation56_spill] sm:$0xff] }
 0x5c6   :  { %v13329_v61 = vld [vmem:[#allocation72_spill] sm:$0xff] }
 0x5c7   :  { %3845 = vtanh.f32 %v2074_v4  ;;  %v13325_v4 = vld [vmem:[#allocation58_spill] sm:$0xff] }
 0x5cd   :  { %v3846_v36 = vpop.eup %3845 }
 0x5ce   :  { %v2076_v32 = vsub.f32 %v8429_v6, %v3846_v36  ;;  %v13305_v6 = vld [vmem:[#allocation51_spill] sm:$0xff] }
 0x5d0   :  { %v2077_v48 = vmul.f32 %v2076_v32, %v2071_v7  ;;  %v13330_v32 = vld [vmem:[#allocation74_spill] sm:$0xff]  ;;  %v13331_v7 = vld [vmem:[#allocation75_spill] sm:$0xff] }
 0x5d2   :  { %v9775_v17 = vadd.f32 %v3846_v36, %v2077_v48  ;;  %v13328_v36 = vld [vmem:[#allocation71_spill] sm:$0xff]  ;;  %v13332_v48 = vld [vmem:[#allocation76_spill] sm:$0xff] }
 0x5d4   :  { %2115 = vmatmul.f32.vlgmr.msra.gmra.mxu3 %v9775_v17  ;;  %2155 = vmatmul.f32.vlgmr.msra.gmra.mxu1 %v9775_v17 }
 0x5d5   :  { %2259 = vmatpush.msra.mxu3 %v8436_v9  ;;  %2299 = vmatpush.msra.mxu1 %v8442_v47  ;;  %v13308_v9 = vld [vmem:[#allocation27_spill] sm:$0xff]  ;;  %v13309_v47 = vld [vmem:[#allocation57_spill] sm:$0xff] }
 0x5d7   :  { %2260 = vmatpush.msra.mxu3 %v8448_v24  ;;  %2300 = vmatpush.msra.mxu1 %v8454_v33  ;;  %v13310_v24 = vld [vmem:[#allocation28_spill] sm:$0xff]  ;;  %v13311_v33 = vld [vmem:[#allocation30_spill] sm:$0xff] }
 0x5d9   :  { %2261 = vmatpush.msra.mxu3 %v8460_v11  ;;  %2301 = vmatpush.msra.mxu1 %v13304_v29  ;;  %v13312_v11 = vld [vmem:[#allocation33_spill] sm:$0xff]  ;;  %v13333_v29 = vld [vmem:[#allocation78_spill] sm:$0xff] }
 0x5db   :  { %2262 = vmatpush.msra.mxu3 %v13305_v6  ;;  %2302 = vmatpush.msra.mxu1 %v13306_v43  ;;  %v13334_v6 = vld [vmem:[#allocation79_spill] sm:$0xff]  ;;  %v13335_v43 = vld [vmem:[#allocation80_spill] sm:$0xff] }
 0x5dc   :  { %2195 = vmatmul.f32.vlgmr.msrb.gmra.mxu3 %v9775_v17  ;;  %2235 = vmatmul.f32.vlgmr.msrb.gmra.mxu1 %v9775_v17 }
 0x5dd   :  { %2263 = vmatpush.msra.mxu3 %v13307_v19  ;;  %2303 = vmatpush.msra.mxu1 %v13308_v9  ;;  %v13336_v19 = vld [vmem:[#allocation81_spill] sm:$0xff]  ;;  %v13337_v9 = vld [vmem:[#allocation82_spill] sm:$0xff] }
 0x5df   :  { %2264 = vmatpush.msra.mxu3 %v13309_v47  ;;  %2304 = vmatpush.msra.mxu1 %v13310_v24  ;;  %v13338_v47 = vld [vmem:[#allocation83_spill] sm:$0xff]  ;;  %v13339_v24 = vld [vmem:[#allocation84_spill] sm:$0xff] }
 0x5e1   :  { %2265 = vmatpush.msra.mxu3 %v13311_v33  ;;  %2305 = vmatpush.msra.mxu1 %v13312_v11  ;;  %v13340_v33 = vld [vmem:[#allocation59_spill] sm:$0xff]  ;;  %v13341_v11 = vld [vmem:[#allocation86_spill] sm:$0xff] }
 0x5e3   :  { %2266 = vmatpush.msra.mxu3 %v13313_v54  ;;  %2306 = vmatpush.msra.mxu1 %v13314_v21  ;;  %v13342_v54 = vld [vmem:[#allocation87_spill] sm:$0xff]  ;;  %v13343_v21 = vld [vmem:[#allocation88_spill] sm:$0xff] }
 0x5e5   :  { %2267 = vmatpush.msra.mxu3 %v13315_v58  ;;  %2307 = vmatpush.msra.mxu1 %v13316_v18  ;;  %v13344_v58 = vld [vmem:[#allocation89_spill] sm:$0xff]  ;;  %v13345_v18 = vld [vmem:[#allocation90_spill] sm:$0xff] }
 0x5e7   :  { %2268 = vmatpush.msra.mxu3 %v13317_v13  ;;  %2308 = vmatpush.msra.mxu1 %v13318_v40  ;;  %v13346_v13 = vld [vmem:[#allocation91_spill] sm:$0xff]  ;;  %v13347_v40 = vld [vmem:[#allocation92_spill] sm:$0xff] }
 0x5e9   :  { %2269 = vmatpush.msra.mxu3 %v13319_v59  ;;  %2309 = vmatpush.msra.mxu1 %v13320_v42  ;;  %v13348_v59 = vld [vmem:[#allocation93_spill] sm:$0xff]  ;;  %v13349_v42 = vld [vmem:[#allocation94_spill] sm:$0xff] }
 0x5eb   :  { %2270 = vmatpush.msra.mxu3 %v13321_v8  ;;  %2310 = vmatpush.msra.mxu1 %v13322_v22  ;;  %v13350_v8 = vld [vmem:[#allocation95_spill] sm:$0xff]  ;;  %v13351_v22 = vld [vmem:[#allocation96_spill] sm:$0xff] }
 0x5ed   :  { %2271 = vmatpush.msra.mxu3 %v13323_v2  ;;  %2311 = vmatpush.msra.mxu1 %v13324_v52  ;;  %v13352_v2 = vld [vmem:[#allocation97_spill] sm:$0xff]  ;;  %v13353_v52 = vld [vmem:[#allocation98_spill] sm:$0xff] }
 0x5ef   :  { %2272 = vmatpush.msra.mxu3 %v13325_v4  ;;  %2312 = vmatpush.msra.mxu1 %v13326_v45  ;;  %v13354_v4 = vld [vmem:[#allocation99_spill] sm:$0xff]  ;;  %v13355_v45 = vld [vmem:[#allocation100_spill] sm:$0xff] }
 0x5f1   :  { %2273 = vmatpush.msra.mxu3 %v13327_v28  ;;  %2313 = vmatpush.msra.mxu1 %v13328_v36  ;;  %v13356_v28 = vld [vmem:[#allocation101_spill] sm:$0xff]  ;;  %v13357_v36 = vld [vmem:[#allocation102_spill] sm:$0xff] }
 0x5f3   :  { %2274 = vmatpush.msra.mxu3 %v13329_v61  ;;  %2314 = vmatpush.msra.mxu1 %v13330_v32  ;;  %v13358_v61 = vld [vmem:[#allocation103_spill] sm:$0xff]  ;;  %v13359_v32 = vld [vmem:[#allocation104_spill] sm:$0xff] }
 0x5f4   :  { %2275 = vmatmul.f32.vlgmr.msra.gmra.mxu3 %v9775_v17  ;;  %2315 = vmatmul.f32.vlgmr.msra.gmra.mxu1 %v9775_v17 }
 0x5f5   :  { %2389 = vmatpush.msrb.mxu3 %v13331_v7  ;;  %2475 = vmatpush.msrb.mxu1 %v13332_v48  ;;  %v13360_v7 = vld [vmem:[#allocation105_spill] sm:$0xff]  ;;  %v13361_v48 = vld [vmem:[#allocation106_spill] sm:$0xff] }
 0x5f7   :  { %2390 = vmatpush.msrb.mxu3 %v13333_v29  ;;  %2476 = vmatpush.msrb.mxu1 %v13334_v6  ;;  %v13362_v29 = vld [vmem:[#allocation107_spill] sm:$0xff]  ;;  %v13363_v6 = vld [vmem:[#allocation108_spill] sm:$0xff] }
 0x5f9   :  { %2391 = vmatpush.msrb.mxu3 %v13335_v43  ;;  %2477 = vmatpush.msrb.mxu1 %v13336_v19  ;;  %v13364_v43 = vld [vmem:[#allocation109_spill] sm:$0xff]  ;;  %v13365_v19 = vld [vmem:[#allocation110_spill] sm:$0xff] }
 0x5fb   :  { %2392 = vmatpush.msrb.mxu3 %v13337_v9  ;;  %2478 = vmatpush.msrb.mxu1 %v13338_v47  ;;  %v13366_v9 = vld [vmem:[#allocation111_spill] sm:$0xff]  ;;  %v13367_v47 = vld [vmem:[#allocation112_spill] sm:$0xff] }
 0x5fd   :  { %2393 = vmatpush.msrb.mxu3 %v13339_v24  ;;  %2479 = vmatpush.msrb.mxu1 %v13340_v33  ;;  %v13368_v24 = vld [vmem:[#allocation113_spill] sm:$0xff]  ;;  %v13369_v33 = vld [vmem:[#allocation114_spill] sm:$0xff] }
 0x5ff   :  { %2394 = vmatpush.msrb.mxu3 %v13341_v11  ;;  %2480 = vmatpush.msrb.mxu1 %v13342_v54  ;;  %v13370_v11 = vld [vmem:[#allocation115_spill] sm:$0xff]  ;;  %v13371_v54 = vld [vmem:[#allocation116_spill] sm:$0xff] }
 0x601   :  { %2395 = vmatpush.msrb.mxu3 %v13343_v21  ;;  %2481 = vmatpush.msrb.mxu1 %v13344_v58  ;;  %v13372_v21 = vld [vmem:[#allocation117_spill] sm:$0xff]  ;;  %v13373_v58 = vld [vmem:[#allocation118_spill] sm:$0xff] }
 0x603   :  { %2396 = vmatpush.msrb.mxu3 %v13345_v18  ;;  %2482 = vmatpush.msrb.mxu1 %v13346_v13  ;;  %v13374_v18 = vld [vmem:[#allocation119_spill] sm:$0xff]  ;;  %v13375_v13 = vld [vmem:[#allocation120_spill] sm:$0xff] }
 0x605   :  { %2397 = vmatpush.msrb.mxu3 %v13347_v40  ;;  %2483 = vmatpush.msrb.mxu1 %v13348_v59  ;;  %v13376_v40 = vld [vmem:[#allocation121_spill] sm:$0xff]  ;;  %v13377_v59 = vld [vmem:[#allocation122_spill] sm:$0xff] }
 0x607   :  { %2398 = vmatpush.msrb.mxu3 %v13349_v42  ;;  %2484 = vmatpush.msrb.mxu1 %v13350_v8  ;;  %v13378_v42 = vld [vmem:[#allocation123_spill] sm:$0xff]  ;;  %v13379_v8 = vld [vmem:[#allocation124_spill] sm:$0xff] }
 0x609   :  { %2399 = vmatpush.msrb.mxu3 %v13351_v22  ;;  %2485 = vmatpush.msrb.mxu1 %v13352_v2  ;;  %v13380_v22 = vld [vmem:[#allocation125_spill] sm:$0xff]  ;;  %v13381_v2 = vld [vmem:[#allocation126_spill] sm:$0xff] }
 0x60b   :  { %2400 = vmatpush.msrb.mxu3 %v13353_v52  ;;  %2486 = vmatpush.msrb.mxu1 %v13354_v4  ;;  %v13382_v52 = vld [vmem:[#allocation127_spill] sm:$0xff] }
 0x60c   :  { %v13383_v4 = vld [vmem:[#allocation23_spill] sm:$0xff] }
 0x60d   :  { %2401 = vmatpush.msrb.mxu3 %v13355_v45  ;;  %2487 = vmatpush.msrb.mxu1 %v13356_v28  ;;  %v13384_v45 = vld [vmem:[#allocation24_spill] sm:$0xff]  ;;  %v13385_v28 = vld [vmem:[#allocation39_spill] sm:$0xff] }
 0x60f   :  { %2402 = vmatpush.msrb.mxu3 %v13357_v36  ;;  %2488 = vmatpush.msrb.mxu1 %v13358_v61  ;;  %v13386_v36 = vld [vmem:[#allocation18_spill] sm:$0xff]  ;;  %v13387_v61 = vld [vmem:[#allocation17_spill] sm:$0xff] }
 0x611   :  { %2403 = vmatpush.msrb.mxu3 %v13359_v32  ;;  %2489 = vmatpush.msrb.mxu1 %v13360_v7  ;;  %v13388_v32 = vld [vmem:[#allocation73_spill] sm:$0xff] }
 0x612   :  { %v13389_v7 = vld [vmem:[#allocation77_spill] sm:$0xff] }
 0x613   :  { %2404 = vmatpush.msrb.mxu3 %v13361_v48  ;;  %2490 = vmatpush.msrb.mxu1 %v13362_v29  ;;  %v13390_v48 = vld [vmem:[#allocation32_spill] sm:$0xff]  ;;  %v13391_v29 = vld [vmem:[#allocation10_spill] sm:$0xff] }
 0x615   :  { %2515 = vmatpush.msra.mxu3 %v13363_v6  ;;  %2555 = vmatpush.msra.mxu1 %v13364_v43  ;;  %v13392_v6 = vld [vmem:[#allocation11_spill] sm:$0xff]  ;;  %v13393_v43 = vld [vmem:[#allocation12_spill] sm:$0xff] }
 0x617   :  { %2516 = vmatpush.msra.mxu3 %v13365_v19  ;;  %2556 = vmatpush.msra.mxu1 %v13366_v9  ;;  %v13394_v19 = vld [vmem:[#allocation13_spill] sm:$0xff]  ;;  %v2136_v9 = vpop.f32.mrf.mxu0 }
 0x619   :  { %2517 = vmatpush.msra.mxu3 %v13367_v47  ;;  %2557 = vmatpush.msra.mxu1 %v13368_v24  ;;  %v13395_v47 = vld [vmem:[#allocation67_spill] sm:$0xff] }
 0x61a   :  { %v2137_v24 = vadd.f32 %v2136_v9, %v13395_v47 }
 0x61b   :  { %2518 = vmatpush.msra.mxu3 %v13369_v33  ;;  %2558 = vmatpush.msra.mxu1 %v13370_v11  ;;  %v13396_v11 = vld [vmem:[#allocation68_spill] sm:$0xff] }
 0x61d   :  { %2519 = vmatpush.msra.mxu3 %v13371_v54  ;;  %2559 = vmatpush.msra.mxu1 %v13372_v21  ;;  %v13397_v54 = vld [vmem:[#allocation38_spill] sm:$0xff] }
 0x61e   :  { %v158_v21 = vadd.f32 %v13397_v54, %v13396_v11 }
 0x61f   :  { %2520 = vmatpush.msra.mxu3 %v13373_v58  ;;  %2560 = vmatpush.msra.mxu1 %v13374_v18  ;;  %v2096_v18 = vpop.f32.mrf.mxu2 }
 0x621   :  { %2521 = vmatpush.msra.mxu3 %v13375_v13  ;;  %2561 = vmatpush.msra.mxu1 %v13376_v40  ;;  %v13398_v40 = vld [vmem:[#allocation61_spill] sm:$0xff] }
 0x623   :  { %2522 = vmatpush.msra.mxu3 %v13377_v59  ;;  %2562 = vmatpush.msra.mxu1 %v13378_v42  ;;  %v2097_v59 = vadd.f32 %v2096_v18, %v13398_v40 }
 0x625   :  { %2523 = vmatpush.msra.mxu3 %v13379_v8  ;;  %2563 = vmatpush.msra.mxu1 %v13380_v22  ;;  %v13399_v22 = vld [vmem:[#allocation65_spill] sm:$0xff] }
 0x627   :  { %2524 = vmatpush.msra.mxu3 %v13381_v2  ;;  %2564 = vmatpush.msra.mxu1 %v13382_v52  ;;  %v13400_v2 = vld [vmem:[#allocation36_spill] sm:$0xff] }
 0x628   :  { %v117_v52 = vadd.f32 %v13400_v2, %v13399_v22 }
 0x629   :  { %2525 = vmatpush.msra.mxu3 %v13383_v4  ;;  %2565 = vmatpush.msra.mxu1 %v13384_v45 }
 0x62b   :  { %2526 = vmatpush.msra.mxu3 %v13385_v28  ;;  %2566 = vmatpush.msra.mxu1 %v13386_v36 }
 0x62d   :  { %2527 = vmatpush.msra.mxu3 %v13387_v61  ;;  %2567 = vmatpush.msra.mxu1 %v13388_v32 }
 0x62f   :  { %2528 = vmatpush.msra.mxu3 %v13389_v7  ;;  %2568 = vmatpush.msra.mxu1 %v13390_v48 }
 0x631   :  { %2529 = vmatpush.msra.mxu3 %v13391_v29  ;;  %2569 = vmatpush.msra.mxu1 %v13392_v6 }
 0x633   :  { %2530 = vmatpush.msra.mxu3 %v13393_v43  ;;  %2570 = vmatpush.msra.mxu1 %v13394_v19  ;;  %v2176_v19 = vpop.f32.mrf.mxu2 }
 0x651   :  { %v2156_v33 = vpop.f32.mrf.mxu1 }
 0x652   :  { %v2157_v58 = vadd.f32 %v2156_v33, %v2137_v24 }
 0x654   :  { %v2324_v13 = vadd.f32 %v2157_v58, %v158_v21  ;;  %v2177_v58 = vadd.f32 %v2176_v19, %v12814_v41 }
 0x656   :  { %v3750_v42 = vmul.f32 -1.442695, %v2324_v13 }
 0x657   :  { %v2116_v8 = vpop.f32.mrf.mxu3 }
 0x658   :  { %v2117_v4 = vadd.f32 %v2116_v8, %v2097_v59  ;;  %3847 = vpow2.f32 %v3750_v42 }
 0x65a   :  { %v2323_v45 = vadd.f32 %v2117_v4, %v117_v52  ;;  %v13401_v52 = vld [vmem:[#allocation54_spill] sm:$0xff] }
 0x65b   :  { %v199_v4 = vadd.f32 %v13401_v52, %v12815_v30  ;;  %v13416_v52 = vld [vmem:[#allocation20_spill] sm:$0xff] }
 0x65c   :  { %v3749_v28 = vmul.f32 -1.442695, %v2323_v45 }
 0x65e   :  { %3849 = vpow2.f32 %v3749_v28  ;;  %v3848_v36 = vpop.eup %3847 }
 0x65f   :  { %v2347_v32 = vadd.f32 1.0, %v3848_v36  ;;  %v2196_v21 = vpop.f32.mrf.mxu3 }
 0x660   :  { %v2197_v42 = vadd.f32 %v2196_v21, %v2177_v58  ;;  %v10073_v21 = vld [vmem:[%s11951_s5 + $0x340] sm:$0xff]  ;;  %v10079_v58 = vld [vmem:[%s11951_s5 + $0x348] sm:$0xff] }
 0x661   :  { %vm2353_vm6 = vweird.f32 %v2347_v32 }
 0x664   :  { %v3850_v61 = vpop.eup %3849 }
 0x665   :  { %v2328_v7 = vadd.f32 1.0, %v3850_v61 }
 0x667   :  { %3851 = vrcp.f32 %v2328_v7  ;;  %v2340_v24 = vand.u32 2147483648, %v2328_v7  ;;  %v2338_v54 = vand.u32 2147483647, %v2328_v7  ;;  %vm2334_vm2 = vweird.f32 %v2328_v7 }
 0x668   :  { %3853 = vrcp.f32 %v2347_v32 }
 0x669   :  { %v2341_v59 = vor.u32 1.1754944e-38, %v2340_v24  ;;  %vm2339_vm4 = vcmp.eq.f32.partialorder %v2338_v54, 8.507059e+37 }
 0x66d   :  { %v3852_v48 = vpop.eup %3851 }
 0x66e   :  { %v3854_v29 = vpop.eup %3853  ;;  %v2330_v6 = vmul.f32 %v3852_v48, %v2328_v7  ;;  %vm2335_vm1 = vweird.f32 %v3852_v48 }
 0x66f   :  { %v2349_v9 = vmul.f32 %v3854_v29, %v2347_v32  ;;  %vm2336_vm3 = vmor %vm2334_vm2, %vm2335_vm1  ;;  %vm2354_vm5 = vweird.f32 %v3854_v29 }
 0x670   :  { %v2331_v43 = vsub.f32 1.0, %v2330_v6  ;;  %v2359_v6 = vand.u32 2147483648, %v2347_v32  ;;  %vm2355_vm7 = vmor %vm2353_vm6, %vm2354_vm5 }
 0x671   :  { %v2350_v13 = vsub.f32 1.0, %v2349_v9 }
 0x672   :  { %v2332_v33 = vmul.f32 %v3852_v48, %v2331_v43  ;;  %v2357_v43 = vand.u32 2147483647, %v2347_v32  ;;  %v2360_v9 = vor.u32 1.1754944e-38, %v2359_v6  ;;  %v9906_v32 = vld [vmem:[%s11951_s5 + $0x5e8] sm:$0xff]  ;;  %v13422_v6 = vld [vmem:[#allocation139_spill] sm:$0xff] }
 0x673   :  { %v2351_v28 = vmul.f32 %v3854_v29, %v2350_v13  ;;  %v13413_v13 = vld [vmem:[#allocation133_spill] sm:$0xff] }
 0x674   :  { %v2333_v18 = vadd.f32 %v3852_v48, %v2332_v33  ;;  %vm2358_vm8 = vcmp.eq.f32.partialorder %v2357_v43, 8.507059e+37  ;;  %v13423_v43 = vld [vmem:[#allocation140_spill] sm:$0xff] }
 0x675   :  { %v2352_v61 = vadd.f32 %v3854_v29, %v2351_v28  ;;  %v13419_v28 = vld [vmem:[#allocation136_spill] sm:$0xff] }
 0x676   :  { %v2337_v8 = vsel %vm2336_vm3, %v3852_v48, %v2333_v18  ;;  %v13412_v18 = vld [vmem:[#allocation132_spill] sm:$0xff] }
 0x677   :  { %v2342_v2 = vsel %vm2339_vm4, %v2341_v59, %v2337_v8  ;;  %v2356_v7 = vsel %vm2355_vm7, %v3854_v29, %v2352_v61  ;;  %v13411_v29 = vld [vmem:[#allocation5_spill] sm:$0xff]  ;;  %v13414_v8 = vld [vmem:[#allocation19_spill] sm:$0xff]  ;;  %v13421_v61 = vld [vmem:[#allocation138_spill] sm:$0xff] }
 0x678   :  { %v2363_v45 = vmul.f32 %v2342_v2, %v2197_v42  ;;  %v2361_v24 = vsel %vm2358_vm8, %v2360_v9, %v2356_v7  ;;  %v10087_v59 = vld [vmem:[%s11951_s5 + $0x310] sm:$0xff]  ;;  %v10093_v42 = vld [vmem:[%s11951_s5 + $0x318] sm:$0xff] }
 0x679   :  { %v13415_v2 = vld [vmem:[#allocation6_spill] sm:$0xff]  ;;  %v13424_v7 = vld [vmem:[#allocation141_spill] sm:$0xff]  ;;  %v13426_v9 = vld [vmem:[#allocation143_spill] sm:$0xff] }
 0x67a   :  { %v2364_v36 = vadd.f32 %v2363_v45, %v199_v4  ;;  %v13417_v4 = vld [vmem:[#allocation134_spill] sm:$0xff]  ;;  %v13418_v45 = vld [vmem:[#allocation135_spill] sm:$0xff] }
 0x67c   :  { %3855 = vtanh.f32 %v2364_v36  ;;  %v13420_v36 = vld [vmem:[#allocation137_spill] sm:$0xff] }
 0x682   :  { %v3856_v19 = vpop.eup %3855 }
 0x683   :  { %v2366_v48 = vsub.f32 %v9023_v62, %v3856_v19  ;;  %v9900_v62 = vld [vmem:[%s11951_s5 + $0x5e0] sm:$0xff] }
 0x685   :  { %v2367_v33 = vmul.f32 %v2366_v48, %v2361_v24  ;;  %v13427_v48 = vld [vmem:[#allocation144_spill] sm:$0xff]  ;;  %v13428_v24 = vld [vmem:[#allocation145_spill] sm:$0xff] }
 0x687   :  { %v9889_v54 = vadd.f32 %v3856_v19, %v2367_v33  ;;  %v13425_v19 = vld [vmem:[#allocation142_spill] sm:$0xff] }
 0x688   :  { %v13429_v33 = vld [vmem:[#allocation146_spill] sm:$0xff] }
 0x689   :  { %2385 = vmatmul.f32.vlgmr.msra.gmra.mxu2 %v9889_v54  ;;  %2405 = vmatmul.f32.vlgmr.msrb.gmra.mxu3 %v9889_v54 }
 0x68a   :  { %2425 = vmatmul.f32.vlgmr.msrb.gmra.mxu0 %v9889_v54  ;;  %2491 = vmatmul.f32.vlgmr.msrb.gmra.mxu1 %v9889_v54 }
 0x68b   :  { %2595 = vmatpush.msrb.mxu3 %v9032_v60  ;;  %2635 = vmatpush.msrb.mxu1 %v9038_v20  ;;  %v9914_v60 = vld [vmem:[%s11951_s5 + $0x5b0] sm:$0xff]  ;;  %v9920_v20 = vld [vmem:[%s11951_s5 + $0x5b8] sm:$0xff] }
 0x68c   :  { %2575 = vmatpush.msra.mxu2 %v9900_v62  ;;  %2615 = vmatpush.msrb.mxu0 %v9906_v32 }
 0x68d   :  { %2596 = vmatpush.msrb.mxu3 %v9046_v31  ;;  %2636 = vmatpush.msrb.mxu1 %v9052_v0  ;;  %v9928_v31 = vld [vmem:[%s11951_s5 + $0x580] sm:$0xff]  ;;  %v9934_v0 = vld [vmem:[%s11951_s5 + $0x588] sm:$0xff] }
 0x68e   :  { %2576 = vmatpush.msra.mxu2 %v9914_v60  ;;  %2616 = vmatpush.msrb.mxu0 %v9920_v20 }
 0x68f   :  { %2597 = vmatpush.msrb.mxu3 %v9060_v14  ;;  %2637 = vmatpush.msrb.mxu1 %v9066_v12  ;;  %v9946_v14 = vld [vmem:[%s11951_s5 + $0x550] sm:$0xff]  ;;  %v9952_v12 = vld [vmem:[%s11951_s5 + $0x558] sm:$0xff] }
 0x690   :  { %2577 = vmatpush.msra.mxu2 %v9928_v31  ;;  %2617 = vmatpush.msrb.mxu0 %v9934_v0 }
 0x691   :  { %2598 = vmatpush.msrb.mxu3 %v9074_v44  ;;  %2638 = vmatpush.msrb.mxu1 %v9080_v63  ;;  %v9960_v44 = vld [vmem:[%s11951_s5 + $0x520] sm:$0xff]  ;;  %v9966_v63 = vld [vmem:[%s11951_s5 + $0x528] sm:$0xff] }
 0x692   :  { %2531 = vmatmul.f32.vlgmr.msra.gmra.mxu3 %v9889_v54  ;;  %2571 = vmatmul.f32.vlgmr.msra.gmra.mxu1 %v9889_v54 }
 0x693   :  { %2599 = vmatpush.msrb.mxu3 %v9088_v51  ;;  %2639 = vmatpush.msrb.mxu1 %v9094_v49  ;;  %v9974_v51 = vld [vmem:[%s11951_s5 + $0x4f0] sm:$0xff]  ;;  %v9980_v49 = vld [vmem:[%s11951_s5 + $0x4f8] sm:$0xff] }
 0x694   :  { %2578 = vmatpush.msra.mxu2 %v9946_v14  ;;  %2618 = vmatpush.msrb.mxu0 %v9952_v12 }
 0x695   :  { %2600 = vmatpush.msrb.mxu3 %v9102_v35  ;;  %2640 = vmatpush.msrb.mxu1 %v9108_v57  ;;  %v9988_v35 = vld [vmem:[%s11951_s5 + $0x4c0] sm:$0xff]  ;;  %v9997_v57 = vld [vmem:[%s11951_s5 + $0x490] sm:$0xff] }
 0x696   :  { %2579 = vmatpush.msra.mxu2 %v9960_v44  ;;  %2619 = vmatpush.msrb.mxu0 %v9966_v63 }
 0x697   :  { %2601 = vmatpush.msrb.mxu3 %v9116_v50  ;;  %2641 = vmatpush.msrb.mxu1 %v9122_v46  ;;  %v10006_v50 = vld [vmem:[%s11951_s5 + $0x460] sm:$0xff]  ;;  %v10015_v46 = vld [vmem:[%s11951_s5 + $0x430] sm:$0xff] }
 0x698   :  { %2580 = vmatpush.msra.mxu2 %v9974_v51  ;;  %2620 = vmatpush.msrb.mxu0 %v9980_v49 }
 0x699   :  { %2602 = vmatpush.msrb.mxu3 %v9130_v39  ;;  %2642 = vmatpush.msrb.mxu1 %v9136_v3  ;;  %v10024_v39 = vld [vmem:[%s11951_s5 + $0x400] sm:$0xff]  ;;  %v13402_v3 = vld [vmem:[#allocation14_spill] sm:$0xff] }
 0x69a   :  { %2581 = vmatpush.msra.mxu2 %v9988_v35  ;;  %2621 = vmatpush.msrb.mxu0 %v9143_v23  ;;  %v13403_v23 = vld [vmem:[#allocation85_spill] sm:$0xff] }
 0x69b   :  { %2603 = vmatpush.msrb.mxu3 %v9149_v55  ;;  %2643 = vmatpush.msrb.mxu1 %v9155_v25  ;;  %v10033_v55 = vld [vmem:[%s11951_s5 + $0x3d0] sm:$0xff]  ;;  %v13404_v25 = vld [vmem:[#allocation15_spill] sm:$0xff] }
 0x69c   :  { %2582 = vmatpush.msra.mxu2 %v9997_v57  ;;  %2622 = vmatpush.msrb.mxu0 %v9162_v56  ;;  %v13405_v56 = vld [vmem:[#allocation128_spill] sm:$0xff] }
 0x69d   :  { %2604 = vmatpush.msrb.mxu3 %v9168_v15  ;;  %2644 = vmatpush.msrb.mxu1 %v9174_v34  ;;  %v13406_v15 = vld [vmem:[#allocation129_spill] sm:$0xff]  ;;  %v10042_v34 = vld [vmem:[%s11951_s5 + $0x3a0] sm:$0xff] }
 0x69e   :  { %2583 = vmatpush.msra.mxu2 %v10006_v50  ;;  %2623 = vmatpush.msrb.mxu0 %v9181_v1  ;;  %v10048_v1 = vld [vmem:[%s11951_s5 + $0x3a8] sm:$0xff] }
 0x69f   :  { %2605 = vmatpush.msrb.mxu3 %v9187_v38  ;;  %2645 = vmatpush.msrb.mxu1 %v9193_v10  ;;  %v13407_v38 = vld [vmem:[#allocation130_spill] sm:$0xff]  ;;  %v13408_v10 = vld [vmem:[#allocation131_spill] sm:$0xff] }
 0x6a0   :  { %2584 = vmatpush.msra.mxu2 %v10015_v46  ;;  %2624 = vmatpush.msrb.mxu0 %v9200_v37  ;;  %v10056_v37 = vld [vmem:[%s11951_s5 + $0x370] sm:$0xff] }
 0x6a1   :  { %2606 = vmatpush.msrb.mxu3 %v9206_v27  ;;  %2646 = vmatpush.msrb.mxu1 %v9212_v5  ;;  %v10062_v27 = vld [vmem:[%s11951_s5 + $0x378] sm:$0xff]  ;;  %v13409_v5 = vld [vmem:[#allocation4_spill] sm:$0xff] }
 0x6a2   :  { %2585 = vmatpush.msra.mxu2 %v10024_v39  ;;  %2625 = vmatpush.msrb.mxu0 %v9219_v16  ;;  %v13410_v16 = vld [vmem:[#allocation16_spill] sm:$0xff] }
 0x6a3   :  { %2607 = vmatpush.msrb.mxu3 %v13402_v3  ;;  %2647 = vmatpush.msrb.mxu1 %v13403_v23  ;;  %v13430_v3 = vld [vmem:[#allocation147_spill] sm:$0xff]  ;;  %v13431_v23 = vld [vmem:[#allocation148_spill] sm:$0xff] }
 0x6a4   :  { %2586 = vmatpush.msra.mxu2 %v10033_v55  ;;  %2626 = vmatpush.msrb.mxu0 %v13404_v25  ;;  %v13432_v25 = vld [vmem:[#allocation149_spill] sm:$0xff] }
 0x6a5   :  { %2608 = vmatpush.msrb.mxu3 %v13405_v56  ;;  %2648 = vmatpush.msrb.mxu1 %v13406_v15  ;;  %v13433_v56 = vld [vmem:[#allocation150_spill] sm:$0xff]  ;;  %v13434_v15 = vld [vmem:[#allocation151_spill] sm:$0xff] }
 0x6a6   :  { %2587 = vmatpush.msra.mxu2 %v10042_v34  ;;  %2627 = vmatpush.msrb.mxu0 %v10048_v1 }
 0x6a7   :  { %2609 = vmatpush.msrb.mxu3 %v13407_v38  ;;  %2649 = vmatpush.msrb.mxu1 %v13408_v10  ;;  %v13435_v38 = vld [vmem:[#allocation152_spill] sm:$0xff]  ;;  %v13436_v10 = vld [vmem:[#allocation153_spill] sm:$0xff] }
 0x6a8   :  { %2588 = vmatpush.msra.mxu2 %v10056_v37  ;;  %2628 = vmatpush.msrb.mxu0 %v10062_v27 }
 0x6a9   :  { %2610 = vmatpush.msrb.mxu3 %v13409_v5  ;;  %2650 = vmatpush.msrb.mxu1 %v13410_v16  ;;  %v13437_v5 = vld [vmem:[#allocation154_spill] sm:$0xff]  ;;  %v13438_v16 = vld [vmem:[#allocation155_spill] sm:$0xff] }
 0x6aa   :  { %2611 = vmatmul.f32.vlgmr.msrb.gmra.mxu3 %v9889_v54  ;;  %2651 = vmatmul.f32.vlgmr.msrb.gmra.mxu1 %v9889_v54 }
 0x6ab   :  { %2675 = vmatpush.msra.mxu3 %v13411_v29  ;;  %2589 = vmatpush.msra.mxu2 %v10073_v21  ;;  %v13439_v29 = vld [vmem:[#allocation156_spill] sm:$0xff] }
 0x6ac   :  { %2629 = vmatpush.msrb.mxu0 %v10079_v58  ;;  %2765 = vmatpush.msra.mxu1 %v13412_v18  ;;  %v13440_v18 = vld [vmem:[#allocation157_spill] sm:$0xff] }
 0x6ad   :  { %2676 = vmatpush.msra.mxu3 %v13413_v13  ;;  %2590 = vmatpush.msra.mxu2 %v10087_v59  ;;  %v13441_v13 = vld [vmem:[#allocation158_spill] sm:$0xff] }
 0x6ae   :  { %2630 = vmatpush.msrb.mxu0 %v10093_v42  ;;  %2766 = vmatpush.msra.mxu1 %v13414_v8  ;;  %v13442_v8 = vld [vmem:[#allocation159_spill] sm:$0xff] }
 0x6af   :  { %2677 = vmatpush.msra.mxu3 %v13415_v2  ;;  %v13443_v2 = vld [vmem:[#allocation160_spill] sm:$0xff] }
 0x6b0   :  { %2767 = vmatpush.msra.mxu1 %v13416_v52  ;;  %v13444_v52 = vld [vmem:[#allocation161_spill] sm:$0xff] }
 0x6b1   :  { %2678 = vmatpush.msra.mxu3 %v13417_v4  ;;  %v13445_v4 = vld [vmem:[#allocation162_spill] sm:$0xff] }
 0x6b2   :  { %2768 = vmatpush.msra.mxu1 %v13418_v45  ;;  %v13446_v45 = vld [vmem:[#allocation163_spill] sm:$0xff] }
 0x6b3   :  { %2679 = vmatpush.msra.mxu3 %v13419_v28  ;;  %v13447_v28 = vld [vmem:[#allocation164_spill] sm:$0xff] }
 0x6b4   :  { %2769 = vmatpush.msra.mxu1 %v13420_v36  ;;  %v13448_v36 = vld [vmem:[#allocation165_spill] sm:$0xff] }
 0x6b5   :  { %2680 = vmatpush.msra.mxu3 %v13421_v61  ;;  %v13449_v61 = vld [vmem:[#allocation166_spill] sm:$0xff] }
 0x6b6   :  { %2770 = vmatpush.msra.mxu1 %v13422_v6  ;;  %v13450_v6 = vld [vmem:[#allocation167_spill] sm:$0xff] }
 0x6b7   :  { %2681 = vmatpush.msra.mxu3 %v13423_v43  ;;  %v13451_v43 = vld [vmem:[#allocation168_spill] sm:$0xff] }
 0x6b8   :  { %2771 = vmatpush.msra.mxu1 %v13424_v7  ;;  %v13452_v7 = vld [vmem:[#allocation169_spill] sm:$0xff] }
 0x6b9   :  { %2682 = vmatpush.msra.mxu3 %v13425_v19  ;;  %v13453_v19 = vld [vmem:[#allocation170_spill] sm:$0xff] }
 0x6ba   :  { %2772 = vmatpush.msra.mxu1 %v13426_v9  ;;  %v13454_v9 = vld [vmem:[#allocation171_spill] sm:$0xff] }
 0x6bb   :  { %2683 = vmatpush.msra.mxu3 %v13427_v48  ;;  %v13455_v48 = vld [vmem:[#allocation172_spill] sm:$0xff] }
 0x6bc   :  { %2773 = vmatpush.msra.mxu1 %v13428_v24  ;;  %v13456_v24 = vld [vmem:[#allocation173_spill] sm:$0xff] }
 0x6bd   :  { %2684 = vmatpush.msra.mxu3 %v13429_v33  ;;  %v13457_v33 = vld [vmem:[#allocation174_spill] sm:$0xff] }
 0x6be   :  { %2774 = vmatpush.msra.mxu1 %v13430_v3  ;;  %v13458_v3 = vld [vmem:[#allocation175_spill] sm:$0xff] }
 0x6bf   :  { %2685 = vmatpush.msra.mxu3 %v13431_v23  ;;  %v13459_v23 = vld [vmem:[#allocation176_spill] sm:$0xff] }
 0x6c0   :  { %2775 = vmatpush.msra.mxu1 %v13432_v25  ;;  %v13460_v25 = vld [vmem:[#allocation177_spill] sm:$0xff] }
 0x6c1   :  { %2686 = vmatpush.msra.mxu3 %v13433_v56  ;;  %v13461_v56 = vld [vmem:[#allocation178_spill] sm:$0xff] }
 0x6c2   :  { %2776 = vmatpush.msra.mxu1 %v13434_v15  ;;  %v13462_v15 = vld [vmem:[#allocation179_spill] sm:$0xff] }
 0x6c3   :  { %2687 = vmatpush.msra.mxu3 %v13435_v38  ;;  %v13463_v38 = vld [vmem:[#allocation180_spill] sm:$0xff] }
 0x6c4   :  { %2777 = vmatpush.msra.mxu1 %v13436_v10  ;;  %v13464_v10 = vld [vmem:[#allocation181_spill] sm:$0xff] }
 0x6c5   :  { %2688 = vmatpush.msra.mxu3 %v13437_v5  ;;  %v13465_v5 = vld [vmem:[#allocation182_spill] sm:$0xff] }
 0x6c6   :  { %2778 = vmatpush.msra.mxu1 %v13438_v16  ;;  %v13466_v16 = vld [vmem:[#allocation183_spill] sm:$0xff] }
 0x6c7   :  { %2689 = vmatpush.msra.mxu3 %v13439_v29  ;;  %v13467_v29 = vld [vmem:[#allocation184_spill] sm:$0xff] }
 0x6c8   :  { %2779 = vmatpush.msra.mxu1 %v13440_v18  ;;  %v13468_v18 = vld [vmem:[#allocation185_spill] sm:$0xff] }
 0x6c9   :  { %2690 = vmatpush.msra.mxu3 %v13441_v13  ;;  %v13469_v13 = vld [vmem:[#allocation186_spill] sm:$0xff] }
 0x6ca   :  { %2691 = vmatmul.f32.vlgmr.msra.gmra.mxu3 %v9889_v54  ;;  %2780 = vmatpush.msra.mxu1 %v13442_v8  ;;  %v13470_v8 = vld [vmem:[#allocation187_spill] sm:$0xff] }
 0x6cb   :  { %2805 = vmatpush.msrb.mxu3 %v13443_v2  ;;  %v13471_v2 = vld [vmem:[#allocation188_spill] sm:$0xff] }
 0x6cc   :  { %2891 = vmatpush.msrb.mxu1 %v13444_v52  ;;  %v13472_v52 = vld [vmem:[#allocation189_spill] sm:$0xff] }
 0x6cd   :  { %2806 = vmatpush.msrb.mxu3 %v13445_v4  ;;  %v13473_v4 = vld [vmem:[#allocation190_spill] sm:$0xff] }
 0x6ce   :  { %2892 = vmatpush.msrb.mxu1 %v13446_v45  ;;  %v13474_v45 = vld [vmem:[#allocation191_spill] sm:$0xff] }
 0x6cf   :  { %2807 = vmatpush.msrb.mxu3 %v13447_v28  ;;  %v13475_v28 = vld [vmem:[#allocation192_spill] sm:$0xff] }
 0x6d0   :  { %2893 = vmatpush.msrb.mxu1 %v13448_v36  ;;  %v13476_v36 = vld [vmem:[#allocation193_spill] sm:$0xff] }
 0x6d1   :  { %2808 = vmatpush.msrb.mxu3 %v13449_v61  ;;  %v13477_v61 = vld [vmem:[#allocation194_spill] sm:$0xff] }
 0x6d2   :  { %2894 = vmatpush.msrb.mxu1 %v13450_v6  ;;  %v13478_v6 = vld [vmem:[#allocation195_spill] sm:$0xff] }
 0x6d3   :  { %2809 = vmatpush.msrb.mxu3 %v13451_v43  ;;  %v13479_v43 = vld [vmem:[#allocation196_spill] sm:$0xff] }
 0x6d4   :  { %2895 = vmatpush.msrb.mxu1 %v13452_v7  ;;  %v13480_v7 = vld [vmem:[#allocation197_spill] sm:$0xff] }
 0x6d5   :  { %2810 = vmatpush.msrb.mxu3 %v13453_v19  ;;  %v13481_v19 = vld [vmem:[#allocation198_spill] sm:$0xff] }
 0x6d6   :  { %2896 = vmatpush.msrb.mxu1 %v13454_v9  ;;  %v13482_v9 = vld [vmem:[#allocation199_spill] sm:$0xff] }
 0x6d7   :  { %2811 = vmatpush.msrb.mxu3 %v13455_v48  ;;  %v13483_v48 = vld [vmem:[#allocation200_spill] sm:$0xff] }
 0x6d8   :  { %2897 = vmatpush.msrb.mxu1 %v13456_v24  ;;  %v13484_v24 = vld [vmem:[#allocation201_spill] sm:$0xff] }
 0x6d9   :  { %2812 = vmatpush.msrb.mxu3 %v13457_v33  ;;  %v13485_v33 = vld [vmem:[#allocation202_spill] sm:$0xff] }
 0x6da   :  { %2898 = vmatpush.msrb.mxu1 %v13458_v3  ;;  %v13486_v3 = vld [vmem:[#allocation203_spill] sm:$0xff] }
 0x6db   :  { %2813 = vmatpush.msrb.mxu3 %v13459_v23  ;;  %v13487_v23 = vld [vmem:[#allocation204_spill] sm:$0xff] }
 0x6dc   :  { %2899 = vmatpush.msrb.mxu1 %v13460_v25  ;;  %v2256_v25 = vpop.f32.mrf.mxu2 }
 0x6dd   :  { %2814 = vmatpush.msrb.mxu3 %v13461_v56  ;;  %v2276_v56 = vpop.f32.mrf.mxu3 }
 0x6de   :  { %2900 = vmatpush.msrb.mxu1 %v13462_v15  ;;  %v13488_v15 = vld [vmem:[#allocation205_spill] sm:$0xff] }
 0x6df   :  { %2815 = vmatpush.msrb.mxu3 %v13463_v38  ;;  %v13489_v38 = vld [vmem:[#allocation206_spill] sm:$0xff] }
 0x6e0   :  { %2901 = vmatpush.msrb.mxu1 %v13464_v10  ;;  %v2216_v10 = vpop.f32.mrf.mxu0 }
 0x6e1   :  { %2816 = vmatpush.msrb.mxu3 %v13465_v5  ;;  %v13490_v5 = vld [vmem:[#allocation207_spill] sm:$0xff] }
 0x6e2   :  { %2902 = vmatpush.msrb.mxu1 %v13466_v16  ;;  %v2236_v16 = vpop.f32.mrf.mxu1 }
 0x6e3   :  { %2817 = vmatpush.msrb.mxu3 %v13467_v29  ;;  %v13491_v29 = vld [vmem:[#allocation7_spill] sm:$0xff] }
 0x6e4   :  { %2903 = vmatpush.msrb.mxu1 %v13468_v18  ;;  %v2217_v18 = vadd.f32 %v2216_v10, %v13491_v29 }
 0x6e5   :  { %2818 = vmatpush.msrb.mxu3 %v13469_v13  ;;  %v13492_v13 = vld [vmem:[#allocation21_spill] sm:$0xff] }
 0x6e6   :  { %2904 = vmatpush.msrb.mxu1 %v13470_v8  ;;  %v2257_v8 = vadd.f32 %v2256_v25, %v13492_v13 }
 0x6e7   :  { %2819 = vmatpush.msrb.mxu3 %v13471_v2 }
 0x6e8   :  { %2905 = vmatpush.msrb.mxu1 %v13472_v52  ;;  %v2296_v25 = vpop.f32.mrf.mxu0 }
 0x6e9   :  { %2820 = vmatpush.msrb.mxu3 %v13473_v4  ;;  %v2237_v4 = vadd.f32 %v2236_v16, %v2217_v18 }
 0x6ea   :  { %2906 = vmatpush.msrb.mxu1 %v13474_v45  ;;  %v2277_v45 = vadd.f32 %v2276_v56, %v2257_v8  ;;  %v2316_v8 = vpop.f32.mrf.mxu1 }
 0x6eb   :  { %2931 = vmatpush.msra.mxu3 %v13475_v28  ;;  %v13493_v28 = vld [vmem:[#allocation8_spill] sm:$0xff] }
 0x6ed   :  { %2932 = vmatpush.msra.mxu3 %v13476_v36 }
 0x6ef   :  { %2933 = vmatpush.msra.mxu3 %v13477_v61  ;;  %v13494_v61 = vld [vmem:[#allocation22_spill] sm:$0xff] }
 0x6f1   :  { %2934 = vmatpush.msra.mxu3 %v13478_v6 }
 0x6f3   :  { %2935 = vmatpush.msra.mxu3 %v13479_v43 }
 0x6f5   :  { %2936 = vmatpush.msra.mxu3 %v13480_v7 }
 0x6f7   :  { %2937 = vmatpush.msra.mxu3 %v13481_v19 }
 0x6f9   :  { %2938 = vmatpush.msra.mxu3 %v13482_v9 }
 0x6fb   :  { %2939 = vmatpush.msra.mxu3 %v13483_v48 }
 0x6fd   :  { %2940 = vmatpush.msra.mxu3 %v13484_v24 }
 0x6ff   :  { %2941 = vmatpush.msra.mxu3 %v13485_v33 }
 0x701   :  { %2942 = vmatpush.msra.mxu3 %v13486_v3 }
 0x703   :  { %2943 = vmatpush.msra.mxu3 %v13487_v23 }
 0x705   :  { %2944 = vmatpush.msra.mxu3 %v13488_v15 }
 0x707   :  { %2945 = vmatpush.msra.mxu3 %v13489_v38 }
 0x709   :  { %2946 = vmatpush.msra.mxu3 %v13490_v5 }
 0x70c   :  { %v2386_v2 = vpop.f32.mrf.mxu2  ;;  %v2406_v52 = vpop.f32.mrf.mxu3 }
 0x70d   :  { %v2387_v36 = vadd.f32 %v2386_v2, %v13493_v28  ;;  %v2407_v6 = vadd.f32 %v2406_v52, %v13494_v61  ;;  %v2297_v2 = vadd.f32 %v2296_v25, %v13120_v53 }
 0x70f   :  { %v2429_v43 = vadd.f32 %v2387_v36, %v2237_v4  ;;  %v2430_v7 = vadd.f32 %v2407_v6, %v2277_v45  ;;  %v2426_v4 = vpop.f32.mrf.mxu0  ;;  %v2317_v6 = vadd.f32 %v2316_v8, %v2297_v2  ;;  %v10188_v2 = vld [vmem:[%s11951_s5 + $0x5f0] sm:$0xff] }
 0x711   :  { %v3751_v19 = vmul.f32 -1.442695, %v2429_v43  ;;  %v3752_v9 = vmul.f32 -1.442695, %v2430_v7 }
 0x713   :  { %3857 = vpow2.f32 %v3751_v19  ;;  %v2427_v19 = vadd.f32 %v2426_v4, %v6674_v26  ;;  %v10218_v4 = vld [vmem:[%s11951_s5 + $0x598] sm:$0xff] }
 0x714   :  { %3859 = vpow2.f32 %v3752_v9  ;;  %13496 = vst [vmem:[#allocation209_spill] sm:$0xff] %v10218_v4 }
 0x719   :  { %v3858_v48 = vpop.eup %3857 }
 0x71a   :  { %v3860_v24 = vpop.eup %3859  ;;  %v2434_v33 = vadd.f32 1.0, %v3858_v48 }
 0x71b   :  { %v2453_v3 = vadd.f32 1.0, %v3860_v24 }
 0x71c   :  { %3861 = vrcp.f32 %v2434_v33  ;;  %v2446_v10 = vand.u32 2147483648, %v2434_v33  ;;  %v2444_v18 = vand.u32 2147483647, %v2434_v33  ;;  %vm2440_vm10 = vweird.f32 %v2434_v33 }
 0x71d   :  { %3863 = vrcp.f32 %v2453_v3  ;;  %vm2459_vm14 = vweird.f32 %v2453_v3  ;;  %v2463_v25 = vand.u32 2147483647, %v2453_v3 }
 0x71e   :  { %v2447_v45 = vor.u32 1.1754944e-38, %v2446_v10  ;;  %vm2445_vm12 = vcmp.eq.f32.partialorder %v2444_v18, 8.507059e+37 }
 0x71f   :  { %vm2464_vm0 = vcmp.eq.f32.partialorder %v2463_v25, 8.507059e+37  ;;  %v10292_v25 = vld [vmem:[%s11951_s5 + $0x478] sm:$0xff] }
 0x720   :  { %13508 = vst [vmem:[#allocation33_spill] sm:$0xff] %v10292_v25 }
 0x722   :  { %v3862_v23 = vpop.eup %3861 }
 0x723   :  { %v3864_v15 = vpop.eup %3863  ;;  %v2436_v56 = vmul.f32 %v3862_v23, %v2434_v33  ;;  %vm2441_vm9 = vweird.f32 %v3862_v23 }
 0x724   :  { %v2455_v5 = vmul.f32 %v3864_v15, %v2453_v3  ;;  %vm2442_vm11 = vmor %vm2440_vm10, %vm2441_vm9  ;;  %vm2460_vm13 = vweird.f32 %v3864_v15 }
 0x725   :  { %v2437_v38 = vsub.f32 1.0, %v2436_v56  ;;  %vm2461_vm15 = vmor %vm2459_vm14, %vm2460_vm13 }
 0x726   :  { %v2456_v36 = vsub.f32 1.0, %v2455_v5 }
 0x727   :  { %v2438_v16 = vmul.f32 %v3862_v23, %v2437_v38  ;;  %v2465_v38 = vand.u32 2147483648, %v2453_v3  ;;  %v10194_v3 = vld [vmem:[%s11951_s5 + $0x5f8] sm:$0xff] }
 0x728   :  { %v2457_v48 = vmul.f32 %v3864_v15, %v2456_v36  ;;  %v10230_v36 = vld [vmem:[%s11951_s5 + $0x568] sm:$0xff] }
 0x729   :  { %v2439_v52 = vadd.f32 %v3862_v23, %v2438_v16  ;;  %v2466_v10 = vor.u32 1.1754944e-38, %v2465_v38  ;;  %13498 = vst [vmem:[#allocation31_spill] sm:$0xff] %v10230_v36  ;;  %v10286_v38 = vld [vmem:[%s11951_s5 + $0x470] sm:$0xff] }
 0x72a   :  { %v2458_v56 = vadd.f32 %v3864_v15, %v2457_v48  ;;  %v10268_v48 = vld [vmem:[%s11951_s5 + $0x4d8] sm:$0xff]  ;;  %13507 = vst [vmem:[#allocation30_spill] sm:$0xff] %v10286_v38 }
 0x72b   :  { %v2443_v43 = vsel %vm2442_vm11, %v3862_v23, %v2439_v52  ;;  %v10212_v52 = vld [vmem:[%s11951_s5 + $0x590] sm:$0xff]  ;;  %13504 = vst [vmem:[#allocation27_spill] sm:$0xff] %v10268_v48 }
 0x72c   :  { %v2448_v7 = vsel %vm2445_vm12, %v2447_v45, %v2443_v43  ;;  %v2462_v33 = vsel %vm2461_vm15, %v3864_v15, %v2458_v56  ;;  %v10206_v15 = vld [vmem:[%s11951_s5 + $0x5c8] sm:$0xff]  ;;  %13495 = vst [vmem:[#allocation208_spill] sm:$0xff] %v10212_v52  ;;  %v10224_v45 = vld [vmem:[%s11951_s5 + $0x560] sm:$0xff]  ;;  %v10244_v43 = vld [vmem:[%s11951_s5 + $0x538] sm:$0xff] }
 0x72d   :  { %v2469_v9 = vmul.f32 %v2448_v7, %v2317_v6  ;;  %v2467_v5 = vsel %vm2464_vm0, %v2466_v10, %v2462_v33  ;;  %13497 = vst [vmem:[#allocation29_spill] sm:$0xff] %v10224_v45  ;;  %v10238_v6 = vld [vmem:[%s11951_s5 + $0x530] sm:$0xff]  ;;  %v10250_v7 = vld [vmem:[%s11951_s5 + $0x500] sm:$0xff]  ;;  %v10280_v56 = vld [vmem:[%s11951_s5 + $0x4a8] sm:$0xff] }
 0x72e   :  { %13499 = vst [vmem:[#allocation46_spill] sm:$0xff] %v10238_v6  ;;  %v10298_v33 = vld [vmem:[%s11951_s5 + $0x440] sm:$0xff]  ;;  %v10310_v10 = vld [vmem:[%s11951_s5 + $0x410] sm:$0xff] }
 0x72f   :  { %v2470_v24 = vadd.f32 %v2469_v9, %v2427_v19  ;;  %13500 = vst [vmem:[#allocation25_spill] sm:$0xff] %v10244_v43  ;;  %v10256_v19 = vld [vmem:[%s11951_s5 + $0x508] sm:$0xff]  ;;  %v10262_v9 = vld [vmem:[%s11951_s5 + $0x4d0] sm:$0xff] }
 0x730   :  { %13501 = vst [vmem:[#allocation51_spill] sm:$0xff] %v10250_v7 }
 0x731   :  { %3865 = vtanh.f32 %v2470_v24  ;;  %13502 = vst [vmem:[#allocation26_spill] sm:$0xff] %v10256_v19  ;;  %v10274_v24 = vld [vmem:[%s11951_s5 + $0x4a0] sm:$0xff] }
 0x732   :  { %13503 = vst [vmem:[#allocation55_spill] sm:$0xff] %v10262_v9 }
 0x733   :  { %13505 = vst [vmem:[#allocation57_spill] sm:$0xff] %v10274_v24 }
 0x734   :  { %13506 = vst [vmem:[#allocation28_spill] sm:$0xff] %v10280_v56 }
 0x735   :  { %13509 = vst [vmem:[#allocation34_spill] sm:$0xff] %v10298_v33 }
 0x736   :  { %13511 = vst [vmem:[#allocation37_spill] sm:$0xff] %v10310_v10 }
 0x737   :  { %v3866_v16 = vpop.eup %3865 }
 0x738   :  { %v2472_v23 = vsub.f32 %v9775_v17, %v3866_v16  ;;  %v10200_v17 = vld [vmem:[%s11951_s5 + $0x5c0] sm:$0xff] }
 0x73a   :  { %v2473_v18 = vmul.f32 %v2472_v23, %v2467_v5  ;;  %v10316_v23 = vld [vmem:[%s11951_s5 + $0x418] sm:$0xff]  ;;  %v10322_v5 = vld [vmem:[%s11951_s5 + $0x3e0] sm:$0xff] }
 0x73b   :  { %13512 = vst [vmem:[#allocation40_spill] sm:$0xff] %v10316_v23 }
 0x73c   :  { %v10181_v8 = vadd.f32 %v3866_v16, %v2473_v18  ;;  %v10304_v16 = vld [vmem:[%s11951_s5 + $0x448] sm:$0xff]  ;;  %13513 = vst [vmem:[#allocation41_spill] sm:$0xff] %v10322_v5 }
 0x73d   :  { %13510 = vst [vmem:[#allocation35_spill] sm:$0xff] %v10304_v16  ;;  %v10328_v18 = vld [vmem:[%s11951_s5 + $0x3e8] sm:$0xff] }
 0x73e   :  { %2511 = vmatmul.f32.vlgmr.msrb.gmra.mxu2 %v10181_v8  ;;  %2551 = vmatmul.f32.vlgmr.msra.gmra.mxu0 %v10181_v8  ;;  %13514 = vst [vmem:[#allocation42_spill] sm:$0xff] %v10328_v18 }
 0x73f   :  { %2655 = vmatpush.msrb.mxu2 %v10188_v2  ;;  %2695 = vmatpush.msra.mxu0 %v10194_v3 }
 0x741   :  { %2656 = vmatpush.msrb.mxu2 %v10200_v17  ;;  %2696 = vmatpush.msra.mxu0 %v10206_v15 }
 0x743   :  { %2657 = vmatpush.msrb.mxu2 %v10212_v52  ;;  %2697 = vmatpush.msra.mxu0 %v10218_v4 }
 0x745   :  { %2658 = vmatpush.msrb.mxu2 %v10224_v45  ;;  %2698 = vmatpush.msra.mxu0 %v10230_v36 }
 0x746   :  { %2591 = vmatmul.f32.vlgmr.msra.gmra.mxu2 %v10181_v8  ;;  %2631 = vmatmul.f32.vlgmr.msrb.gmra.mxu0 %v10181_v8 }
 0x747   :  { %2659 = vmatpush.msrb.mxu2 %v10238_v6  ;;  %2699 = vmatpush.msra.mxu0 %v10244_v43 }
 0x749   :  { %2660 = vmatpush.msrb.mxu2 %v10250_v7  ;;  %2700 = vmatpush.msra.mxu0 %v10256_v19  ;;  %v13588_v19 = vld [vmem:[#allocation43_spill] sm:$0xff] }
 0x74a   :  { %v120_v7 = vadd.f32 %v13588_v19, %v13399_v22 }
 0x74b   :  { %2661 = vmatpush.msrb.mxu2 %v10262_v9  ;;  %2701 = vmatpush.msra.mxu0 %v10268_v48 }
 0x74d   :  { %2662 = vmatpush.msrb.mxu2 %v10274_v24  ;;  %2702 = vmatpush.msra.mxu0 %v10280_v56  ;;  %v2492_v56 = vpop.f32.mrf.mxu1 }
 0x74e   :  { %v2493_v48 = vadd.f32 %v2492_v56, %v13398_v40 }
 0x74f   :  { %2663 = vmatpush.msrb.mxu2 %v10286_v38  ;;  %2703 = vmatpush.msra.mxu0 %v10292_v25 }
 0x751   :  { %2664 = vmatpush.msrb.mxu2 %v10298_v33  ;;  %2704 = vmatpush.msra.mxu0 %v10304_v16 }
 0x753   :  { %2665 = vmatpush.msrb.mxu2 %v10310_v10  ;;  %2705 = vmatpush.msra.mxu0 %v10316_v23  ;;  %v10334_v10 = vld [vmem:[%s11951_s5 + $0x3b0] sm:$0xff]  ;;  %v10340_v23 = vld [vmem:[%s11951_s5 + $0x3b8] sm:$0xff] }
 0x754   :  { %13515 = vst [vmem:[#allocation44_spill] sm:$0xff] %v10334_v10 }
 0x755   :  { %2666 = vmatpush.msrb.mxu2 %v10322_v5  ;;  %2706 = vmatpush.msra.mxu0 %v10328_v18  ;;  %13516 = vst [vmem:[#allocation47_spill] sm:$0xff] %v10340_v23  ;;  %v10346_v5 = vld [vmem:[%s11951_s5 + $0x380] sm:$0xff]  ;;  %v10352_v18 = vld [vmem:[%s11951_s5 + $0x388] sm:$0xff] }
 0x756   :  { %13517 = vst [vmem:[#allocation48_spill] sm:$0xff] %v10346_v5 }
 0x757   :  { %2667 = vmatpush.msrb.mxu2 %v10334_v10  ;;  %2707 = vmatpush.msra.mxu0 %v10340_v23  ;;  %13518 = vst [vmem:[#allocation49_spill] sm:$0xff] %v10352_v18  ;;  %v10358_v10 = vld [vmem:[%s11951_s5 + $0x350] sm:$0xff]  ;;  %v10364_v23 = vld [vmem:[%s11951_s5 + $0x358] sm:$0xff] }
 0x758   :  { %13519 = vst [vmem:[#allocation52_spill] sm:$0xff] %v10358_v10 }
 0x759   :  { %2668 = vmatpush.msrb.mxu2 %v10346_v5  ;;  %2708 = vmatpush.msra.mxu0 %v10352_v18  ;;  %13520 = vst [vmem:[#allocation56_spill] sm:$0xff] %v10364_v23  ;;  %v10370_v5 = vld [vmem:[%s11951_s5 + $0x320] sm:$0xff]  ;;  %v10376_v18 = vld [vmem:[%s11951_s5 + $0x328] sm:$0xff] }
 0x75a   :  { %13521 = vst [vmem:[#allocation58_spill] sm:$0xff] %v10370_v5 }
 0x75b   :  { %2669 = vmatpush.msrb.mxu2 %v10358_v10  ;;  %2709 = vmatpush.msra.mxu0 %v10364_v23  ;;  %13522 = vst [vmem:[#allocation60_spill] sm:$0xff] %v10376_v18  ;;  %v10384_v23 = vld [vmem:[%s11953_s3 + $0x170] sm:$0xff]  ;;  %v10402_v10 = vld [vmem:[%s11951_s5 + $0x2a0] sm:$0xff] }
 0x75c   :  { %13523 = vst [vmem:[#allocation66_spill] sm:$0xff] %v10384_v23 }
 0x75d   :  { %2670 = vmatpush.msrb.mxu2 %v10370_v5  ;;  %2710 = vmatpush.msra.mxu0 %v10376_v18  ;;  %v10390_v5 = vld [vmem:[%s11951_s5 + $0x2d0] sm:$0xff]  ;;  %v10396_v18 = vld [vmem:[%s11953_s3 + $0x158] sm:$0xff]  ;;  %13526 = vst [vmem:[#allocation74_spill] sm:$0xff] %v10402_v10 }
 0x75e   :  { %2671 = vmatmul.f32.vlgmr.msrb.gmra.mxu2 %v10181_v8  ;;  %2711 = vmatmul.f32.vlgmr.msra.gmra.mxu0 %v10181_v8  ;;  %13524 = vst [vmem:[#allocation71_spill] sm:$0xff] %v10390_v5 }
 0x75f   :  { %2785 = vmatpush.msra.mxu2 %v10384_v23  ;;  %2871 = vmatpush.msrb.mxu0 %v10390_v5  ;;  %13525 = vst [vmem:[#allocation72_spill] sm:$0xff] %v10396_v18  ;;  %v10408_v23 = vld [vmem:[%s11953_s3 + $0x140] sm:$0xff]  ;;  %v10414_v5 = vld [vmem:[%s11951_s5 + $0x270] sm:$0xff] }
 0x760   :  { %13527 = vst [vmem:[#allocation75_spill] sm:$0xff] %v10408_v23 }
 0x761   :  { %2786 = vmatpush.msra.mxu2 %v10396_v18  ;;  %2872 = vmatpush.msrb.mxu0 %v10402_v10  ;;  %13528 = vst [vmem:[#allocation76_spill] sm:$0xff] %v10414_v5  ;;  %v10420_v18 = vld [vmem:[%s11953_s3 + $0x128] sm:$0xff]  ;;  %v10426_v10 = vld [vmem:[%s11951_s5 + $0x240] sm:$0xff] }
 0x762   :  { %13529 = vst [vmem:[#allocation78_spill] sm:$0xff] %v10420_v18 }
 0x763   :  { %2787 = vmatpush.msra.mxu2 %v10408_v23  ;;  %2873 = vmatpush.msrb.mxu0 %v10414_v5  ;;  %13530 = vst [vmem:[#allocation79_spill] sm:$0xff] %v10426_v10  ;;  %v10432_v23 = vld [vmem:[%s11953_s3 + $0x110] sm:$0xff] }
 0x764   :  { %13531 = vst [vmem:[#allocation80_spill] sm:$0xff] %v10432_v23  ;;  %v10438_v5 = vld [vmem:[%s11951_s5 + $0x210] sm:$0xff] }
 0x765   :  { %2788 = vmatpush.msra.mxu2 %v10420_v18  ;;  %2874 = vmatpush.msrb.mxu0 %v10426_v10  ;;  %13532 = vst [vmem:[#allocation81_spill] sm:$0xff] %v10438_v5  ;;  %v10444_v18 = vld [vmem:[%s11953_s3 + $0xf8] sm:$0xff]  ;;  %v10450_v10 = vld [vmem:[%s11951_s5 + $0x1e0] sm:$0xff] }
 0x766   :  { %13533 = vst [vmem:[#allocation82_spill] sm:$0xff] %v10444_v18 }
 0x767   :  { %2789 = vmatpush.msra.mxu2 %v10432_v23  ;;  %2875 = vmatpush.msrb.mxu0 %v10438_v5  ;;  %13534 = vst [vmem:[#allocation83_spill] sm:$0xff] %v10450_v10  ;;  %v10456_v23 = vld [vmem:[%s11953_s3 + $0xe0] sm:$0xff]  ;;  %v10462_v5 = vld [vmem:[%s11951_s5 + $0x1b0] sm:$0xff] }
 0x768   :  { %13535 = vst [vmem:[#allocation84_spill] sm:$0xff] %v10456_v23 }
 0x769   :  { %2790 = vmatpush.msra.mxu2 %v10444_v18  ;;  %2876 = vmatpush.msrb.mxu0 %v10450_v10  ;;  %13536 = vst [vmem:[#allocation59_spill] sm:$0xff] %v10462_v5  ;;  %v10468_v18 = vld [vmem:[%s11953_s3 + $0xc8] sm:$0xff]  ;;  %v10474_v10 = vld [vmem:[%s11951_s5 + $0x180] sm:$0xff] }
 0x76a   :  { %13537 = vst [vmem:[#allocation86_spill] sm:$0xff] %v10468_v18 }
 0x76b   :  { %2791 = vmatpush.msra.mxu2 %v10456_v23  ;;  %2877 = vmatpush.msrb.mxu0 %v10462_v5  ;;  %13538 = vst [vmem:[#allocation87_spill] sm:$0xff] %v10474_v10  ;;  %v10480_v23 = vld [vmem:[%s11953_s3 + $0xb0] sm:$0xff] }
 0x76c   :  { %13539 = vst [vmem:[#allocation88_spill] sm:$0xff] %v10480_v23  ;;  %v10486_v5 = vld [vmem:[%s11951_s5 + $0x150] sm:$0xff] }
 0x76d   :  { %2792 = vmatpush.msra.mxu2 %v10468_v18  ;;  %2878 = vmatpush.msrb.mxu0 %v10474_v10  ;;  %13540 = vst [vmem:[#allocation89_spill] sm:$0xff] %v10486_v5  ;;  %v10492_v18 = vld [vmem:[%s11953_s3 + $0x98] sm:$0xff]  ;;  %v10498_v10 = vld [vmem:[%s11951_s5 + $0x120] sm:$0xff] }
 0x76e   :  { %13541 = vst [vmem:[#allocation90_spill] sm:$0xff] %v10492_v18 }
 0x76f   :  { %2793 = vmatpush.msra.mxu2 %v10480_v23  ;;  %2879 = vmatpush.msrb.mxu0 %v10486_v5  ;;  %13542 = vst [vmem:[#allocation91_spill] sm:$0xff] %v10498_v10  ;;  %v10504_v23 = vld [vmem:[%s11953_s3 + $0x80] sm:$0xff]  ;;  %v10510_v5 = vld [vmem:[%s11951_s5 + $0xf0] sm:$0xff] }
 0x770   :  { %13543 = vst [vmem:[#allocation92_spill] sm:$0xff] %v10504_v23 }
 0x771   :  { %2794 = vmatpush.msra.mxu2 %v10492_v18  ;;  %2880 = vmatpush.msrb.mxu0 %v10498_v10  ;;  %13544 = vst [vmem:[#allocation93_spill] sm:$0xff] %v10510_v5  ;;  %v10516_v18 = vld [vmem:[%s11953_s3 + $0x68] sm:$0xff]  ;;  %v10522_v10 = vld [vmem:[%s11951_s5 + $0xc0] sm:$0xff] }
 0x772   :  { %13545 = vst [vmem:[#allocation94_spill] sm:$0xff] %v10516_v18 }
 0x773   :  { %2795 = vmatpush.msra.mxu2 %v10504_v23  ;;  %2881 = vmatpush.msrb.mxu0 %v10510_v5  ;;  %13546 = vst [vmem:[#allocation95_spill] sm:$0xff] %v10522_v10  ;;  %v10528_v23 = vld [vmem:[%s11953_s3 + $0x50] sm:$0xff] }
 0x774   :  { %13547 = vst [vmem:[#allocation96_spill] sm:$0xff] %v10528_v23  ;;  %v10534_v5 = vld [vmem:[%s11951_s5 + $0x90] sm:$0xff] }
 0x775   :  { %2796 = vmatpush.msra.mxu2 %v10516_v18  ;;  %2882 = vmatpush.msrb.mxu0 %v10522_v10  ;;  %13548 = vst [vmem:[#allocation97_spill] sm:$0xff] %v10534_v5  ;;  %v10540_v18 = vld [vmem:[%s11953_s3 + $0x38] sm:$0xff]  ;;  %v10546_v10 = vld [vmem:[%s11951_s5 + $0x60] sm:$0xff] }
 0x776   :  { %13549 = vst [vmem:[#allocation98_spill] sm:$0xff] %v10540_v18 }
 0x777   :  { %2797 = vmatpush.msra.mxu2 %v10528_v23  ;;  %2883 = vmatpush.msrb.mxu0 %v10534_v5  ;;  %13550 = vst [vmem:[#allocation99_spill] sm:$0xff] %v10546_v10  ;;  %v10552_v23 = vld [vmem:[%s11953_s3 + $0x20] sm:$0xff]  ;;  %v10558_v5 = vld [vmem:[%s11951_s5 + $0x30] sm:$0xff] }
 0x778   :  { %13551 = vst [vmem:[#allocation100_spill] sm:$0xff] %v10552_v23 }
 0x779   :  { %2798 = vmatpush.msra.mxu2 %v10540_v18  ;;  %2884 = vmatpush.msrb.mxu0 %v10546_v10  ;;  %13552 = vst [vmem:[#allocation101_spill] sm:$0xff] %v10558_v5  ;;  %v10564_v18 = vld [vmem:[%s11953_s3 + $0x8] sm:$0xff]  ;;  %v10570_v10 = vld [vmem:[%s11951_s5] sm:$0xff] }
 0x77a   :  { %13553 = vst [vmem:[#allocation102_spill] sm:$0xff] %v10564_v18 }
 0x77b   :  { %2799 = vmatpush.msra.mxu2 %v10552_v23  ;;  %2885 = vmatpush.msrb.mxu0 %v10558_v5  ;;  %13554 = vst [vmem:[#allocation103_spill] sm:$0xff] %v10570_v10  ;;  %v10576_v23 = vld [vmem:[%s11951_s5 + $0x2d8] sm:$0xff]  ;;  %v10582_v5 = vld [vmem:[%s11951_s5 + $0x2e0] sm:$0xff] }
 0x77c   :  { %13555 = vst [vmem:[#allocation104_spill] sm:$0xff] %v10576_v23 }
 0x77d   :  { %2800 = vmatpush.msra.mxu2 %v10564_v18  ;;  %2886 = vmatpush.msrb.mxu0 %v10570_v10  ;;  %13556 = vst [vmem:[#allocation105_spill] sm:$0xff] %v10582_v5  ;;  %v10588_v18 = vld [vmem:[%s11951_s5 + $0x2a8] sm:$0xff]  ;;  %v10594_v10 = vld [vmem:[%s11951_s5 + $0x2b0] sm:$0xff] }
 0x77e   :  { %13557 = vst [vmem:[#allocation106_spill] sm:$0xff] %v10588_v18 }
 0x77f   :  { %2911 = vmatpush.msrb.mxu2 %v10576_v23  ;;  %2951 = vmatpush.msra.mxu0 %v10582_v5  ;;  %13558 = vst [vmem:[#allocation107_spill] sm:$0xff] %v10594_v10  ;;  %v10600_v23 = vld [vmem:[%s11951_s5 + $0x278] sm:$0xff]  ;;  %v10606_v5 = vld [vmem:[%s11951_s5 + $0x280] sm:$0xff] }
 0x780   :  { %13559 = vst [vmem:[#allocation108_spill] sm:$0xff] %v10600_v23 }
 0x781   :  { %2912 = vmatpush.msrb.mxu2 %v10588_v18  ;;  %2952 = vmatpush.msra.mxu0 %v10594_v10  ;;  %13560 = vst [vmem:[#allocation109_spill] sm:$0xff] %v10606_v5  ;;  %v10612_v18 = vld [vmem:[%s11951_s5 + $0x248] sm:$0xff]  ;;  %v10618_v10 = vld [vmem:[%s11951_s5 + $0x250] sm:$0xff] }
 0x782   :  { %13561 = vst [vmem:[#allocation110_spill] sm:$0xff] %v10612_v18 }
 0x783   :  { %2913 = vmatpush.msrb.mxu2 %v10600_v23  ;;  %2953 = vmatpush.msra.mxu0 %v10606_v5  ;;  %13562 = vst [vmem:[#allocation111_spill] sm:$0xff] %v10618_v10  ;;  %v10624_v23 = vld [vmem:[%s11951_s5 + $0x218] sm:$0xff]  ;;  %v10630_v5 = vld [vmem:[%s11951_s5 + $0x220] sm:$0xff] }
 0x784   :  { %13563 = vst [vmem:[#allocation112_spill] sm:$0xff] %v10624_v23 }
 0x785   :  { %2914 = vmatpush.msrb.mxu2 %v10612_v18  ;;  %2954 = vmatpush.msra.mxu0 %v10618_v10  ;;  %13564 = vst [vmem:[#allocation113_spill] sm:$0xff] %v10630_v5  ;;  %v10636_v18 = vld [vmem:[%s11951_s5 + $0x1e8] sm:$0xff]  ;;  %v10642_v10 = vld [vmem:[%s11951_s5 + $0x1f0] sm:$0xff] }
 0x786   :  { %13565 = vst [vmem:[#allocation114_spill] sm:$0xff] %v10636_v18 }
 0x787   :  { %2915 = vmatpush.msrb.mxu2 %v10624_v23  ;;  %2955 = vmatpush.msra.mxu0 %v10630_v5  ;;  %13566 = vst [vmem:[#allocation115_spill] sm:$0xff] %v10642_v10  ;;  %v10648_v23 = vld [vmem:[%s11951_s5 + $0x1b8] sm:$0xff]  ;;  %v10654_v5 = vld [vmem:[%s11951_s5 + $0x1c0] sm:$0xff] }
 0x788   :  { %13567 = vst [vmem:[#allocation116_spill] sm:$0xff] %v10648_v23 }
 0x789   :  { %2916 = vmatpush.msrb.mxu2 %v10636_v18  ;;  %2956 = vmatpush.msra.mxu0 %v10642_v10  ;;  %13568 = vst [vmem:[#allocation117_spill] sm:$0xff] %v10654_v5  ;;  %v10660_v18 = vld [vmem:[%s11951_s5 + $0x188] sm:$0xff]  ;;  %v10666_v10 = vld [vmem:[%s11951_s5 + $0x190] sm:$0xff] }
 0x78a   :  { %13569 = vst [vmem:[#allocation118_spill] sm:$0xff] %v10660_v18 }
 0x78b   :  { %2917 = vmatpush.msrb.mxu2 %v10648_v23  ;;  %2957 = vmatpush.msra.mxu0 %v10654_v5  ;;  %13570 = vst [vmem:[#allocation119_spill] sm:$0xff] %v10666_v10  ;;  %v10672_v23 = vld [vmem:[%s11951_s5 + $0x158] sm:$0xff]  ;;  %v10678_v5 = vld [vmem:[%s11951_s5 + $0x160] sm:$0xff] }
 0x78c   :  { %13571 = vst [vmem:[#allocation120_spill] sm:$0xff] %v10672_v23 }
 0x78d   :  { %2918 = vmatpush.msrb.mxu2 %v10660_v18  ;;  %2958 = vmatpush.msra.mxu0 %v10666_v10  ;;  %13572 = vst [vmem:[#allocation121_spill] sm:$0xff] %v10678_v5  ;;  %v10684_v18 = vld [vmem:[%s11951_s5 + $0x128] sm:$0xff]  ;;  %v10690_v10 = vld [vmem:[%s11951_s5 + $0x130] sm:$0xff] }
 0x78e   :  { %13573 = vst [vmem:[#allocation122_spill] sm:$0xff] %v10684_v18 }
 0x78f   :  { %2919 = vmatpush.msrb.mxu2 %v10672_v23  ;;  %2959 = vmatpush.msra.mxu0 %v10678_v5  ;;  %13574 = vst [vmem:[#allocation123_spill] sm:$0xff] %v10690_v10  ;;  %v10696_v23 = vld [vmem:[%s11951_s5 + $0xf8] sm:$0xff]  ;;  %v10702_v5 = vld [vmem:[%s11951_s5 + $0x100] sm:$0xff] }
 0x790   :  { %13575 = vst [vmem:[#allocation124_spill] sm:$0xff] %v10696_v23 }
 0x791   :  { %2920 = vmatpush.msrb.mxu2 %v10684_v18  ;;  %2960 = vmatpush.msra.mxu0 %v10690_v10  ;;  %13576 = vst [vmem:[#allocation125_spill] sm:$0xff] %v10702_v5  ;;  %v10708_v18 = vld [vmem:[%s11951_s5 + $0xc8] sm:$0xff]  ;;  %v10714_v10 = vld [vmem:[%s11951_s5 + $0xd0] sm:$0xff] }
 0x792   :  { %13577 = vst [vmem:[#allocation126_spill] sm:$0xff] %v10708_v18 }
 0x793   :  { %2921 = vmatpush.msrb.mxu2 %v10696_v23  ;;  %2961 = vmatpush.msra.mxu0 %v10702_v5  ;;  %13578 = vst [vmem:[#allocation127_spill] sm:$0xff] %v10714_v10  ;;  %v10720_v23 = vld [vmem:[%s11951_s5 + $0x98] sm:$0xff]  ;;  %v10726_v5 = vld [vmem:[%s11951_s5 + $0xa0] sm:$0xff] }
 0x794   :  { %13579 = vst [vmem:[#allocation23_spill] sm:$0xff] %v10720_v23 }
 0x795   :  { %2922 = vmatpush.msrb.mxu2 %v10708_v18  ;;  %2962 = vmatpush.msra.mxu0 %v10714_v10  ;;  %13580 = vst [vmem:[#allocation24_spill] sm:$0xff] %v10726_v5  ;;  %v10732_v18 = vld [vmem:[%s11951_s5 + $0x68] sm:$0xff]  ;;  %v10738_v10 = vld [vmem:[%s11951_s5 + $0x70] sm:$0xff] }
 0x796   :  { %13581 = vst [vmem:[#allocation39_spill] sm:$0xff] %v10732_v18 }
 0x797   :  { %2923 = vmatpush.msrb.mxu2 %v10720_v23  ;;  %2963 = vmatpush.msra.mxu0 %v10726_v5  ;;  %13582 = vst [vmem:[#allocation18_spill] sm:$0xff] %v10738_v10  ;;  %v10744_v23 = vld [vmem:[%s11951_s5 + $0x38] sm:$0xff]  ;;  %v10750_v5 = vld [vmem:[%s11951_s5 + $0x40] sm:$0xff] }
 0x798   :  { %13583 = vst [vmem:[#allocation17_spill] sm:$0xff] %v10744_v23 }
 0x799   :  { %2924 = vmatpush.msrb.mxu2 %v10732_v18  ;;  %2964 = vmatpush.msra.mxu0 %v10738_v10  ;;  %13584 = vst [vmem:[#allocation73_spill] sm:$0xff] %v10750_v5  ;;  %v10756_v18 = vld [vmem:[%s11951_s5 + $0x8] sm:$0xff]  ;;  %v10762_v10 = vld [vmem:[%s11951_s5 + $0x10] sm:$0xff] }
 0x79a   :  { %13585 = vst [vmem:[#allocation77_spill] sm:$0xff] %v10756_v18 }
 0x79b   :  { %2925 = vmatpush.msrb.mxu2 %v10744_v23  ;;  %2965 = vmatpush.msra.mxu0 %v10750_v5  ;;  %13586 = vst [vmem:[#allocation32_spill] sm:$0xff] %v10762_v10  ;;  %v2532_v23 = vpop.f32.mrf.mxu3  ;;  %v13587_v5 = vld [vmem:[#allocation45_spill] sm:$0xff] }
 0x79c   :  { %v2533_v16 = vadd.f32 %v2532_v23, %v13395_v47  ;;  %v161_v25 = vadd.f32 %v13587_v5, %v13396_v11 }
 0x79d   :  { %2926 = vmatpush.msrb.mxu2 %v10756_v18  ;;  %2966 = vmatpush.msra.mxu0 %v10762_v10 }
 0x7bb   :  { %v2552_v33 = vpop.f32.mrf.mxu0 }
 0x7bc   :  { %v2553_v38 = vadd.f32 %v2552_v33, %v2533_v16 }
 0x7be   :  { %v2720_v24 = vadd.f32 %v2553_v38, %v161_v25 }
 0x7c0   :  { %v3754_v18 = vmul.f32 -1.442695, %v2720_v24  ;;  %v2572_v24 = vpop.f32.mrf.mxu1 }
 0x7c1   :  { %v2512_v9 = vpop.f32.mrf.mxu2 }
 0x7c2   :  { %v2513_v43 = vadd.f32 %v2512_v9, %v2493_v48  ;;  %3867 = vpow2.f32 %v3754_v18 }
 0x7c4   :  { %v2719_v6 = vadd.f32 %v2513_v43, %v120_v7 }
 0x7c6   :  { %v3753_v10 = vmul.f32 -1.442695, %v2719_v6  ;;  %v2573_v6 = vadd.f32 %v2572_v24, %v12814_v41 }
 0x7c8   :  { %3869 = vpow2.f32 %v3753_v10  ;;  %v3868_v23 = vpop.eup %3867 }
 0x7c9   :  { %v2743_v36 = vadd.f32 1.0, %v3868_v23  ;;  %v2592_v43 = vpop.f32.mrf.mxu2  ;;  %v13589_v23 = vld [vmem:[#allocation64_spill] sm:$0xff] }
 0x7ca   :  { %v2593_v48 = vadd.f32 %v2592_v43, %v2573_v6  ;;  %v10920_v6 = vld [vmem:[%s11951_s5 + $0x138] sm:$0xff] }
 0x7cb   :  { %v2755_v52 = vand.u32 2147483648, %v2743_v36  ;;  %vm2749_vm6 = vweird.f32 %v2743_v36 }
 0x7ce   :  { %v3870_v47 = vpop.eup %3869 }
 0x7cf   :  { %v2724_v45 = vadd.f32 1.0, %v3870_v47 }
 0x7d1   :  { %3871 = vrcp.f32 %v2724_v45  ;;  %v2736_v5 = vand.u32 2147483648, %v2724_v45  ;;  %v2734_v19 = vand.u32 2147483647, %v2724_v45  ;;  %vm2730_vm2 = vweird.f32 %v2724_v45 }
 0x7d2   :  { %3873 = vrcp.f32 %v2743_v36 }
 0x7d3   :  { %v2737_v47 = vor.u32 1.1754944e-38, %v2736_v5  ;;  %vm2735_vm4 = vcmp.eq.f32.partialorder %v2734_v19, 8.507059e+37 }
 0x7d7   :  { %v3872_v33 = vpop.eup %3871 }
 0x7d8   :  { %v3874_v38 = vpop.eup %3873  ;;  %v2726_v25 = vmul.f32 %v3872_v33, %v2724_v45  ;;  %vm2731_vm1 = vweird.f32 %v3872_v33 }
 0x7d9   :  { %v2745_v16 = vmul.f32 %v3874_v38, %v2743_v36  ;;  %vm2732_vm3 = vmor %vm2730_vm2, %vm2731_vm1  ;;  %vm2750_vm5 = vweird.f32 %v3874_v38 }
 0x7da   :  { %v2727_v56 = vsub.f32 1.0, %v2726_v25  ;;  %v202_v25 = vadd.f32 %v13589_v23, %v12815_v30  ;;  %vm2751_vm7 = vmor %vm2749_vm6, %vm2750_vm5  ;;  %v10983_v23 = vld [vmem:[%s11951_s5 + $0xb0] sm:$0xff] }
 0x7db   :  { %v2746_v9 = vsub.f32 1.0, %v2745_v16  ;;  %v2756_v16 = vor.u32 1.1754944e-38, %v2755_v52  ;;  %v10804_v52 = vld [vmem:[%s11951_s5 + $0x2c0] sm:$0xff] }
 0x7dc   :  { %v2728_v11 = vmul.f32 %v3872_v33, %v2727_v56 }
 0x7dd   :  { %v2747_v40 = vmul.f32 %v3874_v38, %v2746_v9  ;;  %v10939_v9 = vld [vmem:[%s11951_s5 + $0x108] sm:$0xff] }
 0x7de   :  { %v2729_v7 = vadd.f32 %v3872_v33, %v2728_v11  ;;  %v2753_v11 = vand.u32 2147483647, %v2743_v36  ;;  %v10860_v36 = vld [vmem:[%s11951_s5 + $0x200] sm:$0xff] }
 0x7df   :  { %v2748_v4 = vadd.f32 %v3874_v38, %v2747_v40  ;;  %v10784_v40 = vld [vmem:[%s11951_s5 + $0x2e8] sm:$0xff] }
 0x7e0   :  { %v2733_v10 = vsel %vm2732_vm3, %v3872_v33, %v2729_v7  ;;  %vm2754_vm8 = vcmp.eq.f32.partialorder %v2753_v11, 8.507059e+37  ;;  %v10926_v7 = vld [vmem:[%s11951_s5 + $0x140] sm:$0xff]  ;;  %v11016_v11 = vld [vmem:[%s11951_s5 + $0x50] sm:$0xff] }
 0x7e1   :  { %v2738_v18 = vsel %vm2735_vm4, %v2737_v47, %v2733_v10  ;;  %v2752_v45 = vsel %vm2751_vm7, %v3874_v38, %v2748_v4  ;;  %v10854_v4 = vld [vmem:[%s11951_s5 + $0x1f8] sm:$0xff]  ;;  %v10907_v38 = vld [vmem:[%s11951_s5 + $0x170] sm:$0xff]  ;;  %v10964_v10 = vld [vmem:[%s11951_s5 + $0xe0] sm:$0xff]  ;;  %13594 = vst [vmem:[#allocation38_spill] sm:$0xff] %v11016_v11 }
 0x7e2   :  { %v2759_v22 = vmul.f32 %v2738_v18, %v2593_v48  ;;  %v2757_v5 = vsel %vm2754_vm8, %v2756_v16, %v2752_v45  ;;  %v10945_v47 = vld [vmem:[%s11951_s5 + $0x110] sm:$0xff]  ;;  %v10958_v48 = vld [vmem:[%s11951_s5 + $0xd8] sm:$0xff]  ;;  %v10977_v18 = vld [vmem:[%s11951_s5 + $0xa8] sm:$0xff] }
 0x7e3   :  { %v11052_v45 = vld [vmem:[%s11951_s5 + $0x2c8] sm:$0xff]  ;;  %v11090_v16 = vld [vmem:[%s11951_s5 + $0x238] sm:$0xff] }
 0x7e4   :  { %v2760_v56 = vadd.f32 %v2759_v22, %v202_v25  ;;  %v10790_v22 = vld [vmem:[%s11951_s5 + $0x2f0] sm:$0xff]  ;;  %v10996_v25 = vld [vmem:[%s11951_s5 + $0x78] sm:$0xff]  ;;  %13599 = vst [vmem:[#allocation15_spill] sm:$0xff] %v11052_v45 }
 0x7e5   :  { %13591 = vst [vmem:[#allocation11_spill] sm:$0xff] %v10996_v25 }
 0x7e6   :  { %3875 = vtanh.f32 %v2760_v56  ;;  %v11002_v56 = vld [vmem:[%s11951_s5 + $0x80] sm:$0xff]  ;;  %13605 = vst [vmem:[#allocation16_spill] sm:$0xff] %v11090_v16 }
 0x7e7   :  { %13592 = vst [vmem:[#allocation12_spill] sm:$0xff] %v11002_v56 }
 0x7ec   :  { %v3876_v24 = vpop.eup %3875 }
 0x7ed   :  { %v2762_v33 = vsub.f32 %v9889_v54, %v3876_v24  ;;  %v10798_v54 = vld [vmem:[%s11951_s5 + $0x2b8] sm:$0xff] }
 0x7ef   :  { %v2763_v19 = vmul.f32 %v2762_v33, %v2757_v5  ;;  %v11096_v33 = vld [vmem:[%s11953_s3 + $0x108] sm:$0xff] }
 0x7f0   :  { %13606 = vst [vmem:[#allocation5_spill] sm:$0xff] %v11096_v33  ;;  %v11102_v5 = vld [vmem:[%s11951_s5 + $0x208] sm:$0xff] }
 0x7f1   :  { %v10775_v43 = vadd.f32 %v3876_v24, %v2763_v19  ;;  %v11084_v24 = vld [vmem:[%s11953_s3 + $0x120] sm:$0xff]  ;;  %13607 = vst [vmem:[#allocation132_spill] sm:$0xff] %v11102_v5  ;;  %v11108_v19 = vld [vmem:[%s11953_s3 + $0xf0] sm:$0xff] }
 0x7f2   :  { %13604 = vst [vmem:[#allocation4_spill] sm:$0xff] %v11084_v24 }
 0x7f3   :  { %2781 = vmatmul.f32.vlgmr.msra.gmra.mxu1 %v10775_v43  ;;  %2801 = vmatmul.f32.vlgmr.msra.gmra.mxu2 %v10775_v43  ;;  %13608 = vst [vmem:[#allocation133_spill] sm:$0xff] %v11108_v19 }
 0x7f4   :  { %2821 = vmatmul.f32.vlgmr.msrb.gmra.mxu3 %v10775_v43  ;;  %2887 = vmatmul.f32.vlgmr.msrb.gmra.mxu0 %v10775_v43 }
 0x7f5   :  { %2991 = vmatpush.msra.mxu2 %v10784_v40  ;;  %3031 = vmatpush.msrb.mxu0 %v10790_v22 }
 0x7f6   :  { %2971 = vmatpush.msra.mxu1 %v9900_v62  ;;  %3011 = vmatpush.msrb.mxu3 %v9906_v32  ;;  %v10812_v62 = vld [vmem:[%s11951_s5 + $0x288] sm:$0xff]  ;;  %v10818_v32 = vld [vmem:[%s11951_s5 + $0x290] sm:$0xff] }
 0x7f7   :  { %2992 = vmatpush.msra.mxu2 %v10798_v54  ;;  %3032 = vmatpush.msrb.mxu0 %v10804_v52 }
 0x7f8   :  { %2972 = vmatpush.msra.mxu1 %v9914_v60  ;;  %3012 = vmatpush.msrb.mxu3 %v9920_v20  ;;  %v10826_v60 = vld [vmem:[%s11951_s5 + $0x258] sm:$0xff]  ;;  %v10832_v20 = vld [vmem:[%s11951_s5 + $0x260] sm:$0xff] }
 0x7f9   :  { %2993 = vmatpush.msra.mxu2 %v10812_v62  ;;  %3033 = vmatpush.msrb.mxu0 %v10818_v32 }
 0x7fa   :  { %2973 = vmatpush.msra.mxu1 %v9928_v31  ;;  %3013 = vmatpush.msrb.mxu3 %v9934_v0  ;;  %v10840_v31 = vld [vmem:[%s11951_s5 + $0x228] sm:$0xff]  ;;  %v10846_v0 = vld [vmem:[%s11951_s5 + $0x230] sm:$0xff] }
 0x7fb   :  { %2994 = vmatpush.msra.mxu2 %v10826_v60  ;;  %3034 = vmatpush.msrb.mxu0 %v10832_v20 }
 0x7fc   :  { %2927 = vmatmul.f32.vlgmr.msrb.gmra.mxu2 %v10775_v43  ;;  %2967 = vmatmul.f32.vlgmr.msra.gmra.mxu0 %v10775_v43 }
 0x7fd   :  { %2995 = vmatpush.msra.mxu2 %v10840_v31  ;;  %3035 = vmatpush.msrb.mxu0 %v10846_v0 }
 0x7fe   :  { %2974 = vmatpush.msra.mxu1 %v9946_v14  ;;  %3014 = vmatpush.msrb.mxu3 %v9952_v12  ;;  %v10868_v14 = vld [vmem:[%s11951_s5 + $0x1c8] sm:$0xff]  ;;  %v10874_v12 = vld [vmem:[%s11951_s5 + $0x1d0] sm:$0xff] }
 0x7ff   :  { %2996 = vmatpush.msra.mxu2 %v10854_v4  ;;  %3036 = vmatpush.msrb.mxu0 %v10860_v36 }
 0x800   :  { %2975 = vmatpush.msra.mxu1 %v9960_v44  ;;  %3015 = vmatpush.msrb.mxu3 %v9966_v63  ;;  %v10882_v44 = vld [vmem:[%s11951_s5 + $0x198] sm:$0xff]  ;;  %v10888_v63 = vld [vmem:[%s11951_s5 + $0x1a0] sm:$0xff] }
 0x801   :  { %2997 = vmatpush.msra.mxu2 %v10868_v14  ;;  %3037 = vmatpush.msrb.mxu0 %v10874_v12 }
 0x802   :  { %2976 = vmatpush.msra.mxu1 %v9974_v51  ;;  %3016 = vmatpush.msrb.mxu3 %v9980_v49  ;;  %v10895_v51 = vld [vmem:[%s11951_s5 + $0x4c8] sm:$0xff] }
 0x803   :  { %2998 = vmatpush.msra.mxu2 %v10882_v44  ;;  %3038 = vmatpush.msrb.mxu0 %v10888_v63  ;;  %v10901_v49 = vld [vmem:[%s11951_s5 + $0x168] sm:$0xff] }
 0x804   :  { %2977 = vmatpush.msra.mxu1 %v9988_v35  ;;  %3017 = vmatpush.msrb.mxu3 %v10895_v51  ;;  %v10914_v35 = vld [vmem:[%s11951_s5 + $0x498] sm:$0xff] }
 0x805   :  { %2999 = vmatpush.msra.mxu2 %v10901_v49  ;;  %3039 = vmatpush.msrb.mxu0 %v10907_v38 }
 0x806   :  { %2978 = vmatpush.msra.mxu1 %v9997_v57  ;;  %3018 = vmatpush.msrb.mxu3 %v10914_v35  ;;  %v10933_v57 = vld [vmem:[%s11951_s5 + $0x468] sm:$0xff] }
 0x807   :  { %3000 = vmatpush.msra.mxu2 %v10920_v6  ;;  %3040 = vmatpush.msrb.mxu0 %v10926_v7 }
 0x808   :  { %2979 = vmatpush.msra.mxu1 %v10006_v50  ;;  %3019 = vmatpush.msrb.mxu3 %v10933_v57  ;;  %v10952_v50 = vld [vmem:[%s11951_s5 + $0x438] sm:$0xff] }
 0x809   :  { %3001 = vmatpush.msra.mxu2 %v10939_v9  ;;  %3041 = vmatpush.msrb.mxu0 %v10945_v47 }
 0x80a   :  { %2980 = vmatpush.msra.mxu1 %v10015_v46  ;;  %3020 = vmatpush.msrb.mxu3 %v10952_v50  ;;  %v10971_v46 = vld [vmem:[%s11951_s5 + $0x408] sm:$0xff] }
 0x80b   :  { %3002 = vmatpush.msra.mxu2 %v10958_v48  ;;  %3042 = vmatpush.msrb.mxu0 %v10964_v10 }
 0x80c   :  { %2981 = vmatpush.msra.mxu1 %v10024_v39  ;;  %3021 = vmatpush.msrb.mxu3 %v10971_v46  ;;  %v10990_v39 = vld [vmem:[%s11951_s5 + $0x3d8] sm:$0xff] }
 0x80d   :  { %3003 = vmatpush.msra.mxu2 %v10977_v18  ;;  %3043 = vmatpush.msrb.mxu0 %v10983_v23  ;;  %13590 = vst [vmem:[#allocation10_spill] sm:$0xff] %v10990_v39 }
 0x80e   :  { %2982 = vmatpush.msra.mxu1 %v10033_v55  ;;  %3022 = vmatpush.msrb.mxu3 %v10990_v39  ;;  %v11010_v55 = vld [vmem:[%s11951_s5 + $0x48] sm:$0xff] }
 0x80f   :  { %3004 = vmatpush.msra.mxu2 %v10996_v25  ;;  %3044 = vmatpush.msrb.mxu0 %v11002_v56  ;;  %13593 = vst [vmem:[#allocation13_spill] sm:$0xff] %v11010_v55 }
 0x810   :  { %2983 = vmatpush.msra.mxu1 %v10042_v34  ;;  %3023 = vmatpush.msrb.mxu3 %v10048_v1  ;;  %v11024_v34 = vld [vmem:[%s11951_s5 + $0x18] sm:$0xff]  ;;  %v11030_v1 = vld [vmem:[%s11951_s5 + $0x20] sm:$0xff] }
 0x811   :  { %3005 = vmatpush.msra.mxu2 %v11010_v55  ;;  %3045 = vmatpush.msrb.mxu0 %v11016_v11  ;;  %13595 = vst [vmem:[#allocation36_spill] sm:$0xff] %v11024_v34 }
 0x812   :  { %2984 = vmatpush.msra.mxu1 %v10056_v37  ;;  %3024 = vmatpush.msrb.mxu3 %v10062_v27  ;;  %13596 = vst [vmem:[#allocation54_spill] sm:$0xff] %v11030_v1  ;;  %v11038_v37 = vld [vmem:[%s11951_s5 + $0x2f8] sm:$0xff]  ;;  %v11046_v27 = vld [vmem:[%s11953_s3 + $0x168] sm:$0xff] }
 0x813   :  { %3006 = vmatpush.msra.mxu2 %v11024_v34  ;;  %3046 = vmatpush.msrb.mxu0 %v11030_v1  ;;  %13597 = vst [vmem:[#allocation14_spill] sm:$0xff] %v11038_v37 }
 0x814   :  { %3007 = vmatmul.f32.vlgmr.msra.gmra.mxu2 %v10775_v43  ;;  %3047 = vmatmul.f32.vlgmr.msrb.gmra.mxu0 %v10775_v43  ;;  %13598 = vst [vmem:[#allocation85_spill] sm:$0xff] %v11046_v27 }
 0x815   :  { %3071 = vmatpush.msrb.mxu2 %v11038_v37  ;;  %2985 = vmatpush.msra.mxu1 %v10073_v21  ;;  %v11060_v21 = vld [vmem:[%s11953_s3 + $0x150] sm:$0xff] }
 0x816   :  { %3025 = vmatpush.msrb.mxu3 %v10079_v58  ;;  %3161 = vmatpush.msra.mxu0 %v11046_v27  ;;  %13600 = vst [vmem:[#allocation128_spill] sm:$0xff] %v11060_v21  ;;  %v11066_v58 = vld [vmem:[%s11951_s5 + $0x298] sm:$0xff] }
 0x817   :  { %3072 = vmatpush.msrb.mxu2 %v11052_v45  ;;  %2986 = vmatpush.msra.mxu1 %v10087_v59  ;;  %13601 = vst [vmem:[#allocation129_spill] sm:$0xff] %v11066_v58  ;;  %v11072_v59 = vld [vmem:[%s11953_s3 + $0x138] sm:$0xff] }
 0x818   :  { %3026 = vmatpush.msrb.mxu3 %v10093_v42  ;;  %3162 = vmatpush.msra.mxu0 %v11060_v21  ;;  %13602 = vst [vmem:[#allocation130_spill] sm:$0xff] %v11072_v59  ;;  %v11078_v42 = vld [vmem:[%s11951_s5 + $0x268] sm:$0xff] }
 0x819   :  { %3073 = vmatpush.msrb.mxu2 %v11066_v58  ;;  %13603 = vst [vmem:[#allocation131_spill] sm:$0xff] %v11078_v42  ;;  %v2672_v58 = vpop.f32.mrf.mxu2 }
 0x81a   :  { %3163 = vmatpush.msra.mxu0 %v11072_v59  ;;  %v2632_v59 = vpop.f32.mrf.mxu0 }
 0x81b   :  { %3074 = vmatpush.msrb.mxu2 %v11078_v42  ;;  %v2612_v42 = vpop.f32.mrf.mxu3 }
 0x81c   :  { %3164 = vmatpush.msra.mxu0 %v11084_v24  ;;  %v4665_v24 = vld [vmem:[%s11951_s5 + $0x578] sm:$0xff] }
 0x81d   :  { %3075 = vmatpush.msrb.mxu2 %v11090_v16  ;;  %v11114_v16 = vld [vmem:[%s11951_s5 + $0x1d8] sm:$0xff] }
 0x81e   :  { %3165 = vmatpush.msra.mxu0 %v11096_v33  ;;  %13609 = vst [vmem:[#allocation19_spill] sm:$0xff] %v11114_v16  ;;  %v11120_v33 = vld [vmem:[%s11953_s3 + $0xd8] sm:$0xff] }
 0x81f   :  { %3076 = vmatpush.msrb.mxu2 %v11102_v5  ;;  %13610 = vst [vmem:[#allocation6_spill] sm:$0xff] %v11120_v33  ;;  %v11126_v5 = vld [vmem:[%s11951_s5 + $0x1a8] sm:$0xff] }
 0x820   :  { %3166 = vmatpush.msra.mxu0 %v11108_v19  ;;  %13611 = vst [vmem:[#allocation20_spill] sm:$0xff] %v11126_v5  ;;  %v11132_v19 = vld [vmem:[%s11953_s3 + $0xc0] sm:$0xff] }
 0x821   :  { %3077 = vmatpush.msrb.mxu2 %v11114_v16  ;;  %13612 = vst [vmem:[#allocation134_spill] sm:$0xff] %v11132_v19  ;;  %v11138_v16 = vld [vmem:[%s11951_s5 + $0x178] sm:$0xff] }
 0x822   :  { %3167 = vmatpush.msra.mxu0 %v11120_v33  ;;  %13613 = vst [vmem:[#allocation135_spill] sm:$0xff] %v11138_v16  ;;  %v11144_v33 = vld [vmem:[%s11953_s3 + $0xa8] sm:$0xff] }
 0x823   :  { %3078 = vmatpush.msrb.mxu2 %v11126_v5  ;;  %13614 = vst [vmem:[#allocation136_spill] sm:$0xff] %v11144_v33  ;;  %v11150_v5 = vld [vmem:[%s11951_s5 + $0x148] sm:$0xff]  ;;  %v2692_v56 = vpop.f32.mrf.mxu3 }
 0x824   :  { %3168 = vmatpush.msra.mxu0 %v11132_v19  ;;  %13615 = vst [vmem:[#allocation137_spill] sm:$0xff] %v11150_v5  ;;  %v11156_v19 = vld [vmem:[%s11953_s3 + $0x90] sm:$0xff] }
 0x825   :  { %3079 = vmatpush.msrb.mxu2 %v11138_v16  ;;  %13616 = vst [vmem:[#allocation138_spill] sm:$0xff] %v11156_v19  ;;  %v11162_v16 = vld [vmem:[%s11951_s5 + $0x118] sm:$0xff] }
 0x826   :  { %3169 = vmatpush.msra.mxu0 %v11144_v33  ;;  %13617 = vst [vmem:[#allocation139_spill] sm:$0xff] %v11162_v16  ;;  %v11168_v33 = vld [vmem:[%s11953_s3 + $0x78] sm:$0xff] }
 0x827   :  { %3080 = vmatpush.msrb.mxu2 %v11150_v5  ;;  %13618 = vst [vmem:[#allocation140_spill] sm:$0xff] %v11168_v33  ;;  %v11174_v5 = vld [vmem:[%s11951_s5 + $0xe8] sm:$0xff] }
 0x828   :  { %3170 = vmatpush.msra.mxu0 %v11156_v19  ;;  %13619 = vst [vmem:[#allocation141_spill] sm:$0xff] %v11174_v5  ;;  %v11180_v19 = vld [vmem:[%s11953_s3 + $0x60] sm:$0xff] }
 0x829   :  { %3081 = vmatpush.msrb.mxu2 %v11162_v16  ;;  %13620 = vst [vmem:[#allocation142_spill] sm:$0xff] %v11180_v19  ;;  %v11186_v16 = vld [vmem:[%s11951_s5 + $0xb8] sm:$0xff] }
 0x82a   :  { %3171 = vmatpush.msra.mxu0 %v11168_v33  ;;  %13621 = vst [vmem:[#allocation143_spill] sm:$0xff] %v11186_v16  ;;  %v11192_v33 = vld [vmem:[%s11953_s3 + $0x48] sm:$0xff] }
 0x82b   :  { %3082 = vmatpush.msrb.mxu2 %v11174_v5  ;;  %13622 = vst [vmem:[#allocation144_spill] sm:$0xff] %v11192_v33  ;;  %v11198_v5 = vld [vmem:[%s11951_s5 + $0x88] sm:$0xff] }
 0x82c   :  { %3172 = vmatpush.msra.mxu0 %v11180_v19  ;;  %13623 = vst [vmem:[#allocation145_spill] sm:$0xff] %v11198_v5  ;;  %v11204_v19 = vld [vmem:[%s11953_s3 + $0x30] sm:$0xff] }
 0x82d   :  { %3083 = vmatpush.msrb.mxu2 %v11186_v16  ;;  %13624 = vst [vmem:[#allocation146_spill] sm:$0xff] %v11204_v19  ;;  %v11210_v16 = vld [vmem:[%s11951_s5 + $0x58] sm:$0xff] }
 0x82e   :  { %3173 = vmatpush.msra.mxu0 %v11192_v33  ;;  %13625 = vst [vmem:[#allocation147_spill] sm:$0xff] %v11210_v16  ;;  %v11216_v33 = vld [vmem:[%s11953_s3 + $0x18] sm:$0xff] }
 0x82f   :  { %3084 = vmatpush.msrb.mxu2 %v11198_v5  ;;  %13626 = vst [vmem:[#allocation148_spill] sm:$0xff] %v11216_v33  ;;  %v11222_v5 = vld [vmem:[%s11951_s5 + $0x28] sm:$0xff] }
 0x830   :  { %3174 = vmatpush.msra.mxu0 %v11204_v19  ;;  %13627 = vst [vmem:[#allocation149_spill] sm:$0xff] %v11222_v5  ;;  %v11244_v19 = vld [vmem:[%s11953_s3 + $0x160] sm:$0xff] }
 0x831   :  { %3085 = vmatpush.msrb.mxu2 %v11210_v16  ;;  %v11229_v16 = vld [vmem:[%s11953_s3] sm:$0xff]  ;;  %13630 = vst [vmem:[#allocation152_spill] sm:$0xff] %v11244_v19 }
 0x832   :  { %3175 = vmatpush.msra.mxu0 %v11216_v33  ;;  %13628 = vst [vmem:[#allocation150_spill] sm:$0xff] %v11229_v16  ;;  %v11235_v33 = vld [vmem:[%s11953_s3 + $0x178] sm:$0xff] }
 0x833   :  { %3086 = vmatpush.msrb.mxu2 %v11222_v5  ;;  %13629 = vst [vmem:[#allocation151_spill] sm:$0xff] %v11235_v33  ;;  %v4632_v5 = vld [vmem:[%s11951_s5 + $0x5d0] sm:$0xff] }
 0x834   :  { %3087 = vmatmul.f32.vlgmr.msrb.gmra.mxu2 %v10775_v43  ;;  %3176 = vmatpush.msra.mxu0 %v11229_v16  ;;  %v4634_v16 = vld [vmem:[%s11951_s5 + $0x5a0] sm:$0xff] }
 0x835   :  { %3201 = vmatpush.msra.mxu2 %v11235_v33  ;;  %v11253_v33 = vld [vmem:[%s11953_s3 + $0x148] sm:$0xff] }
 0x836   :  { %3287 = vmatpush.msrb.mxu0 %v4632_v5  ;;  %13631 = vst [vmem:[#allocation153_spill] sm:$0xff] %v11253_v33  ;;  %v4636_v5 = vld [vmem:[%s11951_s5 + $0x570] sm:$0xff] }
 0x837   :  { %3202 = vmatpush.msra.mxu2 %v11244_v19  ;;  %v11262_v19 = vld [vmem:[%s11953_s3 + $0x130] sm:$0xff] }
 0x838   :  { %3288 = vmatpush.msrb.mxu0 %v4634_v16  ;;  %13632 = vst [vmem:[#allocation154_spill] sm:$0xff] %v11262_v19  ;;  %v4638_v16 = vld [vmem:[%s11951_s5 + $0x540] sm:$0xff] }
 0x839   :  { %3203 = vmatpush.msra.mxu2 %v11253_v33  ;;  %v11271_v33 = vld [vmem:[%s11953_s3 + $0x118] sm:$0xff] }
 0x83a   :  { %3289 = vmatpush.msrb.mxu0 %v4636_v5  ;;  %13633 = vst [vmem:[#allocation155_spill] sm:$0xff] %v11271_v33  ;;  %v4640_v5 = vld [vmem:[%s11951_s5 + $0x510] sm:$0xff] }
 0x83b   :  { %3204 = vmatpush.msra.mxu2 %v11262_v19  ;;  %v11280_v19 = vld [vmem:[%s11953_s3 + $0x100] sm:$0xff] }
 0x83c   :  { %3290 = vmatpush.msrb.mxu0 %v4638_v16  ;;  %13634 = vst [vmem:[#allocation156_spill] sm:$0xff] %v11280_v19  ;;  %v4642_v16 = vld [vmem:[%s11951_s5 + $0x4e0] sm:$0xff] }
 0x83d   :  { %3205 = vmatpush.msra.mxu2 %v11271_v33  ;;  %v11289_v33 = vld [vmem:[%s11953_s3 + $0xe8] sm:$0xff] }
 0x83e   :  { %3291 = vmatpush.msrb.mxu0 %v4640_v5  ;;  %13635 = vst [vmem:[#allocation157_spill] sm:$0xff] %v11289_v33  ;;  %v4644_v5 = vld [vmem:[%s11951_s5 + $0x4b0] sm:$0xff] }
 0x83f   :  { %3206 = vmatpush.msra.mxu2 %v11280_v19  ;;  %v11298_v19 = vld [vmem:[%s11953_s3 + $0xd0] sm:$0xff] }
 0x840   :  { %3292 = vmatpush.msrb.mxu0 %v4642_v16  ;;  %13636 = vst [vmem:[#allocation158_spill] sm:$0xff] %v11298_v19  ;;  %v4646_v16 = vld [vmem:[%s11951_s5 + $0x480] sm:$0xff] }
 0x841   :  { %3207 = vmatpush.msra.mxu2 %v11289_v33  ;;  %v11307_v33 = vld [vmem:[%s11953_s3 + $0xb8] sm:$0xff] }
 0x842   :  { %3293 = vmatpush.msrb.mxu0 %v4644_v5  ;;  %13637 = vst [vmem:[#allocation159_spill] sm:$0xff] %v11307_v33  ;;  %v4648_v5 = vld [vmem:[%s11951_s5 + $0x450] sm:$0xff] }
 0x843   :  { %3208 = vmatpush.msra.mxu2 %v11298_v19  ;;  %v11316_v19 = vld [vmem:[%s11953_s3 + $0xa0] sm:$0xff] }
 0x844   :  { %3294 = vmatpush.msrb.mxu0 %v4646_v16  ;;  %13638 = vst [vmem:[#allocation160_spill] sm:$0xff] %v11316_v19  ;;  %v4650_v16 = vld [vmem:[%s11951_s5 + $0x420] sm:$0xff] }
 0x845   :  { %3209 = vmatpush.msra.mxu2 %v11307_v33  ;;  %v11325_v33 = vld [vmem:[%s11953_s3 + $0x88] sm:$0xff] }
 0x846   :  { %3295 = vmatpush.msrb.mxu0 %v4648_v5  ;;  %13639 = vst [vmem:[#allocation161_spill] sm:$0xff] %v11325_v33  ;;  %v4652_v5 = vld [vmem:[%s11951_s5 + $0x3f0] sm:$0xff] }
 0x847   :  { %3210 = vmatpush.msra.mxu2 %v11316_v19  ;;  %v11334_v19 = vld [vmem:[%s11953_s3 + $0x70] sm:$0xff] }
 0x848   :  { %3296 = vmatpush.msrb.mxu0 %v4650_v16  ;;  %13640 = vst [vmem:[#allocation162_spill] sm:$0xff] %v11334_v19  ;;  %v4654_v16 = vld [vmem:[%s11951_s5 + $0x3c0] sm:$0xff] }
 0x849   :  { %3211 = vmatpush.msra.mxu2 %v11325_v33  ;;  %v11343_v33 = vld [vmem:[%s11953_s3 + $0x58] sm:$0xff] }
 0x84a   :  { %3297 = vmatpush.msrb.mxu0 %v4652_v5  ;;  %13641 = vst [vmem:[#allocation163_spill] sm:$0xff] %v11343_v33  ;;  %v4656_v5 = vld [vmem:[%s11951_s5 + $0x390] sm:$0xff] }
 0x84b   :  { %3212 = vmatpush.msra.mxu2 %v11334_v19  ;;  %v11352_v19 = vld [vmem:[%s11953_s3 + $0x40] sm:$0xff] }
 0x84c   :  { %3298 = vmatpush.msrb.mxu0 %v4654_v16  ;;  %13642 = vst [vmem:[#allocation164_spill] sm:$0xff] %v11352_v19  ;;  %v4658_v16 = vld [vmem:[%s11951_s5 + $0x360] sm:$0xff] }
 0x84d   :  { %3213 = vmatpush.msra.mxu2 %v11343_v33  ;;  %v11361_v33 = vld [vmem:[%s11953_s3 + $0x28] sm:$0xff] }
 0x84e   :  { %3299 = vmatpush.msrb.mxu0 %v4656_v5  ;;  %13643 = vst [vmem:[#allocation165_spill] sm:$0xff] %v11361_v33  ;;  %v4660_v5 = vld [vmem:[%s11951_s5 + $0x330] sm:$0xff] }
 0x84f   :  { %3214 = vmatpush.msra.mxu2 %v11352_v19  ;;  %v11370_v19 = vld [vmem:[%s11953_s3 + $0x10] sm:$0xff] }
 0x850   :  { %3300 = vmatpush.msrb.mxu0 %v4658_v16  ;;  %13644 = vst [vmem:[#allocation166_spill] sm:$0xff] %v11370_v19  ;;  %v4662_v16 = vld [vmem:[%s11951_s5 + $0x300] sm:$0xff] }
 0x851   :  { %3215 = vmatpush.msra.mxu2 %v11361_v33  ;;  %v4663_v33 = vld [vmem:[%s11951_s5 + $0x5d8] sm:$0xff] }
 0x852   :  { %3301 = vmatpush.msrb.mxu0 %v4660_v5  ;;  %v4664_v5 = vld [vmem:[%s11951_s5 + $0x5a8] sm:$0xff] }
 0x853   :  { %3216 = vmatpush.msra.mxu2 %v11370_v19  ;;  %v4666_v19 = vld [vmem:[%s11951_s5 + $0x548] sm:$0xff] }
 0x854   :  { %3302 = vmatpush.msrb.mxu0 %v4662_v16  ;;  %v4667_v16 = vld [vmem:[%s11951_s5 + $0x518] sm:$0xff] }
 0x855   :  { %3327 = vmatpush.msrb.mxu2 %v4663_v33  ;;  %v4668_v33 = vld [vmem:[%s11951_s5 + $0x4e8] sm:$0xff] }
 0x857   :  { %3328 = vmatpush.msrb.mxu2 %v4664_v5  ;;  %v4669_v5 = vld [vmem:[%s11951_s5 + $0x4b8] sm:$0xff] }
 0x859   :  { %3329 = vmatpush.msrb.mxu2 %v4665_v24  ;;  %v4670_v24 = vld [vmem:[%s11951_s5 + $0x488] sm:$0xff] }
 0x85b   :  { %3330 = vmatpush.msrb.mxu2 %v4666_v19  ;;  %v4671_v19 = vld [vmem:[%s11951_s5 + $0x458] sm:$0xff] }
 0x85d   :  { %3331 = vmatpush.msrb.mxu2 %v4667_v16  ;;  %v4672_v16 = vld [vmem:[%s11951_s5 + $0x428] sm:$0xff] }
 0x85f   :  { %3332 = vmatpush.msrb.mxu2 %v4668_v33  ;;  %v2652_v33 = vpop.f32.mrf.mxu1 }
 0x860   :  { %v2653_v1 = vadd.f32 %v2652_v33, %v13492_v13 }
 0x861   :  { %3333 = vmatpush.msrb.mxu2 %v4669_v5  ;;  %v4673_v5 = vld [vmem:[%s11951_s5 + $0x3f8] sm:$0xff] }
 0x863   :  { %3334 = vmatpush.msrb.mxu2 %v4670_v24  ;;  %v4674_v24 = vld [vmem:[%s11951_s5 + $0x3c8] sm:$0xff] }
 0x865   :  { %3335 = vmatpush.msrb.mxu2 %v4671_v19  ;;  %v4675_v19 = vld [vmem:[%s11951_s5 + $0x398] sm:$0xff] }
 0x867   :  { %3336 = vmatpush.msrb.mxu2 %v4672_v16  ;;  %v4676_v16 = vld [vmem:[%s11951_s5 + $0x368] sm:$0xff] }
 0x869   :  { %3337 = vmatpush.msrb.mxu2 %v4673_v5  ;;  %v2613_v5 = vadd.f32 %v2612_v42, %v13491_v29  ;;  %v2673_v42 = vadd.f32 %v2672_v58, %v2653_v1 }
 0x86b   :  { %3338 = vmatpush.msrb.mxu2 %v4674_v24  ;;  %v4677_v24 = vld [vmem:[%s11951_s5 + $0x338] sm:$0xff]  ;;  %v2633_v45 = vadd.f32 %v2632_v59, %v2613_v5 }
 0x86d   :  { %3339 = vmatpush.msrb.mxu2 %v4675_v19  ;;  %v4678_v19 = vld [vmem:[%s11951_s5 + $0x308] sm:$0xff] }
 0x86f   :  { %3340 = vmatpush.msrb.mxu2 %v4676_v16 }
 0x870   :  { %v2782_v21 = vpop.f32.mrf.mxu1 }
 0x871   :  { %3341 = vmatpush.msrb.mxu2 %v4677_v24  ;;  %v2783_v27 = vadd.f32 %v2782_v21, %v13493_v28 }
 0x873   :  { %3342 = vmatpush.msrb.mxu2 %v4678_v19  ;;  %v2825_v37 = vadd.f32 %v2783_v27, %v2633_v45  ;;  %v2712_v19 = vpop.f32.mrf.mxu0 }
 0x875   :  { %v3755_v16 = vmul.f32 -1.442695, %v2825_v37 }
 0x876   :  { %v2802_v34 = vpop.f32.mrf.mxu2 }
 0x877   :  { %3877 = vpow2.f32 %v3755_v16  ;;  %v2803_v29 = vadd.f32 %v2802_v34, %v13494_v61 }
 0x879   :  { %v2826_v11 = vadd.f32 %v2803_v29, %v2673_v42  ;;  %v2693_v29 = vadd.f32 %v2692_v56, %v13120_v53 }
 0x87b   :  { %v3756_v55 = vmul.f32 -1.442695, %v2826_v11  ;;  %v2713_v42 = vadd.f32 %v2712_v19, %v2693_v29 }
 0x87d   :  { %v3878_v24 = vpop.eup %3877  ;;  %3879 = vpow2.f32 %v3756_v55  ;;  %v2822_v55 = vpop.f32.mrf.mxu3 }
 0x87e   :  { %v2830_v59 = vadd.f32 1.0, %v3878_v24 }
 0x880   :  { %3881 = vrcp.f32 %v2830_v59  ;;  %v2842_v33 = vand.u32 2147483648, %v2830_v59  ;;  %v2840_v1 = vand.u32 2147483647, %v2830_v59  ;;  %vm2836_vm10 = vweird.f32 %v2830_v59 }
 0x882   :  { %v2843_v16 = vor.u32 1.1754944e-38, %v2842_v33  ;;  %vm2841_vm12 = vcmp.eq.f32.partialorder %v2840_v1, 8.507059e+37 }
 0x883   :  { %v3880_v21 = vpop.eup %3879 }
 0x884   :  { %v2849_v5 = vadd.f32 1.0, %v3880_v21 }
 0x886   :  { %v3882_v28 = vpop.eup %3881  ;;  %3883 = vrcp.f32 %v2849_v5  ;;  %v2861_v56 = vand.u32 2147483648, %v2849_v5  ;;  %vm2855_vm14 = vweird.f32 %v2849_v5 }
 0x887   :  { %v2832_v27 = vmul.f32 %v3882_v28, %v2830_v59  ;;  %vm2837_vm9 = vweird.f32 %v3882_v28 }
 0x888   :  { %vm2838_vm11 = vmor %vm2836_vm10, %vm2837_vm9  ;;  %v2862_v33 = vor.u32 1.1754944e-38, %v2861_v56  ;;  %v13666_v56 = vld [vmem:[#allocation47_spill] sm:$0xff] }
 0x889   :  { %v2833_v45 = vsub.f32 1.0, %v2832_v27  ;;  %v2823_v27 = vadd.f32 %v2822_v55, %v6674_v26  ;;  %v13659_v55 = vld [vmem:[#allocation34_spill] sm:$0xff] }
 0x88b   :  { %v2834_v37 = vmul.f32 %v3882_v28, %v2833_v45 }
 0x88c   :  { %v3884_v58 = vpop.eup %3883 }
 0x88d   :  { %v2851_v11 = vmul.f32 %v3884_v58, %v2849_v5  ;;  %v2835_v34 = vadd.f32 %v3882_v28, %v2834_v37  ;;  %vm2856_vm13 = vweird.f32 %v3884_v58  ;;  %v2859_v37 = vand.u32 2147483647, %v2849_v5  ;;  %v13655_v5 = vld [vmem:[#allocation57_spill] sm:$0xff] }
 0x88e   :  { %vm2857_vm15 = vmor %vm2855_vm14, %vm2856_vm13 }
 0x88f   :  { %v2852_v24 = vsub.f32 1.0, %v2851_v11  ;;  %v2839_v21 = vsel %vm2838_vm11, %v3882_v28, %v2835_v34  ;;  %vm2860_vm0 = vcmp.eq.f32.partialorder %v2859_v37, 8.507059e+37  ;;  %v13657_v11 = vld [vmem:[#allocation30_spill] sm:$0xff]  ;;  %v13658_v34 = vld [vmem:[#allocation33_spill] sm:$0xff]  ;;  %v13667_v37 = vld [vmem:[#allocation48_spill] sm:$0xff] }
 0x890   :  { %v2844_v61 = vsel %vm2841_vm12, %v2843_v16, %v2839_v21  ;;  %v13660_v16 = vld [vmem:[#allocation35_spill] sm:$0xff]  ;;  %v13663_v21 = vld [vmem:[#allocation41_spill] sm:$0xff] }
 0x891   :  { %v2865_v45 = vmul.f32 %v2844_v61, %v2713_v42  ;;  %v2853_v13 = vmul.f32 %v3884_v58, %v2852_v24  ;;  %v13646_v61 = vld [vmem:[#allocation209_spill] sm:$0xff]  ;;  %v13662_v24 = vld [vmem:[#allocation40_spill] sm:$0xff] }
 0x892   :  { %v13661_v42 = vld [vmem:[#allocation37_spill] sm:$0xff] }
 0x893   :  { %v2866_v25 = vadd.f32 %v2865_v45, %v2823_v27  ;;  %v2854_v39 = vadd.f32 %v3884_v58, %v2853_v13  ;;  %v13645_v13 = vld [vmem:[#allocation208_spill] sm:$0xff]  ;;  %v13664_v27 = vld [vmem:[#allocation42_spill] sm:$0xff] }
 0x894   :  { %v13665_v45 = vld [vmem:[#allocation44_spill] sm:$0xff] }
 0x895   :  { %3885 = vtanh.f32 %v2866_v25  ;;  %v2858_v59 = vsel %vm2857_vm15, %v3884_v58, %v2854_v39  ;;  %v13649_v39 = vld [vmem:[#allocation46_spill] sm:$0xff]  ;;  %v13654_v25 = vld [vmem:[#allocation27_spill] sm:$0xff]  ;;  %v13656_v58 = vld [vmem:[#allocation28_spill] sm:$0xff] }
 0x896   :  { %v2863_v1 = vsel %vm2860_vm0, %v2862_v33, %v2858_v59  ;;  %v13668_v59 = vld [vmem:[#allocation49_spill] sm:$0xff]  ;;  %v13669_v33 = vld [vmem:[#allocation52_spill] sm:$0xff] }
 0x89b   :  { %v3886_v53 = vpop.eup %3885 }
 0x89c   :  { %v2868_v28 = vsub.f32 %v10181_v8, %v3886_v53  ;;  %v13647_v8 = vld [vmem:[#allocation29_spill] sm:$0xff] }
 0x89e   :  { %v2869_v19 = vmul.f32 %v2868_v28, %v2863_v1  ;;  %v13670_v28 = vld [vmem:[#allocation56_spill] sm:$0xff]  ;;  %v13671_v1 = vld [vmem:[#allocation58_spill] sm:$0xff] }
 0x8a0   :  { %v11431_v29 = vadd.f32 %v3886_v53, %v2869_v19  ;;  %v13648_v53 = vld [vmem:[#allocation31_spill] sm:$0xff]  ;;  %v13672_v19 = vld [vmem:[#allocation60_spill] sm:$0xff] }
 0x8a2   :  { %2907 = vmatmul.f32.vlgmr.msrb.gmra.mxu1 %v11431_v29  ;;  %2947 = vmatmul.f32.vlgmr.msra.gmra.mxu3 %v11431_v29 }
 0x8a3   :  { %3051 = vmatpush.msrb.mxu1 %v10188_v2  ;;  %3091 = vmatpush.msra.mxu3 %v10194_v3  ;;  %v13650_v2 = vld [vmem:[#allocation25_spill] sm:$0xff]  ;;  %v13651_v3 = vld [vmem:[#allocation51_spill] sm:$0xff] }
 0x8a5   :  { %3052 = vmatpush.msrb.mxu1 %v10200_v17  ;;  %3092 = vmatpush.msra.mxu3 %v10206_v15  ;;  %v13652_v17 = vld [vmem:[#allocation26_spill] sm:$0xff]  ;;  %v13653_v15 = vld [vmem:[#allocation55_spill] sm:$0xff] }
 0x8a7   :  { %3053 = vmatpush.msrb.mxu1 %v13645_v13  ;;  %3093 = vmatpush.msra.mxu3 %v13646_v61  ;;  %v13673_v13 = vld [vmem:[#allocation66_spill] sm:$0xff]  ;;  %v13674_v61 = vld [vmem:[#allocation71_spill] sm:$0xff] }
 0x8a9   :  { %3054 = vmatpush.msrb.mxu1 %v13647_v8  ;;  %3094 = vmatpush.msra.mxu3 %v13648_v53  ;;  %v13675_v8 = vld [vmem:[#allocation72_spill] sm:$0xff]  ;;  %v13676_v53 = vld [vmem:[#allocation74_spill] sm:$0xff] }
 0x8aa   :  { %2987 = vmatmul.f32.vlgmr.msra.gmra.mxu1 %v11431_v29  ;;  %3027 = vmatmul.f32.vlgmr.msrb.gmra.mxu3 %v11431_v29 }
 0x8ab   :  { %3055 = vmatpush.msrb.mxu1 %v13649_v39  ;;  %3095 = vmatpush.msra.mxu3 %v13650_v2  ;;  %v13677_v39 = vld [vmem:[#allocation75_spill] sm:$0xff]  ;;  %v13678_v2 = vld [vmem:[#allocation76_spill] sm:$0xff] }
 0x8ad   :  { %3056 = vmatpush.msrb.mxu1 %v13651_v3  ;;  %3096 = vmatpush.msra.mxu3 %v13652_v17  ;;  %v13679_v3 = vld [vmem:[#allocation78_spill] sm:$0xff]  ;;  %v13680_v17 = vld [vmem:[#allocation79_spill] sm:$0xff] }
 0x8af   :  { %3057 = vmatpush.msrb.mxu1 %v13653_v15  ;;  %3097 = vmatpush.msra.mxu3 %v13654_v25  ;;  %v13681_v15 = vld [vmem:[#allocation80_spill] sm:$0xff]  ;;  %v13682_v25 = vld [vmem:[#allocation81_spill] sm:$0xff] }
 0x8b1   :  { %3058 = vmatpush.msrb.mxu1 %v13655_v5  ;;  %3098 = vmatpush.msra.mxu3 %v13656_v58  ;;  %v13683_v5 = vld [vmem:[#allocation82_spill] sm:$0xff]  ;;  %v13684_v58 = vld [vmem:[#allocation83_spill] sm:$0xff] }
 0x8b3   :  { %3059 = vmatpush.msrb.mxu1 %v13657_v11  ;;  %3099 = vmatpush.msra.mxu3 %v13658_v34  ;;  %v13685_v11 = vld [vmem:[#allocation84_spill] sm:$0xff]  ;;  %v13686_v34 = vld [vmem:[#allocation59_spill] sm:$0xff] }
 0x8b5   :  { %3060 = vmatpush.msrb.mxu1 %v13659_v55  ;;  %3100 = vmatpush.msra.mxu3 %v13660_v16  ;;  %v13687_v55 = vld [vmem:[#allocation86_spill] sm:$0xff]  ;;  %v13688_v16 = vld [vmem:[#allocation87_spill] sm:$0xff] }
 0x8b7   :  { %3061 = vmatpush.msrb.mxu1 %v13661_v42  ;;  %3101 = vmatpush.msra.mxu3 %v13662_v24  ;;  %v13689_v42 = vld [vmem:[#allocation88_spill] sm:$0xff]  ;;  %v13690_v24 = vld [vmem:[#allocation89_spill] sm:$0xff] }
 0x8b9   :  { %3062 = vmatpush.msrb.mxu1 %v13663_v21  ;;  %3102 = vmatpush.msra.mxu3 %v13664_v27  ;;  %v13691_v21 = vld [vmem:[#allocation90_spill] sm:$0xff]  ;;  %v13692_v27 = vld [vmem:[#allocation91_spill] sm:$0xff] }
 0x8bb   :  { %3063 = vmatpush.msrb.mxu1 %v13665_v45  ;;  %3103 = vmatpush.msra.mxu3 %v13666_v56  ;;  %v13693_v45 = vld [vmem:[#allocation92_spill] sm:$0xff]  ;;  %v13694_v56 = vld [vmem:[#allocation93_spill] sm:$0xff] }
 0x8bd   :  { %3064 = vmatpush.msrb.mxu1 %v13667_v37  ;;  %3104 = vmatpush.msra.mxu3 %v13668_v59  ;;  %v13695_v37 = vld [vmem:[#allocation94_spill] sm:$0xff]  ;;  %v13696_v59 = vld [vmem:[#allocation95_spill] sm:$0xff] }
 0x8bf   :  { %3065 = vmatpush.msrb.mxu1 %v13669_v33  ;;  %3105 = vmatpush.msra.mxu3 %v13670_v28  ;;  %v13697_v33 = vld [vmem:[#allocation96_spill] sm:$0xff]  ;;  %v13698_v28 = vld [vmem:[#allocation97_spill] sm:$0xff] }
 0x8c1   :  { %3066 = vmatpush.msrb.mxu1 %v13671_v1  ;;  %3106 = vmatpush.msra.mxu3 %v13672_v19  ;;  %v13699_v1 = vld [vmem:[#allocation98_spill] sm:$0xff]  ;;  %v13700_v19 = vld [vmem:[#allocation99_spill] sm:$0xff] }
 0x8c2   :  { %3067 = vmatmul.f32.vlgmr.msrb.gmra.mxu1 %v11431_v29  ;;  %3107 = vmatmul.f32.vlgmr.msra.gmra.mxu3 %v11431_v29 }
 0x8c3   :  { %3181 = vmatpush.msra.mxu1 %v13673_v13  ;;  %3267 = vmatpush.msrb.mxu3 %v13674_v61  ;;  %v13701_v13 = vld [vmem:[#allocation100_spill] sm:$0xff]  ;;  %v13702_v61 = vld [vmem:[#allocation101_spill] sm:$0xff] }
 0x8c5   :  { %3182 = vmatpush.msra.mxu1 %v13675_v8  ;;  %3268 = vmatpush.msrb.mxu3 %v13676_v53  ;;  %v13703_v8 = vld [vmem:[#allocation102_spill] sm:$0xff]  ;;  %v13704_v53 = vld [vmem:[#allocation103_spill] sm:$0xff] }
 0x8c7   :  { %3183 = vmatpush.msra.mxu1 %v13677_v39  ;;  %3269 = vmatpush.msrb.mxu3 %v13678_v2  ;;  %v13705_v39 = vld [vmem:[#allocation104_spill] sm:$0xff]  ;;  %v13706_v2 = vld [vmem:[#allocation105_spill] sm:$0xff] }
 0x8c9   :  { %3184 = vmatpush.msra.mxu1 %v13679_v3  ;;  %3270 = vmatpush.msrb.mxu3 %v13680_v17  ;;  %v13707_v3 = vld [vmem:[#allocation106_spill] sm:$0xff]  ;;  %v13708_v17 = vld [vmem:[#allocation107_spill] sm:$0xff] }
 0x8cb   :  { %3185 = vmatpush.msra.mxu1 %v13681_v15  ;;  %3271 = vmatpush.msrb.mxu3 %v13682_v25  ;;  %v13709_v15 = vld [vmem:[#allocation108_spill] sm:$0xff]  ;;  %v13710_v25 = vld [vmem:[#allocation109_spill] sm:$0xff] }
 0x8cd   :  { %3186 = vmatpush.msra.mxu1 %v13683_v5  ;;  %3272 = vmatpush.msrb.mxu3 %v13684_v58  ;;  %v13711_v5 = vld [vmem:[#allocation110_spill] sm:$0xff]  ;;  %v13712_v58 = vld [vmem:[#allocation111_spill] sm:$0xff] }
 0x8cf   :  { %3187 = vmatpush.msra.mxu1 %v13685_v11  ;;  %3273 = vmatpush.msrb.mxu3 %v13686_v34  ;;  %v13713_v11 = vld [vmem:[#allocation112_spill] sm:$0xff]  ;;  %v13714_v34 = vld [vmem:[#allocation113_spill] sm:$0xff] }
 0x8d1   :  { %3188 = vmatpush.msra.mxu1 %v13687_v55  ;;  %3274 = vmatpush.msrb.mxu3 %v13688_v16  ;;  %v13715_v55 = vld [vmem:[#allocation114_spill] sm:$0xff]  ;;  %v13716_v16 = vld [vmem:[#allocation115_spill] sm:$0xff] }
 0x8d3   :  { %3189 = vmatpush.msra.mxu1 %v13689_v42  ;;  %3275 = vmatpush.msrb.mxu3 %v13690_v24  ;;  %v13717_v42 = vld [vmem:[#allocation116_spill] sm:$0xff]  ;;  %v13718_v24 = vld [vmem:[#allocation117_spill] sm:$0xff] }
 0x8d5   :  { %3190 = vmatpush.msra.mxu1 %v13691_v21  ;;  %3276 = vmatpush.msrb.mxu3 %v13692_v27  ;;  %v13719_v21 = vld [vmem:[#allocation118_spill] sm:$0xff]  ;;  %v13720_v27 = vld [vmem:[#allocation119_spill] sm:$0xff] }
 0x8d7   :  { %3191 = vmatpush.msra.mxu1 %v13693_v45  ;;  %3277 = vmatpush.msrb.mxu3 %v13694_v56  ;;  %v13721_v45 = vld [vmem:[#allocation120_spill] sm:$0xff]  ;;  %v13722_v56 = vld [vmem:[#allocation121_spill] sm:$0xff] }
 0x8d9   :  { %3192 = vmatpush.msra.mxu1 %v13695_v37  ;;  %3278 = vmatpush.msrb.mxu3 %v13696_v59  ;;  %v13723_v37 = vld [vmem:[#allocation122_spill] sm:$0xff]  ;;  %v13724_v59 = vld [vmem:[#allocation123_spill] sm:$0xff] }
 0x8db   :  { %3193 = vmatpush.msra.mxu1 %v13697_v33  ;;  %3279 = vmatpush.msrb.mxu3 %v13698_v28  ;;  %v13725_v33 = vld [vmem:[#allocation124_spill] sm:$0xff]  ;;  %v13726_v28 = vld [vmem:[#allocation125_spill] sm:$0xff] }
 0x8dd   :  { %3194 = vmatpush.msra.mxu1 %v13699_v1  ;;  %3280 = vmatpush.msrb.mxu3 %v13700_v19  ;;  %v13727_v1 = vld [vmem:[#allocation126_spill] sm:$0xff]  ;;  %v13728_v19 = vld [vmem:[#allocation127_spill] sm:$0xff] }
 0x8df   :  { %3195 = vmatpush.msra.mxu1 %v13701_v13  ;;  %3281 = vmatpush.msrb.mxu3 %v13702_v61  ;;  %v13729_v13 = vld [vmem:[#allocation23_spill] sm:$0xff]  ;;  %v13730_v61 = vld [vmem:[#allocation24_spill] sm:$0xff] }
 0x8e1   :  { %3196 = vmatpush.msra.mxu1 %v13703_v8  ;;  %3282 = vmatpush.msrb.mxu3 %v13704_v53  ;;  %v13731_v8 = vld [vmem:[#allocation39_spill] sm:$0xff]  ;;  %v13732_v53 = vld [vmem:[#allocation18_spill] sm:$0xff] }
 0x8e3   :  { %3307 = vmatpush.msrb.mxu1 %v13705_v39  ;;  %3347 = vmatpush.msra.mxu3 %v13706_v2  ;;  %v13733_v39 = vld [vmem:[#allocation17_spill] sm:$0xff] }
 0x8e4   :  { %v13734_v2 = vld [vmem:[#allocation73_spill] sm:$0xff] }
 0x8e5   :  { %3308 = vmatpush.msrb.mxu1 %v13707_v3  ;;  %3348 = vmatpush.msra.mxu3 %v13708_v17  ;;  %v13735_v3 = vld [vmem:[#allocation77_spill] sm:$0xff]  ;;  %v13736_v17 = vld [vmem:[#allocation32_spill] sm:$0xff] }
 0x8e7   :  { %3309 = vmatpush.msrb.mxu1 %v13709_v15  ;;  %3349 = vmatpush.msra.mxu3 %v13710_v25  ;;  %v2888_v15 = vpop.f32.mrf.mxu0  ;;  %v13737_v25 = vld [vmem:[#allocation61_spill] sm:$0xff] }
 0x8e9   :  { %3310 = vmatpush.msrb.mxu1 %v13711_v5  ;;  %3350 = vmatpush.msra.mxu3 %v13712_v58  ;;  %v2889_v5 = vadd.f32 %v2888_v15, %v13737_v25 }
 0x8eb   :  { %3311 = vmatpush.msrb.mxu1 %v13713_v11  ;;  %3351 = vmatpush.msra.mxu3 %v13714_v34  ;;  %v13738_v11 = vld [vmem:[#allocation65_spill] sm:$0xff]  ;;  %v13739_v34 = vld [vmem:[#allocation50_spill] sm:$0xff] }
 0x8ed   :  { %3312 = vmatpush.msrb.mxu1 %v13715_v55  ;;  %3352 = vmatpush.msra.mxu3 %v13716_v16  ;;  %v123_v55 = vadd.f32 %v13739_v34, %v13738_v11 }
 0x8ef   :  { %3313 = vmatpush.msrb.mxu1 %v13717_v42  ;;  %3353 = vmatpush.msra.mxu3 %v13718_v24  ;;  %v2928_v42 = vpop.f32.mrf.mxu2 }
 0x8f1   :  { %3314 = vmatpush.msrb.mxu1 %v13719_v21  ;;  %3354 = vmatpush.msra.mxu3 %v13720_v27  ;;  %v13740_v21 = vld [vmem:[#allocation67_spill] sm:$0xff] }
 0x8f2   :  { %v2929_v27 = vadd.f32 %v2928_v42, %v13740_v21 }
 0x8f3   :  { %3315 = vmatpush.msrb.mxu1 %v13721_v45  ;;  %3355 = vmatpush.msra.mxu3 %v13722_v56 }
 0x8f5   :  { %3316 = vmatpush.msrb.mxu1 %v13723_v37  ;;  %3356 = vmatpush.msra.mxu3 %v13724_v59  ;;  %v13741_v37 = vld [vmem:[#allocation68_spill] sm:$0xff]  ;;  %v13742_v59 = vld [vmem:[#allocation53_spill] sm:$0xff] }
 0x8f7   :  { %3317 = vmatpush.msrb.mxu1 %v13725_v33  ;;  %3357 = vmatpush.msra.mxu3 %v13726_v28  ;;  %v164_v33 = vadd.f32 %v13742_v59, %v13741_v37 }
 0x8f9   :  { %3318 = vmatpush.msrb.mxu1 %v13727_v1  ;;  %3358 = vmatpush.msra.mxu3 %v13728_v19 }
 0x8fb   :  { %3319 = vmatpush.msrb.mxu1 %v13729_v13  ;;  %3359 = vmatpush.msra.mxu3 %v13730_v61 }
 0x8fd   :  { %3320 = vmatpush.msrb.mxu1 %v13731_v8  ;;  %3360 = vmatpush.msra.mxu3 %v13732_v53 }
 0x8ff   :  { %3321 = vmatpush.msrb.mxu1 %v13733_v39  ;;  %3361 = vmatpush.msra.mxu3 %v13734_v2 }
 0x901   :  { %3322 = vmatpush.msrb.mxu1 %v13735_v3  ;;  %3362 = vmatpush.msra.mxu3 %v13736_v17  ;;  %v2968_v17 = vpop.f32.mrf.mxu0 }
 0x91f   :  { %v2908_v58 = vpop.f32.mrf.mxu1 }
 0x920   :  { %v2909_v16 = vadd.f32 %v2908_v58, %v2889_v5 }
 0x922   :  { %v3115_v24 = vadd.f32 %v2909_v16, %v123_v55  ;;  %v2969_v16 = vadd.f32 %v2968_v17, %v12814_v41 }
 0x924   :  { %v3757_v45 = vmul.f32 -1.442695, %v3115_v24 }
 0x925   :  { %v2948_v56 = vpop.f32.mrf.mxu3 }
 0x926   :  { %3887 = vpow2.f32 %v3757_v45  ;;  %v2949_v28 = vadd.f32 %v2948_v56, %v2929_v27 }
 0x927   :  { %v2988_v55 = vpop.f32.mrf.mxu1 }
 0x928   :  { %v3116_v1 = vadd.f32 %v2949_v28, %v164_v33  ;;  %v2989_v56 = vadd.f32 %v2988_v55, %v2969_v16  ;;  %v13743_v28 = vld [vmem:[#allocation69_spill] sm:$0xff] }
 0x92a   :  { %v3758_v19 = vmul.f32 -1.442695, %v3116_v1  ;;  %v205_v1 = vadd.f32 %v13743_v28, %v12815_v30  ;;  %v13759_v28 = vld [vmem:[#allocation16_spill] sm:$0xff] }
 0x92c   :  { %v3888_v13 = vpop.eup %3887  ;;  %3889 = vpow2.f32 %v3758_v19 }
 0x92d   :  { %v3120_v61 = vadd.f32 1.0, %v3888_v13 }
 0x92f   :  { %3891 = vrcp.f32 %v3120_v61  ;;  %v3132_v15 = vand.u32 2147483648, %v3120_v61  ;;  %v3130_v58 = vand.u32 2147483647, %v3120_v61  ;;  %vm3126_vm2 = vweird.f32 %v3120_v61 }
 0x931   :  { %v3133_v27 = vor.u32 1.1754944e-38, %v3132_v15  ;;  %vm3131_vm4 = vcmp.eq.f32.partialorder %v3130_v58, 8.507059e+37 }
 0x932   :  { %v3890_v8 = vpop.eup %3889 }
 0x933   :  { %v3139_v53 = vadd.f32 1.0, %v3890_v8 }
 0x935   :  { %v3892_v39 = vpop.eup %3891  ;;  %3893 = vrcp.f32 %v3139_v53  ;;  %vm3145_vm6 = vweird.f32 %v3139_v53  ;;  %v3149_v17 = vand.u32 2147483647, %v3139_v53 }
 0x936   :  { %v3122_v2 = vmul.f32 %v3892_v39, %v3120_v61  ;;  %vm3127_vm1 = vweird.f32 %v3892_v39 }
 0x937   :  { %vm3128_vm3 = vmor %vm3126_vm2, %vm3127_vm1  ;;  %vm3150_vm8 = vcmp.eq.f32.partialorder %v3149_v17, 8.507059e+37  ;;  %v13766_v17 = vld [vmem:[#allocation134_spill] sm:$0xff] }
 0x938   :  { %v3123_v3 = vsub.f32 1.0, %v3122_v2 }
 0x93a   :  { %v3124_v5 = vmul.f32 %v3892_v39, %v3123_v3  ;;  %v3151_v3 = vand.u32 2147483648, %v3139_v53 }
 0x93b   :  { %v3894_v34 = vpop.eup %3893 }
 0x93c   :  { %v3141_v42 = vmul.f32 %v3894_v34, %v3139_v53  ;;  %v3125_v24 = vadd.f32 %v3892_v39, %v3124_v5  ;;  %vm3146_vm5 = vweird.f32 %v3894_v34  ;;  %v3152_v5 = vor.u32 1.1754944e-38, %v3151_v3  ;;  %v4680_v53 = vld [vmem:[%s11951_s5 + $0x5e8] sm:$0xff] }
 0x93d   :  { %vm3147_vm7 = vmor %vm3145_vm6, %vm3146_vm5  ;;  %v13765_v3 = vld [vmem:[#allocation20_spill] sm:$0xff] }
 0x93e   :  { %v3142_v45 = vsub.f32 1.0, %v3141_v42  ;;  %v3129_v59 = vsel %vm3128_vm3, %v3892_v39, %v3125_v24  ;;  %v4703_v42 = vld [vmem:[%s11951_s5 + $0x310] sm:$0xff]  ;;  %v4704_v24 = vld [vmem:[%s11951_s5 + $0x318] sm:$0xff] }
 0x93f   :  { %v3134_v33 = vsel %vm3131_vm4, %v3133_v27, %v3129_v59  ;;  %v13754_v27 = vld [vmem:[#allocation128_spill] sm:$0xff]  ;;  %v13757_v59 = vld [vmem:[#allocation131_spill] sm:$0xff] }
 0x940   :  { %v3155_v19 = vmul.f32 %v3134_v33, %v2989_v56  ;;  %v3143_v13 = vmul.f32 %v3894_v34, %v3142_v45  ;;  %v13755_v45 = vld [vmem:[#allocation129_spill] sm:$0xff]  ;;  %v13756_v56 = vld [vmem:[#allocation130_spill] sm:$0xff]  ;;  %v13758_v33 = vld [vmem:[#allocation4_spill] sm:$0xff] }
 0x942   :  { %v3156_v8 = vadd.f32 %v3155_v19, %v205_v1  ;;  %v3144_v2 = vadd.f32 %v3894_v34, %v3143_v13  ;;  %v13760_v1 = vld [vmem:[#allocation5_spill] sm:$0xff]  ;;  %v13761_v19 = vld [vmem:[#allocation132_spill] sm:$0xff] }
 0x943   :  { %v13762_v13 = vld [vmem:[#allocation133_spill] sm:$0xff] }
 0x944   :  { %3895 = vtanh.f32 %v3156_v8  ;;  %v3148_v61 = vsel %vm3147_vm7, %v3894_v34, %v3144_v2  ;;  %v13753_v34 = vld [vmem:[#allocation15_spill] sm:$0xff]  ;;  %v13764_v2 = vld [vmem:[#allocation6_spill] sm:$0xff] }
 0x945   :  { %v3153_v58 = vsel %vm3150_vm8, %v3152_v5, %v3148_v61  ;;  %v13763_v8 = vld [vmem:[#allocation19_spill] sm:$0xff]  ;;  %v13769_v5 = vld [vmem:[#allocation137_spill] sm:$0xff] }
 0x946   :  { %v13767_v61 = vld [vmem:[#allocation135_spill] sm:$0xff] }
 0x94a   :  { %v3896_v15 = vpop.eup %3895 }
 0x94b   :  { %v3158_v39 = vsub.f32 %v10775_v43, %v3896_v15  ;;  %v4679_v43 = vld [vmem:[%s11951_s5 + $0x5e0] sm:$0xff] }
 0x94d   :  { %v3159_v55 = vmul.f32 %v3158_v39, %v3153_v58  ;;  %v13770_v39 = vld [vmem:[#allocation138_spill] sm:$0xff]  ;;  %v13771_v58 = vld [vmem:[#allocation139_spill] sm:$0xff] }
 0x94f   :  { %v11545_v16 = vadd.f32 %v3896_v15, %v3159_v55  ;;  %v13768_v15 = vld [vmem:[#allocation136_spill] sm:$0xff] }
 0x950   :  { %v13772_v55 = vld [vmem:[#allocation140_spill] sm:$0xff] }
 0x951   :  { %3177 = vmatmul.f32.vlgmr.msra.gmra.mxu0 %v11545_v16  ;;  %3197 = vmatmul.f32.vlgmr.msra.gmra.mxu1 %v11545_v16 }
 0x952   :  { %3217 = vmatmul.f32.vlgmr.msra.gmra.mxu2 %v11545_v16  ;;  %3283 = vmatmul.f32.vlgmr.msrb.gmra.mxu3 %v11545_v16 }
 0x953   :  { %3387 = vmatpush.msra.mxu1 %v10784_v40  ;;  %3427 = vmatpush.msrb.mxu3 %v10790_v22  ;;  %v4681_v40 = vld [vmem:[%s11951_s5 + $0x5b0] sm:$0xff]  ;;  %v4682_v22 = vld [vmem:[%s11951_s5 + $0x5b8] sm:$0xff] }
 0x954   :  { %3367 = vmatpush.msra.mxu0 %v4679_v43  ;;  %3407 = vmatpush.msra.mxu2 %v4680_v53  ;;  %v13773_v43 = vld [vmem:[#allocation141_spill] sm:$0xff]  ;;  %v13774_v53 = vld [vmem:[#allocation142_spill] sm:$0xff] }
 0x955   :  { %3388 = vmatpush.msra.mxu1 %v10798_v54  ;;  %3428 = vmatpush.msrb.mxu3 %v10804_v52  ;;  %v4683_v54 = vld [vmem:[%s11951_s5 + $0x580] sm:$0xff]  ;;  %v4684_v52 = vld [vmem:[%s11951_s5 + $0x588] sm:$0xff] }
 0x956   :  { %3368 = vmatpush.msra.mxu0 %v4681_v40  ;;  %3408 = vmatpush.msra.mxu2 %v4682_v22  ;;  %v13775_v40 = vld [vmem:[#allocation143_spill] sm:$0xff]  ;;  %v13776_v22 = vld [vmem:[#allocation144_spill] sm:$0xff] }
 0x957   :  { %3389 = vmatpush.msra.mxu1 %v10812_v62  ;;  %3429 = vmatpush.msrb.mxu3 %v10818_v32  ;;  %v4685_v62 = vld [vmem:[%s11951_s5 + $0x550] sm:$0xff]  ;;  %v4686_v32 = vld [vmem:[%s11951_s5 + $0x558] sm:$0xff] }
 0x958   :  { %3369 = vmatpush.msra.mxu0 %v4683_v54  ;;  %3409 = vmatpush.msra.mxu2 %v4684_v52  ;;  %v13777_v54 = vld [vmem:[#allocation145_spill] sm:$0xff]  ;;  %v13778_v52 = vld [vmem:[#allocation146_spill] sm:$0xff] }
 0x959   :  { %3390 = vmatpush.msra.mxu1 %v10826_v60  ;;  %3430 = vmatpush.msrb.mxu3 %v10832_v20  ;;  %v4687_v60 = vld [vmem:[%s11951_s5 + $0x520] sm:$0xff]  ;;  %v4688_v20 = vld [vmem:[%s11951_s5 + $0x528] sm:$0xff] }
 0x95a   :  { %3323 = vmatmul.f32.vlgmr.msrb.gmra.mxu1 %v11545_v16  ;;  %3363 = vmatmul.f32.vlgmr.msra.gmra.mxu3 %v11545_v16 }
 0x95b   :  { %3391 = vmatpush.msra.mxu1 %v10840_v31  ;;  %3431 = vmatpush.msrb.mxu3 %v10846_v0  ;;  %v4689_v31 = vld [vmem:[%s11951_s5 + $0x4f0] sm:$0xff]  ;;  %v4690_v0 = vld [vmem:[%s11951_s5 + $0x4f8] sm:$0xff] }
 0x95c   :  { %3370 = vmatpush.msra.mxu0 %v4685_v62  ;;  %3410 = vmatpush.msra.mxu2 %v4686_v32  ;;  %v13779_v62 = vld [vmem:[#allocation147_spill] sm:$0xff]  ;;  %v13780_v32 = vld [vmem:[#allocation148_spill] sm:$0xff] }
 0x95d   :  { %3392 = vmatpush.msra.mxu1 %v10854_v4  ;;  %3432 = vmatpush.msrb.mxu3 %v10860_v36  ;;  %v4691_v4 = vld [vmem:[%s11951_s5 + $0x4c0] sm:$0xff]  ;;  %v4692_v36 = vld [vmem:[%s11951_s5 + $0x490] sm:$0xff] }
 0x95e   :  { %3371 = vmatpush.msra.mxu0 %v4687_v60  ;;  %3411 = vmatpush.msra.mxu2 %v4688_v20  ;;  %v13781_v60 = vld [vmem:[#allocation149_spill] sm:$0xff]  ;;  %v13782_v20 = vld [vmem:[#allocation150_spill] sm:$0xff] }
 0x95f   :  { %3393 = vmatpush.msra.mxu1 %v10868_v14  ;;  %3433 = vmatpush.msrb.mxu3 %v10874_v12  ;;  %v4693_v14 = vld [vmem:[%s11951_s5 + $0x460] sm:$0xff]  ;;  %v4694_v12 = vld [vmem:[%s11951_s5 + $0x430] sm:$0xff] }
 0x960   :  { %3372 = vmatpush.msra.mxu0 %v4689_v31  ;;  %3412 = vmatpush.msra.mxu2 %v4690_v0  ;;  %v13783_v31 = vld [vmem:[#allocation151_spill] sm:$0xff]  ;;  %v13784_v0 = vld [vmem:[#allocation152_spill] sm:$0xff] }
 0x961   :  { %3394 = vmatpush.msra.mxu1 %v10882_v44  ;;  %3434 = vmatpush.msrb.mxu3 %v10888_v63  ;;  %v4695_v44 = vld [vmem:[%s11951_s5 + $0x400] sm:$0xff]  ;;  %v4696_v63 = vld [vmem:[%s11951_s5 + $0x3d0] sm:$0xff] }
 0x962   :  { %3373 = vmatpush.msra.mxu0 %v4691_v4  ;;  %3413 = vmatpush.msra.mxu2 %v10895_v51  ;;  %v13744_v51 = vld [vmem:[#allocation10_spill] sm:$0xff]  ;;  %v13785_v4 = vld [vmem:[#allocation153_spill] sm:$0xff] }
 0x963   :  { %3395 = vmatpush.msra.mxu1 %v10901_v49  ;;  %3435 = vmatpush.msrb.mxu3 %v10907_v38  ;;  %v13745_v49 = vld [vmem:[#allocation11_spill] sm:$0xff]  ;;  %v13746_v38 = vld [vmem:[#allocation12_spill] sm:$0xff] }
 0x964   :  { %3374 = vmatpush.msra.mxu0 %v4692_v36  ;;  %3414 = vmatpush.msra.mxu2 %v10914_v35  ;;  %v4697_v35 = vld [vmem:[%s11951_s5 + $0x3a0] sm:$0xff]  ;;  %v13786_v36 = vld [vmem:[#allocation154_spill] sm:$0xff] }
 0x965   :  { %3396 = vmatpush.msra.mxu1 %v10920_v6  ;;  %3436 = vmatpush.msrb.mxu3 %v10926_v7  ;;  %v4698_v6 = vld [vmem:[%s11951_s5 + $0x3a8] sm:$0xff] }
 0x966   :  { %3375 = vmatpush.msra.mxu0 %v4693_v14  ;;  %3415 = vmatpush.msra.mxu2 %v10933_v57  ;;  %v13747_v7 = vld [vmem:[#allocation13_spill] sm:$0xff]  ;;  %v13748_v57 = vld [vmem:[#allocation38_spill] sm:$0xff]  ;;  %v13787_v14 = vld [vmem:[#allocation155_spill] sm:$0xff] }
 0x967   :  { %3397 = vmatpush.msra.mxu1 %v10939_v9  ;;  %3437 = vmatpush.msrb.mxu3 %v10945_v47  ;;  %v4699_v9 = vld [vmem:[%s11951_s5 + $0x370] sm:$0xff]  ;;  %v4700_v47 = vld [vmem:[%s11951_s5 + $0x378] sm:$0xff] }
 0x968   :  { %3376 = vmatpush.msra.mxu0 %v4694_v12  ;;  %3416 = vmatpush.msra.mxu2 %v10952_v50  ;;  %v13749_v50 = vld [vmem:[#allocation36_spill] sm:$0xff] }
 0x969   :  { %3398 = vmatpush.msra.mxu1 %v10958_v48  ;;  %3438 = vmatpush.msrb.mxu3 %v10964_v10  ;;  %v13750_v48 = vld [vmem:[#allocation54_spill] sm:$0xff]  ;;  %v13788_v12 = vld [vmem:[#allocation156_spill] sm:$0xff] }
 0x96a   :  { %3377 = vmatpush.msra.mxu0 %v4695_v44  ;;  %3417 = vmatpush.msra.mxu2 %v10971_v46  ;;  %v13751_v10 = vld [vmem:[#allocation14_spill] sm:$0xff]  ;;  %v4701_v46 = vld [vmem:[%s11951_s5 + $0x340] sm:$0xff]  ;;  %v13789_v44 = vld [vmem:[#allocation157_spill] sm:$0xff] }
 0x96b   :  { %3399 = vmatpush.msra.mxu1 %v10977_v18  ;;  %3439 = vmatpush.msrb.mxu3 %v10983_v23  ;;  %v4702_v18 = vld [vmem:[%s11951_s5 + $0x348] sm:$0xff] }
 0x96c   :  { %3378 = vmatpush.msra.mxu0 %v4696_v63  ;;  %3418 = vmatpush.msra.mxu2 %v13744_v51  ;;  %v13752_v23 = vld [vmem:[#allocation85_spill] sm:$0xff]  ;;  %v13790_v63 = vld [vmem:[#allocation158_spill] sm:$0xff]  ;;  %v13791_v51 = vld [vmem:[#allocation159_spill] sm:$0xff] }
 0x96d   :  { %3400 = vmatpush.msra.mxu1 %v13745_v49  ;;  %3440 = vmatpush.msrb.mxu3 %v13746_v38  ;;  %v13792_v49 = vld [vmem:[#allocation160_spill] sm:$0xff]  ;;  %v13793_v38 = vld [vmem:[#allocation161_spill] sm:$0xff] }
 0x96e   :  { %3379 = vmatpush.msra.mxu0 %v4697_v35  ;;  %3419 = vmatpush.msra.mxu2 %v4698_v6  ;;  %v13794_v35 = vld [vmem:[#allocation162_spill] sm:$0xff]  ;;  %v13795_v6 = vld [vmem:[#allocation163_spill] sm:$0xff] }
 0x96f   :  { %3401 = vmatpush.msra.mxu1 %v13747_v7  ;;  %3441 = vmatpush.msrb.mxu3 %v13748_v57  ;;  %v13796_v7 = vld [vmem:[#allocation164_spill] sm:$0xff]  ;;  %v13797_v57 = vld [vmem:[#allocation165_spill] sm:$0xff] }
 0x970   :  { %3380 = vmatpush.msra.mxu0 %v4699_v9  ;;  %3420 = vmatpush.msra.mxu2 %v4700_v47  ;;  %v13798_v9 = vld [vmem:[#allocation166_spill] sm:$0xff]  ;;  %v3048_v47 = vpop.f32.mrf.mxu0 }
 0x971   :  { %3402 = vmatpush.msra.mxu1 %v13749_v50  ;;  %3442 = vmatpush.msrb.mxu3 %v13750_v48  ;;  %v3068_v50 = vpop.f32.mrf.mxu1  ;;  %v3008_v48 = vpop.f32.mrf.mxu2 }
 0x972   :  { %3403 = vmatmul.f32.vlgmr.msra.gmra.mxu1 %v11545_v16  ;;  %3443 = vmatmul.f32.vlgmr.msrb.gmra.mxu3 %v11545_v16 }
 0x973   :  { %3467 = vmatpush.msrb.mxu1 %v13751_v10  ;;  %3381 = vmatpush.msra.mxu0 %v4701_v46  ;;  %v3028_v10 = vpop.f32.mrf.mxu3  ;;  %v13799_v46 = vld [vmem:[#allocation21_spill] sm:$0xff] }
 0x974   :  { %3421 = vmatpush.msra.mxu2 %v4702_v18  ;;  %3557 = vmatpush.msra.mxu3 %v13752_v23  ;;  %v3049_v18 = vadd.f32 %v3048_v47, %v13799_v46  ;;  %v13800_v23 = vld [vmem:[#allocation7_spill] sm:$0xff] }
 0x975   :  { %3468 = vmatpush.msrb.mxu1 %v13753_v34  ;;  %3382 = vmatpush.msra.mxu0 %v4703_v42  ;;  %v3009_v34 = vadd.f32 %v3008_v48, %v13800_v23  ;;  %v4705_v48 = vld [vmem:[%s11951_s5 + $0x5f0] sm:$0xff] }
 0x976   :  { %3422 = vmatpush.msra.mxu2 %v4704_v24  ;;  %3558 = vmatpush.msra.mxu3 %v13754_v27 }
 0x977   :  { %3469 = vmatpush.msrb.mxu1 %v13755_v45  ;;  %v3029_v27 = vadd.f32 %v3028_v10, %v3009_v34  ;;  %v3069_v45 = vadd.f32 %v3068_v50, %v3049_v18  ;;  %v4706_v10 = vld [vmem:[%s11951_s5 + $0x5f8] sm:$0xff]  ;;  %v4708_v18 = vld [vmem:[%s11951_s5 + $0x5c8] sm:$0xff]  ;;  %v4709_v34 = vld [vmem:[%s11951_s5 + $0x590] sm:$0xff] }
 0x978   :  { %3559 = vmatpush.msra.mxu3 %v13756_v56  ;;  %v13801_v56 = vld [vmem:[#allocation8_spill] sm:$0xff] }
 0x979   :  { %3470 = vmatpush.msrb.mxu1 %v13757_v59 }
 0x97a   :  { %3560 = vmatpush.msra.mxu3 %v13758_v33  ;;  %v13802_v33 = vld [vmem:[#allocation22_spill] sm:$0xff] }
 0x97b   :  { %3471 = vmatpush.msrb.mxu1 %v13759_v28 }
 0x97c   :  { %3561 = vmatpush.msra.mxu3 %v13760_v1 }
 0x97d   :  { %3472 = vmatpush.msrb.mxu1 %v13761_v19 }
 0x97e   :  { %3562 = vmatpush.msra.mxu3 %v13762_v13 }
 0x97f   :  { %3473 = vmatpush.msrb.mxu1 %v13763_v8 }
 0x980   :  { %3563 = vmatpush.msra.mxu3 %v13764_v2 }
 0x981   :  { %3474 = vmatpush.msrb.mxu1 %v13765_v3 }
 0x982   :  { %3564 = vmatpush.msra.mxu3 %v13766_v17 }
 0x983   :  { %3475 = vmatpush.msrb.mxu1 %v13767_v61 }
 0x984   :  { %3565 = vmatpush.msra.mxu3 %v13768_v15 }
 0x985   :  { %3476 = vmatpush.msrb.mxu1 %v13769_v5  ;;  %v3088_v5 = vpop.f32.mrf.mxu2 }
 0x986   :  { %3566 = vmatpush.msra.mxu3 %v13770_v39 }
 0x987   :  { %3477 = vmatpush.msrb.mxu1 %v13771_v58 }
 0x988   :  { %3567 = vmatpush.msra.mxu3 %v13772_v55 }
 0x989   :  { %3478 = vmatpush.msrb.mxu1 %v13773_v43 }
 0x98a   :  { %3568 = vmatpush.msra.mxu3 %v13774_v53 }
 0x98b   :  { %3479 = vmatpush.msrb.mxu1 %v13775_v40 }
 0x98c   :  { %3569 = vmatpush.msra.mxu3 %v13776_v22 }
 0x98d   :  { %3480 = vmatpush.msrb.mxu1 %v13777_v54  ;;  %v3108_v54 = vpop.f32.mrf.mxu3 }
 0x98e   :  { %3570 = vmatpush.msra.mxu3 %v13778_v52  ;;  %v13803_v52 = vld [vmem:[#allocation9_spill] sm:$0xff] }
 0x98f   :  { %3481 = vmatpush.msrb.mxu1 %v13779_v62  ;;  %v3089_v62 = vadd.f32 %v3088_v5, %v13803_v52  ;;  %v4725_v5 = vld [vmem:[%s11951_s5 + $0x410] sm:$0xff] }
 0x990   :  { %3571 = vmatpush.msra.mxu3 %v13780_v32 }
 0x991   :  { %3482 = vmatpush.msrb.mxu1 %v13781_v60 }
 0x992   :  { %3483 = vmatmul.f32.vlgmr.msrb.gmra.mxu1 %v11545_v16  ;;  %3572 = vmatpush.msra.mxu3 %v13782_v20 }
 0x993   :  { %3597 = vmatpush.msra.mxu1 %v13783_v31 }
 0x995   :  { %3598 = vmatpush.msra.mxu1 %v13784_v0  ;;  %v3109_v0 = vadd.f32 %v3108_v54, %v3089_v62  ;;  %v4733_v54 = vld [vmem:[%s11951_s5 + $0x350] sm:$0xff]  ;;  %v4734_v62 = vld [vmem:[%s11951_s5 + $0x358] sm:$0xff] }
 0x997   :  { %3599 = vmatpush.msra.mxu1 %v13785_v4 }
 0x999   :  { %3600 = vmatpush.msra.mxu1 %v13786_v36 }
 0x99b   :  { %3601 = vmatpush.msra.mxu1 %v13787_v14 }
 0x99d   :  { %3602 = vmatpush.msra.mxu1 %v13788_v12 }
 0x99f   :  { %3603 = vmatpush.msra.mxu1 %v13789_v44 }
 0x9a1   :  { %3604 = vmatpush.msra.mxu1 %v13790_v63 }
 0x9a3   :  { %3605 = vmatpush.msra.mxu1 %v13791_v51 }
 0x9a5   :  { %3606 = vmatpush.msra.mxu1 %v13792_v49 }
 0x9a7   :  { %3607 = vmatpush.msra.mxu1 %v13793_v38 }
 0x9a9   :  { %3608 = vmatpush.msra.mxu1 %v13794_v35 }
 0x9ab   :  { %3609 = vmatpush.msra.mxu1 %v13795_v6 }
 0x9ad   :  { %3610 = vmatpush.msra.mxu1 %v13796_v7 }
 0x9af   :  { %3611 = vmatpush.msra.mxu1 %v13797_v57 }
 0x9b1   :  { %3612 = vmatpush.msra.mxu1 %v13798_v9 }
 0x9ce   :  { %v3178_v42 = vpop.f32.mrf.mxu0  ;;  %v3198_v24 = vpop.f32.mrf.mxu1 }
 0x9cf   :  { %v3179_v59 = vadd.f32 %v3178_v42, %v13801_v56  ;;  %v3199_v28 = vadd.f32 %v3198_v24, %v13802_v33  ;;  %v4710_v42 = vld [vmem:[%s11951_s5 + $0x598] sm:$0xff]  ;;  %v4711_v24 = vld [vmem:[%s11951_s5 + $0x560] sm:$0xff] }
 0x9d1   :  { %v3221_v1 = vadd.f32 %v3179_v59, %v3029_v27  ;;  %v3222_v19 = vadd.f32 %v3199_v28, %v3069_v45  ;;  %v4712_v27 = vld [vmem:[%s11951_s5 + $0x568] sm:$0xff]  ;;  %v4713_v45 = vld [vmem:[%s11951_s5 + $0x530] sm:$0xff]  ;;  %v4714_v59 = vld [vmem:[%s11951_s5 + $0x538] sm:$0xff] }
 0x9d2   :  { %v4715_v28 = vld [vmem:[%s11951_s5 + $0x500] sm:$0xff] }
 0x9d3   :  { %v3759_v13 = vmul.f32 -1.442695, %v3221_v1  ;;  %v3760_v8 = vmul.f32 -1.442695, %v3222_v19  ;;  %v4716_v1 = vld [vmem:[%s11951_s5 + $0x508] sm:$0xff]  ;;  %v4717_v19 = vld [vmem:[%s11951_s5 + $0x4d0] sm:$0xff] }
 0x9d5   :  { %3897 = vpow2.f32 %v3759_v13  ;;  %v3218_v20 = vpop.f32.mrf.mxu2  ;;  %v4718_v13 = vld [vmem:[%s11951_s5 + $0x4d8] sm:$0xff] }
 0x9d6   :  { %3899 = vpow2.f32 %v3760_v8  ;;  %v3219_v14 = vadd.f32 %v3218_v20, %v6674_v26  ;;  %v4719_v8 = vld [vmem:[%s11951_s5 + $0x4a0] sm:$0xff]  ;;  %v4737_v20 = vld [vmem:[%s11953_s3 + $0x170] sm:$0xff] }
 0x9db   :  { %v3898_v2 = vpop.eup %3897 }
 0x9dc   :  { %v3900_v3 = vpop.eup %3899  ;;  %v3226_v17 = vadd.f32 1.0, %v3898_v2  ;;  %v4720_v2 = vld [vmem:[%s11951_s5 + $0x4a8] sm:$0xff] }
 0x9dd   :  { %v3245_v61 = vadd.f32 1.0, %v3900_v3  ;;  %v4721_v3 = vld [vmem:[%s11951_s5 + $0x470] sm:$0xff] }
 0x9de   :  { %3901 = vrcp.f32 %v3226_v17  ;;  %v3238_v53 = vand.u32 2147483648, %v3226_v17  ;;  %v3236_v22 = vand.u32 2147483647, %v3226_v17  ;;  %vm3232_vm10 = vweird.f32 %v3226_v17 }
 0x9df   :  { %3903 = vrcp.f32 %v3245_v61  ;;  %v3257_v49 = vand.u32 2147483648, %v3245_v61  ;;  %vm3251_vm14 = vweird.f32 %v3245_v61  ;;  %v3255_v38 = vand.u32 2147483647, %v3245_v61 }
 0x9e0   :  { %v3239_v31 = vor.u32 1.1754944e-38, %v3238_v53  ;;  %vm3237_vm12 = vcmp.eq.f32.partialorder %v3236_v22, 8.507059e+37  ;;  %v4730_v53 = vld [vmem:[%s11951_s5 + $0x3b8] sm:$0xff]  ;;  %v4732_v22 = vld [vmem:[%s11951_s5 + $0x388] sm:$0xff] }
 0x9e1   :  { %v3258_v7 = vor.u32 1.1754944e-38, %v3257_v49  ;;  %vm3256_vm0 = vcmp.eq.f32.partialorder %v3255_v38, 8.507059e+37  ;;  %v4747_v49 = vld [vmem:[%s11953_s3 + $0x80] sm:$0xff]  ;;  %v4748_v38 = vld [vmem:[%s11953_s3 + $0x68] sm:$0xff] }
 0x9e4   :  { %v3902_v15 = vpop.eup %3901 }
 0x9e5   :  { %v3904_v39 = vpop.eup %3903  ;;  %v3228_v58 = vmul.f32 %v3902_v15, %v3226_v17  ;;  %vm3233_vm9 = vweird.f32 %v3902_v15  ;;  %v4722_v17 = vld [vmem:[%s11951_s5 + $0x478] sm:$0xff] }
 0x9e6   :  { %v3247_v43 = vmul.f32 %v3904_v39, %v3245_v61  ;;  %vm3234_vm11 = vmor %vm3232_vm10, %vm3233_vm9  ;;  %vm3252_vm13 = vweird.f32 %v3904_v39  ;;  %v4723_v61 = vld [vmem:[%s11951_s5 + $0x440] sm:$0xff] }
 0x9e7   :  { %v3229_v55 = vsub.f32 1.0, %v3228_v58  ;;  %vm3253_vm15 = vmor %vm3251_vm14, %vm3252_vm13  ;;  %v4727_v58 = vld [vmem:[%s11951_s5 + $0x3e0] sm:$0xff] }
 0x9e8   :  { %v3248_v60 = vsub.f32 1.0, %v3247_v43  ;;  %v4729_v43 = vld [vmem:[%s11951_s5 + $0x3b0] sm:$0xff] }
 0x9e9   :  { %v3230_v40 = vmul.f32 %v3902_v15, %v3229_v55  ;;  %v4728_v55 = vld [vmem:[%s11951_s5 + $0x3e8] sm:$0xff] }
 0x9ea   :  { %v3249_v44 = vmul.f32 %v3904_v39, %v3248_v60  ;;  %v4736_v60 = vld [vmem:[%s11951_s5 + $0x328] sm:$0xff] }
 0x9eb   :  { %v3231_v32 = vadd.f32 %v3902_v15, %v3230_v40  ;;  %v4731_v40 = vld [vmem:[%s11951_s5 + $0x380] sm:$0xff] }
 0x9ec   :  { %v3250_v51 = vadd.f32 %v3904_v39, %v3249_v44  ;;  %v4744_v44 = vld [vmem:[%s11953_s3 + $0xc8] sm:$0xff] }
 0x9ed   :  { %v3235_v4 = vsel %vm3234_vm11, %v3902_v15, %v3231_v32  ;;  %v4724_v15 = vld [vmem:[%s11951_s5 + $0x448] sm:$0xff]  ;;  %v4735_v32 = vld [vmem:[%s11951_s5 + $0x320] sm:$0xff] }
 0x9ee   :  { %v3240_v36 = vsel %vm3237_vm12, %v3239_v31, %v3235_v4  ;;  %v3254_v35 = vsel %vm3253_vm15, %v3904_v39, %v3250_v51  ;;  %v4726_v39 = vld [vmem:[%s11951_s5 + $0x418] sm:$0xff]  ;;  %v4740_v4 = vld [vmem:[%s11953_s3 + $0x128] sm:$0xff] }
 0x9ef   :  { %v3261_v12 = vmul.f32 %v3240_v36, %v3109_v0  ;;  %v3259_v9 = vsel %vm3256_vm0, %v3258_v7, %v3254_v35  ;;  %v4738_v31 = vld [vmem:[%s11953_s3 + $0x158] sm:$0xff]  ;;  %v4739_v0 = vld [vmem:[%s11953_s3 + $0x140] sm:$0xff]  ;;  %v4741_v36 = vld [vmem:[%s11953_s3 + $0x110] sm:$0xff] }
 0x9f0   :  { %v4746_v51 = vld [vmem:[%s11953_s3 + $0x98] sm:$0xff]  ;;  %v4749_v35 = vld [vmem:[%s11953_s3 + $0x50] sm:$0xff]  ;;  %v4751_v7 = vld [vmem:[%s11953_s3 + $0x20] sm:$0xff] }
 0x9f1   :  { %v3262_v63 = vadd.f32 %v3261_v12, %v3219_v14  ;;  %v4742_v14 = vld [vmem:[%s11953_s3 + $0xf8] sm:$0xff]  ;;  %v4743_v12 = vld [vmem:[%s11953_s3 + $0xe0] sm:$0xff] }
 0x9f3   :  { %3905 = vtanh.f32 %v3262_v63  ;;  %v4745_v63 = vld [vmem:[%s11953_s3 + $0xb0] sm:$0xff] }
 0x9f9   :  { %v3906_v6 = vpop.eup %3905 }
 0x9fa   :  { %v3264_v57 = vsub.f32 %v11431_v29, %v3906_v6  ;;  %v4707_v29 = vld [vmem:[%s11951_s5 + $0x5c0] sm:$0xff] }
 0x9fc   :  { %v3265_v47 = vmul.f32 %v3264_v57, %v3259_v9  ;;  %v4752_v57 = vld [vmem:[%s11953_s3 + $0x8] sm:$0xff]  ;;  %v3284_v9 = vpop.f32.mrf.mxu3 }
 0x9fe   :  { %v11727_v50 = vadd.f32 %v3906_v6, %v3265_v47  ;;  %v4750_v6 = vld [vmem:[%s11953_s3 + $0x38] sm:$0xff]  ;;  %v3285_v47 = vadd.f32 %v3284_v9, %v13737_v25  ;;  %v3676_v9 = vld [vmem:[%s11957_s7 + $0x68] sm:$0xff] }
 0xa00   :  { %3303 = vmatmul.f32.vlgmr.msrb.gmra.mxu0 %v11727_v50  ;;  %3343 = vmatmul.f32.vlgmr.msrb.gmra.mxu2 %v11727_v50 }
 0xa01   :  { %3447 = vmatpush.msrb.mxu0 %v4705_v48  ;;  %3487 = vmatpush.msrb.mxu2 %v4706_v10  ;;  %v13804_v10 = vld [vmem:[#allocation62_spill] sm:$0xff] }
 0xa03   :  { %3448 = vmatpush.msrb.mxu0 %v4707_v29  ;;  %3488 = vmatpush.msrb.mxu2 %v4708_v18  ;;  %v126_v29 = vadd.f32 %v13804_v10, %v13738_v11 }
 0xa05   :  { %3449 = vmatpush.msrb.mxu0 %v4709_v34  ;;  %3489 = vmatpush.msrb.mxu2 %v4710_v42  ;;  %v3324_v34 = vpop.f32.mrf.mxu1 }
 0xa07   :  { %3450 = vmatpush.msrb.mxu0 %v4711_v24  ;;  %3490 = vmatpush.msrb.mxu2 %v4712_v27  ;;  %v3325_v24 = vadd.f32 %v3324_v34, %v13740_v21  ;;  %v3364_v21 = vpop.f32.mrf.mxu3 }
 0xa08   :  { %3383 = vmatmul.f32.vlgmr.msra.gmra.mxu0 %v11727_v50  ;;  %3423 = vmatmul.f32.vlgmr.msra.gmra.mxu2 %v11727_v50 }
 0xa09   :  { %3451 = vmatpush.msrb.mxu0 %v4713_v45  ;;  %3491 = vmatpush.msrb.mxu2 %v4714_v59  ;;  %v13805_v59 = vld [vmem:[#allocation63_spill] sm:$0xff] }
 0xa0b   :  { %3452 = vmatpush.msrb.mxu0 %v4715_v28  ;;  %3492 = vmatpush.msrb.mxu2 %v4716_v1  ;;  %v167_v28 = vadd.f32 %v13805_v59, %v13741_v37  ;;  %v3672_v59 = vld [vmem:[%s11957_s7 + $0x48] sm:$0xff] }
 0xa0d   :  { %3453 = vmatpush.msrb.mxu0 %v4717_v19  ;;  %3493 = vmatpush.msrb.mxu2 %v4718_v13 }
 0xa0f   :  { %3454 = vmatpush.msrb.mxu0 %v4719_v8  ;;  %3494 = vmatpush.msrb.mxu2 %v4720_v2 }
 0xa11   :  { %3455 = vmatpush.msrb.mxu0 %v4721_v3  ;;  %3495 = vmatpush.msrb.mxu2 %v4722_v17 }
 0xa13   :  { %3456 = vmatpush.msrb.mxu0 %v4723_v61  ;;  %3496 = vmatpush.msrb.mxu2 %v4724_v15 }
 0xa15   :  { %3457 = vmatpush.msrb.mxu0 %v4725_v5  ;;  %3497 = vmatpush.msrb.mxu2 %v4726_v39 }
 0xa17   :  { %3458 = vmatpush.msrb.mxu0 %v4727_v58  ;;  %3498 = vmatpush.msrb.mxu2 %v4728_v55  ;;  %v3365_v55 = vadd.f32 %v3364_v21, %v12814_v41  ;;  %v3665_v21 = vld [vmem:[%s11957_s7 + $0x10] sm:$0xff] }
 0xa19   :  { %3459 = vmatpush.msrb.mxu0 %v4729_v43  ;;  %3499 = vmatpush.msrb.mxu2 %v4730_v53 }
 0xa1b   :  { %3460 = vmatpush.msrb.mxu0 %v4731_v40  ;;  %3500 = vmatpush.msrb.mxu2 %v4732_v22 }
 0xa1d   :  { %3461 = vmatpush.msrb.mxu0 %v4733_v54  ;;  %3501 = vmatpush.msrb.mxu2 %v4734_v62 }
 0xa1f   :  { %3462 = vmatpush.msrb.mxu0 %v4735_v32  ;;  %3502 = vmatpush.msrb.mxu2 %v4736_v60  ;;  %v13806_v60 = vld [vmem:[#allocation70_spill] sm:$0xff] }
 0xa20   :  { %3463 = vmatmul.f32.vlgmr.msrb.gmra.mxu0 %v11727_v50  ;;  %3503 = vmatmul.f32.vlgmr.msrb.gmra.mxu2 %v11727_v50 }
 0xa21   :  { %3577 = vmatpush.msra.mxu0 %v4737_v20  ;;  %v208_v20 = vadd.f32 %v13806_v60, %v12815_v30 }
 0xa23   :  { %3578 = vmatpush.msra.mxu0 %v4738_v31 }
 0xa25   :  { %3579 = vmatpush.msra.mxu0 %v4739_v0 }
 0xa27   :  { %3580 = vmatpush.msra.mxu0 %v4740_v4 }
 0xa29   :  { %3581 = vmatpush.msra.mxu0 %v4741_v36 }
 0xa2b   :  { %3582 = vmatpush.msra.mxu0 %v4742_v14 }
 0xa2d   :  { %3583 = vmatpush.msra.mxu0 %v4743_v12 }
 0xa2f   :  { %3584 = vmatpush.msra.mxu0 %v4744_v44 }
 0xa31   :  { %3585 = vmatpush.msra.mxu0 %v4745_v63 }
 0xa33   :  { %3586 = vmatpush.msra.mxu0 %v4746_v51 }
 0xa35   :  { %3587 = vmatpush.msra.mxu0 %v4747_v49 }
 0xa37   :  { %3588 = vmatpush.msra.mxu0 %v4748_v38 }
 0xa39   :  { %3589 = vmatpush.msra.mxu0 %v4749_v35 }
 0xa3b   :  { %3590 = vmatpush.msra.mxu0 %v4750_v6  ;;  %v3678_v6 = vld [vmem:[%s11957_s7 + $0x78] sm:$0xff] }
 0xa3c   :  { %3683 = vmatpush.msra.mxu2 %v3678_v6 }
 0xa3d   :  { %3591 = vmatpush.msra.mxu0 %v4751_v7  ;;  %v3444_v7 = vpop.f32.mrf.mxu3 }
 0xa3f   :  { %3592 = vmatpush.msra.mxu0 %v4752_v57  ;;  %v3677_v57 = vld [vmem:[%s11957_s7 + $0x70] sm:$0xff] }
 0xa40   :  { %3684 = vmatpush.msra.mxu2 %v3677_v57 }
 0xa42   :  { %3685 = vmatpush.msra.mxu2 %v3676_v9 }
 0xa7d   :  { %v3304_v48 = vpop.f32.mrf.mxu0 }
 0xa7e   :  { %v3305_v18 = vadd.f32 %v3304_v48, %v3285_v47 }
 0xa80   :  { %v3511_v42 = vadd.f32 %v3305_v18, %v126_v29  ;;  %v3675_v29 = vld [vmem:[%s11957_s7 + $0x60] sm:$0xff]  ;;  %v3404_v18 = vpop.f32.mrf.mxu1 }
 0xa81   :  { %3686 = vmatpush.msra.mxu2 %v3675_v29 }
 0xa82   :  { %v3761_v27 = vmul.f32 -1.442695, %v3511_v42 }
 0xa83   :  { %v3344_v45 = vpop.f32.mrf.mxu2 }
 0xa84   :  { %3907 = vpow2.f32 %v3761_v27  ;;  %v3345_v1 = vadd.f32 %v3344_v45, %v3325_v24  ;;  %v3405_v24 = vadd.f32 %v3404_v18, %v13800_v23  ;;  %v3673_v27 = vld [vmem:[%s11957_s7 + $0x50] sm:$0xff] }
 0xa85   :  { %v3384_v58 = vpop.f32.mrf.mxu0 }
 0xa86   :  { %v3512_v19 = vadd.f32 %v3345_v1, %v167_v28  ;;  %v3385_v54 = vadd.f32 %v3384_v58, %v3365_v55 }
 0xa88   :  { %v3762_v13 = vmul.f32 -1.442695, %v3512_v19  ;;  %v3671_v19 = vld [vmem:[%s11957_s7 + $0x40] sm:$0xff]  ;;  %v3484_v55 = vpop.f32.mrf.mxu1 }
 0xa8a   :  { %v3908_v8 = vpop.eup %3907  ;;  %3909 = vpow2.f32 %v3762_v13  ;;  %v3670_v13 = vld [vmem:[%s11957_s7 + $0x38] sm:$0xff] }
 0xa8b   :  { %v3516_v25 = vadd.f32 1.0, %v3908_v8  ;;  %v3424_v42 = vpop.f32.mrf.mxu2 }
 0xa8c   :  { %v3425_v28 = vadd.f32 %v3424_v42, %v3405_v24 }
 0xa8d   :  { %3911 = vrcp.f32 %v3516_v25  ;;  %v3528_v15 = vand.u32 2147483648, %v3516_v25  ;;  %v3526_v39 = vand.u32 2147483647, %v3516_v25  ;;  %vm3522_vm2 = vweird.f32 %v3516_v25 }
 0xa8f   :  { %v3529_v40 = vor.u32 1.1754944e-38, %v3528_v15  ;;  %vm3527_vm4 = vcmp.eq.f32.partialorder %v3526_v39, 8.507059e+37  ;;  %v3663_v39 = vld [vmem:[%s11957_s7] sm:$0xff] }
 0xa90   :  { %v3910_v2 = vpop.eup %3909 }
 0xa91   :  { %v3535_v11 = vadd.f32 1.0, %v3910_v2  ;;  %v3667_v2 = vld [vmem:[%s11957_s7 + $0x20] sm:$0xff] }
 0xa93   :  { %v3912_v3 = vpop.eup %3911  ;;  %3913 = vrcp.f32 %v3535_v11  ;;  %v3547_v41 = vand.u32 2147483648, %v3535_v11  ;;  %vm3541_vm6 = vweird.f32 %v3535_v11  ;;  %v3545_v14 = vand.u32 2147483647, %v3535_v11 }
 0xa94   :  { %v3518_v17 = vmul.f32 %v3912_v3, %v3516_v25  ;;  %vm3523_vm1 = vweird.f32 %v3912_v3  ;;  %v3669_v25 = vld [vmem:[%s11957_s7 + $0x30] sm:$0xff] }
 0xa95   :  { %vm3524_vm3 = vmor %vm3522_vm2, %vm3523_vm1  ;;  %v3548_v63 = vor.u32 1.1754944e-38, %v3547_v41  ;;  %vm3546_vm8 = vcmp.eq.f32.partialorder %v3545_v14, 8.507059e+37  ;;  %vm3703_vm1 = vcmask 7168  }
 0xa96   :  { %v3519_v61 = vsub.f32 1.0, %v3518_v17 }
 0xa98   :  { %v3520_v5 = vmul.f32 %v3912_v3, %v3519_v61 }
 0xa99   :  { %v3914_v37 = vpop.eup %3913 }
 0xa9a   :  { %v3537_v43 = vmul.f32 %v3914_v37, %v3535_v11  ;;  %v3521_v53 = vadd.f32 %v3912_v3, %v3520_v5  ;;  %vm3542_vm5 = vweird.f32 %v3914_v37  ;;  %v3664_v5 = vld [vmem:[%s11957_s7 + $0x8] sm:$0xff] }
 0xa9b   :  { %vm3543_vm7 = vmor %vm3541_vm6, %vm3542_vm5 }
 0xa9c   :  { %v3538_v22 = vsub.f32 1.0, %v3537_v43  ;;  %v3525_v62 = vsel %vm3524_vm3, %v3912_v3, %v3521_v53  ;;  %v3666_v3 = vld [vmem:[%s11957_s7 + $0x18] sm:$0xff] }
 0xa9d   :  { %v3530_v32 = vsel %vm3527_vm4, %v3529_v40, %v3525_v62  ;;  %v3464_v30 = vpop.f32.mrf.mxu0 }
 0xa9e   :  { %v3551_v31 = vmul.f32 %v3530_v32, %v3385_v54  ;;  %v3539_v0 = vmul.f32 %v3914_v37, %v3538_v22 }
 0xaa0   :  { %v3552_v4 = vadd.f32 %v3551_v31, %v208_v20  ;;  %v3540_v36 = vadd.f32 %v3914_v37, %v3539_v0  ;;  %v3485_v20 = vadd.f32 %v3484_v55, %v13803_v52 }
 0xaa2   :  { %3915 = vtanh.f32 %v3552_v4  ;;  %v3544_v12 = vsel %vm3543_vm7, %v3914_v37, %v3540_v36  ;;  %v14_v37 = vstv %s11958_s8 }
 0xaa3   :  { %v3549_v49 = vsel %vm3546_vm8, %v3548_v63, %v3544_v12  ;;  %15 = vst [vmem:[#allocation3] sm:$0x1] %v14_v37  ;;  %v3504_v60 = vpop.f32.mrf.mxu2 }
 0xaa4   :  { %v3505_v41 = vadd.f32 %v3504_v60, %v3485_v20 }
 0xaa8   :  { %v3916_v44 = vpop.eup %3915 }
 0xaa9   :  { %v3554_v51 = vsub.f32 %v11545_v16, %v3916_v44  ;;  %v3445_v16 = vadd.f32 %v3444_v7, %v13799_v46  ;;  %v3674_v46 = vld [vmem:[%s11957_s7 + $0x58] sm:$0xff] }
 0xaaa   :  { %3687 = vmatpush.msra.mxu2 %v3674_v46 }
 0xaab   :  { %v3555_v38 = vmul.f32 %v3554_v51, %v3549_v49  ;;  %v3465_v48 = vadd.f32 %v3464_v30, %v3445_v16 }
 0xaac   :  { %3688 = vmatpush.msra.mxu2 %v3673_v27 }
 0xaad   :  { %v3556_v35 = vadd.f32 %v3916_v44, %v3555_v38 }
 0xaae   :  { %3689 = vmatpush.msra.mxu2 %v3672_v59 }
 0xaaf   :  { %3573 = vmatmul.f32.vlgmr.msra.gmra.mxu3 %v3556_v35  ;;  %3593 = vmatmul.f32.vlgmr.msra.gmra.mxu0 %v3556_v35 }
 0xab0   :  { %3613 = vmatmul.f32.vlgmr.msra.gmra.mxu1 %v3556_v35  ;;  %3690 = vmatpush.msra.mxu2 %v3671_v19 }
 0xab2   :  { %3691 = vmatpush.msra.mxu2 %v3670_v13 }
 0xab4   :  { %3692 = vmatpush.msra.mxu2 %v3669_v25 }
 0xb2c   :  { %v3594_v47 = vpop.f32.mrf.mxu0 }
 0xb2d   :  { %v3595_v10 = vadd.f32 %v3594_v47, %v13802_v33  ;;  %v3614_v4 = vpop.f32.mrf.mxu1 }
 0xb2e   :  { %v3615_v44 = vadd.f32 %v3614_v4, %v6674_v26  ;;  %v3766_v26 = vld [vmem:[#allocation3] ss:$0 sm:$0xff] }
 0xb2f   :  { %v3618_v34 = vadd.f32 %v3595_v10, %v3465_v48 }
 0xb31   :  { %v3764_v33 = vmul.f32 -1.442695, %v3618_v34 }
 0xb32   :  { %v3574_v45 = vpop.f32.mrf.mxu3 }
 0xb33   :  { %v3575_v1 = vadd.f32 %v3574_v45, %v13801_v56  ;;  %3917 = vpow2.f32 %v3764_v33  ;;  %v3668_v56 = vld [vmem:[%s11957_s7 + $0x28] sm:$0xff] }
 0xb34   :  { %3693 = vmatpush.msra.mxu2 %v3668_v56 }
 0xb35   :  { %v3617_v23 = vadd.f32 %v3575_v1, %v3425_v28 }
 0xb36   :  { %3694 = vmatpush.msra.mxu2 %v3667_v2 }
 0xb37   :  { %v3763_v8 = vmul.f32 -1.442695, %v3617_v23 }
 0xb38   :  { %3695 = vmatpush.msra.mxu2 %v3666_v3 }
 0xb39   :  { %3919 = vpow2.f32 %v3763_v8  ;;  %v3918_v11 = vpop.eup %3917 }
 0xb3a   :  { %v3641_v61 = vadd.f32 1.0, %v3918_v11  ;;  %3696 = vmatpush.msra.mxu2 %v3665_v21 }
 0xb3c   :  { %3697 = vmatpush.msra.mxu2 %v3664_v5  ;;  %v3653_v35 = vand.u32 2147483648, %v3641_v61  ;;  %vm3647_vm14 = vweird.f32 %v3641_v61  ;;  %v3651_v52 = vand.u32 2147483647, %v3641_v61 }
 0xb3e   :  { %3698 = vmatpush.msra.mxu2 %v3663_v39  ;;  %v3654_v7 = vor.u32 1.1754944e-38, %v3653_v35  ;;  %vm3652_vm0 = vcmp.eq.f32.partialorder %v3651_v52, 8.507059e+37 }
 0xb3f   :  { %v3920_v17 = vpop.eup %3919 }
 0xb40   :  { %v3622_v15 = vadd.f32 1.0, %v3920_v17 }
 0xb42   :  { %3921 = vrcp.f32 %v3622_v15  ;;  %v3634_v54 = vand.u32 2147483648, %v3622_v15  ;;  %v3632_v32 = vand.u32 2147483647, %v3622_v15  ;;  %vm3628_vm10 = vweird.f32 %v3622_v15 }
 0xb43   :  { %3923 = vrcp.f32 %v3641_v61 }
 0xb44   :  { %v3635_v36 = vor.u32 1.1754944e-38, %v3634_v54  ;;  %vm3633_vm12 = vcmp.eq.f32.partialorder %v3632_v32, 8.507059e+37 }
 0xb48   :  { %v3922_v58 = vpop.eup %3921 }
 0xb49   :  { %v3924_v43 = vpop.eup %3923  ;;  %v3624_v53 = vmul.f32 %v3922_v58, %v3622_v15  ;;  %vm3629_vm9 = vweird.f32 %v3922_v58 }
 0xb4a   :  { %v3643_v22 = vmul.f32 %v3924_v43, %v3641_v61  ;;  %vm3630_vm11 = vmor %vm3628_vm10, %vm3629_vm9  ;;  %vm3648_vm13 = vweird.f32 %v3924_v43 }
 0xb4b   :  { %v3625_v40 = vsub.f32 1.0, %v3624_v53  ;;  %vm3649_vm15 = vmor %vm3647_vm14, %vm3648_vm13 }
 0xb4c   :  { %v3644_v0 = vsub.f32 1.0, %v3643_v22 }
 0xb4d   :  { %v3626_v62 = vmul.f32 %v3922_v58, %v3625_v40 }
 0xb4e   :  { %v3645_v51 = vmul.f32 %v3924_v43, %v3644_v0 }
 0xb4f   :  { %v3627_v31 = vadd.f32 %v3922_v58, %v3626_v62 }
 0xb50   :  { %v3646_v38 = vadd.f32 %v3924_v43, %v3645_v51 }
 0xb51   :  { %v3631_v14 = vsel %vm3630_vm11, %v3922_v58, %v3627_v31 }
 0xb52   :  { %v3636_v12 = vsel %vm3633_vm12, %v3635_v36, %v3631_v14  ;;  %v3650_v30 = vsel %vm3649_vm15, %v3924_v43, %v3646_v38 }
 0xb53   :  { %v3657_v63 = vmul.f32 %v3636_v12, %v3505_v41  ;;  %v3655_v16 = vsel %vm3652_vm0, %v3654_v7, %v3650_v30 }
 0xb55   :  { %v3658_v49 = vadd.f32 %v3657_v63, %v3615_v44 }
 0xb57   :  { %3925 = vtanh.f32 %v3658_v49 }
 0xb5d   :  { %v3926_v6 = vpop.eup %3925 }
 0xb5e   :  { %v3660_v57 = vsub.f32 %v11727_v50, %v3926_v6 }
 0xb60   :  { %v3661_v9 = vmul.f32 %v3660_v57, %v3655_v16 }
 0xb62   :  { %v3662_v47 = vadd.f32 %v3926_v6, %v3661_v9 }
 0xb64   :  { %3699 = vmatmul.f32.vlgmr.msra.gmra.mxu2 %v3662_v47 }
 0xbe7   :  { %v3700_v48 = vpop.f32.mrf.mxu2 }
 0xbe8   :  { %v3701_v10 = vadd.f32 %v3766_v26, %v3700_v48 }
 0xbea   :  { %3704 = vst.msk [vmem:[%s11959_s9] sm:$0xff] %vm3703_vm1, %v3701_v10 }

</bundles_post_ra>
